<compile_context>
chip_gen: v6e
topology: v6e:2x2x1
jax: 0.10.0
libtpu: 0.0.40
codegen_flags: <defaults>
</compile_context>

<pallas_src>
import functools

import jax
import jax.numpy as jnp
import numpy as np
from jax.experimental import pallas as pl
from jax.experimental.pallas import tpu as pltpu


def _cdiv(a, b):
    return -(-a // b)


# ----------------------------------------------------------------------------
# Pallas kernel: Bblk sequences per grid step, full encoder stack inside.
# ----------------------------------------------------------------------------
def tsti_encoder_kernel(
    x_ref,                       # (Bblk, P, Lp)  f32
    wp_w_ref, wp_b_ref,          # (Lp, dm) bf16, (1, dm) f32
    pos_ref,                     # (P, dm)  f32
    wqkv_ref, bqkv_ref,          # (L, dm, 3*dm) bf16, (L, 1, 3*dm) f32  (scale folded into Q)
    wo_ref, bo_ref,              # (L, dm, dm) bf16, (L, 1, dm) f32
    bn1_s_ref, bn1_h_ref,        # (L, 1, dm) f32  folded eval-mode BN scale / shift
    ff1_w_ref, ff1_b_ref,        # (L, dm, dff) bf16, (L, 1, dff) f32
    ff2_w_ref, ff2_b_ref,        # (L, dff, dm) bf16, (L, 1, dm) f32
    bn2_s_ref, bn2_h_ref,        # (L, 1, dm) f32
    o_ref,                       # (Bblk, P, dm) f32
    prev_ref,                    # VMEM scratch (H*Bblk, P, P) f32: residual-attn carry
    *, n_heads,
):
    Bblk, P, Lp = x_ref.shape
    dm = wp_w_ref.shape[1]
    L = wqkv_ref.shape[0]
    H = n_heads
    d_k = dm // H
    R = Bblk * P
    f32 = jnp.float32
    bf16 = jnp.bfloat16

    # Patch embedding + positional encoding (all Bblk*P rows at once).
    x2 = x_ref[...].reshape(R, Lp).astype(bf16)
    h2 = jnp.dot(x2, wp_w_ref[...], preferred_element_type=f32) + wp_b_ref[...]
    h2 = (h2.reshape(Bblk, P, dm) + pos_ref[...]).reshape(R, dm)

    # TODO(synk): dropout omitted (inference / dropout=0.0).
    for l in range(L):                                   # static unroll over layers
        # --- fused Q/K/V projection: one (R, dm) @ (dm, 3*dm) MXU pass ----------
        qkv = (jnp.dot(h2.astype(bf16), wqkv_ref[l], preferred_element_type=f32)
               + bqkv_ref[l]).reshape(Bblk, P, 3 * dm)

        # Split into head-major batched tensors (H*Bblk, P, d_k). Pure data
        # movement (static lane slices + leading-dim concat); all matmul work
        # already happened in the fused dot above.
        def heads(base, _qkv=qkv):
            return jnp.concatenate(
                [_qkv[:, :, base + hh * d_k: base + (hh + 1) * d_k]
                 for hh in range(H)],
                axis=0)

        q = heads(0).astype(bf16)          # (H*Bblk, P, d_k)  (scale already folded)
        k = heads(dm).astype(bf16)
        v = heads(2 * dm).astype(bf16)

        # --- batched attention scores over the (H*Bblk) axis ---------------------
        s = jnp.einsum("bpd,bqd->bpq", q, k,
                       preferred_element_type=f32)       # (H*Bblk, P, P)
        if l > 0:                                        # residual-attention carry
            s = s + prev_ref[...]
        if l + 1 < L:                                    # last layer: no consumer
            prev_ref[...] = s

        # Manual softmax: exp + approximate reciprocal live on the EUP slot.
        m = jnp.max(s, axis=-1, keepdims=True)
        e = jnp.exp(s - m)
        a = e * pl.reciprocal(jnp.sum(e, axis=-1, keepdims=True), approx=True)

        ctx = jnp.einsum("bpq,bqd->bpd", a.astype(bf16), v,
                         preferred_element_type=f32)     # (H*Bblk, P, d_k)

        # Re-pack heads along lanes -> (Bblk, P, H*d_k), then one dm-deep W_O matmul.
        ctx_cat = jnp.concatenate(
            [ctx[hh * Bblk:(hh + 1) * Bblk] for hh in range(H)], axis=-1)
        attn = jnp.dot(ctx_cat.reshape(R, dm).astype(bf16), wo_ref[l],
                       preferred_element_type=f32)       # (R, dm)

        # residual + BatchNorm1d (eval mode; scale/shift folded in the wrapper)
        # TODO(synk): training-mode BatchNorm (batch statistics) couples grid steps;
        #             only inference-mode BN is implemented here.
        h2 = h2 + attn + bo_ref[l]
        h2 = h2 * bn1_s_ref[l] + bn1_h_ref[l]

        # feed-forward
        ff = (jnp.dot(h2.astype(bf16), ff1_w_ref[l], preferred_element_type=f32)
              + ff1_b_ref[l])
        # TODO(synk): PyTorch nn.GELU default is exact erf; tanh approximation used.
        ff = jax.nn.gelu(ff, approximate=True)
        ff = (jnp.dot(ff.astype(bf16), ff2_w_ref[l], preferred_element_type=f32)
              + ff2_b_ref[l])

        h2 = h2 + ff
        h2 = h2 * bn2_s_ref[l] + bn2_h_ref[l]

    o_ref[...] = h2.reshape(Bblk, P, dm).astype(o_ref.dtype)


# ----------------------------------------------------------------------------
# Wrapper: layout prep (QKV fusion, scale/BN folding, bf16 weights, batching)
# ----------------------------------------------------------------------------
def tsti_encoder_forward(x, params, *, n_layers, n_heads, d_model, d_ff,
                         bn_eps=1e-5, target_rows=512):
    bs, nvars, patch_len, patch_num = x.shape
    # permute (0,1,3,2) and fold (bs, nvars) -> channel-independent batch
    xr = jnp.transpose(x, (0, 1, 3, 2)).reshape(bs * nvars, patch_num, patch_len)
    BN, P, Lp = xr.shape
    dm, L, H = d_model, n_layers, n_heads
    d_k = dm // H
    bf16 = jnp.bfloat16

    # --- rows per grid step: prefer one big block (single-TC v5e/v6e); natural
    #     multi-step splitting kicks in once BN*P exceeds target_rows, which keeps
    #     per-step blocks MXU-friendly and feeds both v7x TensorCores.
    Bblk = min(BN, max(1, target_rows // P))
    n_blocks = _cdiv(BN, Bblk)
    BNp = n_blocks * Bblk
    if BNp != BN:                                   # zero-pad; padded rows discarded
        xr = jnp.concatenate([xr, jnp.zeros((BNp - BN, P, Lp), xr.dtype)], axis=0)

    # --- fold eval-mode BatchNorm (running stats + affine) into scale / shift
    def bn_fold(g, b, mean, var):
        s = g / jnp.sqrt(var + bn_eps)
        return s, b - mean * s

    bn1_s, bn1_h = bn_fold(params["bn1_g"], params["bn1_b"],
                           params["bn1_m"], params["bn1_v"])
    bn2_s, bn2_h = bn_fold(params["bn2_g"], params["bn2_b"],
                           params["bn2_m"], params["bn2_v"])

    # --- fuse Q/K/V weights (1/sqrt(d_k) folded into Q), bf16 matmul weights
    scale = float(d_k) ** -0.5
    wqkv = jnp.concatenate(
        [params["wq"] * scale, params["wk"], params["wv"]], axis=-1).astype(bf16)
    bqkv = jnp.concatenate(
        [params["bq"] * scale, params["bk"], params["bv"]], axis=-1)
    wp_w = params["wp_w"].astype(bf16)
    wo = params["wo"].astype(bf16)                   # input features head-major (H, d_k)
    ff1_w = params["ff1_w"].astype(bf16)
    ff2_w = params["ff2_w"].astype(bf16)

    # --- VMEM limit: ~3/4 of per-core capacity (≈48 MiB on v7x, ≈96 MiB on v5e/v6e)
    try:
        vmem_cap = int(pltpu.get_tpu_info().vmem_capacity_bytes)
    except Exception:
        vmem_cap = 64 * 1024 * 1024
    vmem_limit = max(32 * 1024 * 1024, (vmem_cap * 3) // 4)

    def full(shape):
        n = len(shape)
        return pl.BlockSpec(shape, lambda b, _n=n: (0,) * _n)

    # TODO(synk): on v7x, give these constant-index weight specs
    #             pipeline_mode=pl.Buffered(1) (single-buffer) to halve weight VMEM.
    in_specs = [
        pl.BlockSpec((Bblk, P, Lp), lambda b: (b, 0, 0)),   # x: Bblk sequences / step
        full((Lp, dm)), full((1, dm)),                      # W_P
        full((P, dm)),                                      # W_pos
        full((L, dm, 3 * dm)), full((L, 1, 3 * dm)),        # fused W_QKV
        full((L, dm, dm)), full((L, 1, dm)),                # W_O
        full((L, 1, dm)), full((L, 1, dm)),                 # BN1 scale/shift
        full((L, dm, d_ff)), full((L, 1, d_ff)),            # FF1
        full((L, d_ff, dm)), full((L, 1, dm)),              # FF2
        full((L, 1, dm)), full((L, 1, dm)),                 # BN2 scale/shift
    ]

    kernel = functools.partial(tsti_encoder_kernel, n_heads=H)

    out = pl.pallas_call(
        kernel,
        out_shape=jax.ShapeDtypeStruct((BNp, P, dm), jnp.float32),
        grid_spec=pltpu.PrefetchScalarGridSpec(
            num_scalar_prefetch=0,
            grid=(n_blocks,),
            in_specs=in_specs,
            out_specs=pl.BlockSpec((Bblk, P, dm), lambda b: (b, 0, 0)),
            scratch_shapes=[pltpu.VMEM((H * Bblk, P, P), jnp.float32)],
        ),
        compiler_params=pltpu.CompilerParams(
            dimension_semantics=("parallel",),
            vmem_limit_bytes=vmem_limit,
        ),
    )(
        xr,
        wp_w, params["wp_b"], params["pos"],
        wqkv, bqkv, wo, params["bo"],
        bn1_s, bn1_h,
        ff1_w, params["ff1_b"], ff2_w, params["ff2_b"],
        bn2_s, bn2_h,
    )
    return out[:BN].reshape(bs, nvars, P, dm)


# ----------------------------------------------------------------------------
# Pure-JAX reference (torch-style formulation of the same math, full f32)
# ----------------------------------------------------------------------------
def reference_forward(x, params, *, n_layers, n_heads, d_model, d_ff, bn_eps=1e-5):
    bs, nvars, patch_len, patch_num = x.shape
    h = jnp.transpose(x, (0, 1, 3, 2)).reshape(bs * nvars, patch_num, patch_len)
    h = h @ params["wp_w"] + params["wp_b"][0]
    h = h + params["pos"][None]
    BN, P, dm = h.shape
    d_k = d_model // n_heads
    scale = d_k ** -0.5

    def bn(t, l, g, b, m, v):
        return (t - m[l, 0]) / jnp.sqrt(v[l, 0] + bn_eps) * g[l, 0] + b[l, 0]

    prev = jnp.zeros((BN, n_heads, P, P), jnp.float32)
    for l in range(n_layers):
        q = h @ params["wq"][l] + params["bq"][l, 0]
        k = h @ params["wk"][l] + params["bk"][l, 0]
        v = h @ params["wv"][l] + params["bv"][l, 0]
        qh = q.reshape(BN, P, n_heads, d_k).transpose(0, 2, 1, 3)
        kh = k.reshape(BN, P, n_heads, d_k).transpose(0, 2, 1, 3)
        vh = v.reshape(BN, P, n_heads, d_k).transpose(0, 2, 1, 3)
        s = jnp.einsum("bhpd,bhqd->bhpq", qh, kh) * scale + prev
        prev = s
        a = jax.nn.softmax(s, axis=-1)
        ctx = jnp.einsum("bhpq,bhqd->bhpd", a, vh).transpose(0, 2, 1, 3).reshape(BN, P, dm)
        h = h + (ctx @ params["wo"][l] + params["bo"][l, 0])
        h = bn(h, l, params["bn1_g"], params["bn1_b"], params["bn1_m"], params["bn1_v"])
        f = jax.nn.gelu(h @ params["ff1_w"][l] + params["ff1_b"][l, 0], approximate=True)
        f = f @ params["ff2_w"][l] + params["ff2_b"][l, 0]
        h = h + f
        h = bn(h, l, params["bn2_g"], params["bn2_b"], params["bn2_m"], params["bn2_v"])
    return h.reshape(bs, nvars, P, dm)


# ----------------------------------------------------------------------------
# Deterministic parameter init (torch-Linear-style uniform; W_pos ~ U(-.02,.02);
# non-trivial BatchNorm running stats + affine to exercise the eval-mode BN path)
# ----------------------------------------------------------------------------
def init_params(key, *, patch_len, patch_num, d_model, d_ff, n_layers):
    ks = iter(jax.random.split(key, 64))

    def lin(fan_in, shape):
        bound = 1.0 / np.sqrt(fan_in)
        return jax.random.uniform(next(ks), shape, jnp.float32, -bound, bound)

    def unif(shape, lo, hi):
        return jax.random.uniform(next(ks), shape, jnp.float32, lo, hi)

    L, dm = n_layers, d_model
    return {
        "wp_w": lin(patch_len, (patch_len, dm)),
        "wp_b": lin(patch_len, (1, dm)),
        "pos": unif((patch_num, dm), -0.02, 0.02),
        "wq": lin(dm, (L, dm, dm)), "bq": lin(dm, (L, 1, dm)),
        "wk": lin(dm, (L, dm, dm)), "bk": lin(dm, (L, 1, dm)),
        "wv": lin(dm, (L, dm, dm)), "bv": lin(dm, (L, 1, dm)),
        "wo": lin(dm, (L, dm, dm)), "bo": lin(dm, (L, 1, dm)),
        "bn1_g": unif((L, 1, dm), 0.8, 1.2), "bn1_b": unif((L, 1, dm), -0.1, 0.1),
        "bn1_m": unif((L, 1, dm), -0.05, 0.05), "bn1_v": unif((L, 1, dm), 0.9, 1.1),
        "ff1_w": lin(dm, (L, dm, d_ff)), "ff1_b": lin(dm, (L, 1, d_ff)),
        "ff2_w": lin(d_ff, (L, d_ff, dm)), "ff2_b": lin(d_ff, (L, 1, dm)),
        "bn2_g": unif((L, 1, dm), 0.8, 1.2), "bn2_b": unif((L, 1, dm), -0.1, 0.1),
        "bn2_m": unif((L, 1, dm), -0.05, 0.05), "bn2_v": unif((L, 1, dm), 0.9, 1.1),
    }


if __name__ == "__main__":
    # small config: c_in=4 channels, patch_len=8, patch_num=8, d_model=32,
    # n_heads=4, d_ff=64, n_layers=3, only_patching=False, dropout=0 (eval mode)
    bs, c_in, patch_len, patch_num = 2, 4, 8, 8
    d_model, n_heads, d_ff, n_layers = 32, 4, 64, 3

    key = jax.random.PRNGKey(0)
    k_x, k_p = jax.random.split(key)
    x = jax.random.normal(k_x, (bs, c_in, patch_len, patch_num), jnp.float32)
    params = init_params(
        k_p, patch_len=patch_len, patch_num=patch_num,
        d_model=d_model, d_ff=d_ff, n_layers=n_layers,
    )

    out = tsti_encoder_forward(
        x, params, n_layers=n_layers, n_heads=n_heads, d_model=d_model, d_ff=d_ff
    )
    out = jax.block_until_ready(out)

    ref = reference_forward(
        x, params, n_layers=n_layers, n_heads=n_heads, d_model=d_model, d_ff=d_ff
    )
    ref = jax.block_until_ready(ref)

    assert out.shape == (bs, c_in, patch_num, d_model), out.shape
    # bf16 MXU inputs (f32 accumulation) + approximate reciprocal softmax + tanh
    # GELU -> inference-grade tolerance vs the full-f32 reference.
    np.testing.assert_allclose(np.asarray(out), np.asarray(ref), rtol=5e-2, atol=5e-2)

    print("KERNEL_OK")
</pallas_src>

<mosaic_0001>
module attributes {stable_mosaic.version = 11 : i64} {
  func.func @tsti_encoder_kernel(%arg0: i32, %arg1: memref<8x8x8xf32, #tpu.memory_space<vmem>>, %arg2: memref<8x32xbf16, #tpu.memory_space<vmem>>, %arg3: memref<1x32xf32, #tpu.memory_space<vmem>>, %arg4: memref<8x32xf32, #tpu.memory_space<vmem>>, %arg5: memref<3x32x96xbf16, #tpu.memory_space<vmem>>, %arg6: memref<3x1x96xf32, #tpu.memory_space<vmem>>, %arg7: memref<3x32x32xbf16, #tpu.memory_space<vmem>>, %arg8: memref<3x1x32xf32, #tpu.memory_space<vmem>>, %arg9: memref<3x1x32xf32, #tpu.memory_space<vmem>>, %arg10: memref<3x1x32xf32, #tpu.memory_space<vmem>>, %arg11: memref<3x32x64xbf16, #tpu.memory_space<vmem>>, %arg12: memref<3x1x64xf32, #tpu.memory_space<vmem>>, %arg13: memref<3x64x32xbf16, #tpu.memory_space<vmem>>, %arg14: memref<3x1x32xf32, #tpu.memory_space<vmem>>, %arg15: memref<3x1x32xf32, #tpu.memory_space<vmem>>, %arg16: memref<3x1x32xf32, #tpu.memory_space<vmem>>, %arg17: memref<8x8x32xf32, #tpu.memory_space<vmem>>, %arg18: memref<32x8x8xf32, #tpu.memory_space<vmem>>) attributes {dimension_semantics = [#tpu.dimension_semantics<parallel>], iteration_bounds = array<i64: 1>, scalar_prefetch = 0 : i64, scratch_operands = 1 : i64, tpu.core_type = #tpu.core_type<tc>, window_params = [{transform_indices = @transform_0, window_bounds = array<i64: 8, 8, 8>}, {pipeline_mode = #tpu.pipeline_mode<synchronous>, transform_indices = @transform_1, window_bounds = array<i64: 8, 32>}, {pipeline_mode = #tpu.pipeline_mode<synchronous>, transform_indices = @transform_2, window_bounds = array<i64: 1, 32>}, {pipeline_mode = #tpu.pipeline_mode<synchronous>, transform_indices = @transform_3, window_bounds = array<i64: 8, 32>}, {pipeline_mode = #tpu.pipeline_mode<synchronous>, transform_indices = @transform_4, window_bounds = array<i64: 3, 32, 96>}, {pipeline_mode = #tpu.pipeline_mode<synchronous>, transform_indices = @transform_5, window_bounds = array<i64: 3, 1, 96>}, {pipeline_mode = #tpu.pipeline_mode<synchronous>, transform_indices = @transform_6, window_bounds = array<i64: 3, 32, 32>}, {pipeline_mode = #tpu.pipeline_mode<synchronous>, transform_indices = @transform_7, window_bounds = array<i64: 3, 1, 32>}, {pipeline_mode = #tpu.pipeline_mode<synchronous>, transform_indices = @transform_8, window_bounds = array<i64: 3, 1, 32>}, {pipeline_mode = #tpu.pipeline_mode<synchronous>, transform_indices = @transform_9, window_bounds = array<i64: 3, 1, 32>}, {pipeline_mode = #tpu.pipeline_mode<synchronous>, transform_indices = @transform_10, window_bounds = array<i64: 3, 32, 64>}, {pipeline_mode = #tpu.pipeline_mode<synchronous>, transform_indices = @transform_11, window_bounds = array<i64: 3, 1, 64>}, {pipeline_mode = #tpu.pipeline_mode<synchronous>, transform_indices = @transform_12, window_bounds = array<i64: 3, 64, 32>}, {pipeline_mode = #tpu.pipeline_mode<synchronous>, transform_indices = @transform_13, window_bounds = array<i64: 3, 1, 32>}, {pipeline_mode = #tpu.pipeline_mode<synchronous>, transform_indices = @transform_14, window_bounds = array<i64: 3, 1, 32>}, {pipeline_mode = #tpu.pipeline_mode<synchronous>, transform_indices = @transform_15, window_bounds = array<i64: 3, 1, 32>}, {transform_indices = @transform_16, window_bounds = array<i64: 8, 8, 32>}]} {
    %c0 = arith.constant 0 : index
    %c0_0 = arith.constant 0 : index
    %c0_1 = arith.constant 0 : index
    %0 = vector.load %arg1[%c0, %c0_0, %c0_1] : memref<8x8x8xf32, #tpu.memory_space<vmem>>, vector<8x8x8xf32>
    %1 = vector.shape_cast %0 : vector<8x8x8xf32> to vector<64x8xf32>
    %2 = arith.truncf %1 : vector<64x8xf32> to vector<64x8xbf16>
    %c0_2 = arith.constant 0 : index
    %c0_3 = arith.constant 0 : index
    %3 = vector.load %arg2[%c0_2, %c0_3] : memref<8x32xbf16, #tpu.memory_space<vmem>>, vector<8x32xbf16>
    %cst = arith.constant dense<0.000000e+00> : vector<64x32xf32>
    %4 = tpu.matmul %2, %3, %cst {dimension_numbers = #tpu.dot_dimension_numbers<[1], [0], [0], [1], [0, 0, 1, 1], [], []>} : vector<64x8xbf16>, vector<8x32xbf16>, vector<64x32xf32> -> vector<64x32xf32>
    %c0_4 = arith.constant 0 : index
    %c0_5 = arith.constant 0 : index
    %5 = vector.load %arg3[%c0_4, %c0_5] : memref<1x32xf32, #tpu.memory_space<vmem>>, vector<1x32xf32>
    %6 = vector.broadcast %5 : vector<1x32xf32> to vector<64x32xf32>
    %7 = arith.addf %4, %6 : vector<64x32xf32>
    %8 = vector.shape_cast %7 : vector<64x32xf32> to vector<8x8x32xf32>
    %c0_6 = arith.constant 0 : index
    %c0_7 = arith.constant 0 : index
    %9 = vector.load %arg4[%c0_6, %c0_7] : memref<8x32xf32, #tpu.memory_space<vmem>>, vector<8x32xf32>
    %10 = vector.shape_cast %9 : vector<8x32xf32> to vector<1x8x32xf32>
    %11 = vector.broadcast %10 : vector<1x8x32xf32> to vector<8x8x32xf32>
    %12 = arith.addf %8, %11 : vector<8x8x32xf32>
    %13 = vector.shape_cast %12 : vector<8x8x32xf32> to vector<64x32xf32>
    %14 = arith.truncf %13 : vector<64x32xf32> to vector<64x32xbf16>
    %c0_8 = arith.constant 0 : index
    %c0_9 = arith.constant 0 : index
    %c0_10 = arith.constant 0 : index
    %15 = vector.load %arg5[%c0_8, %c0_9, %c0_10] : memref<3x32x96xbf16, #tpu.memory_space<vmem>>, vector<1x32x96xbf16>
    %16 = vector.shape_cast %15 : vector<1x32x96xbf16> to vector<32x96xbf16>
    %cst_11 = arith.constant dense<0.000000e+00> : vector<64x96xf32>
    %17 = tpu.matmul %14, %16, %cst_11 {dimension_numbers = #tpu.dot_dimension_numbers<[1], [0], [0], [1], [0, 0, 1, 1], [], []>} : vector<64x32xbf16>, vector<32x96xbf16>, vector<64x96xf32> -> vector<64x96xf32>
    %c0_12 = arith.constant 0 : index
    %c0_13 = arith.constant 0 : index
    %c0_14 = arith.constant 0 : index
    %18 = vector.load %arg6[%c0_12, %c0_13, %c0_14] : memref<3x1x96xf32, #tpu.memory_space<vmem>>, vector<1x1x96xf32>
    %19 = vector.shape_cast %18 : vector<1x1x96xf32> to vector<1x96xf32>
    %20 = vector.broadcast %19 : vector<1x96xf32> to vector<64x96xf32>
    %21 = arith.addf %17, %20 : vector<64x96xf32>
    %22 = vector.shape_cast %21 : vector<64x96xf32> to vector<8x8x96xf32>
    %23 = vector.extract_strided_slice %22 {offsets = [0, 0, 0], sizes = [8, 8, 8], strides = [1, 1, 1]} : vector<8x8x96xf32> to vector<8x8x8xf32>
    %24 = vector.extract_strided_slice %22 {offsets = [0, 0, 8], sizes = [8, 8, 8], strides = [1, 1, 1]} : vector<8x8x96xf32> to vector<8x8x8xf32>
    %25 = vector.extract_strided_slice %22 {offsets = [0, 0, 16], sizes = [8, 8, 8], strides = [1, 1, 1]} : vector<8x8x96xf32> to vector<8x8x8xf32>
    %26 = vector.extract_strided_slice %22 {offsets = [0, 0, 24], sizes = [8, 8, 8], strides = [1, 1, 1]} : vector<8x8x96xf32> to vector<8x8x8xf32>
    %27 = tpu.concatenate %23, %24, %25, %26 in 0 : vector<8x8x8xf32>, vector<8x8x8xf32>, vector<8x8x8xf32>, vector<8x8x8xf32> -> vector<32x8x8xf32>
    %28 = arith.truncf %27 : vector<32x8x8xf32> to vector<32x8x8xbf16>
    %29 = vector.extract_strided_slice %22 {offsets = [0, 0, 32], sizes = [8, 8, 8], strides = [1, 1, 1]} : vector<8x8x96xf32> to vector<8x8x8xf32>
    %30 = vector.extract_strided_slice %22 {offsets = [0, 0, 40], sizes = [8, 8, 8], strides = [1, 1, 1]} : vector<8x8x96xf32> to vector<8x8x8xf32>
    %31 = vector.extract_strided_slice %22 {offsets = [0, 0, 48], sizes = [8, 8, 8], strides = [1, 1, 1]} : vector<8x8x96xf32> to vector<8x8x8xf32>
    %32 = vector.extract_strided_slice %22 {offsets = [0, 0, 56], sizes = [8, 8, 8], strides = [1, 1, 1]} : vector<8x8x96xf32> to vector<8x8x8xf32>
    %33 = tpu.concatenate %29, %30, %31, %32 in 0 : vector<8x8x8xf32>, vector<8x8x8xf32>, vector<8x8x8xf32>, vector<8x8x8xf32> -> vector<32x8x8xf32>
    %34 = arith.truncf %33 : vector<32x8x8xf32> to vector<32x8x8xbf16>
    %35 = vector.extract_strided_slice %22 {offsets = [0, 0, 64], sizes = [8, 8, 8], strides = [1, 1, 1]} : vector<8x8x96xf32> to vector<8x8x8xf32>
    %36 = vector.extract_strided_slice %22 {offsets = [0, 0, 72], sizes = [8, 8, 8], strides = [1, 1, 1]} : vector<8x8x96xf32> to vector<8x8x8xf32>
    %37 = vector.extract_strided_slice %22 {offsets = [0, 0, 80], sizes = [8, 8, 8], strides = [1, 1, 1]} : vector<8x8x96xf32> to vector<8x8x8xf32>
    %38 = vector.extract_strided_slice %22 {offsets = [0, 0, 88], sizes = [8, 8, 8], strides = [1, 1, 1]} : vector<8x8x96xf32> to vector<8x8x8xf32>
    %39 = tpu.concatenate %35, %36, %37, %38 in 0 : vector<8x8x8xf32>, vector<8x8x8xf32>, vector<8x8x8xf32>, vector<8x8x8xf32> -> vector<32x8x8xf32>
    %40 = arith.truncf %39 : vector<32x8x8xf32> to vector<32x8x8xbf16>
    "tpu.trace_start"() <{level = 10 : i32, message = "bpd,bqd->bpq"}> : () -> ()
    %cst_15 = arith.constant dense<0.000000e+00> : vector<32x8x8xf32>
    %41 = tpu.matmul %28, %34, %cst_15 {dimension_numbers = #tpu.dot_dimension_numbers<[2], [2], [1], [1], [0, 0, 0, 1, 1, 1], [0], [0]>} : vector<32x8x8xbf16>, vector<32x8x8xbf16>, vector<32x8x8xf32> -> vector<32x8x8xf32>
    "tpu.trace_stop"() : () -> ()
    %c0_16 = arith.constant 0 : index
    %c0_17 = arith.constant 0 : index
    %c0_18 = arith.constant 0 : index
    %42 = vector.load %arg18[%c0_16, %c0_17, %c0_18] : memref<32x8x8xf32, #tpu.memory_space<vmem>>, vector<32x8x8xf32>
    tpu.vector_store %arg18[%c0_16, %c0_17, %c0_18], %41 {strides = array<i32>} : memref<32x8x8xf32, #tpu.memory_space<vmem>>, vector<32x8x8xf32>,
    %cst_19 = arith.constant dense<0xFF800000> : vector<32x8xf32>
    %43 = vector.multi_reduction <maximumf>, %41, %cst_19 [2] : vector<32x8x8xf32> to vector<32x8xf32>
    %44 = vector.shape_cast %43 : vector<32x8xf32> to vector<32x8x1xf32>
    %45 = vector.broadcast %44 : vector<32x8x1xf32> to vector<32x8x8xf32>
    %46 = arith.subf %41, %45 : vector<32x8x8xf32>
    %47 = math.exp %46 : vector<32x8x8xf32>
    %cst_20 = arith.constant dense<0.000000e+00> : vector<32x8xf32>
    %48 = vector.multi_reduction <add>, %47, %cst_20 [2] : vector<32x8x8xf32> to vector<32x8xf32>
    %49 = vector.shape_cast %48 : vector<32x8xf32> to vector<32x8x1xf32>
    %50 = tpu.reciprocal %49 {approx = true} : vector<32x8x1xf32> -> vector<32x8x1xf32>
    %51 = vector.broadcast %50 : vector<32x8x1xf32> to vector<32x8x8xf32>
    %52 = arith.mulf %47, %51 : vector<32x8x8xf32>
    %53 = arith.truncf %52 : vector<32x8x8xf32> to vector<32x8x8xbf16>
    "tpu.trace_start"() <{level = 10 : i32, message = "bpq,bqd->bpd"}> : () -> ()
    %cst_21 = arith.constant dense<0.000000e+00> : vector<32x8x8xf32>
    %54 = tpu.matmul %53, %40, %cst_21 {dimension_numbers = #tpu.dot_dimension_numbers<[2], [1], [1], [2], [0, 0, 0, 1, 1, 2], [0], [0]>} : vector<32x8x8xbf16>, vector<32x8x8xbf16>, vector<32x8x8xf32> -> vector<32x8x8xf32>
    "tpu.trace_stop"() : () -> ()
    %55 = vector.extract_strided_slice %54 {offsets = [0, 0, 0], sizes = [8, 8, 8], strides = [1, 1, 1]} : vector<32x8x8xf32> to vector<8x8x8xf32>
    %56 = vector.extract_strided_slice %54 {offsets = [8, 0, 0], sizes = [8, 8, 8], strides = [1, 1, 1]} : vector<32x8x8xf32> to vector<8x8x8xf32>
    %57 = vector.extract_strided_slice %54 {offsets = [16, 0, 0], sizes = [8, 8, 8], strides = [1, 1, 1]} : vector<32x8x8xf32> to vector<8x8x8xf32>
    %58 = vector.extract_strided_slice %54 {offsets = [24, 0, 0], sizes = [8, 8, 8], strides = [1, 1, 1]} : vector<32x8x8xf32> to vector<8x8x8xf32>
    %59 = tpu.concatenate %55, %56, %57, %58 in 2 : vector<8x8x8xf32>, vector<8x8x8xf32>, vector<8x8x8xf32>, vector<8x8x8xf32> -> vector<8x8x32xf32>
    %60 = vector.shape_cast %59 : vector<8x8x32xf32> to vector<64x32xf32>
    %61 = arith.truncf %60 : vector<64x32xf32> to vector<64x32xbf16>
    %c0_22 = arith.constant 0 : index
    %c0_23 = arith.constant 0 : index
    %c0_24 = arith.constant 0 : index
    %62 = vector.load %arg7[%c0_22, %c0_23, %c0_24] : memref<3x32x32xbf16, #tpu.memory_space<vmem>>, vector<1x32x32xbf16>
    %63 = vector.shape_cast %62 : vector<1x32x32xbf16> to vector<32x32xbf16>
    %cst_25 = arith.constant dense<0.000000e+00> : vector<64x32xf32>
    %64 = tpu.matmul %61, %63, %cst_25 {dimension_numbers = #tpu.dot_dimension_numbers<[1], [0], [0], [1], [0, 0, 1, 1], [], []>} : vector<64x32xbf16>, vector<32x32xbf16>, vector<64x32xf32> -> vector<64x32xf32>
    %65 = arith.addf %13, %64 : vector<64x32xf32>
    %c0_26 = arith.constant 0 : index
    %c0_27 = arith.constant 0 : index
    %c0_28 = arith.constant 0 : index
    %66 = vector.load %arg8[%c0_26, %c0_27, %c0_28] : memref<3x1x32xf32, #tpu.memory_space<vmem>>, vector<1x1x32xf32>
    %67 = vector.shape_cast %66 : vector<1x1x32xf32> to vector<1x32xf32>
    %68 = vector.broadcast %67 : vector<1x32xf32> to vector<64x32xf32>
    %69 = arith.addf %65, %68 : vector<64x32xf32>
    %c0_29 = arith.constant 0 : index
    %c0_30 = arith.constant 0 : index
    %c0_31 = arith.constant 0 : index
    %70 = vector.load %arg9[%c0_29, %c0_30, %c0_31] : memref<3x1x32xf32, #tpu.memory_space<vmem>>, vector<1x1x32xf32>
    %71 = vector.shape_cast %70 : vector<1x1x32xf32> to vector<1x32xf32>
    %72 = vector.broadcast %71 : vector<1x32xf32> to vector<64x32xf32>
    %73 = arith.mulf %69, %72 : vector<64x32xf32>
    %c0_32 = arith.constant 0 : index
    %c0_33 = arith.constant 0 : index
    %c0_34 = arith.constant 0 : index
    %74 = vector.load %arg10[%c0_32, %c0_33, %c0_34] : memref<3x1x32xf32, #tpu.memory_space<vmem>>, vector<1x1x32xf32>
    %75 = vector.shape_cast %74 : vector<1x1x32xf32> to vector<1x32xf32>
    %76 = vector.broadcast %75 : vector<1x32xf32> to vector<64x32xf32>
    %77 = arith.addf %73, %76 : vector<64x32xf32>
    %78 = arith.truncf %77 : vector<64x32xf32> to vector<64x32xbf16>
    %c0_35 = arith.constant 0 : index
    %c0_36 = arith.constant 0 : index
    %c0_37 = arith.constant 0 : index
    %79 = vector.load %arg11[%c0_35, %c0_36, %c0_37] : memref<3x32x64xbf16, #tpu.memory_space<vmem>>, vector<1x32x64xbf16>
    %80 = vector.shape_cast %79 : vector<1x32x64xbf16> to vector<32x64xbf16>
    %cst_38 = arith.constant dense<0.000000e+00> : vector<64x64xf32>
    %81 = tpu.matmul %78, %80, %cst_38 {dimension_numbers = #tpu.dot_dimension_numbers<[1], [0], [0], [1], [0, 0, 1, 1], [], []>} : vector<64x32xbf16>, vector<32x64xbf16>, vector<64x64xf32> -> vector<64x64xf32>
    %c0_39 = arith.constant 0 : index
    %c0_40 = arith.constant 0 : index
    %c0_41 = arith.constant 0 : index
    %82 = vector.load %arg12[%c0_39, %c0_40, %c0_41] : memref<3x1x64xf32, #tpu.memory_space<vmem>>, vector<1x1x64xf32>
    %83 = vector.shape_cast %82 : vector<1x1x64xf32> to vector<1x64xf32>
    %84 = vector.broadcast %83 : vector<1x64xf32> to vector<64x64xf32>
    %85 = arith.addf %81, %84 : vector<64x64xf32>
    %86 = arith.mulf %85, %85 : vector<64x64xf32>
    %87 = arith.mulf %85, %86 : vector<64x64xf32>
    %cst_42 = arith.constant 4.471500e-02 : f32
    %88 = vector.broadcast %cst_42 : f32 to vector<64x64xf32>
    %89 = arith.mulf %88, %87 : vector<64x64xf32>
    %90 = arith.addf %85, %89 : vector<64x64xf32>
    %cst_43 = arith.constant 0.797884583 : f32
    %91 = vector.broadcast %cst_43 : f32 to vector<64x64xf32>
    %92 = arith.mulf %91, %90 : vector<64x64xf32>
    %93 = math.tanh %92 : vector<64x64xf32>
    %cst_44 = arith.constant 1.000000e+00 : f32
    %94 = vector.broadcast %cst_44 : f32 to vector<64x64xf32>
    %95 = arith.addf %94, %93 : vector<64x64xf32>
    %cst_45 = arith.constant 5.000000e-01 : f32
    %96 = vector.broadcast %cst_45 : f32 to vector<64x64xf32>
    %97 = arith.mulf %96, %95 : vector<64x64xf32>
    %98 = arith.mulf %85, %97 : vector<64x64xf32>
    %99 = arith.truncf %98 : vector<64x64xf32> to vector<64x64xbf16>
    %c0_46 = arith.constant 0 : index
    %c0_47 = arith.constant 0 : index
    %c0_48 = arith.constant 0 : index
    %100 = vector.load %arg13[%c0_46, %c0_47, %c0_48] : memref<3x64x32xbf16, #tpu.memory_space<vmem>>, vector<1x64x32xbf16>
    %101 = vector.shape_cast %100 : vector<1x64x32xbf16> to vector<64x32xbf16>
    %cst_49 = arith.constant dense<0.000000e+00> : vector<64x32xf32>
    %102 = tpu.matmul %99, %101, %cst_49 {dimension_numbers = #tpu.dot_dimension_numbers<[1], [0], [0], [1], [0, 0, 1, 1], [], []>} : vector<64x64xbf16>, vector<64x32xbf16>, vector<64x32xf32> -> vector<64x32xf32>
    %c0_50 = arith.constant 0 : index
    %c0_51 = arith.constant 0 : index
    %c0_52 = arith.constant 0 : index
    %103 = vector.load %arg14[%c0_50, %c0_51, %c0_52] : memref<3x1x32xf32, #tpu.memory_space<vmem>>, vector<1x1x32xf32>
    %104 = vector.shape_cast %103 : vector<1x1x32xf32> to vector<1x32xf32>
    %105 = vector.broadcast %104 : vector<1x32xf32> to vector<64x32xf32>
    %106 = arith.addf %102, %105 : vector<64x32xf32>
    %107 = arith.addf %77, %106 : vector<64x32xf32>
    %c0_53 = arith.constant 0 : index
    %c0_54 = arith.constant 0 : index
    %c0_55 = arith.constant 0 : index
    %108 = vector.load %arg15[%c0_53, %c0_54, %c0_55] : memref<3x1x32xf32, #tpu.memory_space<vmem>>, vector<1x1x32xf32>
    %109 = vector.shape_cast %108 : vector<1x1x32xf32> to vector<1x32xf32>
    %110 = vector.broadcast %109 : vector<1x32xf32> to vector<64x32xf32>
    %111 = arith.mulf %107, %110 : vector<64x32xf32>
    %c0_56 = arith.constant 0 : index
    %c0_57 = arith.constant 0 : index
    %c0_58 = arith.constant 0 : index
    %112 = vector.load %arg16[%c0_56, %c0_57, %c0_58] : memref<3x1x32xf32, #tpu.memory_space<vmem>>, vector<1x1x32xf32>
    %113 = vector.shape_cast %112 : vector<1x1x32xf32> to vector<1x32xf32>
    %114 = vector.broadcast %113 : vector<1x32xf32> to vector<64x32xf32>
    %115 = arith.addf %111, %114 : vector<64x32xf32>
    %116 = arith.truncf %115 : vector<64x32xf32> to vector<64x32xbf16>
    %c1 = arith.constant 1 : index
    %c0_59 = arith.constant 0 : index
    %c0_60 = arith.constant 0 : index
    %117 = vector.load %arg5[%c1, %c0_59, %c0_60] : memref<3x32x96xbf16, #tpu.memory_space<vmem>>, vector<1x32x96xbf16>
    %118 = vector.shape_cast %117 : vector<1x32x96xbf16> to vector<32x96xbf16>
    %cst_61 = arith.constant dense<0.000000e+00> : vector<64x96xf32>
    %119 = tpu.matmul %116, %118, %cst_61 {dimension_numbers = #tpu.dot_dimension_numbers<[1], [0], [0], [1], [0, 0, 1, 1], [], []>} : vector<64x32xbf16>, vector<32x96xbf16>, vector<64x96xf32> -> vector<64x96xf32>
    %c1_62 = arith.constant 1 : index
    %c0_63 = arith.constant 0 : index
    %c0_64 = arith.constant 0 : index
    %120 = vector.load %arg6[%c1_62, %c0_63, %c0_64] : memref<3x1x96xf32, #tpu.memory_space<vmem>>, vector<1x1x96xf32>
    %121 = vector.shape_cast %120 : vector<1x1x96xf32> to vector<1x96xf32>
    %122 = vector.broadcast %121 : vector<1x96xf32> to vector<64x96xf32>
    %123 = arith.addf %119, %122 : vector<64x96xf32>
    %124 = vector.shape_cast %123 : vector<64x96xf32> to vector<8x8x96xf32>
    %125 = vector.extract_strided_slice %124 {offsets = [0, 0, 0], sizes = [8, 8, 8], strides = [1, 1, 1]} : vector<8x8x96xf32> to vector<8x8x8xf32>
    %126 = vector.extract_strided_slice %124 {offsets = [0, 0, 8], sizes = [8, 8, 8], strides = [1, 1, 1]} : vector<8x8x96xf32> to vector<8x8x8xf32>
    %127 = vector.extract_strided_slice %124 {offsets = [0, 0, 16], sizes = [8, 8, 8], strides = [1, 1, 1]} : vector<8x8x96xf32> to vector<8x8x8xf32>
    %128 = vector.extract_strided_slice %124 {offsets = [0, 0, 24], sizes = [8, 8, 8], strides = [1, 1, 1]} : vector<8x8x96xf32> to vector<8x8x8xf32>
    %129 = tpu.concatenate %125, %126, %127, %128 in 0 : vector<8x8x8xf32>, vector<8x8x8xf32>, vector<8x8x8xf32>, vector<8x8x8xf32> -> vector<32x8x8xf32>
    %130 = arith.truncf %129 : vector<32x8x8xf32> to vector<32x8x8xbf16>
    %131 = vector.extract_strided_slice %124 {offsets = [0, 0, 32], sizes = [8, 8, 8], strides = [1, 1, 1]} : vector<8x8x96xf32> to vector<8x8x8xf32>
    %132 = vector.extract_strided_slice %124 {offsets = [0, 0, 40], sizes = [8, 8, 8], strides = [1, 1, 1]} : vector<8x8x96xf32> to vector<8x8x8xf32>
    %133 = vector.extract_strided_slice %124 {offsets = [0, 0, 48], sizes = [8, 8, 8], strides = [1, 1, 1]} : vector<8x8x96xf32> to vector<8x8x8xf32>
    %134 = vector.extract_strided_slice %124 {offsets = [0, 0, 56], sizes = [8, 8, 8], strides = [1, 1, 1]} : vector<8x8x96xf32> to vector<8x8x8xf32>
    %135 = tpu.concatenate %131, %132, %133, %134 in 0 : vector<8x8x8xf32>, vector<8x8x8xf32>, vector<8x8x8xf32>, vector<8x8x8xf32> -> vector<32x8x8xf32>
    %136 = arith.truncf %135 : vector<32x8x8xf32> to vector<32x8x8xbf16>
    %137 = vector.extract_strided_slice %124 {offsets = [0, 0, 64], sizes = [8, 8, 8], strides = [1, 1, 1]} : vector<8x8x96xf32> to vector<8x8x8xf32>
    %138 = vector.extract_strided_slice %124 {offsets = [0, 0, 72], sizes = [8, 8, 8], strides = [1, 1, 1]} : vector<8x8x96xf32> to vector<8x8x8xf32>
    %139 = vector.extract_strided_slice %124 {offsets = [0, 0, 80], sizes = [8, 8, 8], strides = [1, 1, 1]} : vector<8x8x96xf32> to vector<8x8x8xf32>
    %140 = vector.extract_strided_slice %124 {offsets = [0, 0, 88], sizes = [8, 8, 8], strides = [1, 1, 1]} : vector<8x8x96xf32> to vector<8x8x8xf32>
    %141 = tpu.concatenate %137, %138, %139, %140 in 0 : vector<8x8x8xf32>, vector<8x8x8xf32>, vector<8x8x8xf32>, vector<8x8x8xf32> -> vector<32x8x8xf32>
    %142 = arith.truncf %141 : vector<32x8x8xf32> to vector<32x8x8xbf16>
    "tpu.trace_start"() <{level = 10 : i32, message = "bpd,bqd->bpq"}> : () -> ()
    %cst_65 = arith.constant dense<0.000000e+00> : vector<32x8x8xf32>
    %143 = tpu.matmul %130, %136, %cst_65 {dimension_numbers = #tpu.dot_dimension_numbers<[2], [2], [1], [1], [0, 0, 0, 1, 1, 1], [0], [0]>} : vector<32x8x8xbf16>, vector<32x8x8xbf16>, vector<32x8x8xf32> -> vector<32x8x8xf32>
    "tpu.trace_stop"() : () -> ()
    %c0_66 = arith.constant 0 : index
    %c0_67 = arith.constant 0 : index
    %c0_68 = arith.constant 0 : index
    %144 = vector.load %arg18[%c0_66, %c0_67, %c0_68] : memref<32x8x8xf32, #tpu.memory_space<vmem>>, vector<32x8x8xf32>
    %145 = arith.addf %143, %144 : vector<32x8x8xf32>
    %c0_69 = arith.constant 0 : index
    %c0_70 = arith.constant 0 : index
    %c0_71 = arith.constant 0 : index
    %146 = vector.load %arg18[%c0_69, %c0_70, %c0_71] : memref<32x8x8xf32, #tpu.memory_space<vmem>>, vector<32x8x8xf32>
    tpu.vector_store %arg18[%c0_69, %c0_70, %c0_71], %145 {strides = array<i32>} : memref<32x8x8xf32, #tpu.memory_space<vmem>>, vector<32x8x8xf32>,
    %cst_72 = arith.constant dense<0xFF800000> : vector<32x8xf32>
    %147 = vector.multi_reduction <maximumf>, %145, %cst_72 [2] : vector<32x8x8xf32> to vector<32x8xf32>
    %148 = vector.shape_cast %147 : vector<32x8xf32> to vector<32x8x1xf32>
    %149 = vector.broadcast %148 : vector<32x8x1xf32> to vector<32x8x8xf32>
    %150 = arith.subf %145, %149 : vector<32x8x8xf32>
    %151 = math.exp %150 : vector<32x8x8xf32>
    %cst_73 = arith.constant dense<0.000000e+00> : vector<32x8xf32>
    %152 = vector.multi_reduction <add>, %151, %cst_73 [2] : vector<32x8x8xf32> to vector<32x8xf32>
    %153 = vector.shape_cast %152 : vector<32x8xf32> to vector<32x8x1xf32>
    %154 = tpu.reciprocal %153 {approx = true} : vector<32x8x1xf32> -> vector<32x8x1xf32>
    %155 = vector.broadcast %154 : vector<32x8x1xf32> to vector<32x8x8xf32>
    %156 = arith.mulf %151, %155 : vector<32x8x8xf32>
    %157 = arith.truncf %156 : vector<32x8x8xf32> to vector<32x8x8xbf16>
    "tpu.trace_start"() <{level = 10 : i32, message = "bpq,bqd->bpd"}> : () -> ()
    %cst_74 = arith.constant dense<0.000000e+00> : vector<32x8x8xf32>
    %158 = tpu.matmul %157, %142, %cst_74 {dimension_numbers = #tpu.dot_dimension_numbers<[2], [1], [1], [2], [0, 0, 0, 1, 1, 2], [0], [0]>} : vector<32x8x8xbf16>, vector<32x8x8xbf16>, vector<32x8x8xf32> -> vector<32x8x8xf32>
    "tpu.trace_stop"() : () -> ()
    %159 = vector.extract_strided_slice %158 {offsets = [0, 0, 0], sizes = [8, 8, 8], strides = [1, 1, 1]} : vector<32x8x8xf32> to vector<8x8x8xf32>
    %160 = vector.extract_strided_slice %158 {offsets = [8, 0, 0], sizes = [8, 8, 8], strides = [1, 1, 1]} : vector<32x8x8xf32> to vector<8x8x8xf32>
    %161 = vector.extract_strided_slice %158 {offsets = [16, 0, 0], sizes = [8, 8, 8], strides = [1, 1, 1]} : vector<32x8x8xf32> to vector<8x8x8xf32>
    %162 = vector.extract_strided_slice %158 {offsets = [24, 0, 0], sizes = [8, 8, 8], strides = [1, 1, 1]} : vector<32x8x8xf32> to vector<8x8x8xf32>
    %163 = tpu.concatenate %159, %160, %161, %162 in 2 : vector<8x8x8xf32>, vector<8x8x8xf32>, vector<8x8x8xf32>, vector<8x8x8xf32> -> vector<8x8x32xf32>
    %164 = vector.shape_cast %163 : vector<8x8x32xf32> to vector<64x32xf32>
    %165 = arith.truncf %164 : vector<64x32xf32> to vector<64x32xbf16>
    %c1_75 = arith.constant 1 : index
    %c0_76 = arith.constant 0 : index
    %c0_77 = arith.constant 0 : index
    %166 = vector.load %arg7[%c1_75, %c0_76, %c0_77] : memref<3x32x32xbf16, #tpu.memory_space<vmem>>, vector<1x32x32xbf16>
    %167 = vector.shape_cast %166 : vector<1x32x32xbf16> to vector<32x32xbf16>
    %cst_78 = arith.constant dense<0.000000e+00> : vector<64x32xf32>
    %168 = tpu.matmul %165, %167, %cst_78 {dimension_numbers = #tpu.dot_dimension_numbers<[1], [0], [0], [1], [0, 0, 1, 1], [], []>} : vector<64x32xbf16>, vector<32x32xbf16>, vector<64x32xf32> -> vector<64x32xf32>
    %169 = arith.addf %115, %168 : vector<64x32xf32>
    %c1_79 = arith.constant 1 : index
    %c0_80 = arith.constant 0 : index
    %c0_81 = arith.constant 0 : index
    %170 = vector.load %arg8[%c1_79, %c0_80, %c0_81] : memref<3x1x32xf32, #tpu.memory_space<vmem>>, vector<1x1x32xf32>
    %171 = vector.shape_cast %170 : vector<1x1x32xf32> to vector<1x32xf32>
    %172 = vector.broadcast %171 : vector<1x32xf32> to vector<64x32xf32>
    %173 = arith.addf %169, %172 : vector<64x32xf32>
    %c1_82 = arith.constant 1 : index
    %c0_83 = arith.constant 0 : index
    %c0_84 = arith.constant 0 : index
    %174 = vector.load %arg9[%c1_82, %c0_83, %c0_84] : memref<3x1x32xf32, #tpu.memory_space<vmem>>, vector<1x1x32xf32>
    %175 = vector.shape_cast %174 : vector<1x1x32xf32> to vector<1x32xf32>
    %176 = vector.broadcast %175 : vector<1x32xf32> to vector<64x32xf32>
    %177 = arith.mulf %173, %176 : vector<64x32xf32>
    %c1_85 = arith.constant 1 : index
    %c0_86 = arith.constant 0 : index
    %c0_87 = arith.constant 0 : index
    %178 = vector.load %arg10[%c1_85, %c0_86, %c0_87] : memref<3x1x32xf32, #tpu.memory_space<vmem>>, vector<1x1x32xf32>
    %179 = vector.shape_cast %178 : vector<1x1x32xf32> to vector<1x32xf32>
    %180 = vector.broadcast %179 : vector<1x32xf32> to vector<64x32xf32>
    %181 = arith.addf %177, %180 : vector<64x32xf32>
    %182 = arith.truncf %181 : vector<64x32xf32> to vector<64x32xbf16>
    %c1_88 = arith.constant 1 : index
    %c0_89 = arith.constant 0 : index
    %c0_90 = arith.constant 0 : index
    %183 = vector.load %arg11[%c1_88, %c0_89, %c0_90] : memref<3x32x64xbf16, #tpu.memory_space<vmem>>, vector<1x32x64xbf16>
    %184 = vector.shape_cast %183 : vector<1x32x64xbf16> to vector<32x64xbf16>
    %cst_91 = arith.constant dense<0.000000e+00> : vector<64x64xf32>
    %185 = tpu.matmul %182, %184, %cst_91 {dimension_numbers = #tpu.dot_dimension_numbers<[1], [0], [0], [1], [0, 0, 1, 1], [], []>} : vector<64x32xbf16>, vector<32x64xbf16>, vector<64x64xf32> -> vector<64x64xf32>
    %c1_92 = arith.constant 1 : index
    %c0_93 = arith.constant 0 : index
    %c0_94 = arith.constant 0 : index
    %186 = vector.load %arg12[%c1_92, %c0_93, %c0_94] : memref<3x1x64xf32, #tpu.memory_space<vmem>>, vector<1x1x64xf32>
    %187 = vector.shape_cast %186 : vector<1x1x64xf32> to vector<1x64xf32>
    %188 = vector.broadcast %187 : vector<1x64xf32> to vector<64x64xf32>
    %189 = arith.addf %185, %188 : vector<64x64xf32>
    %190 = arith.mulf %189, %189 : vector<64x64xf32>
    %191 = arith.mulf %189, %190 : vector<64x64xf32>
    %cst_95 = arith.constant 4.471500e-02 : f32
    %192 = vector.broadcast %cst_95 : f32 to vector<64x64xf32>
    %193 = arith.mulf %192, %191 : vector<64x64xf32>
    %194 = arith.addf %189, %193 : vector<64x64xf32>
    %cst_96 = arith.constant 0.797884583 : f32
    %195 = vector.broadcast %cst_96 : f32 to vector<64x64xf32>
    %196 = arith.mulf %195, %194 : vector<64x64xf32>
    %197 = math.tanh %196 : vector<64x64xf32>
    %cst_97 = arith.constant 1.000000e+00 : f32
    %198 = vector.broadcast %cst_97 : f32 to vector<64x64xf32>
    %199 = arith.addf %198, %197 : vector<64x64xf32>
    %cst_98 = arith.constant 5.000000e-01 : f32
    %200 = vector.broadcast %cst_98 : f32 to vector<64x64xf32>
    %201 = arith.mulf %200, %199 : vector<64x64xf32>
    %202 = arith.mulf %189, %201 : vector<64x64xf32>
    %203 = arith.truncf %202 : vector<64x64xf32> to vector<64x64xbf16>
    %c1_99 = arith.constant 1 : index
    %c0_100 = arith.constant 0 : index
    %c0_101 = arith.constant 0 : index
    %204 = vector.load %arg13[%c1_99, %c0_100, %c0_101] : memref<3x64x32xbf16, #tpu.memory_space<vmem>>, vector<1x64x32xbf16>
    %205 = vector.shape_cast %204 : vector<1x64x32xbf16> to vector<64x32xbf16>
    %cst_102 = arith.constant dense<0.000000e+00> : vector<64x32xf32>
    %206 = tpu.matmul %203, %205, %cst_102 {dimension_numbers = #tpu.dot_dimension_numbers<[1], [0], [0], [1], [0, 0, 1, 1], [], []>} : vector<64x64xbf16>, vector<64x32xbf16>, vector<64x32xf32> -> vector<64x32xf32>
    %c1_103 = arith.constant 1 : index
    %c0_104 = arith.constant 0 : index
    %c0_105 = arith.constant 0 : index
    %207 = vector.load %arg14[%c1_103, %c0_104, %c0_105] : memref<3x1x32xf32, #tpu.memory_space<vmem>>, vector<1x1x32xf32>
    %208 = vector.shape_cast %207 : vector<1x1x32xf32> to vector<1x32xf32>
    %209 = vector.broadcast %208 : vector<1x32xf32> to vector<64x32xf32>
    %210 = arith.addf %206, %209 : vector<64x32xf32>
    %211 = arith.addf %181, %210 : vector<64x32xf32>
    %c1_106 = arith.constant 1 : index
    %c0_107 = arith.constant 0 : index
    %c0_108 = arith.constant 0 : index
    %212 = vector.load %arg15[%c1_106, %c0_107, %c0_108] : memref<3x1x32xf32, #tpu.memory_space<vmem>>, vector<1x1x32xf32>
    %213 = vector.shape_cast %212 : vector<1x1x32xf32> to vector<1x32xf32>
    %214 = vector.broadcast %213 : vector<1x32xf32> to vector<64x32xf32>
    %215 = arith.mulf %211, %214 : vector<64x32xf32>
    %c1_109 = arith.constant 1 : index
    %c0_110 = arith.constant 0 : index
    %c0_111 = arith.constant 0 : index
    %216 = vector.load %arg16[%c1_109, %c0_110, %c0_111] : memref<3x1x32xf32, #tpu.memory_space<vmem>>, vector<1x1x32xf32>
    %217 = vector.shape_cast %216 : vector<1x1x32xf32> to vector<1x32xf32>
    %218 = vector.broadcast %217 : vector<1x32xf32> to vector<64x32xf32>
    %219 = arith.addf %215, %218 : vector<64x32xf32>
    %220 = arith.truncf %219 : vector<64x32xf32> to vector<64x32xbf16>
    %c2 = arith.constant 2 : index
    %c0_112 = arith.constant 0 : index
    %c0_113 = arith.constant 0 : index
    %221 = vector.load %arg5[%c2, %c0_112, %c0_113] : memref<3x32x96xbf16, #tpu.memory_space<vmem>>, vector<1x32x96xbf16>
    %222 = vector.shape_cast %221 : vector<1x32x96xbf16> to vector<32x96xbf16>
    %cst_114 = arith.constant dense<0.000000e+00> : vector<64x96xf32>
    %223 = tpu.matmul %220, %222, %cst_114 {dimension_numbers = #tpu.dot_dimension_numbers<[1], [0], [0], [1], [0, 0, 1, 1], [], []>} : vector<64x32xbf16>, vector<32x96xbf16>, vector<64x96xf32> -> vector<64x96xf32>
    %c2_115 = arith.constant 2 : index
    %c0_116 = arith.constant 0 : index
    %c0_117 = arith.constant 0 : index
    %224 = vector.load %arg6[%c2_115, %c0_116, %c0_117] : memref<3x1x96xf32, #tpu.memory_space<vmem>>, vector<1x1x96xf32>
    %225 = vector.shape_cast %224 : vector<1x1x96xf32> to vector<1x96xf32>
    %226 = vector.broadcast %225 : vector<1x96xf32> to vector<64x96xf32>
    %227 = arith.addf %223, %226 : vector<64x96xf32>
    %228 = vector.shape_cast %227 : vector<64x96xf32> to vector<8x8x96xf32>
    %229 = vector.extract_strided_slice %228 {offsets = [0, 0, 0], sizes = [8, 8, 8], strides = [1, 1, 1]} : vector<8x8x96xf32> to vector<8x8x8xf32>
    %230 = vector.extract_strided_slice %228 {offsets = [0, 0, 8], sizes = [8, 8, 8], strides = [1, 1, 1]} : vector<8x8x96xf32> to vector<8x8x8xf32>
    %231 = vector.extract_strided_slice %228 {offsets = [0, 0, 16], sizes = [8, 8, 8], strides = [1, 1, 1]} : vector<8x8x96xf32> to vector<8x8x8xf32>
    %232 = vector.extract_strided_slice %228 {offsets = [0, 0, 24], sizes = [8, 8, 8], strides = [1, 1, 1]} : vector<8x8x96xf32> to vector<8x8x8xf32>
    %233 = tpu.concatenate %229, %230, %231, %232 in 0 : vector<8x8x8xf32>, vector<8x8x8xf32>, vector<8x8x8xf32>, vector<8x8x8xf32> -> vector<32x8x8xf32>
    %234 = arith.truncf %233 : vector<32x8x8xf32> to vector<32x8x8xbf16>
    %235 = vector.extract_strided_slice %228 {offsets = [0, 0, 32], sizes = [8, 8, 8], strides = [1, 1, 1]} : vector<8x8x96xf32> to vector<8x8x8xf32>
    %236 = vector.extract_strided_slice %228 {offsets = [0, 0, 40], sizes = [8, 8, 8], strides = [1, 1, 1]} : vector<8x8x96xf32> to vector<8x8x8xf32>
    %237 = vector.extract_strided_slice %228 {offsets = [0, 0, 48], sizes = [8, 8, 8], strides = [1, 1, 1]} : vector<8x8x96xf32> to vector<8x8x8xf32>
    %238 = vector.extract_strided_slice %228 {offsets = [0, 0, 56], sizes = [8, 8, 8], strides = [1, 1, 1]} : vector<8x8x96xf32> to vector<8x8x8xf32>
    %239 = tpu.concatenate %235, %236, %237, %238 in 0 : vector<8x8x8xf32>, vector<8x8x8xf32>, vector<8x8x8xf32>, vector<8x8x8xf32> -> vector<32x8x8xf32>
    %240 = arith.truncf %239 : vector<32x8x8xf32> to vector<32x8x8xbf16>
    %241 = vector.extract_strided_slice %228 {offsets = [0, 0, 64], sizes = [8, 8, 8], strides = [1, 1, 1]} : vector<8x8x96xf32> to vector<8x8x8xf32>
    %242 = vector.extract_strided_slice %228 {offsets = [0, 0, 72], sizes = [8, 8, 8], strides = [1, 1, 1]} : vector<8x8x96xf32> to vector<8x8x8xf32>
    %243 = vector.extract_strided_slice %228 {offsets = [0, 0, 80], sizes = [8, 8, 8], strides = [1, 1, 1]} : vector<8x8x96xf32> to vector<8x8x8xf32>
    %244 = vector.extract_strided_slice %228 {offsets = [0, 0, 88], sizes = [8, 8, 8], strides = [1, 1, 1]} : vector<8x8x96xf32> to vector<8x8x8xf32>
    %245 = tpu.concatenate %241, %242, %243, %244 in 0 : vector<8x8x8xf32>, vector<8x8x8xf32>, vector<8x8x8xf32>, vector<8x8x8xf32> -> vector<32x8x8xf32>
    %246 = arith.truncf %245 : vector<32x8x8xf32> to vector<32x8x8xbf16>
    "tpu.trace_start"() <{level = 10 : i32, message = "bpd,bqd->bpq"}> : () -> ()
    %cst_118 = arith.constant dense<0.000000e+00> : vector<32x8x8xf32>
    %247 = tpu.matmul %234, %240, %cst_118 {dimension_numbers = #tpu.dot_dimension_numbers<[2], [2], [1], [1], [0, 0, 0, 1, 1, 1], [0], [0]>} : vector<32x8x8xbf16>, vector<32x8x8xbf16>, vector<32x8x8xf32> -> vector<32x8x8xf32>
    "tpu.trace_stop"() : () -> ()
    %c0_119 = arith.constant 0 : index
    %c0_120 = arith.constant 0 : index
    %c0_121 = arith.constant 0 : index
    %248 = vector.load %arg18[%c0_119, %c0_120, %c0_121] : memref<32x8x8xf32, #tpu.memory_space<vmem>>, vector<32x8x8xf32>
    %249 = arith.addf %247, %248 : vector<32x8x8xf32>
    %cst_122 = arith.constant dense<0xFF800000> : vector<32x8xf32>
    %250 = vector.multi_reduction <maximumf>, %249, %cst_122 [2] : vector<32x8x8xf32> to vector<32x8xf32>
    %251 = vector.shape_cast %250 : vector<32x8xf32> to vector<32x8x1xf32>
    %252 = vector.broadcast %251 : vector<32x8x1xf32> to vector<32x8x8xf32>
    %253 = arith.subf %249, %252 : vector<32x8x8xf32>
    %254 = math.exp %253 : vector<32x8x8xf32>
    %cst_123 = arith.constant dense<0.000000e+00> : vector<32x8xf32>
    %255 = vector.multi_reduction <add>, %254, %cst_123 [2] : vector<32x8x8xf32> to vector<32x8xf32>
    %256 = vector.shape_cast %255 : vector<32x8xf32> to vector<32x8x1xf32>
    %257 = tpu.reciprocal %256 {approx = true} : vector<32x8x1xf32> -> vector<32x8x1xf32>
    %258 = vector.broadcast %257 : vector<32x8x1xf32> to vector<32x8x8xf32>
    %259 = arith.mulf %254, %258 : vector<32x8x8xf32>
    %260 = arith.truncf %259 : vector<32x8x8xf32> to vector<32x8x8xbf16>
    "tpu.trace_start"() <{level = 10 : i32, message = "bpq,bqd->bpd"}> : () -> ()
    %cst_124 = arith.constant dense<0.000000e+00> : vector<32x8x8xf32>
    %261 = tpu.matmul %260, %246, %cst_124 {dimension_numbers = #tpu.dot_dimension_numbers<[2], [1], [1], [2], [0, 0, 0, 1, 1, 2], [0], [0]>} : vector<32x8x8xbf16>, vector<32x8x8xbf16>, vector<32x8x8xf32> -> vector<32x8x8xf32>
    "tpu.trace_stop"() : () -> ()
    %262 = vector.extract_strided_slice %261 {offsets = [0, 0, 0], sizes = [8, 8, 8], strides = [1, 1, 1]} : vector<32x8x8xf32> to vector<8x8x8xf32>
    %263 = vector.extract_strided_slice %261 {offsets = [8, 0, 0], sizes = [8, 8, 8], strides = [1, 1, 1]} : vector<32x8x8xf32> to vector<8x8x8xf32>
    %264 = vector.extract_strided_slice %261 {offsets = [16, 0, 0], sizes = [8, 8, 8], strides = [1, 1, 1]} : vector<32x8x8xf32> to vector<8x8x8xf32>
    %265 = vector.extract_strided_slice %261 {offsets = [24, 0, 0], sizes = [8, 8, 8], strides = [1, 1, 1]} : vector<32x8x8xf32> to vector<8x8x8xf32>
    %266 = tpu.concatenate %262, %263, %264, %265 in 2 : vector<8x8x8xf32>, vector<8x8x8xf32>, vector<8x8x8xf32>, vector<8x8x8xf32> -> vector<8x8x32xf32>
    %267 = vector.shape_cast %266 : vector<8x8x32xf32> to vector<64x32xf32>
    %268 = arith.truncf %267 : vector<64x32xf32> to vector<64x32xbf16>
    %c2_125 = arith.constant 2 : index
    %c0_126 = arith.constant 0 : index
    %c0_127 = arith.constant 0 : index
    %269 = vector.load %arg7[%c2_125, %c0_126, %c0_127] : memref<3x32x32xbf16, #tpu.memory_space<vmem>>, vector<1x32x32xbf16>
    %270 = vector.shape_cast %269 : vector<1x32x32xbf16> to vector<32x32xbf16>
    %cst_128 = arith.constant dense<0.000000e+00> : vector<64x32xf32>
    %271 = tpu.matmul %268, %270, %cst_128 {dimension_numbers = #tpu.dot_dimension_numbers<[1], [0], [0], [1], [0, 0, 1, 1], [], []>} : vector<64x32xbf16>, vector<32x32xbf16>, vector<64x32xf32> -> vector<64x32xf32>
    %272 = arith.addf %219, %271 : vector<64x32xf32>
    %c2_129 = arith.constant 2 : index
    %c0_130 = arith.constant 0 : index
    %c0_131 = arith.constant 0 : index
    %273 = vector.load %arg8[%c2_129, %c0_130, %c0_131] : memref<3x1x32xf32, #tpu.memory_space<vmem>>, vector<1x1x32xf32>
    %274 = vector.shape_cast %273 : vector<1x1x32xf32> to vector<1x32xf32>
    %275 = vector.broadcast %274 : vector<1x32xf32> to vector<64x32xf32>
    %276 = arith.addf %272, %275 : vector<64x32xf32>
    %c2_132 = arith.constant 2 : index
    %c0_133 = arith.constant 0 : index
    %c0_134 = arith.constant 0 : index
    %277 = vector.load %arg9[%c2_132, %c0_133, %c0_134] : memref<3x1x32xf32, #tpu.memory_space<vmem>>, vector<1x1x32xf32>
    %278 = vector.shape_cast %277 : vector<1x1x32xf32> to vector<1x32xf32>
    %279 = vector.broadcast %278 : vector<1x32xf32> to vector<64x32xf32>
    %280 = arith.mulf %276, %279 : vector<64x32xf32>
    %c2_135 = arith.constant 2 : index
    %c0_136 = arith.constant 0 : index
    %c0_137 = arith.constant 0 : index
    %281 = vector.load %arg10[%c2_135, %c0_136, %c0_137] : memref<3x1x32xf32, #tpu.memory_space<vmem>>, vector<1x1x32xf32>
    %282 = vector.shape_cast %281 : vector<1x1x32xf32> to vector<1x32xf32>
    %283 = vector.broadcast %282 : vector<1x32xf32> to vector<64x32xf32>
    %284 = arith.addf %280, %283 : vector<64x32xf32>
    %285 = arith.truncf %284 : vector<64x32xf32> to vector<64x32xbf16>
    %c2_138 = arith.constant 2 : index
    %c0_139 = arith.constant 0 : index
    %c0_140 = arith.constant 0 : index
    %286 = vector.load %arg11[%c2_138, %c0_139, %c0_140] : memref<3x32x64xbf16, #tpu.memory_space<vmem>>, vector<1x32x64xbf16>
    %287 = vector.shape_cast %286 : vector<1x32x64xbf16> to vector<32x64xbf16>
    %cst_141 = arith.constant dense<0.000000e+00> : vector<64x64xf32>
    %288 = tpu.matmul %285, %287, %cst_141 {dimension_numbers = #tpu.dot_dimension_numbers<[1], [0], [0], [1], [0, 0, 1, 1], [], []>} : vector<64x32xbf16>, vector<32x64xbf16>, vector<64x64xf32> -> vector<64x64xf32>
    %c2_142 = arith.constant 2 : index
    %c0_143 = arith.constant 0 : index
    %c0_144 = arith.constant 0 : index
    %289 = vector.load %arg12[%c2_142, %c0_143, %c0_144] : memref<3x1x64xf32, #tpu.memory_space<vmem>>, vector<1x1x64xf32>
    %290 = vector.shape_cast %289 : vector<1x1x64xf32> to vector<1x64xf32>
    %291 = vector.broadcast %290 : vector<1x64xf32> to vector<64x64xf32>
    %292 = arith.addf %288, %291 : vector<64x64xf32>
    %293 = arith.mulf %292, %292 : vector<64x64xf32>
    %294 = arith.mulf %292, %293 : vector<64x64xf32>
    %cst_145 = arith.constant 4.471500e-02 : f32
    %295 = vector.broadcast %cst_145 : f32 to vector<64x64xf32>
    %296 = arith.mulf %295, %294 : vector<64x64xf32>
    %297 = arith.addf %292, %296 : vector<64x64xf32>
    %cst_146 = arith.constant 0.797884583 : f32
    %298 = vector.broadcast %cst_146 : f32 to vector<64x64xf32>
    %299 = arith.mulf %298, %297 : vector<64x64xf32>
    %300 = math.tanh %299 : vector<64x64xf32>
    %cst_147 = arith.constant 1.000000e+00 : f32
    %301 = vector.broadcast %cst_147 : f32 to vector<64x64xf32>
    %302 = arith.addf %301, %300 : vector<64x64xf32>
    %cst_148 = arith.constant 5.000000e-01 : f32
    %303 = vector.broadcast %cst_148 : f32 to vector<64x64xf32>
    %304 = arith.mulf %303, %302 : vector<64x64xf32>
    %305 = arith.mulf %292, %304 : vector<64x64xf32>
    %306 = arith.truncf %305 : vector<64x64xf32> to vector<64x64xbf16>
    %c2_149 = arith.constant 2 : index
    %c0_150 = arith.constant 0 : index
    %c0_151 = arith.constant 0 : index
    %307 = vector.load %arg13[%c2_149, %c0_150, %c0_151] : memref<3x64x32xbf16, #tpu.memory_space<vmem>>, vector<1x64x32xbf16>
    %308 = vector.shape_cast %307 : vector<1x64x32xbf16> to vector<64x32xbf16>
    %cst_152 = arith.constant dense<0.000000e+00> : vector<64x32xf32>
    %309 = tpu.matmul %306, %308, %cst_152 {dimension_numbers = #tpu.dot_dimension_numbers<[1], [0], [0], [1], [0, 0, 1, 1], [], []>} : vector<64x64xbf16>, vector<64x32xbf16>, vector<64x32xf32> -> vector<64x32xf32>
    %c2_153 = arith.constant 2 : index
    %c0_154 = arith.constant 0 : index
    %c0_155 = arith.constant 0 : index
    %310 = vector.load %arg14[%c2_153, %c0_154, %c0_155] : memref<3x1x32xf32, #tpu.memory_space<vmem>>, vector<1x1x32xf32>
    %311 = vector.shape_cast %310 : vector<1x1x32xf32> to vector<1x32xf32>
    %312 = vector.broadcast %311 : vector<1x32xf32> to vector<64x32xf32>
    %313 = arith.addf %309, %312 : vector<64x32xf32>
    %314 = arith.addf %284, %313 : vector<64x32xf32>
    %c2_156 = arith.constant 2 : index
    %c0_157 = arith.constant 0 : index
    %c0_158 = arith.constant 0 : index
    %315 = vector.load %arg15[%c2_156, %c0_157, %c0_158] : memref<3x1x32xf32, #tpu.memory_space<vmem>>, vector<1x1x32xf32>
    %316 = vector.shape_cast %315 : vector<1x1x32xf32> to vector<1x32xf32>
    %317 = vector.broadcast %316 : vector<1x32xf32> to vector<64x32xf32>
    %318 = arith.mulf %314, %317 : vector<64x32xf32>
    %c2_159 = arith.constant 2 : index
    %c0_160 = arith.constant 0 : index
    %c0_161 = arith.constant 0 : index
    %319 = vector.load %arg16[%c2_159, %c0_160, %c0_161] : memref<3x1x32xf32, #tpu.memory_space<vmem>>, vector<1x1x32xf32>
    %320 = vector.shape_cast %319 : vector<1x1x32xf32> to vector<1x32xf32>
    %321 = vector.broadcast %320 : vector<1x32xf32> to vector<64x32xf32>
    %322 = arith.addf %318, %321 : vector<64x32xf32>
    %323 = vector.shape_cast %322 : vector<64x32xf32> to vector<8x8x32xf32>
    %c0_162 = arith.constant 0 : index
    %c0_163 = arith.constant 0 : index
    %c0_164 = arith.constant 0 : index
    %324 = vector.load %arg17[%c0_162, %c0_163, %c0_164] : memref<8x8x32xf32, #tpu.memory_space<vmem>>, vector<8x8x32xf32>
    tpu.vector_store %arg17[%c0_162, %c0_163, %c0_164], %323 {strides = array<i32>} : memref<8x8x32xf32, #tpu.memory_space<vmem>>, vector<8x8x32xf32>,
    return
  }
  func.func @transform_0(%arg0: i32) -> (i32, i32, i32) {
    %c0_i32 = arith.constant 0 : i32
    %c0_i32_0 = arith.constant 0 : i32
    %c0_i32_1 = arith.constant 0 : i32
    return %arg0, %c0_i32, %c0_i32_0 : i32, i32, i32
  }
  func.func @transform_1(%arg0: i32) -> (i32, i32) {
    %c0_i32 = arith.constant 0 : i32
    %c0_i32_0 = arith.constant 0 : i32
    %c0_i32_1 = arith.constant 0 : i32
    return %c0_i32, %c0_i32_0 : i32, i32
  }
  func.func @transform_2(%arg0: i32) -> (i32, i32) {
    %c0_i32 = arith.constant 0 : i32
    %c0_i32_0 = arith.constant 0 : i32
    %c0_i32_1 = arith.constant 0 : i32
    return %c0_i32, %c0_i32_0 : i32, i32
  }
  func.func @transform_3(%arg0: i32) -> (i32, i32) {
    %c0_i32 = arith.constant 0 : i32
    %c0_i32_0 = arith.constant 0 : i32
    %c0_i32_1 = arith.constant 0 : i32
    return %c0_i32, %c0_i32_0 : i32, i32
  }
  func.func @transform_4(%arg0: i32) -> (i32, i32, i32) {
    %c0_i32 = arith.constant 0 : i32
    %c0_i32_0 = arith.constant 0 : i32
    %c0_i32_1 = arith.constant 0 : i32
    %c0_i32_2 = arith.constant 0 : i32
    return %c0_i32, %c0_i32_0, %c0_i32_1 : i32, i32, i32
  }
  func.func @transform_5(%arg0: i32) -> (i32, i32, i32) {
    %c0_i32 = arith.constant 0 : i32
    %c0_i32_0 = arith.constant 0 : i32
    %c0_i32_1 = arith.constant 0 : i32
    %c0_i32_2 = arith.constant 0 : i32
    return %c0_i32, %c0_i32_0, %c0_i32_1 : i32, i32, i32
  }
  func.func @transform_6(%arg0: i32) -> (i32, i32, i32) {
    %c0_i32 = arith.constant 0 : i32
    %c0_i32_0 = arith.constant 0 : i32
    %c0_i32_1 = arith.constant 0 : i32
    %c0_i32_2 = arith.constant 0 : i32
    return %c0_i32, %c0_i32_0, %c0_i32_1 : i32, i32, i32
  }
  func.func @transform_7(%arg0: i32) -> (i32, i32, i32) {
    %c0_i32 = arith.constant 0 : i32
    %c0_i32_0 = arith.constant 0 : i32
    %c0_i32_1 = arith.constant 0 : i32
    %c0_i32_2 = arith.constant 0 : i32
    return %c0_i32, %c0_i32_0, %c0_i32_1 : i32, i32, i32
  }
  func.func @transform_8(%arg0: i32) -> (i32, i32, i32) {
    %c0_i32 = arith.constant 0 : i32
    %c0_i32_0 = arith.constant 0 : i32
    %c0_i32_1 = arith.constant 0 : i32
    %c0_i32_2 = arith.constant 0 : i32
    return %c0_i32, %c0_i32_0, %c0_i32_1 : i32, i32, i32
  }
  func.func @transform_9(%arg0: i32) -> (i32, i32, i32) {
    %c0_i32 = arith.constant 0 : i32
    %c0_i32_0 = arith.constant 0 : i32
    %c0_i32_1 = arith.constant 0 : i32
    %c0_i32_2 = arith.constant 0 : i32
    return %c0_i32, %c0_i32_0, %c0_i32_1 : i32, i32, i32
  }
  func.func @transform_10(%arg0: i32) -> (i32, i32, i32) {
    %c0_i32 = arith.constant 0 : i32
    %c0_i32_0 = arith.constant 0 : i32
    %c0_i32_1 = arith.constant 0 : i32
    %c0_i32_2 = arith.constant 0 : i32
    return %c0_i32, %c0_i32_0, %c0_i32_1 : i32, i32, i32
  }
  func.func @transform_11(%arg0: i32) -> (i32, i32, i32) {
    %c0_i32 = arith.constant 0 : i32
    %c0_i32_0 = arith.constant 0 : i32
    %c0_i32_1 = arith.constant 0 : i32
    %c0_i32_2 = arith.constant 0 : i32
    return %c0_i32, %c0_i32_0, %c0_i32_1 : i32, i32, i32
  }
  func.func @transform_12(%arg0: i32) -> (i32, i32, i32) {
    %c0_i32 = arith.constant 0 : i32
    %c0_i32_0 = arith.constant 0 : i32
    %c0_i32_1 = arith.constant 0 : i32
    %c0_i32_2 = arith.constant 0 : i32
    return %c0_i32, %c0_i32_0, %c0_i32_1 : i32, i32, i32
  }
  func.func @transform_13(%arg0: i32) -> (i32, i32, i32) {
    %c0_i32 = arith.constant 0 : i32
    %c0_i32_0 = arith.constant 0 : i32
    %c0_i32_1 = arith.constant 0 : i32
    %c0_i32_2 = arith.constant 0 : i32
    return %c0_i32, %c0_i32_0, %c0_i32_1 : i32, i32, i32
  }
  func.func @transform_14(%arg0: i32) -> (i32, i32, i32) {
    %c0_i32 = arith.constant 0 : i32
    %c0_i32_0 = arith.constant 0 : i32
    %c0_i32_1 = arith.constant 0 : i32
    %c0_i32_2 = arith.constant 0 : i32
    return %c0_i32, %c0_i32_0, %c0_i32_1 : i32, i32, i32
  }
  func.func @transform_15(%arg0: i32) -> (i32, i32, i32) {
    %c0_i32 = arith.constant 0 : i32
    %c0_i32_0 = arith.constant 0 : i32
    %c0_i32_1 = arith.constant 0 : i32
    %c0_i32_2 = arith.constant 0 : i32
    return %c0_i32, %c0_i32_0, %c0_i32_1 : i32, i32, i32
  }
  func.func @transform_16(%arg0: i32) -> (i32, i32, i32) {
    %c0_i32 = arith.constant 0 : i32
    %c0_i32_0 = arith.constant 0 : i32
    %c0_i32_1 = arith.constant 0 : i32
    return %arg0, %c0_i32, %c0_i32_0 : i32, i32, i32
  }
}

</mosaic_0001>

<bundles_post_ra>
// kernel: tpu_custom_call.1
= control target key start
LH: loop header
LB: loop body
LE: loop exit
PB: predicated region body
PF: predicated region fallthrough
CT: control target
= control target key end

     0   :  { %s20384_s0 = inlined_call_operand.vmem [shape: f32[8,8,8], index: 0, kind: input, shape index: {}]   ;;  %s20385_s1 = inlined_call_operand.hbm [shape: bf16[8,32], index: 1, kind: input, shape index: {}]   ;;  %s20386_s2 = inlined_call_operand.hbm [shape: f32[1,32], index: 2, kind: input, shape index: {}]   ;;  %s20387_s3 = inlined_call_operand.hbm [shape: f32[8,32], index: 3, kind: input, shape index: {}]   ;;  %s20388_s4 = inlined_call_operand.vmem [shape: bf16[3,32,96], index: 4, kind: input, shape index: {}]   ;;  %s20389_s5 = inlined_call_operand.hbm [shape: f32[3,1,96], index: 5, kind: input, shape index: {}]   ;;  %s20390_s6 = inlined_call_operand.hbm [shape: bf16[3,32,32], index: 6, kind: input, shape index: {}]   ;;  %s20391_s7 = inlined_call_operand.hbm [shape: f32[3,1,32], index: 7, kind: input, shape index: {}]   ;;  %s20392_s8 = inlined_call_operand.hbm [shape: f32[3,1,32], index: 8, kind: input, shape index: {}]   ;;  %s20393_s9 = inlined_call_operand.hbm [shape: f32[3,1,32], index: 9, kind: input, shape index: {}]   ;;  %s20394_s10 = inlined_call_operand.vmem [shape: bf16[3,32,64], index: 10, kind: input, shape index: {}]   ;;  %s20395_s11 = inlined_call_operand.vmem [shape: f32[3,1,64], index: 11, kind: input, shape index: {}]   ;;  %s20396_s12 = inlined_call_operand.vmem [shape: bf16[3,64,32], index: 12, kind: input, shape index: {}]   ;;  %s20397_s13 = inlined_call_operand.vmem [shape: f32[3,1,32], index: 13, kind: input, shape index: {}]   ;;  %s20398_s14 = inlined_call_operand.vmem [shape: f32[3,1,32], index: 14, kind: input, shape index: {}]   ;;  %s20399_s15 = inlined_call_operand.hbm [shape: f32[3,1,32], index: 15, kind: input, shape index: {}]   ;;  %s20400_s16 = inlined_call_operand.hbm [shape: f32[8,8,32], index: 16, kind: output, shape index: {}]  }
   0x1   :  { %20434 = sst [smem:[#allocation46_spill]] %s20384_s0 }
   0x2   :  { %21 = vsyncpa [#allocation4], 0 }
   0x3   :  { %22 = vsyncpa [#allocation7], 0 }
   0x4   :  { %23 = vsyncpa [#allocation10], 0 }
   0x5   :  { %24 = vsyncpa [#allocation13], 0 }
   0x6   :  { %25 = vsyncpa [#allocation16], 0 }
   0x7   :  { %26 = vsyncpa [#allocation5], 0  ;;  %s16574_s21 = smov [#allocation6]   ;;  %s16575_s23 = smov [#allocation9]  }
   0x8   :  { %s45_s22 = sshll.u32 %s16574_s21, 4  ;;  %s66_s24 = sshll.u32 %s16575_s23, 4  ;;  %s46_s22 = int_to_ptr.vmem [resolvable:$true] %s45_s22  ;;  %s67_s24 = int_to_ptr.vmem [resolvable:$true] %s66_s24 }
   0x9   :  { %s16370_s25 = scalar_lea.vmem %s46_s22, 16  ;;  %s16374_s26 = scalar_lea.vmem %s46_s22, 32 }
   0xa   :  { %p16371_p0 = scmp.ne.s32.totalorder %s46_s22, %s16370_s25  ;;  %p16375_p1 = scmp.lt.s32.totalorder %s46_s22, %s46_s22 }
   0xb   :  { %p16376_p2 = scmp.lt.s32.totalorder %s16374_s26, %s16370_s25 }
   0xd   :  { %p16377_p3 = por %p16376_p2, %p16375_p1 }
   0xf   :  { %p16378_p4 = pnand %p16377_p3, %p16371_p0 }
  0x11   :  { %16381 = shalt.err (!%p16378_p4)
}
  0x12   :  { %48 = dma.hbm_to_vmem [thread:$0]  %s20386_s2, 16, %s46_s22, [#allocation7]  }
  0x13   :  { %s16390_s29 = scalar_lea.vmem %s67_s24, 48  ;;  %s16394_s30 = scalar_lea.vmem %s67_s24, 64 }
  0x14   :  { %p16391_p5 = scmp.ne.s32.totalorder %s67_s24, %s16390_s29  ;;  %p16395_p6 = scmp.lt.s32.totalorder %s67_s24, %s67_s24 }
  0x15   :  { %p16396_p7 = scmp.lt.s32.totalorder %s16394_s30, %s16390_s29 }
  0x17   :  { %p16397_p8 = por %p16396_p7, %p16395_p6 }
  0x19   :  { %p16398_p9 = pnand %p16397_p8, %p16391_p5 }
  0x1b   :  { %16401 = shalt.err (!%p16398_p9)
}
  0x1c   :  { %s16576_s0 = smov 16   ;;  %s16577_s17 = smov 1  }
  0x1d   :  { %72 = dma.hbm_to_vmem [thread:$0]  %s20389_s5, 48, %s67_s24, [#allocation10], %s16576_s0, %s16576_s0, %s16577_s17  }
  0x1e   :  { %s16578_s20 = smov [#allocation12]   ;;  %s16579_s2 = smov [#allocation15]  }
  0x1f   :  { %s90_s21 = sshll.u32 %s16578_s20, 4  ;;  %s114_s22 = sshll.u32 %s16579_s2, 4  ;;  %s91_s21 = int_to_ptr.vmem [resolvable:$true] %s90_s21  ;;  %s115_s22 = int_to_ptr.vmem [resolvable:$true] %s114_s22 }
  0x20   :  { %s16410_s23 = scalar_lea.vmem %s91_s21, 48  ;;  %s16414_s25 = scalar_lea.vmem %s91_s21, 64 }
  0x21   :  { %p16411_p10 = scmp.ne.s32.totalorder %s91_s21, %s16410_s23  ;;  %p16415_p11 = scmp.lt.s32.totalorder %s91_s21, %s91_s21 }
  0x22   :  { %p16416_p12 = scmp.lt.s32.totalorder %s16414_s25, %s16410_s23 }
  0x24   :  { %p16417_p13 = por %p16416_p12, %p16415_p11 }
  0x26   :  { %p16418_p0 = pnand %p16417_p13, %p16411_p10 }
  0x28   :  { %16421 = shalt.err (!%p16418_p0)
}
  0x29   :  { %96 = dma.hbm_to_vmem [thread:$0]  %s20391_s7, 48, %s91_s21, [#allocation13], %s16576_s0, %s16576_s0, %s16577_s17  }
  0x2a   :  { %s16430_s5 = scalar_lea.vmem %s115_s22, 48  ;;  %s16434_s24 = scalar_lea.vmem %s115_s22, 64 }
  0x2b   :  { %p16431_p1 = scmp.ne.s32.totalorder %s115_s22, %s16430_s5  ;;  %p16435_p2 = scmp.lt.s32.totalorder %s115_s22, %s115_s22 }
  0x2c   :  { %p16436_p3 = scmp.lt.s32.totalorder %s16434_s24, %s16430_s5 }
  0x2e   :  { %p16437_p4 = por %p16436_p3, %p16435_p2 }
  0x30   :  { %p16438_p5 = pnand %p16437_p4, %p16431_p1 }
  0x32   :  { %16441 = shalt.err (!%p16438_p5)
}
  0x33   :  { %120 = dma.hbm_to_vmem [thread:$0]  %s20393_s9, 48, %s115_s22, [#allocation16], %s16576_s0, %s16576_s0, %s16577_s17  }
  0x34   :  { %s16580_s30 = smov [#allocation3]   ;;  %s16581_s19 = smov [#allocation8]  }
  0x35   :  { %s35_s18 = sshll.u32 %s16580_s30, 4  ;;  %s55_s20 = sshll.u32 %s16581_s19, 4  ;;  %s36_s18 = int_to_ptr.vmem [resolvable:$true] %s35_s18  ;;  %s56_s20 = int_to_ptr.vmem [resolvable:$true] %s55_s20 }
  0x36   :  { %s16450_s7 = scalar_lea.vmem %s36_s18, 64  ;;  %p16455_p7 = scmp.lt.s32.totalorder %s36_s18, %s36_s18 }
  0x37   :  { %p16451_p6 = scmp.ne.s32.totalorder %s36_s18, %s16450_s7  ;;  %p16456_p8 = scmp.lt.s32.totalorder %s16450_s7, %s16450_s7 }
  0x39   :  { %p16457_p9 = por %p16456_p8, %p16455_p7 }
  0x3b   :  { %p16458_p10 = pnand %p16457_p9, %p16451_p6 }
  0x3d   :  { %16461 = shalt.err (!%p16458_p10)
}
  0x3e   :  { %38 = dma.hbm_to_vmem [thread:$0]  %s20385_s1, 64, %s36_s18, [#allocation4]  }
  0x3f   :  { %s16470_s23 = scalar_lea.vmem %s56_s20, 128  ;;  %p16475_p12 = scmp.lt.s32.totalorder %s56_s20, %s56_s20 }
  0x40   :  { %p16471_p11 = scmp.ne.s32.totalorder %s56_s20, %s16470_s23  ;;  %p16476_p13 = scmp.lt.s32.totalorder %s16470_s23, %s16470_s23 }
  0x42   :  { %p16477_p0 = por %p16476_p13, %p16475_p12 }
  0x44   :  { %p16478_p1 = pnand %p16477_p0, %p16471_p11 }
  0x46   :  { %16481 = shalt.err (!%p16478_p1)
}
  0x47   :  { %58 = dma.hbm_to_vmem [thread:$0]  %s20387_s3, 128, %s56_s20, [#allocation7]  }
  0x48   :  { %s16582_s25 = smov [#allocation11]  }
  0x49   :  { %s78_s26 = sshll.u32 %s16582_s25, 4  ;;  %s79_s26 = int_to_ptr.vmem [resolvable:$true] %s78_s26 }
  0x4a   :  { %s16490_s27 = scalar_lea.vmem %s79_s26, 768  ;;  %p16495_p3 = scmp.lt.s32.totalorder %s79_s26, %s79_s26 }
  0x4b   :  { %p16491_p2 = scmp.ne.s32.totalorder %s79_s26, %s16490_s27  ;;  %p16496_p4 = scmp.lt.s32.totalorder %s16490_s27, %s16490_s27 }
  0x4d   :  { %p16497_p5 = por %p16496_p4, %p16495_p3 }
  0x4f   :  { %p16498_p6 = pnand %p16497_p5, %p16491_p2 }
  0x51   :  { %16501 = shalt.err (!%p16498_p6)
}
  0x52   :  { %s16583_s1 = smov 64   ;;  %s16584_s5 = smov 4  }
  0x53   :  { %84 = dma.hbm_to_vmem [thread:$0]  %s20390_s6, 768, %s79_s26, [#allocation10], %s16583_s1, %s16583_s1, %s16584_s5  }
  0x54   :  { %s16585_s29 = smov [#allocation14]   ;;  %s16586_s30 = smov [#allocation17]  }
  0x55   :  { %s102_s3 = sshll.u32 %s16585_s29, 4  ;;  %s136_s18 = sshll.u32 %s16586_s30, 4  ;;  %s103_s3 = int_to_ptr.vmem [resolvable:$true] %s102_s3  ;;  %s137_s18 = int_to_ptr.vmem [resolvable:$true] %s136_s18 }
  0x56   :  { %s16510_s19 = scalar_lea.vmem %s103_s3, 48  ;;  %s16514_s20 = scalar_lea.vmem %s103_s3, 64 }
  0x57   :  { %p16511_p7 = scmp.ne.s32.totalorder %s103_s3, %s16510_s19  ;;  %p16515_p8 = scmp.lt.s32.totalorder %s103_s3, %s103_s3 }
  0x58   :  { %p16516_p9 = scmp.lt.s32.totalorder %s16514_s20, %s16510_s19 }
  0x5a   :  { %p16517_p10 = por %p16516_p9, %p16515_p8 }
  0x5c   :  { %p16518_p11 = pnand %p16517_p10, %p16511_p7 }
  0x5e   :  { %16521 = shalt.err (!%p16518_p11)
}
  0x5f   :  { %108 = dma.hbm_to_vmem [thread:$0]  %s20392_s8, 48, %s103_s3, [#allocation13], %s16576_s0, %s16576_s0, %s16577_s17  }
  0x60   :  { %s16530_s6 = scalar_lea.vmem %s137_s18, 48  ;;  %s16534_s2 = scalar_lea.vmem %s137_s18, 64 }
  0x61   :  { %p16531_p12 = scmp.ne.s32.totalorder %s137_s18, %s16530_s6  ;;  %p16535_p13 = scmp.lt.s32.totalorder %s137_s18, %s137_s18 }
  0x62   :  { %p16536_p0 = scmp.lt.s32.totalorder %s16534_s2, %s16530_s6 }
  0x64   :  { %p16537_p1 = por %p16536_p0, %p16535_p13 }
  0x66   :  { %p16538_p2 = pnand %p16537_p1, %p16531_p12 }
  0x68   :  { %16541 = shalt.err (!%p16538_p2)
}
  0x69   :  { %142 = dma.hbm_to_vmem [thread:$0]  %s20399_s15, 48, %s137_s18, [#allocation16], %s16576_s0, %s16576_s0, %s16577_s17  }
  0x6a   :  { %16562 = dma.done.wait [#allocation4], 64  }
  0x6b   :  { %16563 = vsyncadd [#allocation4], 4294967232 }
  0x6c   :  { %16564 = dma.done.wait [#allocation7], 144  }
  0x6d   :  { %16565 = vsyncadd [#allocation7], 4294967152 }
  0x6e   :  { %16566 = dma.done.wait [#allocation10], 816  }
  0x6f   :  { %16567 = vsyncadd [#allocation10], 4294966480 }
  0x70   :  { %16568 = dma.done.wait [#allocation13], 96  }
  0x71   :  { %16569 = vsyncadd [#allocation13], 4294967200 }
  0x72   :  { %16570 = dma.done.wait [#allocation16], 96  }
  0x73   :  { %16571 = vsyncadd [#allocation16], 4294967200  ;;  %vm204_vm0 = vcmask 1043456   ;;  %v183_v0 = vld [vmem:[#allocation3] sm:$0xf]  ;;  %s20435_s25 = sld [smem:[#allocation46_spill]] }
  0x74   :  { %vm191_vm1 = vcmask 64512   ;;  %15515 = vmatprep.subr.msk.bf16.mxu0 %vm204_vm0, %v183_v0  ;;  %v206_v3 = vsel %vm204_vm0, %v183_v0, 0  ;;  %15516 = vmatprep.subr.msk.bf16.mxu1 %vm204_vm0, %v183_v0  ;;  %v15900_v14 = vld [vmem:[%s20388_s4 + $0x8] sm:$0xff]   ;;  %v15901_v15 = vld [vmem:[%s20388_s4] sm:$0xff]   ;;  %vm309_vm2 = vcmask 261120   ;;  %v20402_v53 = vmov 0.0  }
  0x75   :  { %14196 = vmatpush3.bf16.msra.mxu0 %v206_v3  ;;  %15514 = vmatpush3.bf16.msra.mxu1 %v206_v3  ;;  %v13391_v19 = vld [vmem:[#allocation6] ss:$0 sm:$0xff]  ;;  %v273_v28 = vld [vmem:[#allocation8] sm:$0xff]  ;;  %v13396_v48 = vld [vmem:[#allocation9] ss:$0 sm:$0xff]  ;;  %s16588_s9 = smov 120  }
  0x76   :  { %14205 = vmatprep.subr.bf16.mxu1 %v15900_v14  ;;  %14217 = vmatprep.subr.bf16.mxu0 %v20402_v53  ;;  %vm16589_vm3 = vmmov 0   ;;  %s16590_s8 = smov 96   ;;  %s16591_s22 = smov 112   ;;  %vm4123_vm4 = vcmask 130048   ;;  %vm4132_vm5 = vcmask 195584   ;;  %vm4510_vm6 = vcmask 523264  }
  0x77   :  { %s16593_s26 = smov 8   ;;  %s16594_s27 = smov 24  }
  0x79   :  { %v171_v1 = vld [vmem:[%s20435_s25] sm:$0xff]  ;;  %v172_v2 = vld [vmem:[%s20435_s25 + $0x8] sm:$0xff]  ;;  %v173_v5 = vld [vmem:[%s20435_s25 + $0x10] sm:$0xff] }
  0x7a   :  { %v179_v4 = vpack.c.bf16 %v172_v2, %v171_v1  ;;  %v174_v6 = vld [vmem:[%s20435_s25 + $0x18] sm:$0xff]  ;;  %v175_v7 = vld [vmem:[%s20435_s25 + $0x20] sm:$0xff]  ;;  %v176_v9 = vld [vmem:[%s20435_s25 + $0x28] sm:$0xff] }
  0x7b   :  { %v180_v8 = vpack.c.bf16 %v174_v6, %v173_v5  ;;  %v177_v10 = vld [vmem:[%s20435_s25 + $0x30] sm:$0xff]  ;;  %v178_v11 = vld [vmem:[%s20435_s25 + $0x38] sm:$0xff]  ;;  %v181_v12 = vpack.c.bf16 %v176_v9, %v175_v7  ;;  %s16592_s25 = smov 104  }
  0x7c   :  { %14197 = vmatprep.mubr.msk.bf16.mxu0 %vm191_vm1, %v179_v4  ;;  %v182_v13 = vpack.c.bf16 %v178_v11, %v177_v10 }
  0x7d   :  { %14198 = vmatmul.mubr.msk.bf16.vlgmr.msra.gmra.mxu0 %vm191_vm1, %v180_v8  ;;  %14201 = vmatprep.mubr.msk.bf16.mxu1 %vm191_vm1, %v181_v12 }
  0x7e   :  { %14202 = vmatmul.mubr.msk.bf16.vlgmr.msra.gmra.mxu1 %vm191_vm1, %v182_v13  ;;  %14219 = vmatprep.mubr.msk.bf16.mxu0 %vm16589_vm3, %v20402_v53 }
  0x7f   :  { %14206 = vmatpush3.bf16.msra.mxu1 %v15900_v14 }
  0x80   :  { %14207 = vmatprep.subr.bf16.mxu1 %v15901_v15 }
  0x83   :  { %14208 = vmatpush3.bf16.msra.mxu1 %v15901_v15 }
  0x84   :  { %14223 = vmatprep.subr.bf16.mxu1 %v20402_v53 }
 0x13d   :  { %v14199_v16 = vpop.f32.mrf.mxu0 }
 0x13e   :  { %v14203_v17 = vpop.f32.mrf.mxu1  ;;  %v251_v26 = vadd.f32 %v14199_v16, %v13391_v19 }
 0x13f   :  { %v242_v18 = vpop.f32.mrf.mxu0  ;;  %v267_v37 = vadd.f32 %v14203_v17, %v13391_v19 }
 0x140   :  { %v258_v20 = vpop.f32.mrf.mxu1  ;;  %v243_v23 = vadd.f32 %v13391_v19, %v242_v18  ;;  %v16771_v36 = vadd.f32 %v273_v28, %v251_v26 }
 0x141   :  { %v14200_v21 = vpop.f32.mrf.mxu0  ;;  %v259_v22 = vadd.f32 %v13391_v19, %v258_v20  ;;  %v16782_v43 = vadd.f32 %v273_v28, %v267_v37 }
 0x142   :  { %v254_v24 = vadd.f32 %v14200_v21, %v13391_v19  ;;  %v14204_v25 = vpop.f32.mrf.mxu1  ;;  %v16767_v34 = vadd.f32 %v273_v28, %v243_v23  ;;  %20440 = vst [vmem:[#allocation29_spill] sm:$0xff] %v16771_v36 }
 0x143   :  { %v245_v27 = vpop.f32.mrf.mxu0  ;;  %v16765_v32 = vadd.f32 %v273_v28, %v259_v22  ;;  %v270_v38 = vadd.f32 %v14204_v25, %v13391_v19  ;;  %20442 = vst [vmem:[#allocation31_spill] sm:$0xff] %v16782_v43 }
 0x144   :  { %v246_v29 = vadd.f32 %v13391_v19, %v245_v27  ;;  %v261_v30 = vpop.f32.mrf.mxu1  ;;  %v16763_v31 = vadd.f32 %v273_v28, %v254_v24  ;;  %20438 = vst [vmem:[#allocation27_spill] sm:$0xff] %v16767_v34 }
 0x145   :  { %20437 = vst [vmem:[#allocation26_spill] sm:$0xff] %v16765_v32  ;;  %v262_v33 = vadd.f32 %v13391_v19, %v261_v30  ;;  %v16784_v44 = vadd.f32 %v273_v28, %v270_v38 }
 0x146   :  { %20436 = vst [vmem:[#allocation25_spill] sm:$0xff] %v16763_v31  ;;  %v16769_v35 = vadd.f32 %v273_v28, %v246_v29  ;;  %v283_v41 = vpack.c.bf16 %v16763_v31, %v16771_v36 }
 0x147   :  { %v16773_v39 = vadd.f32 %v273_v28, %v262_v33  ;;  %20443 = vst [vmem:[#allocation32_spill] sm:$0xff] %v16784_v44  ;;  %v285_v45 = vpack.c.bf16 %v16784_v44, %v16782_v43 }
 0x148   :  { %20439 = vst [vmem:[#allocation28_spill] sm:$0xff] %v16769_v35  ;;  %v282_v40 = vpack.c.bf16 %v16769_v35, %v16767_v34 }
 0x149   :  { %20441 = vst [vmem:[#allocation30_spill] sm:$0xff] %v16773_v39  ;;  %v284_v42 = vpack.c.bf16 %v16773_v39, %v16765_v32 }
 0x14a   :  { %14209 = vmatprep.mubr.msk.bf16.mxu1 %vm309_vm2, %v282_v40 }
 0x14b   :  { %14210 = vmatmul.mubr.msk.bf16.vlgmr.msra.gmra.mxu1 %vm309_vm2, %v283_v41 }
 0x14c   :  { %14213 = vmatprep.mubr.msk.bf16.mxu1 %vm309_vm2, %v284_v42 }
 0x153   :  { %14214 = vmatmul.mubr.msk.bf16.gmra.mxu1 %vm309_vm2, %v285_v45 }
 0x154   :  { %14225 = vmatprep.mubr.msk.bf16.mxu1 %vm16589_vm3, %v20402_v53 }
 0x20b   :  { %v14211_v46 = vpop.f32.mrf.mxu1 }
 0x20c   :  { %v365_v51 = vadd.f32 %v14211_v46, %v13396_v48 }
 0x20d   :  { %v356_v47 = vpop.f32.mrf.mxu1 }
 0x20e   :  { %v357_v54 = vadd.f32 %v13396_v48, %v356_v47  ;;  %v16823_v7 = vpack.c.bf16 %v365_v51, %v365_v51 }
 0x20f   :  { %v14212_v49 = vpop.f32.mrf.mxu1 }
 0x210   :  { %v368_v50 = vadd.f32 %v14212_v49, %v13396_v48  ;;  %v16806_v4 = vpack.c.bf16 %v357_v54, %v357_v54 }
 0x211   :  { %v359_v52 = vpop.f32.mrf.mxu1 }
 0x212   :  { %v360_v55 = vadd.f32 %v13396_v48, %v359_v52  ;;  %v16793_v57 = vpack.i.bf16 %v368_v50, %v365_v51  ;;  %v16817_v6 = vpack.c.bf16 %v368_v50, %v368_v50 }
 0x213   :  { %v14215_v56 = vpop.f32.mrf.mxu1 }
 0x214   :  { %v15540_v58 = vpack.i.bf16 %v360_v55, %v357_v54  ;;  %v381_v62 = vadd.f32 %v14215_v56, %v13396_v48  ;;  %v16815_v5 = vpack.c.bf16 %v360_v55, %v360_v55 }
 0x215   :  { %v372_v59 = vpop.f32.mrf.mxu1 }
 0x216   :  { %15541 = vrot.lane.b32.xlu0 %v15540_v58, %s16588_s9  ;;  %v373_v61 = vadd.f32 %v13396_v48, %v372_v59  ;;  %v16843_v11 = vpack.c.bf16 %v381_v62, %v381_v62 }
 0x217   :  { %v14216_v60 = vpop.f32.mrf.mxu1 }
 0x218   :  { %v384_v63 = vadd.f32 %v14216_v60, %v13396_v48  ;;  %v16825_v8 = vpack.c.bf16 %v373_v61, %v373_v61 }
 0x219   :  { %v375_v0 = vpop.f32.mrf.mxu1 }
 0x21a   :  { %v376_v1 = vadd.f32 %v13396_v48, %v375_v0  ;;  %15546 = vrot.lane.b32.xlu0 %v16793_v57, %s16588_s9  ;;  %v16802_v2 = vpack.i.bf16 %v384_v63, %v381_v62  ;;  %v16837_v10 = vpack.c.bf16 %v384_v63, %v384_v63 }
 0x21c   :  { %v16804_v3 = vpack.i.bf16 %v376_v1, %v373_v61  ;;  %v16835_v9 = vpack.c.bf16 %v376_v1, %v376_v1 }
 0x21e   :  { %15551 = vrot.lane.b32.xlu1 %v16804_v3, %s16588_s9  ;;  %500 = vrot.lane.b32.xlu0 %v16806_v4, %s16590_s8 }
 0x222   :  { %15556 = vrot.lane.b32.xlu1 %v16802_v2, %s16588_s9  ;;  %15561 = vrot.lane.b32.xlu0 %v15540_v58, %s16591_s22 }
 0x226   :  { %549 = vrot.lane.b32.xlu1 %v16815_v5, %s16590_s8  ;;  %647 = vrot.lane.b32.xlu0 %v16817_v6, %s16590_s8 }
 0x22a   :  { %598 = vrot.lane.b32.xlu1 %v16823_v7, %s16590_s8  ;;  %696 = vrot.lane.b32.xlu0 %v16825_v8, %s16590_s8 }
 0x22e   :  { %15566 = vrot.lane.b32.xlu1 %v16793_v57, %s16591_s22  ;;  %15571 = vrot.lane.b32.xlu0 %v16804_v3, %s16591_s22 }
 0x232   :  { %745 = vrot.lane.b32.xlu1 %v16835_v9, %s16590_s8  ;;  %843 = vrot.lane.b32.xlu0 %v16837_v10, %s16590_s8 }
 0x236   :  { %794 = vrot.lane.b32.xlu1 %v16843_v11, %s16590_s8 }
 0x23a   :  { %15576 = vrot.lane.b32.xlu1 %v16802_v2, %s16591_s22 }
 0x288   :  { %v15542_v12 = vpop.permute.xlu0 %15541 }
 0x289   :  { %v15544_v13 = vunpack.i.h.bf16 %v15542_v12  ;;  %v15543_v14 = vunpack.i.l.bf16 %v15542_v12 }
 0x28b   :  { %v16849_v15 = vpack.c.bf16 %v15544_v13, %v15544_v13  ;;  %v16851_v16 = vpack.c.bf16 %v15543_v14, %v15543_v14 }
 0x28c   :  { %v15547_v17 = vpop.permute.xlu0 %15546 }
 0x28d   :  { %v15548_v18 = vunpack.i.l.bf16 %v15547_v17  ;;  %941 = vrot.lane.b32.xlu1 %v16849_v15, %s16590_s8  ;;  %892 = vrot.lane.b32.xlu0 %v16851_v16, %s16590_s8  ;;  %v15549_v19 = vunpack.i.h.bf16 %v15547_v17 }
 0x28f   :  { %v16857_v20 = vpack.c.bf16 %v15548_v18, %v15548_v18  ;;  %v16863_v26 = vpack.c.bf16 %v15549_v19, %v15549_v19 }
 0x290   :  { %v15552_v21 = vpop.permute.xlu1 %15551  ;;  %v501_v22 = vpop.permute.xlu0 %500 }
 0x291   :  { %v15554_v23 = vunpack.i.h.bf16 %v15552_v21  ;;  %v15553_v24 = vunpack.i.l.bf16 %v15552_v21  ;;  %v506_v25 = vsel %vm191_vm1, %v501_v22, 0  ;;  %990 = vrot.lane.b32.xlu1 %v16857_v20, %s16590_s8  ;;  %15581 = vrot.lane.b32.xlu0 %v15540_v58, %s16592_s25 }
 0x292   :  { %14218 = vmatpush3.bf16.xpose.msra.mxu0 %v506_v25 }
 0x293   :  { %14229 = vmatprep.subr.bf16.mxu0 %v20402_v53  ;;  %v16870_v30 = vpack.c.bf16 %v15554_v23, %v15554_v23  ;;  %v16872_v33 = vpack.c.bf16 %v15553_v24, %v15553_v24 }
 0x294   :  { %v15557_v27 = vpop.permute.xlu1 %15556  ;;  %v15562_v28 = vpop.permute.xlu0 %15561 }
 0x295   :  { %v15558_v29 = vunpack.i.l.bf16 %v15557_v27  ;;  %15586 = vrot.lane.b32.xlu1 %v16793_v57, %s16592_s25  ;;  %1039 = vrot.lane.b32.xlu0 %v16863_v26, %s16590_s8  ;;  %v15559_v42 = vunpack.i.h.bf16 %v15557_v27  ;;  %v15564_v48 = vunpack.i.h.bf16 %v15562_v28  ;;  %v15563_v49 = vunpack.i.l.bf16 %v15562_v28 }
 0x297   :  { %v16879_v41 = vpack.c.bf16 %v15558_v29, %v15558_v29  ;;  %v16892_v51 = vpack.c.bf16 %v15559_v42, %v15559_v42  ;;  %v16901_v55 = vpack.c.bf16 %v15564_v48, %v15564_v48  ;;  %v16906_v59 = vpack.c.bf16 %v15563_v49, %v15563_v49 }
 0x298   :  { %v550_v37 = vpop.permute.xlu1 %549  ;;  %v648_v38 = vpop.permute.xlu0 %647 }
 0x299   :  { %v555_v40 = vsel %vm191_vm1, %v550_v37, 0  ;;  %1137 = vrot.lane.b32.xlu1 %v16870_v30, %s16590_s8  ;;  %1088 = vrot.lane.b32.xlu0 %v16872_v33, %s16590_s8  ;;  %v653_v52 = vsel %vm191_vm1, %v648_v38, 0 }
 0x29a   :  { %14220 = vmatmul.mubr.msk.bf16.vlgmr.msra.gmra.mxu0 %vm191_vm1, %v16806_v4  ;;  %14224 = vmatpush3.bf16.xpose.msra.mxu1 %v555_v40 }
 0x29b   :  { %14235 = vmatprep.subr.bf16.mxu1 %v20402_v53  ;;  %14231 = vmatprep.mubr.msk.bf16.mxu0 %vm16589_vm3, %v20402_v53 }
 0x29c   :  { %v599_v45 = vpop.permute.xlu1 %598  ;;  %v697_v47 = vpop.permute.xlu0 %696 }
 0x29d   :  { %v604_v46 = vsel %vm191_vm1, %v599_v45, 0  ;;  %1186 = vrot.lane.b32.xlu1 %v16879_v41, %s16590_s8  ;;  %15591 = vrot.lane.b32.xlu0 %v16804_v3, %s16592_s25  ;;  %v702_v60 = vsel %vm191_vm1, %v697_v47, 0 }
 0x29e   :  { %14230 = vmatpush3.bf16.xpose.msra.mxu0 %v604_v46 }
 0x29f   :  { %14241 = vmatprep.subr.bf16.mxu0 %v20402_v53 }
 0x2a0   :  { %v15567_v50 = vpop.permute.xlu1 %15566  ;;  %v15572_v57 = vpop.permute.xlu0 %15571 }
 0x2a1   :  { %14226 = vmatmul.mubr.msk.bf16.vlgmr.msra.gmra.mxu1 %vm191_vm1, %v16815_v5  ;;  %15596 = vrot.lane.b32.xlu1 %v16802_v2, %s16592_s25  ;;  %v15569_v54 = vunpack.i.h.bf16 %v15567_v50  ;;  %v15568_v56 = vunpack.i.l.bf16 %v15567_v50  ;;  %v15574_v61 = vunpack.i.h.bf16 %v15572_v57  ;;  %v15573_v63 = vunpack.i.l.bf16 %v15572_v57 }
 0x2a2   :  { %1235 = vrot.lane.b32.xlu0 %v16892_v51, %s16590_s8  ;;  %14236 = vmatpush3.bf16.xpose.msra.mxu1 %v653_v52 }
 0x2a3   :  { %14237 = vmatprep.mubr.msk.bf16.mxu1 %vm16589_vm3, %v20402_v53  ;;  %14247 = vmatprep.subr.bf16.mxu1 %v20402_v53  ;;  %v16915_v62 = vpack.c.bf16 %v15569_v54, %v15569_v54  ;;  %v16920_v1 = vpack.c.bf16 %v15568_v56, %v15568_v56  ;;  %v16929_v3 = vpack.c.bf16 %v15574_v61, %v15574_v61 }
 0x2a4   :  { %v746_v58 = vpop.permute.xlu1 %745  ;;  %v16934_v13 = vpack.c.bf16 %v15573_v63, %v15573_v63  ;;  %v844_v19 = vpop.permute.xlu0 %843 }
 0x2a5   :  { %14232 = vmatmul.mubr.msk.bf16.vlgmr.msra.gmra.mxu0 %vm191_vm1, %v16823_v7  ;;  %1333 = vrot.lane.b32.xlu1 %v16901_v55, %s16590_s8  ;;  %v751_v2 = vsel %vm191_vm1, %v746_v58, 0  ;;  %v849_v23 = vsel %vm191_vm1, %v844_v19, 0 }
 0x2a6   :  { %1284 = vrot.lane.b32.xlu0 %v16906_v59, %s16590_s8  ;;  %14242 = vmatpush3.bf16.xpose.msra.mxu0 %v702_v60 }
 0x2a7   :  { %14243 = vmatprep.mubr.msk.bf16.mxu0 %vm16589_vm3, %v20402_v53  ;;  %14253 = vmatprep.subr.bf16.mxu0 %v20402_v53 }
 0x2a8   :  { %v795_v0 = vpop.permute.xlu1 %794 }
 0x2a9   :  { %14238 = vmatmul.mubr.msk.bf16.vlgmr.msra.gmra.mxu1 %vm191_vm1, %v16817_v6  ;;  %1431 = vrot.lane.b32.xlu1 %v16915_v62, %s16590_s8  ;;  %v800_v14 = vsel %vm191_vm1, %v795_v0, 0 }
 0x2aa   :  { %1382 = vrot.lane.b32.xlu0 %v16920_v1, %s16590_s8  ;;  %14248 = vmatpush3.bf16.xpose.msra.mxu1 %v751_v2 }
 0x2ab   :  { %14249 = vmatprep.mubr.msk.bf16.mxu1 %vm16589_vm3, %v20402_v53  ;;  %14259 = vmatprep.subr.bf16.mxu1 %v20402_v53 }
 0x2ac   :  { %v15577_v12 = vpop.permute.xlu1 %15576 }
 0x2ad   :  { %v15579_v17 = vunpack.i.h.bf16 %v15577_v12  ;;  %v15578_v18 = vunpack.i.l.bf16 %v15577_v12  ;;  %14244 = vmatmul.mubr.msk.bf16.vlgmr.msra.gmra.mxu0 %vm191_vm1, %v16825_v8  ;;  %1529 = vrot.lane.b32.xlu1 %v16929_v3, %s16590_s8 }
 0x2ae   :  { %1480 = vrot.lane.b32.xlu0 %v16934_v13, %s16590_s8  ;;  %14254 = vmatpush3.bf16.xpose.msra.mxu0 %v800_v14 }
 0x2af   :  { %v16943_v21 = vpack.c.bf16 %v15579_v17, %v15579_v17  ;;  %v16945_v22 = vpack.c.bf16 %v15578_v18, %v15578_v18  ;;  %14255 = vmatprep.mubr.msk.bf16.mxu0 %vm16589_vm3, %v20402_v53  ;;  %14265 = vmatprep.subr.bf16.mxu0 %v20402_v53 }
 0x2b1   :  { %14250 = vmatmul.mubr.msk.bf16.vlgmr.msra.gmra.mxu1 %vm191_vm1, %v16835_v9  ;;  %1627 = vrot.lane.b32.xlu1 %v16943_v21, %s16590_s8 }
 0x2b2   :  { %1578 = vrot.lane.b32.xlu0 %v16945_v22, %s16590_s8  ;;  %14260 = vmatpush3.bf16.xpose.msra.mxu1 %v849_v23 }
 0x2b3   :  { %14261 = vmatprep.mubr.msk.bf16.mxu1 %vm16589_vm3, %v20402_v53  ;;  %14271 = vmatprep.subr.bf16.mxu1 %v20402_v53 }
 0x2b5   :  { %14256 = vmatmul.mubr.msk.bf16.vlgmr.msra.gmra.mxu0 %vm191_vm1, %v16843_v11 }
 0x2b6   :  { %14267 = vmatprep.mubr.msk.bf16.mxu0 %vm16589_vm3, %v20402_v53 }
 0x2b9   :  { %14262 = vmatmul.mubr.msk.bf16.vlgmr.msra.gmra.mxu1 %vm191_vm1, %v16837_v10 }
 0x2ba   :  { %14273 = vmatprep.mubr.msk.bf16.mxu1 %vm16589_vm3, %v20402_v53 }
 0x2ff   :  { %v942_v24 = vpop.permute.xlu1 %941  ;;  %v893_v25 = vpop.permute.xlu0 %892 }
 0x300   :  { %v947_v27 = vsel %vm191_vm1, %v942_v24, 0  ;;  %v898_v28 = vsel %vm191_vm1, %v893_v25, 0 }
 0x301   :  { %14266 = vmatpush3.bf16.xpose.msra.mxu0 %v898_v28  ;;  %14272 = vmatpush3.bf16.xpose.msra.mxu1 %v947_v27 }
 0x302   :  { %14277 = vmatprep.subr.bf16.mxu0 %v20402_v53  ;;  %14283 = vmatprep.subr.bf16.mxu1 %v20402_v53 }
 0x303   :  { %v991_v29 = vpop.permute.xlu1 %990  ;;  %v15582_v37 = vpop.permute.xlu0 %15581 }
 0x304   :  { %v15584_v38 = vunpack.i.h.bf16 %v15582_v37  ;;  %v15583_v40 = vunpack.i.l.bf16 %v15582_v37  ;;  %v996_v52 = vsel %vm191_vm1, %v991_v29, 0 }
 0x306   :  { %v16972_v42 = vpack.c.bf16 %v15584_v38, %v15584_v38  ;;  %v16974_v45 = vpack.c.bf16 %v15583_v40, %v15583_v40 }
 0x307   :  { %v15587_v46 = vpop.permute.xlu1 %15586  ;;  %v1040_v47 = vpop.permute.xlu0 %1039 }
 0x308   :  { %v15589_v48 = vunpack.i.h.bf16 %v15587_v46  ;;  %v15588_v49 = vunpack.i.l.bf16 %v15587_v46  ;;  %v1045_v50 = vsel %vm191_vm1, %v1040_v47, 0  ;;  %14268 = vmatmul.mubr.msk.bf16.vlgmr.msra.gmra.mxu0 %vm191_vm1, %v16851_v16  ;;  %14274 = vmatmul.mubr.msk.bf16.vlgmr.msra.gmra.mxu1 %vm191_vm1, %v16849_v15 }
 0x309   :  { %1725 = vrot.lane.b32.xlu1 %v16972_v42, %s16590_s8  ;;  %1676 = vrot.lane.b32.xlu0 %v16974_v45, %s16590_s8 }
 0x30a   :  { %14278 = vmatpush3.bf16.xpose.msra.mxu0 %v996_v52  ;;  %14284 = vmatpush3.bf16.xpose.msra.mxu1 %v1045_v50  ;;  %v16986_v54 = vpack.c.bf16 %v15589_v48, %v15589_v48  ;;  %v16988_v56 = vpack.c.bf16 %v15588_v49, %v15588_v49 }
 0x30b   :  { %v1138_v57 = vpop.permute.xlu1 %1137  ;;  %v1089_v58 = vpop.permute.xlu0 %1088  ;;  %14279 = vmatprep.mubr.msk.bf16.mxu0 %vm16589_vm3, %v20402_v53  ;;  %14285 = vmatprep.mubr.msk.bf16.mxu1 %vm16589_vm3, %v20402_v53 }
 0x30c   :  { %14289 = vmatprep.subr.bf16.mxu0 %v20402_v53  ;;  %14295 = vmatprep.subr.bf16.mxu1 %v20402_v53  ;;  %v1143_v60 = vsel %vm191_vm1, %v1138_v57, 0  ;;  %v1094_v61 = vsel %vm191_vm1, %v1089_v58, 0 }
 0x30d   :  { %1823 = vrot.lane.b32.xlu1 %v16986_v54, %s16590_s8  ;;  %1774 = vrot.lane.b32.xlu0 %v16988_v56, %s16590_s8 }
 0x30f   :  { %v1187_v63 = vpop.permute.xlu1 %1186  ;;  %v15592_v0 = vpop.permute.xlu0 %15591 }
 0x310   :  { %v15594_v2 = vunpack.i.h.bf16 %v15592_v0  ;;  %v15593_v12 = vunpack.i.l.bf16 %v15592_v0  ;;  %v1192_v28 = vsel %vm191_vm1, %v1187_v63, 0 }
 0x311   :  { %14280 = vmatmul.mubr.msk.bf16.vlgmr.msra.gmra.mxu0 %vm191_vm1, %v16857_v20  ;;  %14286 = vmatmul.mubr.msk.bf16.vlgmr.msra.gmra.mxu1 %vm191_vm1, %v16863_v26 }
 0x312   :  { %14290 = vmatpush3.bf16.xpose.msra.mxu0 %v1094_v61  ;;  %14296 = vmatpush3.bf16.xpose.msra.mxu1 %v1143_v60  ;;  %v17006_v14 = vpack.c.bf16 %v15594_v2, %v15594_v2  ;;  %v17008_v17 = vpack.c.bf16 %v15593_v12, %v15593_v12 }
 0x313   :  { %v15597_v18 = vpop.permute.xlu1 %15596  ;;  %14291 = vmatprep.mubr.msk.bf16.mxu0 %vm16589_vm3, %v20402_v53  ;;  %14297 = vmatprep.mubr.msk.bf16.mxu1 %vm16589_vm3, %v20402_v53 }
 0x314   :  { %v15599_v19 = vunpack.i.h.bf16 %v15597_v18  ;;  %v15598_v23 = vunpack.i.l.bf16 %v15597_v18  ;;  %1921 = vrot.lane.b32.xlu1 %v17006_v14, %s16590_s8  ;;  %1872 = vrot.lane.b32.xlu0 %v17008_v17, %s16590_s8  ;;  %v1236_v24 = vpop.permute.xlu0 %1235 }
 0x315   :  { %14301 = vmatprep.subr.bf16.mxu0 %v20402_v53  ;;  %14307 = vmatprep.subr.bf16.mxu1 %v20402_v53  ;;  %v1241_v29 = vsel %vm191_vm1, %v1236_v24, 0 }
 0x316   :  { %v17020_v25 = vpack.c.bf16 %v15599_v19, %v15599_v19  ;;  %v17022_v27 = vpack.c.bf16 %v15598_v23, %v15598_v23 }
 0x317   :  { %v1334_v37 = vpop.permute.xlu1 %1333 }
 0x318   :  { %20444 = vst [vmem:[#allocation33_spill] sm:$0xff] %v17020_v25  ;;  %20445 = vst [vmem:[#allocation34_spill] sm:$0xff] %v17022_v27  ;;  %2019 = vrot.lane.b32.xlu1 %v17020_v25, %s16590_s8  ;;  %1970 = vrot.lane.b32.xlu0 %v17022_v27, %s16590_s8  ;;  %v1285_v38 = vpop.permute.xlu0 %1284  ;;  %v1339_v40 = vsel %vm191_vm1, %v1334_v37, 0 }
 0x319   :  { %14292 = vmatmul.mubr.msk.bf16.vlgmr.msra.gmra.mxu0 %vm191_vm1, %v16872_v33  ;;  %14298 = vmatmul.mubr.msk.bf16.vlgmr.msra.gmra.mxu1 %vm191_vm1, %v16870_v30  ;;  %v1290_v46 = vsel %vm191_vm1, %v1285_v38, 0 }
 0x31a   :  { %14302 = vmatpush3.bf16.xpose.msra.mxu0 %v1192_v28  ;;  %14308 = vmatpush3.bf16.xpose.msra.mxu1 %v1241_v29 }
 0x31b   :  { %14303 = vmatprep.mubr.msk.bf16.mxu0 %vm16589_vm3, %v20402_v53  ;;  %14309 = vmatprep.mubr.msk.bf16.mxu1 %vm16589_vm3, %v20402_v53 }
 0x31c   :  { %2483 = vrot.lane.b32.xlu1 %v16806_v4, %s16583_s1  ;;  %2531 = vrot.lane.b32.xlu0 %v16815_v5, %s16583_s1  ;;  %v1432_v4 = vpop.permute.xlu1 %1431  ;;  %v1383_v5 = vpop.permute.xlu0 %1382 }
 0x31d   :  { %14313 = vmatprep.subr.bf16.mxu0 %v20402_v53  ;;  %14319 = vmatprep.subr.bf16.mxu1 %v20402_v53 }
 0x320   :  { %2579 = vrot.lane.b32.xlu1 %v16823_v7, %s16583_s1  ;;  %2627 = vrot.lane.b32.xlu0 %v16817_v6, %s16583_s1  ;;  %v1437_v6 = vsel %vm191_vm1, %v1432_v4, 0  ;;  %v1388_v7 = vsel %vm191_vm1, %v1383_v5, 0 }
 0x321   :  { %14304 = vmatmul.mubr.msk.bf16.vlgmr.msra.gmra.mxu0 %vm191_vm1, %v16879_v41  ;;  %14310 = vmatmul.mubr.msk.bf16.vlgmr.msra.gmra.mxu1 %vm191_vm1, %v16892_v51 }
 0x322   :  { %14314 = vmatpush3.bf16.xpose.msra.mxu0 %v1290_v46  ;;  %14320 = vmatpush3.bf16.xpose.msra.mxu1 %v1339_v40 }
 0x323   :  { %14315 = vmatprep.mubr.msk.bf16.mxu0 %vm16589_vm3, %v20402_v53  ;;  %14321 = vmatprep.mubr.msk.bf16.mxu1 %vm16589_vm3, %v20402_v53 }
 0x324   :  { %2675 = vrot.lane.b32.xlu1 %v16825_v8, %s16583_s1  ;;  %2723 = vrot.lane.b32.xlu0 %v16835_v9, %s16583_s1  ;;  %v1530_v8 = vpop.permute.xlu1 %1529  ;;  %v1481_v9 = vpop.permute.xlu0 %1480 }
 0x325   :  { %14331 = vmatprep.subr.bf16.mxu1 %v20402_v53  ;;  %14325 = vmatprep.subr.bf16.mxu0 %v20402_v53 }
 0x328   :  { %2771 = vrot.lane.b32.xlu1 %v16843_v11, %s16583_s1  ;;  %2819 = vrot.lane.b32.xlu0 %v16837_v10, %s16583_s1  ;;  %v1535_v10 = vsel %vm191_vm1, %v1530_v8, 0  ;;  %v1486_v11 = vsel %vm191_vm1, %v1481_v9, 0 }
 0x329   :  { %14322 = vmatmul.mubr.msk.bf16.vlgmr.msra.gmra.mxu1 %vm191_vm1, %v16901_v55  ;;  %14316 = vmatmul.mubr.msk.bf16.vlgmr.msra.gmra.mxu0 %vm191_vm1, %v16906_v59 }
 0x32a   :  { %14326 = vmatpush3.bf16.xpose.msra.mxu0 %v1388_v7  ;;  %14332 = vmatpush3.bf16.xpose.msra.mxu1 %v1437_v6 }
 0x32b   :  { %14327 = vmatprep.mubr.msk.bf16.mxu0 %vm16589_vm3, %v20402_v53  ;;  %14333 = vmatprep.mubr.msk.bf16.mxu1 %vm16589_vm3, %v20402_v53 }
 0x32c   :  { %2867 = vrot.lane.b32.xlu1 %v16851_v16, %s16583_s1  ;;  %2915 = vrot.lane.b32.xlu0 %v16849_v15, %s16583_s1  ;;  %v1628_v15 = vpop.permute.xlu1 %1627  ;;  %v1579_v16 = vpop.permute.xlu0 %1578 }
 0x32d   :  { %14343 = vmatprep.subr.bf16.mxu1 %v20402_v53  ;;  %14337 = vmatprep.subr.bf16.mxu0 %v20402_v53 }
 0x330   :  { %2963 = vrot.lane.b32.xlu1 %v16857_v20, %s16583_s1  ;;  %3011 = vrot.lane.b32.xlu0 %v16863_v26, %s16583_s1  ;;  %v1633_v20 = vsel %vm191_vm1, %v1628_v15, 0  ;;  %v1584_v26 = vsel %vm191_vm1, %v1579_v16, 0 }
 0x331   :  { %14334 = vmatmul.mubr.msk.bf16.vlgmr.msra.gmra.mxu1 %vm191_vm1, %v16915_v62  ;;  %14328 = vmatmul.mubr.msk.bf16.vlgmr.msra.gmra.mxu0 %vm191_vm1, %v16920_v1 }
 0x332   :  { %14338 = vmatpush3.bf16.xpose.msra.mxu0 %v1486_v11  ;;  %14344 = vmatpush3.bf16.xpose.msra.mxu1 %v1535_v10 }
 0x333   :  { %14339 = vmatprep.mubr.msk.bf16.mxu0 %vm16589_vm3, %v20402_v53  ;;  %14345 = vmatprep.mubr.msk.bf16.mxu1 %vm16589_vm3, %v20402_v53 }
 0x334   :  { %3059 = vrot.lane.b32.xlu1 %v16872_v33, %s16583_s1  ;;  %3203 = vrot.lane.b32.xlu0 %v16892_v51, %s16583_s1 }
 0x335   :  { %14355 = vmatprep.subr.bf16.mxu1 %v20402_v53  ;;  %14349 = vmatprep.subr.bf16.mxu0 %v20402_v53 }
 0x338   :  { %3155 = vrot.lane.b32.xlu1 %v16879_v41, %s16583_s1  ;;  %3299 = vrot.lane.b32.xlu0 %v16901_v55, %s16583_s1 }
 0x339   :  { %14346 = vmatmul.mubr.msk.bf16.vlgmr.msra.gmra.mxu1 %vm191_vm1, %v16929_v3  ;;  %14340 = vmatmul.mubr.msk.bf16.vlgmr.msra.gmra.mxu0 %vm191_vm1, %v16934_v13 }
 0x33a   :  { %14350 = vmatpush3.bf16.xpose.msra.mxu0 %v1584_v26  ;;  %14356 = vmatpush3.bf16.xpose.msra.mxu1 %v1633_v20 }
 0x33b   :  { %14351 = vmatprep.mubr.msk.bf16.mxu0 %vm16589_vm3, %v20402_v53  ;;  %14357 = vmatprep.mubr.msk.bf16.mxu1 %vm16589_vm3, %v20402_v53 }
 0x33c   :  { %3251 = vrot.lane.b32.xlu1 %v16906_v59, %s16583_s1  ;;  %3395 = vrot.lane.b32.xlu0 %v16915_v62, %s16583_s1 }
 0x33d   :  { %14367 = vmatprep.subr.bf16.mxu1 %v20402_v53  ;;  %14361 = vmatprep.subr.bf16.mxu0 %v20402_v53 }
 0x340   :  { %3347 = vrot.lane.b32.xlu1 %v16920_v1, %s16583_s1  ;;  %3587 = vrot.lane.b32.xlu0 %v16943_v21, %s16583_s1 }
 0x341   :  { %14358 = vmatmul.mubr.msk.bf16.vlgmr.msra.gmra.mxu1 %vm191_vm1, %v16943_v21  ;;  %14352 = vmatmul.mubr.msk.bf16.vlgmr.msra.gmra.mxu0 %vm191_vm1, %v16945_v22 }
 0x342   :  { %14363 = vmatprep.mubr.msk.bf16.mxu0 %vm16589_vm3, %v20402_v53  ;;  %14369 = vmatprep.mubr.msk.bf16.mxu1 %vm16589_vm3, %v20402_v53 }
 0x344   :  { %3443 = vrot.lane.b32.xlu1 %v16934_v13, %s16583_s1  ;;  %3107 = vrot.lane.b32.xlu0 %v16870_v30, %s16583_s1 }
 0x348   :  { %3539 = vrot.lane.b32.xlu1 %v16945_v22, %s16583_s1  ;;  %3491 = vrot.lane.b32.xlu0 %v16929_v3, %s16583_s1 }
 0x34c   :  { %3635 = vrot.lane.b32.xlu1 %v16974_v45, %s16583_s1 }
 0x35a   :  { %v17146_v33 = vpop.f32.mrf.mxu0 }
 0x35b   :  { %2067 = vst.msk [vmem:[#allocation2] sm:$0xff] %vm191_vm1, %v17146_v33  ;;  %v2099_v3 = vsel %vm191_vm1, %v17146_v33, -inf }
 0x35c   :  { %v14221_v41 = vpop.f32.mrf.mxu0 }
 0x35e   :  { %v545_v51 = vpop.f32.mrf.mxu0 }
 0x360   :  { %v14222_v55 = vpop.f32.mrf.mxu0 }
 0x361   :  { %v17150_v59 = vpop.f32.mrf.mxu1 }
 0x362   :  { %2068 = vst.msk [vmem:[#allocation2 + $0x8] sm:$0xff] %vm191_vm1, %v17150_v59  ;;  %v2102_v63 = vsel %vm191_vm1, %v17150_v59, -inf }
 0x363   :  { %v14227_v30 = vpop.f32.mrf.mxu1 }
 0x365   :  { %v594_v62 = vpop.f32.mrf.mxu1  ;;  %v17154_v1 = vpop.f32.mrf.mxu0 }
 0x366   :  { %2069 = vst.msk [vmem:[#allocation2 + $0x10] sm:$0xff] %vm191_vm1, %v17154_v1  ;;  %v2105_v48 = vsel %vm191_vm1, %v17154_v1, -inf }
 0x367   :  { %v14228_v13 = vpop.f32.mrf.mxu1  ;;  %v14233_v21 = vpop.f32.mrf.mxu0  ;;  %2100 = vmax.xlane.f32.xlu0 %v2099_v3 }
 0x369   :  { %v643_v22 = vpop.f32.mrf.mxu0  ;;  %v17160_v47 = vpop.f32.mrf.mxu1 }
 0x36a   :  { %2070 = vst.msk [vmem:[#allocation2 + $0x18] sm:$0xff] %vm191_vm1, %v17160_v47  ;;  %v2108_v58 = vsel %vm191_vm1, %v17160_v47, -inf }
 0x36b   :  { %v14234_v49 = vpop.f32.mrf.mxu0  ;;  %v14239_v50 = vpop.f32.mrf.mxu1  ;;  %2106 = vmax.xlane.f32.xlu0 %v2105_v48 }
 0x36d   :  { %v692_v52 = vpop.f32.mrf.mxu1  ;;  %v17166_v57 = vpop.f32.mrf.mxu0 }
 0x36e   :  { %2071 = vst.msk [vmem:[#allocation2 + $0x20] sm:$0xff] %vm191_vm1, %v17166_v57  ;;  %v2111_v23 = vsel %vm191_vm1, %v17166_v57, -inf }
 0x36f   :  { %v14240_v60 = vpop.f32.mrf.mxu1  ;;  %v14245_v61 = vpop.f32.mrf.mxu0  ;;  %2109 = vmax.xlane.f32.xlu0 %v2108_v58 }
 0x370   :  { %2103 = vmax.xlane.f32.xlu1 %v2102_v63 }
 0x371   :  { %v741_v0 = vpop.f32.mrf.mxu0  ;;  %v17174_v2 = vpop.f32.mrf.mxu1 }
 0x372   :  { %2072 = vst.msk [vmem:[#allocation2 + $0x28] sm:$0xff] %vm191_vm1, %v17174_v2  ;;  %v2114_v12 = vsel %vm191_vm1, %v17174_v2, -inf }
 0x373   :  { %v14246_v18 = vpop.f32.mrf.mxu0  ;;  %v14251_v19 = vpop.f32.mrf.mxu1  ;;  %2115 = vmax.xlane.f32.xlu0 %v2114_v12 }
 0x374   :  { %2112 = vmax.xlane.f32.xlu1 %v2111_v23 }
 0x375   :  { %v790_v24 = vpop.f32.mrf.mxu1  ;;  %v17182_v28 = vpop.f32.mrf.mxu0 }
 0x376   :  { %2073 = vst.msk [vmem:[#allocation2 + $0x30] sm:$0xff] %vm191_vm1, %v17182_v28  ;;  %v2117_v29 = vsel %vm191_vm1, %v17182_v28, -inf }
 0x377   :  { %v14252_v37 = vpop.f32.mrf.mxu1  ;;  %v14257_v38 = vpop.f32.mrf.mxu0 }
 0x378   :  { %2118 = vmax.xlane.f32.xlu1 %v2117_v29 }
 0x379   :  { %v839_v40 = vpop.f32.mrf.mxu0  ;;  %v17188_v46 = vpop.f32.mrf.mxu1 }
 0x37a   :  { %2074 = vst.msk [vmem:[#allocation2 + $0x38] sm:$0xff] %vm191_vm1, %v17188_v46  ;;  %v2120_v4 = vsel %vm191_vm1, %v17188_v46, -inf }
 0x37b   :  { %v1726_v5 = vpop.permute.xlu1 %1725  ;;  %v1677_v6 = vpop.permute.xlu0 %1676  ;;  %2121 = vmax.xlane.f32.xlu0 %v2120_v4 }
 0x37c   :  { %v1731_v7 = vsel %vm191_vm1, %v1726_v5, 0  ;;  %v1682_v8 = vsel %vm191_vm1, %v1677_v6, 0  ;;  %v14258_v9 = vpop.f32.mrf.mxu0  ;;  %v14263_v10 = vpop.f32.mrf.mxu1 }
 0x37d   :  { %14362 = vmatpush3.bf16.xpose.msra.mxu0 %v1682_v8  ;;  %14368 = vmatpush3.bf16.xpose.msra.mxu1 %v1731_v7 }
 0x37e   :  { %v888_v11 = vpop.f32.mrf.mxu1  ;;  %14373 = vmatprep.subr.bf16.mxu0 %v20402_v53  ;;  %14379 = vmatprep.subr.bf16.mxu1 %v20402_v53 }
 0x37f   :  { %v1824_v16 = vpop.permute.xlu1 %1823  ;;  %v1775_v20 = vpop.permute.xlu0 %1774 }
 0x380   :  { %v14264_v15 = vpop.f32.mrf.mxu1  ;;  %v1829_v26 = vsel %vm191_vm1, %v1824_v16, 0  ;;  %v1780_v41 = vsel %vm191_vm1, %v1775_v20, 0 }
 0x384   :  { %14364 = vmatmul.mubr.msk.bf16.vlgmr.msra.gmra.mxu0 %vm191_vm1, %v16974_v45  ;;  %14370 = vmatmul.mubr.msk.bf16.vlgmr.msra.gmra.mxu1 %vm191_vm1, %v16972_v42 }
 0x385   :  { %14374 = vmatpush3.bf16.xpose.msra.mxu0 %v1780_v41  ;;  %14380 = vmatpush3.bf16.xpose.msra.mxu1 %v1829_v26 }
 0x386   :  { %14381 = vmatprep.mubr.msk.bf16.mxu1 %vm16589_vm3, %v20402_v53  ;;  %14375 = vmatprep.mubr.msk.bf16.mxu0 %vm16589_vm3, %v20402_v53  ;;  %v1922_v51 = vpop.permute.xlu1 %1921  ;;  %v1873_v55 = vpop.permute.xlu0 %1872 }
 0x387   :  { %14385 = vmatprep.subr.bf16.mxu0 %v20402_v53  ;;  %14391 = vmatprep.subr.bf16.mxu1 %v20402_v53  ;;  %v1927_v30 = vsel %vm191_vm1, %v1922_v51, 0  ;;  %v1878_v45 = vsel %vm191_vm1, %v1873_v55, 0 }
 0x38a   :  { %v2020_v62 = vpop.permute.xlu1 %2019  ;;  %v1971_v3 = vpop.permute.xlu0 %1970 }
 0x38b   :  { %v2025_v13 = vsel %vm191_vm1, %v2020_v62, 0  ;;  %v1976_v21 = vsel %vm191_vm1, %v1971_v3, 0 }
 0x38c   :  { %14376 = vmatmul.mubr.msk.bf16.vlgmr.msra.gmra.mxu0 %vm191_vm1, %v16988_v56  ;;  %14382 = vmatmul.mubr.msk.bf16.vlgmr.msra.gmra.mxu1 %vm191_vm1, %v16986_v54 }
 0x38d   :  { %14386 = vmatpush3.bf16.xpose.msra.mxu0 %v1878_v45  ;;  %14392 = vmatpush3.bf16.xpose.msra.mxu1 %v1927_v30 }
 0x38e   :  { %14393 = vmatprep.mubr.msk.bf16.mxu1 %vm16589_vm3, %v20402_v53  ;;  %14387 = vmatprep.mubr.msk.bf16.mxu0 %vm16589_vm3, %v20402_v53  ;;  %v2484_v22 = vpop.permute.xlu1 %2483  ;;  %v2532_v48 = vpop.permute.xlu0 %2531 }
 0x38f   :  { %14397 = vmatprep.subr.bf16.mxu0 %v20402_v53  ;;  %14403 = vmatprep.subr.bf16.mxu1 %v20402_v53  ;;  %v2489_v49 = vsel %vm204_vm0, %v2484_v22, 0  ;;  %v2537_v50 = vsel %vm204_vm0, %v2532_v48, 0 }
 0x392   :  { %v17246_v52 = vpop.permute.xlu1 %2579  ;;  %v17248_v58 = vpop.permute.xlu0 %2627 }
 0x394   :  { %14388 = vmatmul.mubr.msk.bf16.vlgmr.msra.gmra.mxu0 %vm191_vm1, %v17008_v17  ;;  %14394 = vmatmul.mubr.msk.bf16.vlgmr.msra.gmra.mxu1 %vm191_vm1, %v17006_v14 }
 0x395   :  { %14398 = vmatpush3.bf16.xpose.msra.mxu0 %v1976_v21  ;;  %14404 = vmatpush3.bf16.xpose.msra.mxu1 %v2025_v13 }
 0x396   :  { %14405 = vmatprep.mubr.msk.bf16.mxu1 %vm16589_vm3, %v20402_v53  ;;  %14399 = vmatprep.mubr.msk.bf16.mxu0 %vm16589_vm3, %v20402_v53  ;;  %v17250_v60 = vpop.permute.xlu1 %2675  ;;  %v17252_v61 = vpop.permute.xlu0 %2723 }
 0x397   :  { %14409 = vmatprep.subr.bf16.mxu0 %v20402_v53  ;;  %14415 = vmatprep.subr.bf16.mxu1 %v20402_v53 }
 0x39a   :  { %v17258_v12 = vpop.permute.xlu1 %2771  ;;  %v17268_v29 = vpop.permute.xlu0 %2819 }
 0x39c   :  { %14400 = vmatmul.mubr.msk.bf16.vlgmr.msra.gmra.mxu0 %vm191_vm1, %v17022_v27  ;;  %14406 = vmatmul.mubr.msk.bf16.vlgmr.msra.gmra.mxu1 %vm191_vm1, %v17020_v25 }
 0x39d   :  { %14410 = vmatpush3.bf16.msra.mxu0 %v2489_v49  ;;  %14416 = vmatpush3.bf16.msra.mxu1 %v2537_v50 }
 0x39e   :  { %14417 = vmatprep.mubr.msk.bf16.mxu1 %vm16589_vm3, %v20402_v53  ;;  %14427 = vmatprep.subr.bf16.mxu1 %v20402_v53  ;;  %v17270_v5 = vpop.permute.xlu1 %2867  ;;  %v17276_v8 = vpop.permute.xlu0 %2915 }
 0x39f   :  { %14411 = vmatprep.mubr.msk.bf16.mxu0 %vm16589_vm3, %v20402_v53  ;;  %14421 = vmatprep.subr.bf16.mxu0 %v20402_v53 }
 0x3a2   :  { %v17286_v26 = vpop.permute.xlu1 %2963  ;;  %v17288_v55 = vpop.permute.xlu0 %3011 }
 0x3a6   :  { %v17302_v22 = vpop.permute.xlu1 %3059  ;;  %v17304_v50 = vpop.permute.xlu0 %3203 }
 0x3c8   :  { %v17254_v63 = vpop.f32.mrf.mxu0  ;;  %v17256_v0 = vpop.f32.mrf.mxu1 }
 0x3c9   :  { %2075 = vst.msk [vmem:[#allocation2 + $0x40] sm:$0xff] %vm191_vm1, %v17254_v63  ;;  %2076 = vst.msk [vmem:[#allocation2 + $0x48] sm:$0xff] %vm191_vm1, %v17256_v0  ;;  %v2123_v18 = vsel %vm191_vm1, %v17254_v63, -inf  ;;  %v2126_v19 = vsel %vm191_vm1, %v17256_v0, -inf }
 0x3ca   :  { %v14269_v23 = vpop.f32.mrf.mxu0  ;;  %v14275_v24 = vpop.f32.mrf.mxu1  ;;  %2124 = vmax.xlane.f32.xlu1 %v2123_v18  ;;  %2127 = vmax.xlane.f32.xlu0 %v2126_v19 }
 0x3cc   :  { %v937_v37 = vpop.f32.mrf.mxu0  ;;  %v986_v38 = vpop.f32.mrf.mxu1 }
 0x3cd   :  { %v17310_v37 = vpop.permute.xlu1 %3155 }
 0x3ce   :  { %v14270_v40 = vpop.f32.mrf.mxu0  ;;  %v14276_v4 = vpop.f32.mrf.mxu1 }
 0x3d1   :  { %v17272_v6 = vpop.f32.mrf.mxu0  ;;  %v17274_v7 = vpop.f32.mrf.mxu1 }
 0x3d2   :  { %2077 = vst.msk [vmem:[#allocation2 + $0x50] sm:$0xff] %vm191_vm1, %v17272_v6  ;;  %2078 = vst.msk [vmem:[#allocation2 + $0x58] sm:$0xff] %vm191_vm1, %v17274_v7  ;;  %v2129_v9 = vsel %vm191_vm1, %v17272_v6, -inf  ;;  %v2132_v10 = vsel %vm191_vm1, %v17274_v7, -inf }
 0x3d3   :  { %v14281_v11 = vpop.f32.mrf.mxu0  ;;  %v14287_v15 = vpop.f32.mrf.mxu1  ;;  %2130 = vmax.xlane.f32.xlu1 %v2129_v9  ;;  %2133 = vmax.xlane.f32.xlu0 %v2132_v10 }
 0x3d4   :  { %v17320_v10 = vpop.permute.xlu0 %3299 }
 0x3d5   :  { %v1035_v16 = vpop.f32.mrf.mxu0  ;;  %v1084_v20 = vpop.f32.mrf.mxu1 }
 0x3d7   :  { %v14282_v41 = vpop.f32.mrf.mxu0  ;;  %v14288_v51 = vpop.f32.mrf.mxu1 }
 0x3d8   :  { %v17322_v41 = vpop.permute.xlu1 %3251 }
 0x3d9   :  { %v17290_v30 = vpop.f32.mrf.mxu0  ;;  %v17292_v45 = vpop.f32.mrf.mxu1 }
 0x3da   :  { %2079 = vst.msk [vmem:[#allocation2 + $0x60] sm:$0xff] %vm191_vm1, %v17290_v30  ;;  %2080 = vst.msk [vmem:[#allocation2 + $0x68] sm:$0xff] %vm191_vm1, %v17292_v45  ;;  %v2135_v62 = vsel %vm191_vm1, %v17290_v30, -inf  ;;  %v2138_v3 = vsel %vm191_vm1, %v17292_v45, -inf }
 0x3db   :  { %v14293_v13 = vpop.f32.mrf.mxu0  ;;  %v14299_v21 = vpop.f32.mrf.mxu1  ;;  %2136 = vmax.xlane.f32.xlu1 %v2135_v62  ;;  %2139 = vmax.xlane.f32.xlu0 %v2138_v3 }
 0x3dc   :  { %v17328_v3 = vpop.permute.xlu0 %3395 }
 0x3dd   :  { %v1133_v48 = vpop.f32.mrf.mxu0  ;;  %v1182_v49 = vpop.f32.mrf.mxu1  ;;  %20446 = vst [vmem:[#allocation35_spill] sm:$0xff] %v17328_v3 }
 0x3df   :  { %v14294_v18 = vpop.f32.mrf.mxu0  ;;  %v14300_v19 = vpop.f32.mrf.mxu1 }
 0x3e0   :  { %v17334_v18 = vpop.permute.xlu1 %3347 }
 0x3e1   :  { %v17306_v23 = vpop.f32.mrf.mxu0  ;;  %v17308_v24 = vpop.f32.mrf.mxu1  ;;  %20447 = vst [vmem:[#allocation36_spill] sm:$0xff] %v17334_v18 }
 0x3e2   :  { %2081 = vst.msk [vmem:[#allocation2 + $0x70] sm:$0xff] %vm191_vm1, %v17306_v23  ;;  %2082 = vst.msk [vmem:[#allocation2 + $0x78] sm:$0xff] %vm191_vm1, %v17308_v24  ;;  %v2141_v38 = vsel %vm191_vm1, %v17306_v23, -inf  ;;  %v2144_v40 = vsel %vm191_vm1, %v17308_v24, -inf }
 0x3e3   :  { %v14305_v4 = vpop.f32.mrf.mxu0  ;;  %v14311_v9 = vpop.f32.mrf.mxu1  ;;  %2142 = vmax.xlane.f32.xlu1 %v2141_v38  ;;  %2145 = vmax.xlane.f32.xlu0 %v2144_v40 }
 0x3e4   :  { %v17336_v40 = vpop.permute.xlu0 %3587 }
 0x3e5   :  { %v1231_v11 = vpop.f32.mrf.mxu0  ;;  %v1280_v15 = vpop.f32.mrf.mxu1  ;;  %20448 = vst [vmem:[#allocation37_spill] sm:$0xff] %v17336_v40 }
 0x3e7   :  { %v14306_v16 = vpop.f32.mrf.mxu0  ;;  %v14312_v20 = vpop.f32.mrf.mxu1 }
 0x3e8   :  { %v17346_v16 = vpop.permute.xlu1 %3443 }
 0x3e9   :  { %v17324_v51 = vpop.f32.mrf.mxu0  ;;  %v17326_v62 = vpop.f32.mrf.mxu1  ;;  %20449 = vst [vmem:[#allocation38_spill] sm:$0xff] %v17346_v16 }
 0x3ea   :  { %2083 = vst.msk [vmem:[#allocation2 + $0x80] sm:$0xff] %vm191_vm1, %v17324_v51  ;;  %2084 = vst.msk [vmem:[#allocation2 + $0x88] sm:$0xff] %vm191_vm1, %v17326_v62 }
 0x3eb   :  { %v14317_v13 = vpop.f32.mrf.mxu0  ;;  %v14323_v21 = vpop.f32.mrf.mxu1 }
 0x3ec   :  { %v17350_v21 = vpop.permute.xlu0 %3107 }
 0x3ed   :  { %v1329_v48 = vpop.f32.mrf.mxu0  ;;  %v1378_v49 = vpop.f32.mrf.mxu1 }
 0x3ef   :  { %v14318_v19 = vpop.f32.mrf.mxu0  ;;  %v14324_v38 = vpop.f32.mrf.mxu1 }
 0x3f1   :  { %v17338_v4 = vpop.f32.mrf.mxu0  ;;  %v17340_v9 = vpop.f32.mrf.mxu1 }
 0x3f2   :  { %2085 = vst.msk [vmem:[#allocation2 + $0x90] sm:$0xff] %vm191_vm1, %v17338_v4  ;;  %2086 = vst.msk [vmem:[#allocation2 + $0x98] sm:$0xff] %vm191_vm1, %v17340_v9 }
 0x3f3   :  { %v14329_v11 = vpop.f32.mrf.mxu0  ;;  %v14335_v15 = vpop.f32.mrf.mxu1 }
 0x3f4   :  { %3731 = vrot.lane.b32.xlu1 %v16988_v56, %s16583_s1  ;;  %v17360_v11 = vpop.permute.xlu1 %3539 }
 0x3f5   :  { %v1427_v20 = vpop.f32.mrf.mxu0  ;;  %v1476_v13 = vpop.f32.mrf.mxu1  ;;  %20450 = vst [vmem:[#allocation39_spill] sm:$0xff] %v17360_v11 }
 0x3f6   :  { %v17366_v20 = vpop.permute.xlu0 %3491 }
 0x3f7   :  { %v14330_v48 = vpop.f32.mrf.mxu0  ;;  %v14336_v49 = vpop.f32.mrf.mxu1  ;;  %20451 = vst [vmem:[#allocation40_spill] sm:$0xff] %v17366_v20 }
 0x3f8   :  { %3779 = vrot.lane.b32.xlu1 %v16986_v54, %s16583_s1  ;;  %v17368_v53 = vpop.permute.xlu1 %3635 }
 0x3f9   :  { %v17354_v19 = vpop.f32.mrf.mxu1  ;;  %3683 = vrot.lane.b32.xlu0 %v16972_v42, %s16583_s1  ;;  %v17358_v38 = vpop.f32.mrf.mxu0  ;;  %20452 = vst [vmem:[#allocation41_spill] sm:$0xff] %v17368_v53 }
 0x3fa   :  { %2088 = vst.msk [vmem:[#allocation2 + $0xa8] sm:$0xff] %vm191_vm1, %v17354_v19  ;;  %2087 = vst.msk [vmem:[#allocation2 + $0xa0] sm:$0xff] %vm191_vm1, %v17358_v38  ;;  %v2101_v42 = vpop.xlane.xlu0 %2100 }
 0x3fb   :  { %v14341_v56 = vpop.f32.mrf.mxu0  ;;  %v14347_v15 = vpop.f32.mrf.mxu1  ;;  %v2195_v31 = vsub.f32 %v17146_v33, %v2101_v42 }
 0x3fc   :  { %v2104_v32 = vpop.xlane.xlu1 %2103 }
 0x3fd   :  { %v1525_v54 = vpop.f32.mrf.mxu0  ;;  %v1574_v13 = vpop.f32.mrf.mxu1  ;;  %v2227_v53 = vmul.f32 1.442695, %v2195_v31  ;;  %v2147_v31 = vsel %vm191_vm1, %v17324_v51, -inf }
 0x3ff   :  { %v14342_v48 = vpop.f32.mrf.mxu0  ;;  %v14348_v49 = vpop.f32.mrf.mxu1 }
 0x400   :  { %v2107_v48 = vpop.xlane.xlu0 %2106  ;;  %v2196_v49 = vsub.f32 %v17150_v59, %v2104_v32  ;;  %v2150_v32 = vsel %vm191_vm1, %v17326_v62, -inf }
 0x401   :  { %v17370_v39 = vpop.f32.mrf.mxu0  ;;  %v17372_v44 = vpop.f32.mrf.mxu1 }
 0x402   :  { %2089 = vst.msk [vmem:[#allocation2 + $0xb0] sm:$0xff] %vm191_vm1, %v17370_v39  ;;  %2090 = vst.msk [vmem:[#allocation2 + $0xb8] sm:$0xff] %vm191_vm1, %v17372_v44  ;;  %v2229_v34 = vmul.f32 1.442695, %v2196_v49 }
 0x403   :  { %v14353_v56 = vpop.f32.mrf.mxu0  ;;  %v14359_v15 = vpop.f32.mrf.mxu1 }
 0x404   :  { %v2110_v36 = vpop.xlane.xlu0 %2109  ;;  %15930 = vpow2.f32 %v2229_v34  ;;  %v2197_v56 = vsub.f32 %v17154_v1, %v2107_v48  ;;  %v2153_v1 = vsel %vm191_vm1, %v17338_v4, -inf }
 0x405   :  { %v1623_v54 = vpop.f32.mrf.mxu0  ;;  %v1672_v13 = vpop.f32.mrf.mxu1  ;;  %v2198_v11 = vsub.f32 %v17160_v47, %v2110_v36  ;;  %15932 = vpow2.f32 %v2227_v53 }
 0x406   :  { %v2231_v54 = vmul.f32 1.442695, %v2197_v56  ;;  %v2168_v56 = vsel %vm191_vm1, %v17372_v44, -inf }
 0x407   :  { %v14354_v43 = vpop.f32.mrf.mxu0  ;;  %v14360_v35 = vpop.f32.mrf.mxu1  ;;  %v2233_v15 = vmul.f32 1.442695, %v2198_v11  ;;  %v2159_v11 = vsel %vm191_vm1, %v17358_v38, -inf }
 0x408   :  { %v2116_v40 = vpop.xlane.xlu0 %2115  ;;  %v2113_v35 = vpop.xlane.xlu1 %2112  ;;  %v2156_v43 = vsel %vm191_vm1, %v17340_v9, -inf }
 0x409   :  { %15934 = vpow2.f32 %v2233_v15  ;;  %v2200_v13 = vsub.f32 %v17174_v2, %v2116_v40  ;;  %v2199_v34 = vsub.f32 %v17166_v57, %v2113_v35  ;;  %v2162_v57 = vsel %vm191_vm1, %v17354_v19, -inf }
 0x40a   :  { %15936 = vpow2.f32 %v2231_v54 }
 0x40b   :  { %v2237_v36 = vmul.f32 1.442695, %v2200_v13  ;;  %v2235_v33 = vmul.f32 1.442695, %v2199_v34 }
 0x40c   :  { %v2119_v54 = vpop.xlane.xlu1 %2118  ;;  %v2122_v13 = vpop.xlane.xlu0 %2121 }
 0x40d   :  { %15938 = vpow2.f32 %v2237_v36  ;;  %v2201_v36 = vsub.f32 %v17182_v28, %v2119_v54  ;;  %v2202_v34 = vsub.f32 %v17188_v46, %v2122_v13 }
 0x40e   :  { %15940 = vpow2.f32 %v2235_v33 }
 0x40f   :  { %v2239_v33 = vmul.f32 1.442695, %v2201_v36 }
 0x411   :  { %v17390_v53 = vpop.eup %15930  ;;  %15942 = vpow2.f32 %v2239_v33 }
 0x412   :  { %v2294_v59 = vsel %vm191_vm1, %v17390_v53, 0.0  ;;  %v17396_v47 = vpop.eup %15932 }
 0x413   :  { %v2291_v2 = vsel %vm191_vm1, %v17396_v47, 0.0 }
 0x416   :  { %v17402_v40 = vpop.eup %15934 }
 0x417   :  { %v2300_v42 = vsel %vm191_vm1, %v17402_v40, 0.0  ;;  %v17408_v48 = vpop.eup %15936 }
 0x418   :  { %2151 = vmax.xlane.f32.xlu0 %v2150_v32  ;;  %v2297_v49 = vsel %vm191_vm1, %v17408_v48, 0.0  ;;  %v2165_v32 = vsel %vm191_vm1, %v17370_v39, -inf }
 0x41a   :  { %v17414_v15 = vpop.eup %15938 }
 0x41b   :  { %v2306_v35 = vsel %vm191_vm1, %v17414_v15, 0.0 }
 0x41c   :  { %2157 = vmax.xlane.f32.xlu0 %v2156_v43  ;;  %2148 = vmax.xlane.f32.xlu1 %v2147_v31  ;;  %v17420_v31 = vpop.eup %15940 }
 0x41d   :  { %v2303_v43 = vsel %vm191_vm1, %v17420_v31, 0.0 }
 0x420   :  { %2295 = vadd.xlane.f32.xlu0 %v2294_v59  ;;  %2154 = vmax.xlane.f32.xlu1 %v2153_v1  ;;  %v2241_v59 = vmul.f32 1.442695, %v2202_v34 }
 0x422   :  { %15944 = vpow2.f32 %v2241_v59 }
 0x424   :  { %2163 = vmax.xlane.f32.xlu0 %v2162_v57  ;;  %2292 = vadd.xlane.f32.xlu1 %v2291_v2  ;;  %v17430_v2 = vpop.eup %15942 }
 0x425   :  { %v2309_v13 = vsel %vm191_vm1, %v17430_v2, 0.0 }
 0x428   :  { %2160 = vmax.xlane.f32.xlu1 %v2159_v11  ;;  %2301 = vadd.xlane.f32.xlu0 %v2300_v42 }
 0x42c   :  { %2298 = vadd.xlane.f32.xlu1 %v2297_v49  ;;  %2169 = vmax.xlane.f32.xlu0 %v2168_v56 }
 0x42f   :  { %v17440_v11 = vpop.eup %15944 }
 0x430   :  { %2166 = vmax.xlane.f32.xlu1 %v2165_v32  ;;  %2307 = vadd.xlane.f32.xlu0 %v2306_v35  ;;  %v2312_v32 = vsel %vm191_vm1, %v17440_v11, 0.0 }
 0x434   :  { %2304 = vadd.xlane.f32.xlu1 %v2303_v43 }
 0x444   :  { %v17426_v1 = vpop.f32.mrf.mxu0  ;;  %v17428_v57 = vpop.f32.mrf.mxu1 }
 0x445   :  { %2091 = vst.msk [vmem:[#allocation2 + $0xc0] sm:$0xff] %vm191_vm1, %v17426_v1  ;;  %2092 = vst.msk [vmem:[#allocation2 + $0xc8] sm:$0xff] %vm191_vm1, %v17428_v57  ;;  %v2171_v28 = vsel %vm191_vm1, %v17426_v1, -inf  ;;  %v2174_v46 = vsel %vm191_vm1, %v17428_v57, -inf }
 0x446   :  { %v14365_v42 = vpop.f32.mrf.mxu0  ;;  %v14371_v49 = vpop.f32.mrf.mxu1  ;;  %2172 = vmax.xlane.f32.xlu1 %v2171_v28  ;;  %2175 = vmax.xlane.f32.xlu0 %v2174_v46 }
 0x448   :  { %v1721_v56 = vpop.f32.mrf.mxu0  ;;  %v1770_v54 = vpop.f32.mrf.mxu1 }
 0x44a   :  { %v14366_v35 = vpop.f32.mrf.mxu0  ;;  %v14372_v36 = vpop.f32.mrf.mxu1  ;;  %2310 = vadd.xlane.f32.xlu1 %v2309_v13  ;;  %2313 = vadd.xlane.f32.xlu0 %v2312_v32 }
 0x44c   :  { %v17446_v34 = vpop.f32.mrf.mxu0  ;;  %v17448_v43 = vpop.f32.mrf.mxu1 }
 0x44d   :  { %2093 = vst.msk [vmem:[#allocation2 + $0xd0] sm:$0xff] %vm191_vm1, %v17446_v34  ;;  %2094 = vst.msk [vmem:[#allocation2 + $0xd8] sm:$0xff] %vm191_vm1, %v17448_v43  ;;  %v2177_v33 = vsel %vm191_vm1, %v17446_v34, -inf  ;;  %v2180_v59 = vsel %vm191_vm1, %v17448_v43, -inf }
 0x44e   :  { %v14377_v28 = vpop.f32.mrf.mxu0  ;;  %v14383_v46 = vpop.f32.mrf.mxu1  ;;  %2178 = vmax.xlane.f32.xlu1 %v2177_v33  ;;  %2181 = vmax.xlane.f32.xlu0 %v2180_v59 }
 0x450   :  { %v1819_v42 = vpop.f32.mrf.mxu0  ;;  %v1868_v49 = vpop.f32.mrf.mxu1 }
 0x452   :  { %v14378_v56 = vpop.f32.mrf.mxu0  ;;  %v14384_v54 = vpop.f32.mrf.mxu1 }
 0x453   :  { %v2125_v13 = vpop.xlane.xlu1 %2124  ;;  %v2128_v32 = vpop.xlane.xlu0 %2127 }
 0x454   :  { %v17458_v35 = vpop.f32.mrf.mxu1  ;;  %v2203_v36 = vsub.f32 %v17254_v63, %v2125_v13  ;;  %v17461_v16 = vpop.f32.mrf.mxu0  ;;  %v2204_v20 = vsub.f32 %v17256_v0, %v2128_v32 }
 0x455   :  { %2096 = vst.msk [vmem:[#allocation2 + $0xe8] sm:$0xff] %vm191_vm1, %v17458_v35  ;;  %2095 = vst.msk [vmem:[#allocation2 + $0xe0] sm:$0xff] %vm191_vm1, %v17461_v16  ;;  %v2183_v33 = vsel %vm191_vm1, %v17461_v16, -inf  ;;  %v2186_v59 = vsel %vm191_vm1, %v17458_v35, -inf }
 0x456   :  { %v2243_v28 = vmul.f32 1.442695, %v2203_v36  ;;  %v2245_v46 = vmul.f32 1.442695, %v2204_v20  ;;  %v14389_v42 = vpop.f32.mrf.mxu0  ;;  %v14395_v63 = vpop.f32.mrf.mxu1  ;;  %2184 = vmax.xlane.f32.xlu1 %v2183_v33  ;;  %2187 = vmax.xlane.f32.xlu0 %v2186_v59 }
 0x458   :  { %15946 = vpow2.f32 %v2243_v28  ;;  %v1917_v0 = vpop.f32.mrf.mxu0  ;;  %v1966_v49 = vpop.f32.mrf.mxu1 }
 0x459   :  { %15948 = vpow2.f32 %v2245_v46 }
 0x45a   :  { %v14390_v56 = vpop.f32.mrf.mxu0  ;;  %v14396_v54 = vpop.f32.mrf.mxu1 }
 0x45c   :  { %v17472_v13 = vpop.f32.mrf.mxu1  ;;  %v2131_v32 = vpop.xlane.xlu1 %2130 }
 0x45d   :  { %2098 = vst.msk [vmem:[#allocation2 + $0xf8] sm:$0xff] %vm191_vm1, %v17472_v13  ;;  %v2205_v18 = vsub.f32 %v17272_v6, %v2131_v32  ;;  %v17477_v36 = vpop.f32.mrf.mxu0  ;;  %v2134_v20 = vpop.xlane.xlu0 %2133  ;;  %v2192_v33 = vsel %vm191_vm1, %v17472_v13, -inf }
 0x45e   :  { %2097 = vst.msk [vmem:[#allocation2 + $0xf0] sm:$0xff] %vm191_vm1, %v17477_v36  ;;  %v2206_v59 = vsub.f32 %v17274_v7, %v2134_v20  ;;  %v14407_v28 = vpop.f32.mrf.mxu1  ;;  %v2189_v46 = vsel %vm191_vm1, %v17477_v36, -inf  ;;  %2193 = vmax.xlane.f32.xlu0 %v2192_v33 }
 0x45f   :  { %v2247_v42 = vmul.f32 1.442695, %v2205_v18  ;;  %v14401_v63 = vpop.f32.mrf.mxu0  ;;  %2190 = vmax.xlane.f32.xlu1 %v2189_v46 }
 0x460   :  { %v2249_v6 = vmul.f32 1.442695, %v2206_v59  ;;  %v2064_v0 = vpop.f32.mrf.mxu1 }
 0x461   :  { %15950 = vpow2.f32 %v2247_v42  ;;  %v2015_v49 = vpop.f32.mrf.mxu0 }
 0x462   :  { %15952 = vpow2.f32 %v2249_v6  ;;  %v14408_v56 = vpop.f32.mrf.mxu1 }
 0x463   :  { %v14402_v54 = vpop.f32.mrf.mxu0 }
 0x464   :  { %v2137_v32 = vpop.xlane.xlu1 %2136  ;;  %v2140_v3 = vpop.xlane.xlu0 %2139 }
 0x465   :  { %v17486_v27 = vpop.eup %15946  ;;  %v2207_v7 = vsub.f32 %v17290_v30, %v2137_v32  ;;  %v2208_v20 = vsub.f32 %v17292_v45, %v2140_v3 }
 0x466   :  { %v17490_v28 = vpop.eup %15948  ;;  %v2315_v18 = vsel %vm191_vm1, %v17486_v27, 0.0 }
 0x467   :  { %v2251_v33 = vmul.f32 1.442695, %v2207_v7  ;;  %v2253_v59 = vmul.f32 1.442695, %v2208_v20  ;;  %2316 = vadd.xlane.f32.xlu1 %v2315_v18  ;;  %v2318_v46 = vsel %vm191_vm1, %v17490_v28, 0.0 }
 0x468   :  { %2319 = vadd.xlane.f32.xlu0 %v2318_v46 }
 0x469   :  { %15954 = vpow2.f32 %v2251_v33 }
 0x46a   :  { %15956 = vpow2.f32 %v2253_v59 }
 0x46c   :  { %v2143_v42 = vpop.xlane.xlu1 %2142  ;;  %v2146_v63 = vpop.xlane.xlu0 %2145 }
 0x46d   :  { %v2209_v30 = vsub.f32 %v17306_v23, %v2143_v42  ;;  %v2210_v45 = vsub.f32 %v17308_v24, %v2146_v63 }
 0x46e   :  { %v17498_v3 = vpop.eup %15950 }
 0x46f   :  { %v17500_v6 = vpop.eup %15952  ;;  %v2255_v0 = vmul.f32 1.442695, %v2209_v30  ;;  %v2257_v49 = vmul.f32 1.442695, %v2210_v45  ;;  %v2321_v56 = vsel %vm191_vm1, %v17498_v3, 0.0 }
 0x470   :  { %2322 = vadd.xlane.f32.xlu1 %v2321_v56  ;;  %v2324_v54 = vsel %vm191_vm1, %v17500_v6, 0.0  ;;  %v17522_v46 = vpop.permute.xlu1 %3731  ;;  %v17524_v42 = vpop.permute.xlu0 %3683 }
 0x471   :  { %15958 = vpow2.f32 %v2255_v0  ;;  %2325 = vadd.xlane.f32.xlu0 %v2324_v54  ;;  %20453 = vst [vmem:[#allocation42_spill] sm:$0xff] %v17522_v46  ;;  %20454 = vst [vmem:[#allocation43_spill] sm:$0xff] %v17524_v42 }
 0x472   :  { %15960 = vpow2.f32 %v2257_v49 }
 0x474   :  { %v17526_v63 = vpop.permute.xlu1 %3779 }
 0x475   :  { %20455 = vst [vmem:[#allocation44_spill] sm:$0xff] %v17526_v63 }
 0x476   :  { %v17506_v32 = vpop.eup %15954 }
 0x477   :  { %v17508_v23 = vpop.eup %15956  ;;  %v2327_v24 = vsel %vm191_vm1, %v17506_v32, 0.0 }
 0x478   :  { %2328 = vadd.xlane.f32.xlu1 %v2327_v24  ;;  %v2330_v7 = vsel %vm191_vm1, %v17508_v23, 0.0 }
 0x479   :  { %2331 = vadd.xlane.f32.xlu0 %v2330_v7 }
 0x47e   :  { %v17514_v20 = vpop.eup %15958 }
 0x47f   :  { %v17516_v18 = vpop.eup %15960  ;;  %v2333_v33 = vsel %vm191_vm1, %v17514_v20, 0.0 }
 0x480   :  { %2334 = vadd.xlane.f32.xlu1 %v2333_v33  ;;  %v2336_v59 = vsel %vm191_vm1, %v17516_v18, 0.0 }
 0x481   :  { %2337 = vadd.xlane.f32.xlu0 %v2336_v59 }
 0x4a1   :  { %v2152_v30 = vpop.xlane.xlu0 %2151 }
 0x4a2   :  { %v2212_v45 = vsub.f32 %v17326_v62, %v2152_v30 }
 0x4a4   :  { %v2261_v0 = vmul.f32 1.442695, %v2212_v45 }
 0x4a5   :  { %v2149_v49 = vpop.xlane.xlu1 %2148  ;;  %v2158_v56 = vpop.xlane.xlu0 %2157 }
 0x4a6   :  { %15962 = vpow2.f32 %v2261_v0  ;;  %v2211_v54 = vsub.f32 %v17324_v51, %v2149_v49  ;;  %v2214_v24 = vsub.f32 %v17340_v9, %v2158_v56 }
 0x4a8   :  { %v2259_v7 = vmul.f32 1.442695, %v2211_v54  ;;  %v2265_v33 = vmul.f32 1.442695, %v2214_v24 }
 0x4a9   :  { %v2155_v59 = vpop.xlane.xlu1 %2154  ;;  %v2296_v25 = vpop.xlane.xlu0 %2295 }
 0x4aa   :  { %15964 = vpow2.f32 %v2259_v7  ;;  %v2213_v46 = vsub.f32 %v17338_v4, %v2155_v59 }
 0x4ab   :  { %15966 = vpow2.f32 %v2265_v33 }
 0x4ac   :  { %v2263_v63 = vmul.f32 1.442695, %v2213_v46  ;;  %15968 = vrcp.f32 %v2296_v25 }
 0x4ad   :  { %v2293_v42 = vpop.xlane.xlu1 %2292  ;;  %v2164_v62 = vpop.xlane.xlu0 %2163 }
 0x4ae   :  { %15970 = vpow2.f32 %v2263_v63  ;;  %v2216_v30 = vsub.f32 %v17354_v19, %v2164_v62 }
 0x4af   :  { %15972 = vrcp.f32 %v2293_v42 }
 0x4b0   :  { %v2269_v45 = vmul.f32 1.442695, %v2216_v30 }
 0x4b1   :  { %v2161_v51 = vpop.xlane.xlu1 %2160  ;;  %v2302_v0 = vpop.xlane.xlu0 %2301 }
 0x4b2   :  { %15974 = vpow2.f32 %v2269_v45  ;;  %v2215_v9 = vsub.f32 %v17358_v38, %v2161_v51 }
 0x4b3   :  { %v17534_v49 = vpop.eup %15962  ;;  %15976 = vrcp.f32 %v2302_v0 }
 0x4b4   :  { %v2267_v56 = vmul.f32 1.442695, %v2215_v9  ;;  %v2342_v4 = vsel %vm191_vm1, %v17534_v49, 0.0 }
 0x4b5   :  { %v2299_v25 = vpop.xlane.xlu1 %2298  ;;  %2343 = vadd.xlane.f32.xlu0 %v2342_v4  ;;  %v2170_v46 = vpop.xlane.xlu0 %2169 }
 0x4b6   :  { %15978 = vpow2.f32 %v2267_v56  ;;  %v2218_v19 = vsub.f32 %v17372_v44, %v2170_v46  ;;  %v20456_v46 = vmov 0.0  }
 0x4b7   :  { %v17539_v42 = vpop.eup %15964  ;;  %15980 = vrcp.f32 %v2299_v25  ;;  %v2633_v25 = vsel %vm204_vm0, %v17248_v58, 0  ;;  %v2585_v58 = vsel %vm204_vm0, %v17246_v52, 0 }
 0x4b8   :  { %v17541_v63 = vpop.eup %15966  ;;  %v2273_v54 = vmul.f32 1.442695, %v2218_v19  ;;  %v2339_v38 = vsel %vm191_vm1, %v17539_v42, 0.0 }
 0x4b9   :  { %v15969_v24 = vpop.eup %15968  ;;  %2340 = vadd.xlane.f32.xlu1 %v2339_v38  ;;  %v2167_v7 = vpop.xlane.xlu1 %2166  ;;  %v2348_v33 = vsel %vm191_vm1, %v17541_v63, 0.0 }
 0x4ba   :  { %v2308_v59 = vpop.xlane.xlu0 %2307  ;;  %15982 = vpow2.f32 %v2273_v54  ;;  %v2217_v62 = vsub.f32 %v17370_v39, %v2167_v7  ;;  %2349 = vadd.xlane.f32.xlu0 %v2348_v33  ;;  %v2420_v44 = vmul.f32 %v15969_v24, %v17390_v53 }
 0x4bb   :  { %v17549_v30 = vpop.eup %15970  ;;  %15984 = vrcp.f32 %v2308_v59  ;;  %v2729_v59 = vsel %vm204_vm0, %v17252_v61, 0 }
 0x4bc   :  { %v15973_v45 = vpop.eup %15972  ;;  %v2271_v51 = vmul.f32 1.442695, %v2217_v62  ;;  %v2452_v0 = vpack.c.bf16 %v2420_v44, %v2420_v44  ;;  %v2345_v9 = vsel %vm191_vm1, %v17549_v30, 0.0 }
 0x4bd   :  { %2346 = vadd.xlane.f32.xlu1 %v2345_v9  ;;  %v2305_v56 = vpop.xlane.xlu1 %2304  ;;  %v2419_v4 = vmul.f32 %v15973_v45, %v17396_v47 }
 0x4be   :  { %15986 = vpow2.f32 %v2271_v51  ;;  %14418 = vmatmul.mubr.msk.bf16.vlgmr.msra.gmra.mxu1 %vm191_vm1, %v2452_v0 }
 0x4bf   :  { %v17557_v39 = vpop.eup %15974  ;;  %14428 = vmatpush3.bf16.msra.mxu1 %v2633_v25  ;;  %15988 = vrcp.f32 %v2305_v56  ;;  %v2451_v53 = vpack.c.bf16 %v2419_v4, %v2419_v4  ;;  %14429 = vmatprep.mubr.msk.bf16.mxu1 %vm16589_vm3, %v20456_v46  ;;  %v2825_v4 = vsel %vm204_vm0, %v17268_v29, 0 }
 0x4c0   :  { %v15977_v19 = vpop.eup %15976  ;;  %v2354_v54 = vsel %vm191_vm1, %v17557_v39, 0.0  ;;  %14439 = vmatprep.subr.bf16.mxu1 %v20456_v46 }
 0x4c1   :  { %14412 = vmatmul.mubr.msk.bf16.vlgmr.msra.gmra.mxu0 %vm191_vm1, %v2451_v53  ;;  %2355 = vadd.xlane.f32.xlu0 %v2354_v54  ;;  %v2422_v47 = vmul.f32 %v15977_v19, %v17402_v40 }
 0x4c2   :  { %14422 = vmatpush3.bf16.msra.mxu0 %v2585_v58  ;;  %14423 = vmatprep.mubr.msk.bf16.mxu0 %vm16589_vm3, %v20456_v46 }
 0x4c3   :  { %v17570_v38 = vpop.eup %15978  ;;  %v2454_v24 = vpack.c.bf16 %v2422_v47, %v2422_v47  ;;  %14433 = vmatprep.subr.bf16.mxu0 %v20456_v46 }
 0x4c4   :  { %v15981_v7 = vpop.eup %15980  ;;  %v2351_v33 = vsel %vm191_vm1, %v17570_v38, 0.0 }
 0x4c5   :  { %2352 = vadd.xlane.f32.xlu1 %v2351_v33  ;;  %v2421_v52 = vmul.f32 %v15981_v7, %v17408_v48  ;;  %v2681_v48 = vsel %vm204_vm0, %v17250_v60, 0 }
 0x4c6   :  { %14430 = vmatmul.mubr.msk.bf16.vlgmr.msra.gmra.mxu1 %vm191_vm1, %v2454_v24 }
 0x4c7   :  { %v17579_v40 = vpop.eup %15982  ;;  %14440 = vmatpush3.bf16.msra.mxu1 %v2729_v59  ;;  %v2453_v62 = vpack.c.bf16 %v2421_v52, %v2421_v52  ;;  %14441 = vmatprep.mubr.msk.bf16.mxu1 %vm16589_vm3, %v20456_v46 }
 0x4c8   :  { %v15985_v44 = vpop.eup %15984  ;;  %v2360_v45 = vsel %vm191_vm1, %v17579_v40, 0.0  ;;  %14451 = vmatprep.subr.bf16.mxu1 %v20456_v46 }
 0x4c9   :  { %14424 = vmatmul.mubr.msk.bf16.vlgmr.msra.gmra.mxu0 %vm191_vm1, %v2453_v62  ;;  %2361 = vadd.xlane.f32.xlu0 %v2360_v45  ;;  %v2424_v61 = vmul.f32 %v15985_v44, %v17414_v15 }
 0x4ca   :  { %14434 = vmatpush3.bf16.msra.mxu0 %v2681_v48  ;;  %14435 = vmatprep.mubr.msk.bf16.mxu0 %vm16589_vm3, %v20456_v46 }
 0x4cb   :  { %v17592_v51 = vpop.eup %15986  ;;  %v2456_v0 = vpack.c.bf16 %v2424_v61, %v2424_v61  ;;  %14445 = vmatprep.subr.bf16.mxu0 %v20456_v46 }
 0x4cc   :  { %v15989_v9 = vpop.eup %15988  ;;  %v2357_v56 = vsel %vm191_vm1, %v17592_v51, 0.0 }
 0x4cd   :  { %2358 = vadd.xlane.f32.xlu1 %v2357_v56  ;;  %v2423_v60 = vmul.f32 %v15989_v9, %v17420_v31  ;;  %v2777_v31 = vsel %vm204_vm0, %v17258_v12, 0  ;;  %v2873_v56 = vsel %vm204_vm0, %v17270_v5, 0 }
 0x4ce   :  { %14442 = vmatmul.mubr.msk.bf16.vlgmr.msra.gmra.mxu1 %vm191_vm1, %v2456_v0 }
 0x4cf   :  { %14452 = vmatpush3.bf16.msra.mxu1 %v2825_v4  ;;  %v2173_v15 = vpop.xlane.xlu1 %2172  ;;  %v2176_v25 = vpop.xlane.xlu0 %2175  ;;  %v2455_v53 = vpack.c.bf16 %v2423_v60, %v2423_v60  ;;  %14453 = vmatprep.mubr.msk.bf16.mxu1 %vm16589_vm3, %v20456_v46 }
 0x4d0   :  { %v2219_v19 = vsub.f32 %v17426_v1, %v2173_v15  ;;  %v2220_v54 = vsub.f32 %v17428_v57, %v2176_v25  ;;  %14463 = vmatprep.subr.bf16.mxu1 %v20456_v46  ;;  %v2921_v15 = vsel %vm204_vm0, %v17276_v8, 0 }
 0x4d1   :  { %14436 = vmatmul.mubr.msk.bf16.vlgmr.msra.gmra.mxu0 %vm191_vm1, %v2455_v53 }
 0x4d2   :  { %v2275_v29 = vmul.f32 1.442695, %v2219_v19  ;;  %v2277_v58 = vmul.f32 1.442695, %v2220_v54  ;;  %14446 = vmatpush3.bf16.msra.mxu0 %v2777_v31  ;;  %14447 = vmatprep.mubr.msk.bf16.mxu0 %vm16589_vm3, %v20456_v46 }
 0x4d3   :  { %v2311_v47 = vpop.xlane.xlu1 %2310  ;;  %v2314_v24 = vpop.xlane.xlu0 %2313  ;;  %14457 = vmatprep.subr.bf16.mxu0 %v20456_v46 }
 0x4d4   :  { %15990 = vpow2.f32 %v2275_v29 }
 0x4d5   :  { %15992 = vpow2.f32 %v2277_v58 }
 0x4d6   :  { %15994 = vrcp.f32 %v2311_v47 }
 0x4d7   :  { %15996 = vrcp.f32 %v2314_v24  ;;  %v2179_v1 = vpop.xlane.xlu1 %2178  ;;  %v2182_v57 = vpop.xlane.xlu0 %2181 }
 0x4d8   :  { %v2221_v12 = vsub.f32 %v17446_v34, %v2179_v1  ;;  %v2222_v7 = vsub.f32 %v17448_v43, %v2182_v57 }
 0x4da   :  { %v2279_v33 = vmul.f32 1.442695, %v2221_v12  ;;  %v2281_v52 = vmul.f32 1.442695, %v2222_v7 }
 0x4dc   :  { %15998 = vpow2.f32 %v2279_v33 }
 0x4dd   :  { %16000 = vpow2.f32 %v2281_v52  ;;  %v2969_v52 = vsel %vm204_vm0, %v17286_v26, 0 }
 0x4df   :  { %v2185_v60 = vpop.xlane.xlu1 %2184  ;;  %v2188_v25 = vpop.xlane.xlu0 %2187 }
 0x4e1   :  { %v17614_v59 = vpop.eup %15990 }
 0x4e2   :  { %v17616_v62 = vpop.eup %15992  ;;  %v2363_v44 = vsel %vm191_vm1, %v17614_v59, 0.0 }
 0x4e3   :  { %v15995_v45 = vpop.eup %15994  ;;  %2364 = vadd.xlane.f32.xlu1 %v2363_v44  ;;  %v2366_v48 = vsel %vm191_vm1, %v17616_v62, 0.0 }
 0x4e4   :  { %v15997_v61 = vpop.eup %15996  ;;  %2367 = vadd.xlane.f32.xlu0 %v2366_v48  ;;  %v2425_v34 = vmul.f32 %v15995_v45, %v17430_v2 }
 0x4e5   :  { %v2426_v43 = vmul.f32 %v15997_v61, %v17440_v11 }
 0x4e6   :  { %v2457_v0 = vpack.c.bf16 %v2425_v34, %v2425_v34 }
 0x4e7   :  { %v2458_v9 = vpack.c.bf16 %v2426_v43, %v2426_v43  ;;  %v2194_v53 = vpop.xlane.xlu0 %2193 }
 0x4e8   :  { %14448 = vmatmul.mubr.msk.bf16.vlgmr.msra.gmra.mxu0 %vm191_vm1, %v2457_v0  ;;  %v2191_v8 = vpop.xlane.xlu1 %2190 }
 0x4e9   :  { %v17627_v4 = vpop.eup %15998  ;;  %14454 = vmatmul.mubr.msk.bf16.vlgmr.msra.gmra.mxu1 %vm191_vm1, %v2458_v9  ;;  %14458 = vmatpush3.bf16.msra.mxu0 %v2873_v56  ;;  %v2225_v43 = vsub.f32 %v17477_v36, %v2191_v8  ;;  %v2226_v56 = vsub.f32 %v17472_v13, %v2194_v53 }
 0x4ea   :  { %v17632_v2 = vpop.eup %16000  ;;  %14464 = vmatpush3.bf16.msra.mxu1 %v2921_v15  ;;  %v2369_v11 = vsel %vm191_vm1, %v17627_v4, 0.0  ;;  %14459 = vmatprep.mubr.msk.bf16.mxu0 %vm16589_vm3, %v20456_v46 }
 0x4eb   :  { %2370 = vadd.xlane.f32.xlu1 %v2369_v11  ;;  %v2372_v5 = vsel %vm191_vm1, %v17632_v2, 0.0  ;;  %14465 = vmatprep.mubr.msk.bf16.mxu1 %vm16589_vm3, %v20456_v46  ;;  %v2289_v13 = vmul.f32 1.442695, %v2226_v56  ;;  %v3209_v11 = vsel %vm204_vm0, %v17304_v50, 0  ;;  %v20461_v56 = vld [vmem:[#allocation40_spill] sm:$0xff] }
 0x4ec   :  { %2373 = vadd.xlane.f32.xlu0 %v2372_v5  ;;  %14469 = vmatprep.subr.bf16.mxu0 %v20456_v46 }
 0x4ed   :  { %14475 = vmatprep.subr.bf16.mxu1 %v20456_v46 }
 0x4f0   :  { %v2317_v19 = vpop.xlane.xlu1 %2316 }
 0x4f1   :  { %16002 = vrcp.f32 %v2317_v19  ;;  %v2320_v54 = vpop.xlane.xlu0 %2319  ;;  %v3257_v19 = vsel %vm204_vm0, %v17322_v41, 0 }
 0x4f2   :  { %16004 = vrcp.f32 %v2320_v54 }
 0x4f9   :  { %v2323_v31 = vpop.xlane.xlu1 %2322 }
 0x4fa   :  { %16006 = vrcp.f32 %v2323_v31  ;;  %v2326_v29 = vpop.xlane.xlu0 %2325  ;;  %v3305_v31 = vsel %vm204_vm0, %v17320_v10, 0 }
 0x4fb   :  { %16008 = vrcp.f32 %v2326_v29 }
 0x4fc   :  { %3875 = vrot.lane.b32.xlu1 %v17006_v14, %s16583_s1  ;;  %v3017_v14 = vsel %vm204_vm0, %v17288_v55, 0  ;;  %v2224_v55 = vsub.f32 %v17458_v35, %v2188_v25  ;;  %v3113_v35 = vsel %vm204_vm0, %v17350_v21, 0  ;;  %v3161_v25 = vsel %vm204_vm0, %v17310_v37, 0 }
 0x4fe   :  { %v16003_v58 = vpop.eup %16002  ;;  %v2285_v9 = vmul.f32 1.442695, %v2224_v55 }
 0x4ff   :  { %v16005_v47 = vpop.eup %16004  ;;  %v2427_v24 = vmul.f32 %v16003_v58, %v17486_v27  ;;  %v2223_v27 = vsub.f32 %v17461_v16, %v2185_v60  ;;  %v3065_v16 = vsel %vm204_vm0, %v17302_v22, 0 }
 0x500   :  { %v2428_v1 = vmul.f32 %v16005_v47, %v17490_v28  ;;  %v20457_v47 = vld [vmem:[#allocation33_spill] sm:$0xff] }
 0x501   :  { %v2329_v57 = vpop.xlane.xlu1 %2328  ;;  %v2459_v12 = vpack.c.bf16 %v2427_v24, %v2427_v24  ;;  %v2283_v34 = vmul.f32 1.442695, %v2223_v27  ;;  %v20458_v24 = vld [vmem:[#allocation34_spill] sm:$0xff] }
 0x502   :  { %16010 = vrcp.f32 %v2329_v57  ;;  %3827 = vrot.lane.b32.xlu0 %v17008_v17, %s16583_s1  ;;  %v2332_v7 = vpop.xlane.xlu0 %2331  ;;  %v2460_v33 = vpack.c.bf16 %v2428_v1, %v2428_v1 }
 0x503   :  { %16012 = vrcp.f32 %v2332_v7  ;;  %14460 = vmatmul.mubr.msk.bf16.vlgmr.msra.gmra.mxu0 %vm191_vm1, %v2459_v12 }
 0x504   :  { %14466 = vmatmul.mubr.msk.bf16.vlgmr.msra.gmra.mxu1 %vm191_vm1, %v2460_v33  ;;  %14470 = vmatpush3.bf16.msra.mxu0 %v2969_v52 }
 0x505   :  { %14476 = vmatpush3.bf16.msra.mxu1 %v3017_v14  ;;  %14471 = vmatprep.mubr.msk.bf16.mxu0 %vm16589_vm3, %v20456_v46 }
 0x506   :  { %14477 = vmatprep.mubr.msk.bf16.mxu1 %vm16589_vm3, %v20456_v46  ;;  %14481 = vmatprep.subr.bf16.mxu0 %v20456_v46 }
 0x507   :  { %v16007_v17 = vpop.eup %16006  ;;  %14487 = vmatprep.subr.bf16.mxu1 %v20456_v46 }
 0x508   :  { %v16009_v26 = vpop.eup %16008  ;;  %v2429_v28 = vmul.f32 %v16007_v17, %v17498_v3  ;;  %v2287_v3 = vmul.f32 1.442695, %v2225_v43  ;;  %v20460_v43 = vld [vmem:[#allocation36_spill] sm:$0xff] }
 0x509   :  { %v2335_v44 = vpop.xlane.xlu1 %2334  ;;  %v2430_v45 = vmul.f32 %v16009_v26, %v17500_v6 }
 0x50a   :  { %16014 = vrcp.f32 %v2335_v44  ;;  %v2338_v48 = vpop.xlane.xlu0 %2337  ;;  %v2461_v61 = vpack.c.bf16 %v2429_v28, %v2429_v28  ;;  %v20459_v28 = vld [vmem:[#allocation35_spill] sm:$0xff] }
 0x50b   :  { %16016 = vrcp.f32 %v2338_v48  ;;  %v2462_v0 = vpack.c.bf16 %v2430_v45, %v2430_v45  ;;  %v3401_v44 = vsel %vm204_vm0, %v20459_v28, 0 }
 0x50c   :  { %14472 = vmatmul.mubr.msk.bf16.vlgmr.msra.gmra.mxu0 %vm191_vm1, %v2461_v61  ;;  %16018 = vpow2.f32 %v2283_v34 }
 0x50d   :  { %14478 = vmatmul.mubr.msk.bf16.vlgmr.msra.gmra.mxu1 %vm191_vm1, %v2462_v0  ;;  %14482 = vmatpush3.bf16.msra.mxu0 %v3065_v16  ;;  %16020 = vpow2.f32 %v2285_v9  ;;  %v3353_v0 = vsel %vm204_vm0, %v20460_v43, 0 }
 0x50e   :  { %14488 = vmatpush3.bf16.msra.mxu1 %v3113_v35  ;;  %14483 = vmatprep.mubr.msk.bf16.mxu0 %vm16589_vm3, %v20456_v46  ;;  %16022 = vpow2.f32 %v2287_v3  ;;  %v3497_v35 = vsel %vm204_vm0, %v20461_v56, 0 }
 0x50f   :  { %v16011_v36 = vpop.eup %16010  ;;  %14489 = vmatprep.mubr.msk.bf16.mxu1 %vm16589_vm3, %v20456_v46  ;;  %14493 = vmatprep.subr.bf16.mxu0 %v20456_v46  ;;  %16024 = vpow2.f32 %v2289_v13  ;;  %v20462_v13 = vld [vmem:[#allocation38_spill] sm:$0xff] }
 0x510   :  { %v16013_v22 = vpop.eup %16012  ;;  %14499 = vmatprep.subr.bf16.mxu1 %v20456_v46  ;;  %v2431_v21 = vmul.f32 %v16011_v36, %v17506_v32 }
 0x511   :  { %v2432_v6 = vmul.f32 %v16013_v22, %v17508_v23 }
 0x512   :  { %v2463_v60 = vpack.c.bf16 %v2431_v21, %v2431_v21  ;;  %v3449_v21 = vsel %vm204_vm0, %v20462_v13, 0 }
 0x513   :  { %v2464_v15 = vpack.c.bf16 %v2432_v6, %v2432_v6 }
 0x514   :  { %14484 = vmatmul.mubr.msk.bf16.vlgmr.msra.gmra.mxu0 %vm191_vm1, %v2463_v60 }
 0x515   :  { %14490 = vmatmul.mubr.msk.bf16.vlgmr.msra.gmra.mxu1 %vm191_vm1, %v2464_v15  ;;  %14494 = vmatpush3.bf16.msra.mxu0 %v3161_v25 }
 0x516   :  { %14500 = vmatpush3.bf16.msra.mxu1 %v3209_v11  ;;  %14495 = vmatprep.mubr.msk.bf16.mxu0 %vm16589_vm3, %v20456_v46 }
 0x517   :  { %v16015_v32 = vpop.eup %16014  ;;  %14501 = vmatprep.mubr.msk.bf16.mxu1 %vm16589_vm3, %v20456_v46  ;;  %14505 = vmatprep.subr.bf16.mxu0 %v20456_v46 }
 0x518   :  { %v16017_v37 = vpop.eup %16016  ;;  %14511 = vmatprep.subr.bf16.mxu1 %v20456_v46  ;;  %v2433_v23 = vmul.f32 %v16015_v32, %v17514_v20 }
 0x519   :  { %v2434_v50 = vmul.f32 %v16017_v37, %v17516_v18  ;;  %v17696_v53 = vpop.eup %16018  ;;  %v20464_v37 = vld [vmem:[#allocation39_spill] sm:$0xff] }
 0x51a   :  { %v2465_v5 = vpack.c.bf16 %v2433_v23, %v2433_v23  ;;  %v17701_v54 = vpop.eup %16020  ;;  %v2375_v20 = vsel %vm191_vm1, %v17696_v53, 0.0  ;;  %v3545_v23 = vsel %vm204_vm0, %v20464_v37, 0 }
 0x51b   :  { %v2466_v8 = vpack.c.bf16 %v2434_v50, %v2434_v50  ;;  %v17713_v41 = vpop.eup %16022  ;;  %v2378_v10 = vsel %vm191_vm1, %v17701_v54, 0.0 }
 0x51c   :  { %14496 = vmatmul.mubr.msk.bf16.vlgmr.msra.gmra.mxu0 %vm191_vm1, %v2465_v5  ;;  %v17718_v18 = vpop.eup %16024  ;;  %v2381_v29 = vsel %vm191_vm1, %v17713_v41, 0.0  ;;  %v20465_v5 = vld [vmem:[#allocation43_spill] sm:$0xff] }
 0x51d   :  { %14502 = vmatmul.mubr.msk.bf16.vlgmr.msra.gmra.mxu1 %vm191_vm1, %v2466_v8  ;;  %14506 = vmatpush3.bf16.msra.mxu0 %v3257_v19  ;;  %v2384_v58 = vsel %vm191_vm1, %v17718_v18, 0.0 }
 0x51e   :  { %14512 = vmatpush3.bf16.msra.mxu1 %v3305_v31  ;;  %14513 = vmatprep.mubr.msk.bf16.mxu1 %vm16589_vm3, %v20456_v46  ;;  %v20466_v31 = vld [vmem:[#allocation41_spill] sm:$0xff] }
 0x51f   :  { %14523 = vmatprep.subr.bf16.mxu1 %v20456_v46  ;;  %14507 = vmatprep.mubr.msk.bf16.mxu0 %vm16589_vm3, %v20456_v46 }
 0x520   :  { %2376 = vadd.xlane.f32.xlu1 %v2375_v20  ;;  %14517 = vmatprep.subr.bf16.mxu0 %v20456_v46  ;;  %v3641_v20 = vsel %vm204_vm0, %v20466_v31, 0 }
 0x521   :  { %2379 = vadd.xlane.f32.xlu0 %v2378_v10 }
 0x524   :  { %2382 = vadd.xlane.f32.xlu1 %v2381_v29 }
 0x525   :  { %2385 = vadd.xlane.f32.xlu0 %v2384_v58 }
 0x535   :  { %3971 = vrot.lane.b32.xlu1 %v20457_v47, %s16583_s1 }
 0x53b   :  { %3923 = vrot.lane.b32.xlu0 %v20458_v24, %s16583_s1 }
 0x53e   :  { %v2344_v1 = vpop.xlane.xlu0 %2343 }
 0x53f   :  { %16026 = vrcp.f32 %v2344_v1 }
 0x542   :  { %v2341_v57 = vpop.xlane.xlu1 %2340 }
 0x543   :  { %16028 = vrcp.f32 %v2341_v57  ;;  %v2350_v12 = vpop.xlane.xlu0 %2349 }
 0x544   :  { %16030 = vrcp.f32 %v2350_v12 }
 0x546   :  { %v2347_v7 = vpop.xlane.xlu1 %2346 }
 0x547   :  { %16032 = vrcp.f32 %v2347_v7 }
 0x54a   :  { %v2356_v33 = vpop.xlane.xlu0 %2355 }
 0x54b   :  { %16034 = vrcp.f32 %v2356_v33  ;;  %v20467_v33 = vld [vmem:[#allocation42_spill] sm:$0xff] }
 0x54c   :  { %v16027_v52 = vpop.eup %16026 }
 0x54d   :  { %v2436_v14 = vmul.f32 %v16027_v52, %v17534_v49  ;;  %v3737_v52 = vsel %vm204_vm0, %v20467_v33, 0 }
 0x54e   :  { %v2353_v17 = vpop.xlane.xlu1 %2352 }
 0x54f   :  { %16036 = vrcp.f32 %v2353_v17  ;;  %v2468_v27 = vpack.c.bf16 %v2436_v14, %v2436_v14  ;;  %v20468_v14 = vld [vmem:[#allocation44_spill] sm:$0xff] }
 0x550   :  { %v16029_v26 = vpop.eup %16028  ;;  %v3785_v17 = vsel %vm204_vm0, %v20468_v14, 0 }
 0x551   :  { %v16031_v55 = vpop.eup %16030  ;;  %14514 = vmatmul.mubr.msk.bf16.vlgmr.msra.gmra.mxu1 %vm191_vm1, %v2468_v27  ;;  %v2435_v45 = vmul.f32 %v16029_v26, %v17539_v42 }
 0x552   :  { %14524 = vmatpush3.bf16.msra.mxu1 %v3401_v44  ;;  %v2362_v48 = vpop.xlane.xlu0 %2361  ;;  %14525 = vmatprep.mubr.msk.bf16.mxu1 %vm16589_vm3, %v20456_v46  ;;  %v2438_v61 = vmul.f32 %v16031_v55, %v17541_v63 }
 0x553   :  { %16038 = vrcp.f32 %v2362_v48  ;;  %v2467_v49 = vpack.c.bf16 %v2435_v45, %v2435_v45  ;;  %14535 = vmatprep.subr.bf16.mxu1 %v20456_v46 }
 0x554   :  { %v16033_v34 = vpop.eup %16032  ;;  %v2470_v42 = vpack.c.bf16 %v2438_v61, %v2438_v61 }
 0x555   :  { %14508 = vmatmul.mubr.msk.bf16.vlgmr.msra.gmra.mxu0 %vm191_vm1, %v2467_v49  ;;  %v2437_v63 = vmul.f32 %v16033_v34, %v17549_v30 }
 0x556   :  { %14518 = vmatpush3.bf16.msra.mxu0 %v3353_v0  ;;  %v2359_v16 = vpop.xlane.xlu1 %2358  ;;  %14519 = vmatprep.mubr.msk.bf16.mxu0 %vm16589_vm3, %v20456_v46 }
 0x557   :  { %16040 = vrcp.f32 %v2359_v16  ;;  %14529 = vmatprep.subr.bf16.mxu0 %v20456_v46  ;;  %v2469_v3 = vpack.c.bf16 %v2437_v63, %v2437_v63 }
 0x558   :  { %v16035_v9 = vpop.eup %16034 }
 0x559   :  { %14526 = vmatmul.mubr.msk.bf16.vlgmr.msra.gmra.mxu1 %vm191_vm1, %v2470_v42  ;;  %v2440_v36 = vmul.f32 %v16035_v9, %v17557_v39  ;;  %v20463_v39 = vld [vmem:[#allocation37_spill] sm:$0xff] }
 0x55a   :  { %14536 = vmatpush3.bf16.msra.mxu1 %v3497_v35  ;;  %14537 = vmatprep.mubr.msk.bf16.mxu1 %vm16589_vm3, %v20456_v46  ;;  %v3593_v15 = vsel %vm204_vm0, %v20463_v39, 0 }
 0x55b   :  { %14547 = vmatprep.subr.bf16.mxu1 %v20456_v46  ;;  %v2472_v30 = vpack.c.bf16 %v2440_v36, %v2440_v36 }
 0x55c   :  { %v16037_v22 = vpop.eup %16036 }
 0x55d   :  { %14520 = vmatmul.mubr.msk.bf16.vlgmr.msra.gmra.mxu0 %vm191_vm1, %v2469_v3  ;;  %v2439_v6 = vmul.f32 %v16037_v22, %v17570_v38 }
 0x55e   :  { %14530 = vmatpush3.bf16.msra.mxu0 %v3449_v21  ;;  %14531 = vmatprep.mubr.msk.bf16.mxu0 %vm16589_vm3, %v20456_v46 }
 0x55f   :  { %14541 = vmatprep.subr.bf16.mxu0 %v20456_v46  ;;  %v2471_v11 = vpack.c.bf16 %v2439_v6, %v2439_v6 }
 0x560   :  { %v16039_v60 = vpop.eup %16038 }
 0x561   :  { %14538 = vmatmul.mubr.msk.bf16.vlgmr.msra.gmra.mxu1 %vm191_vm1, %v2472_v30  ;;  %v2442_v25 = vmul.f32 %v16039_v60, %v17579_v40  ;;  %v3689_v40 = vsel %vm204_vm0, %v20465_v5, 0 }
 0x562   :  { %14548 = vmatpush3.bf16.msra.mxu1 %v3593_v15  ;;  %14549 = vmatprep.mubr.msk.bf16.mxu1 %vm16589_vm3, %v20456_v46 }
 0x563   :  { %14559 = vmatprep.subr.bf16.mxu1 %v20456_v46  ;;  %v2474_v38 = vpack.c.bf16 %v2442_v25, %v2442_v25 }
 0x564   :  { %v16041_v32 = vpop.eup %16040 }
 0x565   :  { %14532 = vmatmul.mubr.msk.bf16.vlgmr.msra.gmra.mxu0 %vm191_vm1, %v2471_v11  ;;  %v2441_v50 = vmul.f32 %v16041_v32, %v17592_v51 }
 0x566   :  { %14542 = vmatpush3.bf16.msra.mxu0 %v3545_v23  ;;  %14543 = vmatprep.mubr.msk.bf16.mxu0 %vm16589_vm3, %v20456_v46 }
 0x567   :  { %14553 = vmatprep.subr.bf16.mxu0 %v20456_v46  ;;  %v2473_v8 = vpack.c.bf16 %v2441_v50, %v2441_v50 }
 0x569   :  { %14550 = vmatmul.mubr.msk.bf16.vlgmr.msra.gmra.mxu1 %vm191_vm1, %v2474_v38 }
 0x56a   :  { %14560 = vmatpush3.bf16.msra.mxu1 %v3689_v40  ;;  %14561 = vmatprep.mubr.msk.bf16.mxu1 %vm16589_vm3, %v20456_v46 }
 0x56b   :  { %14571 = vmatprep.subr.bf16.mxu1 %v20456_v46 }
 0x56c   :  { %v2365_v19 = vpop.xlane.xlu1 %2364 }
 0x56d   :  { %16042 = vrcp.f32 %v2365_v19  ;;  %v2368_v51 = vpop.xlane.xlu0 %2367  ;;  %14544 = vmatmul.mubr.msk.bf16.vlgmr.msra.gmra.mxu0 %vm191_vm1, %v2473_v8 }
 0x56e   :  { %16044 = vrcp.f32 %v2368_v51  ;;  %14554 = vmatpush3.bf16.msra.mxu0 %v3641_v20  ;;  %14555 = vmatprep.mubr.msk.bf16.mxu0 %vm16589_vm3, %v20456_v46 }
 0x56f   :  { %14565 = vmatprep.subr.bf16.mxu0 %v20456_v46 }
 0x574   :  { %v2371_v10 = vpop.xlane.xlu1 %2370 }
 0x575   :  { %16046 = vrcp.f32 %v2371_v10  ;;  %v2374_v29 = vpop.xlane.xlu0 %2373 }
 0x576   :  { %16048 = vrcp.f32 %v2374_v29 }
 0x578   :  { %v3876_v34 = vpop.permute.xlu1 %3875 }
 0x579   :  { %v3828_v48 = vpop.permute.xlu0 %3827 }
 0x57a   :  { %v16043_v58 = vpop.eup %16042  ;;  %v3833_v42 = vsel %vm204_vm0, %v3828_v48, 0 }
 0x57b   :  { %v16045_v47 = vpop.eup %16044  ;;  %v2443_v24 = vmul.f32 %v16043_v58, %v17614_v59 }
 0x57c   :  { %v2444_v1 = vmul.f32 %v16045_v47, %v17616_v62 }
 0x57d   :  { %v2475_v57 = vpack.c.bf16 %v2443_v24, %v2443_v24 }
 0x57e   :  { %v2476_v12 = vpack.c.bf16 %v2444_v1, %v2444_v1  ;;  %v17786_v7 = vpop.f32.mrf.mxu1 }
 0x57f   :  { %14556 = vmatmul.mubr.msk.bf16.vlgmr.msra.gmra.mxu0 %vm191_vm1, %v2475_v57 }
 0x580   :  { %v14419_v27 = vpop.f32.mrf.mxu1  ;;  %14562 = vmatmul.mubr.msk.bf16.vlgmr.msra.gmra.mxu1 %vm191_vm1, %v2476_v12  ;;  %14566 = vmatpush3.bf16.msra.mxu0 %v3737_v52 }
 0x581   :  { %14572 = vmatpush3.bf16.msra.mxu1 %v3785_v17  ;;  %v17794_v59 = vpop.f32.mrf.mxu0  ;;  %14567 = vmatprep.mubr.msk.bf16.mxu0 %vm16589_vm3, %v20456_v46 }
 0x582   :  { %v16047_v62 = vpop.eup %16046  ;;  %v2576_v26 = vpop.f32.mrf.mxu1  ;;  %14573 = vmatprep.mubr.msk.bf16.mxu1 %vm16589_vm3, %v20456_v46  ;;  %14577 = vmatprep.subr.bf16.mxu0 %v20456_v46 }
 0x583   :  { %v16049_v55 = vpop.eup %16048  ;;  %v2445_v28 = vmul.f32 %v16047_v62, %v17627_v4  ;;  %v14413_v44 = vpop.f32.mrf.mxu0  ;;  %14583 = vmatprep.subr.bf16.mxu1 %v20456_v46  ;;  %v3881_v4 = vsel %vm204_vm0, %v3876_v34, 0 }
 0x584   :  { %v2446_v45 = vmul.f32 %v16049_v55, %v17632_v2  ;;  %v14420_v61 = vpop.f32.mrf.mxu1 }
 0x585   :  { %v2477_v49 = vpack.c.bf16 %v2445_v28, %v2445_v28  ;;  %v2528_v43 = vpop.f32.mrf.mxu0 }
 0x586   :  { %v2478_v0 = vpack.c.bf16 %v2446_v45, %v2446_v45  ;;  %v17804_v16 = vpop.f32.mrf.mxu1 }
 0x587   :  { %v14414_v63 = vpop.f32.mrf.mxu0  ;;  %14568 = vmatmul.mubr.msk.bf16.vlgmr.msra.gmra.mxu0 %vm191_vm1, %v2477_v49 }
 0x588   :  { %v14431_v9 = vpop.f32.mrf.mxu1  ;;  %14574 = vmatmul.mubr.msk.bf16.vlgmr.msra.gmra.mxu1 %vm191_vm1, %v2478_v0  ;;  %14578 = vmatpush3.bf16.msra.mxu0 %v3833_v42 }
 0x589   :  { %14584 = vmatpush3.bf16.msra.mxu1 %v3881_v4  ;;  %v17810_v2 = vpop.f32.mrf.mxu0  ;;  %14579 = vmatprep.mubr.msk.bf16.mxu0 %vm16589_vm3, %v20456_v46 }
 0x58a   :  { %v2672_v56 = vpop.f32.mrf.mxu1  ;;  %14585 = vmatprep.mubr.msk.bf16.mxu1 %vm16589_vm3, %v20456_v46  ;;  %14589 = vmatprep.subr.bf16.mxu0 %v20456_v46 }
 0x58b   :  { %v14425_v35 = vpop.f32.mrf.mxu0  ;;  %14595 = vmatprep.subr.bf16.mxu1 %v20456_v46 }
 0x58c   :  { %v14432_v36 = vpop.f32.mrf.mxu1 }
 0x58d   :  { %v2624_v3 = vpop.f32.mrf.mxu0 }
 0x58e   :  { %v17818_v22 = vpop.f32.mrf.mxu1 }
 0x58f   :  { %v14426_v13 = vpop.f32.mrf.mxu0 }
 0x590   :  { %v14443_v21 = vpop.f32.mrf.mxu1 }
 0x591   :  { %v17820_v30 = vpop.f32.mrf.mxu0 }
 0x592   :  { %v2768_v6 = vpop.f32.mrf.mxu1 }
 0x593   :  { %v14437_v60 = vpop.f32.mrf.mxu0 }
 0x594   :  { %v14444_v39 = vpop.f32.mrf.mxu1 }
 0x595   :  { %v2720_v15 = vpop.f32.mrf.mxu0 }
 0x597   :  { %v14438_v25 = vpop.f32.mrf.mxu0 }
 0x5a8   :  { %v17822_v11 = vpop.f32.mrf.mxu0 }
 0x5a9   :  { %v17824_v32 = vpop.f32.mrf.mxu1  ;;  %v2377_v37 = vpop.xlane.xlu1 %2376 }
 0x5aa   :  { %v14449_v23 = vpop.f32.mrf.mxu0  ;;  %16050 = vrcp.f32 %v2377_v37  ;;  %v2380_v38 = vpop.xlane.xlu0 %2379 }
 0x5ab   :  { %v14455_v50 = vpop.f32.mrf.mxu1  ;;  %16052 = vrcp.f32 %v2380_v38 }
 0x5ac   :  { %v2816_v5 = vpop.f32.mrf.mxu0 }
 0x5ad   :  { %v2864_v40 = vpop.f32.mrf.mxu1  ;;  %v2383_v8 = vpop.xlane.xlu1 %2382 }
 0x5ae   :  { %v14450_v19 = vpop.f32.mrf.mxu0  ;;  %16054 = vrcp.f32 %v2383_v8  ;;  %v2386_v31 = vpop.xlane.xlu0 %2385 }
 0x5af   :  { %v14456_v20 = vpop.f32.mrf.mxu1  ;;  %16056 = vrcp.f32 %v2386_v31 }
 0x5b1   :  { %v3972_v1 = vpop.permute.xlu1 %3971 }
 0x5b2   :  { %v3924_v47 = vpop.permute.xlu0 %3923  ;;  %v3977_v14 = vsel %vm204_vm0, %v3972_v1, 0 }
 0x5b3   :  { %v3929_v52 = vsel %vm204_vm0, %v3924_v47, 0 }
 0x5b7   :  { %v16051_v51 = vpop.eup %16050 }
 0x5b8   :  { %v16053_v10 = vpop.eup %16052  ;;  %v2447_v29 = vmul.f32 %v16051_v51, %v17696_v53 }
 0x5b9   :  { %v2448_v58 = vmul.f32 %v16053_v10, %v17701_v54 }
 0x5ba   :  { %v2479_v24 = vpack.c.bf16 %v2447_v29, %v2447_v29 }
 0x5bb   :  { %v16055_v57 = vpop.eup %16054  ;;  %v2480_v12 = vpack.c.bf16 %v2448_v58, %v2448_v58 }
 0x5bc   :  { %v16057_v33 = vpop.eup %16056  ;;  %14580 = vmatmul.mubr.msk.bf16.vlgmr.msra.gmra.mxu0 %vm191_vm1, %v2479_v24  ;;  %v2449_v17 = vmul.f32 %v16055_v57, %v17713_v41 }
 0x5bd   :  { %14586 = vmatmul.mubr.msk.bf16.vlgmr.msra.gmra.mxu1 %vm191_vm1, %v2480_v12  ;;  %14590 = vmatpush3.bf16.msra.mxu0 %v3929_v52  ;;  %v2450_v53 = vmul.f32 %v16057_v33, %v17718_v18 }
 0x5be   :  { %14596 = vmatpush3.bf16.msra.mxu1 %v3977_v14  ;;  %14591 = vmatprep.mubr.msk.bf16.mxu0 %vm16589_vm3, %v20456_v46  ;;  %v2481_v54 = vpack.c.bf16 %v2449_v17, %v2449_v17 }
 0x5bf   :  { %14597 = vmatprep.mubr.msk.bf16.mxu1 %vm16589_vm3, %v20456_v46  ;;  %v2482_v27 = vpack.c.bf16 %v2450_v53, %v2450_v53 }
 0x5c3   :  { %v2909_v62 = vpop.f32.mrf.mxu0 }
 0x5c4   :  { %v2957_v26 = vpop.f32.mrf.mxu1  ;;  %14592 = vmatmul.mubr.msk.bf16.vlgmr.msra.gmra.mxu0 %vm191_vm1, %v2481_v54 }
 0x5c5   :  { %v15600_v55 = vpack.i.bf16 %v2957_v26, %v2909_v62  ;;  %14598 = vmatmul.mubr.msk.bf16.vlgmr.msra.gmra.mxu1 %vm191_vm1, %v2482_v27  ;;  %v14461_v28 = vpop.f32.mrf.mxu0 }
 0x5c6   :  { %v14467_v41 = vpop.f32.mrf.mxu1 }
 0x5c7   :  { %15601 = vrot.lane.b32.xlu0 %v15600_v55, %s16593_s26  ;;  %v2912_v44 = vpop.f32.mrf.mxu0 }
 0x5c8   :  { %v2960_v45 = vpop.f32.mrf.mxu1 }
 0x5c9   :  { %v14462_v18 = vpop.f32.mrf.mxu0 }
 0x5ca   :  { %v14468_v48 = vpop.f32.mrf.mxu1 }
 0x5cc   :  { %v3005_v61 = vpop.f32.mrf.mxu0 }
 0x5cd   :  { %v3053_v49 = vpop.f32.mrf.mxu1 }
 0x5ce   :  { %v15605_v34 = vpack.i.bf16 %v3053_v49, %v3005_v61  ;;  %v14473_v43 = vpop.f32.mrf.mxu0 }
 0x5cf   :  { %v14479_v0 = vpop.f32.mrf.mxu1 }
 0x5d0   :  { %15606 = vrot.lane.b32.xlu1 %v15605_v34, %s16593_s26  ;;  %v3008_v42 = vpop.f32.mrf.mxu0 }
 0x5d1   :  { %v3056_v63 = vpop.f32.mrf.mxu1 }
 0x5d2   :  { %v14474_v4 = vpop.f32.mrf.mxu0  ;;  %v15902_v63 = vld [vmem:[#allocation11 + $0x8] sm:$0xff]  }
 0x5d3   :  { %v14480_v9 = vpop.f32.mrf.mxu1  ;;  %14601 = vmatprep.subr.bf16.mxu0 %v15902_v63 }
 0x5d4   :  { %v17842_v56 = vpop.f32.mrf.mxu0  ;;  %14602 = vmatpush3.bf16.msra.mxu0 %v15902_v63 }
 0x5d5   :  { %v17844_v35 = vpop.f32.mrf.mxu1 }
 0x5d6   :  { %v15630_v36 = vpack.i.bf16 %v17844_v35, %v17842_v56  ;;  %v14485_v3 = vpop.f32.mrf.mxu0 }
 0x5d7   :  { %v14491_v13 = vpop.f32.mrf.mxu1  ;;  %v15903_v3 = vld [vmem:[#allocation11] sm:$0xff]  }
 0x5d8   :  { %v3104_v21 = vpop.f32.mrf.mxu0  ;;  %14603 = vmatprep.subr.bf16.mxu0 %v15903_v3 }
 0x5d9   :  { %v3152_v6 = vpop.f32.mrf.mxu1  ;;  %14604 = vmatpush3.bf16.msra.mxu0 %v15903_v3 }
 0x5da   :  { %v14486_v60 = vpop.f32.mrf.mxu0 }
 0x5db   :  { %v14492_v39 = vpop.f32.mrf.mxu1 }
 0x5dc   :  { %v17848_v15 = vpop.f32.mrf.mxu0 }
 0x5dd   :  { %v17850_v25 = vpop.f32.mrf.mxu1 }
 0x5de   :  { %v15635_v37 = vpack.i.bf16 %v17850_v25, %v17848_v15  ;;  %v14497_v23 = vpop.f32.mrf.mxu0 }
 0x5df   :  { %v14503_v38 = vpop.f32.mrf.mxu1 }
 0x5e0   :  { %v3200_v50 = vpop.f32.mrf.mxu0 }
 0x5e1   :  { %v3248_v5 = vpop.f32.mrf.mxu1 }
 0x5e2   :  { %v14498_v40 = vpop.f32.mrf.mxu0 }
 0x5e3   :  { %v14504_v8 = vpop.f32.mrf.mxu1 }
 0x611   :  { %v3341_v19 = vpop.f32.mrf.mxu1 }
 0x613   :  { %v14515_v31 = vpop.f32.mrf.mxu1 }
 0x615   :  { %v3293_v20 = vpop.f32.mrf.mxu0  ;;  %v3344_v51 = vpop.f32.mrf.mxu1 }
 0x616   :  { %v15610_v10 = vpack.i.bf16 %v3341_v19, %v3293_v20 }
 0x617   :  { %v14509_v29 = vpop.f32.mrf.mxu0  ;;  %v14516_v58 = vpop.f32.mrf.mxu1 }
 0x618   :  { %15611 = vrot.lane.b32.xlu0 %v15610_v10, %s16576_s0 }
 0x619   :  { %v3296_v47 = vpop.f32.mrf.mxu0  ;;  %v3437_v24 = vpop.f32.mrf.mxu1 }
 0x61b   :  { %v14510_v1 = vpop.f32.mrf.mxu0  ;;  %v14527_v57 = vpop.f32.mrf.mxu1 }
 0x61d   :  { %v3389_v12 = vpop.f32.mrf.mxu0  ;;  %v3440_v33 = vpop.f32.mrf.mxu1 }
 0x61e   :  { %v15615_v52 = vpack.i.bf16 %v3437_v24, %v3389_v12 }
 0x61f   :  { %v14521_v14 = vpop.f32.mrf.mxu0  ;;  %v14528_v17 = vpop.f32.mrf.mxu1 }
 0x620   :  { %15616 = vrot.lane.b32.xlu1 %v15615_v52, %s16576_s0 }
 0x621   :  { %v3392_v53 = vpop.f32.mrf.mxu0  ;;  %v3533_v54 = vpop.f32.mrf.mxu1 }
 0x623   :  { %v14522_v27 = vpop.f32.mrf.mxu0  ;;  %v14539_v62 = vpop.f32.mrf.mxu1 }
 0x625   :  { %v3485_v26 = vpop.f32.mrf.mxu0  ;;  %v3536_v55 = vpop.f32.mrf.mxu1 }
 0x626   :  { %v15640_v40 = vpack.i.bf16 %v3533_v54, %v3485_v26 }
 0x627   :  { %v14533_v28 = vpop.f32.mrf.mxu0  ;;  %v14540_v41 = vpop.f32.mrf.mxu1 }
 0x629   :  { %v3488_v44 = vpop.f32.mrf.mxu0  ;;  %v3629_v45 = vpop.f32.mrf.mxu1 }
 0x62b   :  { %v14534_v18 = vpop.f32.mrf.mxu0  ;;  %v14551_v48 = vpop.f32.mrf.mxu1 }
 0x62d   :  { %v3581_v61 = vpop.f32.mrf.mxu0  ;;  %v3632_v49 = vpop.f32.mrf.mxu1 }
 0x62e   :  { %v15645_v56 = vpack.i.bf16 %v3629_v45, %v3581_v61 }
 0x62f   :  { %v14545_v34 = vpop.f32.mrf.mxu0  ;;  %v14552_v43 = vpop.f32.mrf.mxu1 }
 0x631   :  { %v3584_v0 = vpop.f32.mrf.mxu0 }
 0x633   :  { %v14546_v42 = vpop.f32.mrf.mxu0 }
 0x639   :  { %v15602_v62 = vpop.permute.xlu0 %15601 }
 0x63a   :  { %v15604_v55 = vunpack.i.h.bf16 %v15602_v62  ;;  %v15603_v28 = vunpack.i.l.bf16 %v15602_v62 }
 0x63c   :  { %v4116_v48 = vsel %vm191_vm1, %v17786_v7, %v15604_v55  ;;  %v4115_v61 = vsel %vm191_vm1, %v17794_v59, %v15603_v28 }
 0x63f   :  { %v3677_v4 = vpop.f32.mrf.mxu0 }
 0x640   :  { %v3725_v9 = vpop.f32.mrf.mxu1 }
 0x641   :  { %v15620_v13 = vpack.i.bf16 %v3725_v9, %v3677_v4  ;;  %v14557_v21 = vpop.f32.mrf.mxu0 }
 0x642   :  { %v14563_v6 = vpop.f32.mrf.mxu1  ;;  %v15607_v45 = vpop.permute.xlu1 %15606 }
 0x643   :  { %15621 = vrot.lane.b32.xlu0 %v15620_v13, %s16594_s27  ;;  %v3680_v60 = vpop.f32.mrf.mxu0  ;;  %v15609_v3 = vunpack.i.h.bf16 %v15607_v45  ;;  %v15608_v13 = vunpack.i.l.bf16 %v15607_v45 }
 0x644   :  { %v3728_v39 = vpop.f32.mrf.mxu1 }
 0x645   :  { %v14558_v23 = vpop.f32.mrf.mxu0  ;;  %v4118_v59 = vsel %vm191_vm1, %v17804_v16, %v15609_v3  ;;  %v4117_v60 = vsel %vm191_vm1, %v17810_v2, %v15608_v13  ;;  %v20472_v3 = vld [vmem:[#allocation28_spill] sm:$0xff] }
 0x646   :  { %v14564_v38 = vpop.f32.mrf.mxu1 }
 0x647   :  { %15631 = vrot.lane.b32.xlu0 %v15630_v36, %s16593_s26  ;;  %v3773_v50 = vpop.f32.mrf.mxu0 }
 0x648   :  { %v3821_v5 = vpop.f32.mrf.mxu1 }
 0x649   :  { %v15625_v8 = vpack.i.bf16 %v3821_v5, %v3773_v50  ;;  %v14569_v19 = vpop.f32.mrf.mxu0 }
 0x64a   :  { %v14575_v31 = vpop.f32.mrf.mxu1 }
 0x64b   :  { %15641 = vrot.lane.b32.xlu0 %v15640_v40, %s16576_s0  ;;  %15626 = vrot.lane.b32.xlu1 %v15625_v8, %s16594_s27  ;;  %v3776_v20 = vpop.f32.mrf.mxu0 }
 0x64c   :  { %v3824_v51 = vpop.f32.mrf.mxu1 }
 0x64d   :  { %v14570_v10 = vpop.f32.mrf.mxu0 }
 0x64e   :  { %v14576_v29 = vpop.f32.mrf.mxu1 }
 0x64f   :  { %15636 = vrot.lane.b32.xlu1 %v15635_v37, %s16593_s26 }
 0x653   :  { %15646 = vrot.lane.b32.xlu1 %v15645_v56, %s16576_s0 }
 0x67c   :  { %v3869_v35 = vpop.f32.mrf.mxu0 }
 0x67d   :  { %v3917_v36 = vpop.f32.mrf.mxu1 }
 0x67e   :  { %v15650_v58 = vpack.i.bf16 %v3917_v36, %v3869_v35  ;;  %v14581_v47 = vpop.f32.mrf.mxu0 }
 0x67f   :  { %v14587_v24 = vpop.f32.mrf.mxu1 }
 0x680   :  { %15651 = vrot.lane.b32.xlu0 %v15650_v58, %s16594_s27  ;;  %v3872_v1 = vpop.f32.mrf.mxu0 }
 0x681   :  { %v3920_v57 = vpop.f32.mrf.mxu1 }
 0x682   :  { %v14582_v12 = vpop.f32.mrf.mxu0 }
 0x683   :  { %v14588_v33 = vpop.f32.mrf.mxu1 }
 0x684   :  { %v3965_v52 = vpop.f32.mrf.mxu0 }
 0x685   :  { %v4013_v14 = vpop.f32.mrf.mxu1 }
 0x686   :  { %v15655_v17 = vpack.i.bf16 %v4013_v14, %v3965_v52  ;;  %v14593_v53 = vpop.f32.mrf.mxu0 }
 0x687   :  { %v14599_v15 = vpop.f32.mrf.mxu1 }
 0x688   :  { %15656 = vrot.lane.b32.xlu1 %v15655_v17, %s16594_s27  ;;  %v3968_v25 = vpop.f32.mrf.mxu0 }
 0x689   :  { %v4016_v37 = vpop.f32.mrf.mxu1 }
 0x68a   :  { %v14594_v54 = vpop.f32.mrf.mxu0  ;;  %v15612_v26 = vpop.permute.xlu0 %15611 }
 0x68b   :  { %v14600_v27 = vpop.f32.mrf.mxu1  ;;  %v15614_v41 = vunpack.i.h.bf16 %v15612_v26  ;;  %v15613_v44 = vunpack.i.l.bf16 %v15612_v26 }
 0x68d   :  { %v4124_v43 = vsel %vm4123_vm4, %v4115_v61, %v15613_v44  ;;  %v4125_v0 = vsel %vm4123_vm4, %v4116_v48, %v15614_v41  ;;  %v20469_v41 = vld [vmem:[#allocation29_spill] sm:$0xff]  ;;  %v20470_v48 = vld [vmem:[#allocation27_spill] sm:$0xff] }
 0x692   :  { %v15617_v42 = vpop.permute.xlu1 %15616 }
 0x693   :  { %v15619_v21 = vunpack.i.h.bf16 %v15617_v42  ;;  %v15618_v6 = vunpack.i.l.bf16 %v15617_v42 }
 0x695   :  { %v4127_v38 = vsel %vm4123_vm4, %v4118_v59, %v15619_v21  ;;  %v4126_v50 = vsel %vm4123_vm4, %v4117_v60, %v15618_v6  ;;  %v13475_v60 = vld [vmem:[#allocation15] ss:$0 sm:$0xff] }
 0x6b5   :  { %v15622_v18 = vpop.permute.xlu0 %15621 }
 0x6b6   :  { %v15624_v49 = vunpack.i.h.bf16 %v15622_v18  ;;  %v15623_v34 = vunpack.i.l.bf16 %v15622_v18  ;;  %v13473_v18 = vld [vmem:[#allocation12] ss:$0 sm:$0xff] }
 0x6b8   :  { %v4133_v63 = vsel %vm4132_vm5, %v4124_v43, %v15623_v34  ;;  %v4134_v4 = vsel %vm4132_vm5, %v4125_v0, %v15624_v49  ;;  %v20471_v43 = vld [vmem:[#allocation25_spill] sm:$0xff] }
 0x6b9   :  { %v4141_v9 = vpack.c.bf16 %v4134_v4, %v4133_v63  ;;  %v15632_v19 = vpop.permute.xlu0 %15631  ;;  %v13474_v4 = vld [vmem:[#allocation14] ss:$0 sm:$0xff] }
 0x6ba   :  { %v15634_v20 = vunpack.i.h.bf16 %v15632_v19  ;;  %v15633_v16 = vunpack.i.l.bf16 %v15632_v19 }
 0x6bb   :  { %14605 = vmatprep.mubr.msk.bf16.mxu0 %vm309_vm2, %v4141_v9 }
 0x6bc   :  { %v4120_v56 = vsel %vm191_vm1, %v17818_v22, %v15634_v20  ;;  %v4119_v35 = vsel %vm191_vm1, %v17820_v30, %v15633_v16 }
 0x6bd   :  { %v15627_v7 = vpop.permute.xlu1 %15626  ;;  %v15642_v31 = vpop.permute.xlu0 %15641 }
 0x6be   :  { %v15629_v39 = vunpack.i.h.bf16 %v15627_v7  ;;  %v15628_v23 = vunpack.i.l.bf16 %v15627_v7  ;;  %v15644_v10 = vunpack.i.h.bf16 %v15642_v31  ;;  %v15643_v2 = vunpack.i.l.bf16 %v15642_v31  ;;  %v20473_v31 = vld [vmem:[#allocation31_spill] sm:$0xff] }
 0x6c0   :  { %v4136_v5 = vsel %vm4132_vm5, %v4127_v38, %v15629_v39  ;;  %v4135_v40 = vsel %vm4132_vm5, %v4126_v50, %v15628_v23  ;;  %v4128_v47 = vsel %vm4123_vm4, %v4119_v35, %v15643_v2  ;;  %v4129_v24 = vsel %vm4123_vm4, %v4120_v56, %v15644_v10  ;;  %v20475_v56 = vld [vmem:[#allocation32_spill] sm:$0xff] }
 0x6c1   :  { %v4142_v8 = vpack.c.bf16 %v4136_v5, %v4135_v40  ;;  %v15637_v51 = vpop.permute.xlu1 %15636 }
 0x6c2   :  { %v15639_v52 = vunpack.i.h.bf16 %v15637_v51  ;;  %v15638_v14 = vunpack.i.l.bf16 %v15637_v51  ;;  %v20474_v51 = vld [vmem:[#allocation26_spill] sm:$0xff] }
 0x6c3   :  { %14606 = vmatmul.mubr.msk.bf16.vlgmr.msra.gmra.mxu0 %vm309_vm2, %v4142_v8 }
 0x6c4   :  { %v4122_v30 = vsel %vm191_vm1, %v17824_v32, %v15639_v52  ;;  %v4121_v15 = vsel %vm191_vm1, %v17822_v11, %v15638_v14  ;;  %v15904_v32 = vld [vmem:[%s20394_s10 + $0x8] sm:$0xff]   ;;  %v15905_v11 = vld [vmem:[%s20394_s10] sm:$0xff]  }
 0x6c5   :  { %v15647_v1 = vpop.permute.xlu1 %15646  ;;  %14613 = vmatprep.subr.bf16.mxu1 %v15904_v32 }
 0x6c6   :  { %v15649_v17 = vunpack.i.h.bf16 %v15647_v1  ;;  %v15648_v53 = vunpack.i.l.bf16 %v15647_v1  ;;  %14614 = vmatpush3.bf16.msra.mxu1 %v15904_v32 }
 0x6c7   :  { %14615 = vmatprep.subr.bf16.mxu1 %v15905_v11 }
 0x6c8   :  { %v4130_v54 = vsel %vm4123_vm4, %v4121_v15, %v15648_v53  ;;  %v4131_v27 = vsel %vm4123_vm4, %v4122_v30, %v15649_v17 }
 0x6ca   :  { %14616 = vmatpush3.bf16.msra.mxu1 %v15905_v11 }
 0x6f2   :  { %v15652_v29 = vpop.permute.xlu0 %15651 }
 0x6f3   :  { %v15654_v36 = vunpack.i.h.bf16 %v15652_v29  ;;  %v15653_v58 = vunpack.i.l.bf16 %v15652_v29 }
 0x6f5   :  { %v4137_v57 = vsel %vm4132_vm5, %v4128_v47, %v15653_v58  ;;  %v4138_v12 = vsel %vm4132_vm5, %v4129_v24, %v15654_v36  ;;  %v20476_v24 = vld [vmem:[#allocation30_spill] sm:$0xff] }
 0x6f6   :  { %v4143_v33 = vpack.c.bf16 %v4138_v12, %v4137_v57 }
 0x6f8   :  { %14609 = vmatprep.mubr.msk.bf16.mxu0 %vm309_vm2, %v4143_v33 }
 0x6fa   :  { %v15657_v22 = vpop.permute.xlu1 %15656 }
 0x6fb   :  { %v15659_v25 = vunpack.i.h.bf16 %v15657_v22  ;;  %v15658_v37 = vunpack.i.l.bf16 %v15657_v22 }
 0x6fd   :  { %v4140_v62 = vsel %vm4132_vm5, %v4131_v27, %v15659_v25  ;;  %v4139_v26 = vsel %vm4132_vm5, %v4130_v54, %v15658_v37  ;;  %v15906_v37 = vld [vmem:[%s20396_s12 + $0x18] sm:$0xff]   ;;  %v15907_v54 = vld [vmem:[%s20396_s12 + $0x10] sm:$0xff]   ;;  %v15908_v27 = vld [vmem:[%s20396_s12 + $0x8] sm:$0xff]  }
 0x6fe   :  { %v4144_v55 = vpack.c.bf16 %v4140_v62, %v4139_v26  ;;  %14625 = vmatprep.subr.bf16.mxu0 %v15906_v37  ;;  %v15909_v62 = vld [vmem:[%s20396_s12] sm:$0xff]  }
 0x6ff   :  { %14626 = vmatpush3.bf16.msra.mxu0 %v15906_v37  ;;  %v17964_v26 = vld [vmem:[%s20395_s11] ss:$0 sm:$0xff] }
 0x700   :  { %14610 = vmatmul.mubr.msk.bf16.gmra.mxu0 %vm309_vm2, %v4144_v55  ;;  %14627 = vmatprep.subr.bf16.mxu0 %v15907_v54 }
 0x703   :  { %14628 = vmatpush3.bf16.msra.mxu0 %v15907_v54 }
 0x704   :  { %14629 = vmatprep.subr.bf16.mxu0 %v15908_v27 }
 0x707   :  { %14630 = vmatpush3.bf16.msra.mxu0 %v15908_v27 }
 0x708   :  { %14631 = vmatprep.subr.bf16.mxu0 %v15909_v62 }
 0x70b   :  { %14632 = vmatpush3.bf16.msra.mxu0 %v15909_v62 }
 0x70c   :  { %14653 = vmatprep.subr.bf16.mxu0 %v20456_v46 }
 0x783   :  { %v14607_v28 = vpop.f32.mrf.mxu0 }
 0x784   :  { %v4240_v44 = vadd.f32 %v14607_v28, %v20469_v41 }
 0x785   :  { %v4207_v45 = vpop.f32.mrf.mxu0 }
 0x786   :  { %v4238_v61 = vadd.f32 %v4207_v45, %v20470_v48  ;;  %v4255_v42 = vadd.f32 %v13473_v18, %v4240_v44 }
 0x787   :  { %v14608_v49 = vpop.f32.mrf.mxu0 }
 0x788   :  { %v4253_v34 = vadd.f32 %v13473_v18, %v4238_v61  ;;  %v4241_v0 = vadd.f32 %v14608_v49, %v20471_v43  ;;  %v4270_v59 = vmul.f32 %v13474_v4, %v4255_v42 }
 0x789   :  { %v4210_v63 = vpop.f32.mrf.mxu0 }
 0x78a   :  { %v4256_v9 = vadd.f32 %v13473_v18, %v4241_v0  ;;  %v4239_v13 = vadd.f32 %v4210_v63, %v20472_v3  ;;  %v4268_v21 = vmul.f32 %v13474_v4, %v4253_v34  ;;  %v17922_v5 = vadd.f32 %v13475_v60, %v4270_v59 }
 0x78c   :  { %v4271_v6 = vmul.f32 %v13474_v4, %v4256_v9  ;;  %v4254_v7 = vadd.f32 %v13473_v18, %v4239_v13  ;;  %v17918_v38 = vadd.f32 %v13475_v60, %v4268_v21 }
 0x78e   :  { %v4269_v39 = vmul.f32 %v13474_v4, %v4254_v7  ;;  %v17916_v23 = vadd.f32 %v13475_v60, %v4271_v6 }
 0x790   :  { %v17920_v50 = vadd.f32 %v13475_v60, %v4269_v39  ;;  %v4292_v8 = vpack.c.bf16 %v17916_v23, %v17922_v5 }
 0x792   :  { %v4291_v40 = vpack.c.bf16 %v17920_v50, %v17918_v38 }
 0x794   :  { %14617 = vmatprep.mubr.msk.bf16.mxu1 %vm309_vm2, %v4291_v40 }
 0x795   :  { %14618 = vmatmul.mubr.msk.bf16.vlgmr.msra.gmra.mxu1 %vm309_vm2, %v4292_v8 }
 0x7c0   :  { %v14611_v19 = vpop.f32.mrf.mxu0 }
 0x7c1   :  { %v4244_v20 = vadd.f32 %v14611_v19, %v20473_v31 }
 0x7c2   :  { %v4223_v16 = vpop.f32.mrf.mxu0 }
 0x7c3   :  { %v4242_v10 = vadd.f32 %v4223_v16, %v20474_v51  ;;  %v4259_v36 = vadd.f32 %v13473_v18, %v4244_v20 }
 0x7c4   :  { %v14612_v2 = vpop.f32.mrf.mxu0 }
 0x7c5   :  { %v4257_v29 = vadd.f32 %v13473_v18, %v4242_v10  ;;  %v4245_v35 = vadd.f32 %v14612_v2, %v20475_v56  ;;  %v4274_v52 = vmul.f32 %v13474_v4, %v4259_v36 }
 0x7c6   :  { %v4226_v58 = vpop.f32.mrf.mxu0 }
 0x7c7   :  { %v4260_v47 = vadd.f32 %v13473_v18, %v4245_v35  ;;  %v4243_v1 = vadd.f32 %v4226_v58, %v20476_v24  ;;  %v4272_v57 = vmul.f32 %v13474_v4, %v4257_v29  ;;  %v17940_v30 = vadd.f32 %v13475_v60, %v4274_v52 }
 0x7c9   :  { %v4275_v12 = vmul.f32 %v13474_v4, %v4260_v47  ;;  %v4258_v33 = vadd.f32 %v13473_v18, %v4243_v1  ;;  %v17936_v53 = vadd.f32 %v13475_v60, %v4272_v57 }
 0x7cb   :  { %v4273_v14 = vmul.f32 %v13474_v4, %v4258_v33  ;;  %v17934_v17 = vadd.f32 %v13475_v60, %v4275_v12 }
 0x7cd   :  { %v17938_v22 = vadd.f32 %v13475_v60, %v4273_v14  ;;  %v4294_v25 = vpack.c.bf16 %v17934_v17, %v17940_v30 }
 0x7cf   :  { %v4293_v15 = vpack.c.bf16 %v17938_v22, %v17936_v53 }
 0x7d1   :  { %14621 = vmatprep.mubr.msk.bf16.mxu1 %vm309_vm2, %v4293_v15 }
 0x7d2   :  { %14622 = vmatmul.mubr.msk.bf16.gmra.mxu1 %vm309_vm2, %v4294_v25 }
 0x855   :  { %v14619_v55 = vpop.f32.mrf.mxu1 }
 0x856   :  { %v4373_v32 = vadd.f32 %v14619_v55, %v17964_v26 }
 0x857   :  { %v4364_v11 = vpop.f32.mrf.mxu1 }
 0x858   :  { %v4397_v28 = vmul.f32 %v4373_v32, %v4373_v32  ;;  %v4365_v41 = vadd.f32 %v17964_v26, %v4364_v11 }
 0x859   :  { %v14620_v44 = vpop.f32.mrf.mxu1 }
 0x85a   :  { %v4405_v45 = vmul.f32 %v4397_v28, %v4373_v32  ;;  %v4395_v18 = vmul.f32 %v4365_v41, %v4365_v41  ;;  %v4376_v48 = vadd.f32 %v14620_v44, %v17964_v26 }
 0x85b   :  { %v4367_v61 = vpop.f32.mrf.mxu1 }
 0x85c   :  { %v4413_v49 = vmul.f32 0.044715, %v4405_v45  ;;  %v4403_v34 = vmul.f32 %v4395_v18, %v4365_v41  ;;  %v4398_v43 = vmul.f32 %v4376_v48, %v4376_v48  ;;  %v4368_v0 = vadd.f32 %v17964_v26, %v4367_v61 }
 0x85e   :  { %v4421_v42 = vadd.f32 %v4413_v49, %v4373_v32  ;;  %v4411_v63 = vmul.f32 0.044715, %v4403_v34  ;;  %v4406_v4 = vmul.f32 %v4398_v43, %v4376_v48  ;;  %v4396_v9 = vmul.f32 %v4368_v0, %v4368_v0 }
 0x860   :  { %v4429_v3 = vmul.f32 0.7978846, %v4421_v42  ;;  %v4419_v13 = vadd.f32 %v4411_v63, %v4365_v41  ;;  %v4414_v21 = vmul.f32 0.044715, %v4406_v4  ;;  %v4404_v6 = vmul.f32 %v4396_v9, %v4368_v0 }
 0x862   :  { %v4427_v7 = vmul.f32 0.7978846, %v4419_v13  ;;  %v4422_v59 = vadd.f32 %v4414_v21, %v4376_v48  ;;  %v4412_v60 = vmul.f32 0.044715, %v4404_v6  ;;  %16058 = vtanh.f32 %v4429_v3 }
 0x864   :  { %16060 = vtanh.f32 %v4427_v7  ;;  %v4430_v39 = vmul.f32 0.7978846, %v4422_v59  ;;  %v4420_v40 = vadd.f32 %v4412_v60, %v4368_v0 }
 0x866   :  { %16062 = vtanh.f32 %v4430_v39  ;;  %v4428_v8 = vmul.f32 0.7978846, %v4420_v40 }
 0x868   :  { %16064 = vtanh.f32 %v4428_v8 }
 0x86f   :  { %v16059_v19 = vpop.eup %16058 }
 0x870   :  { %v4445_v51 = vadd.f32 1.0, %v16059_v19 }
 0x871   :  { %v16061_v31 = vpop.eup %16060 }
 0x872   :  { %v4443_v20 = vadd.f32 1.0, %v16061_v31  ;;  %v4453_v36 = vmul.f32 0.5, %v4445_v51 }
 0x873   :  { %v16063_v16 = vpop.eup %16062 }
 0x874   :  { %v4446_v10 = vadd.f32 1.0, %v16063_v16  ;;  %v4451_v29 = vmul.f32 0.5, %v4443_v20  ;;  %v4461_v57 = vmul.f32 %v4453_v36, %v4373_v32  ;;  %v15911_v36 = vld [vmem:[%s20388_s4 + $0x10] sm:$0xff]  }
 0x875   :  { %v16065_v2 = vpop.eup %16064 }
 0x876   :  { %v4454_v56 = vmul.f32 0.5, %v4446_v10  ;;  %v4444_v35 = vadd.f32 1.0, %v16065_v2  ;;  %v4459_v24 = vmul.f32 %v4451_v29, %v4365_v41 }
 0x878   :  { %v4452_v58 = vmul.f32 0.5, %v4444_v35  ;;  %v4462_v47 = vmul.f32 %v4454_v56, %v4376_v48  ;;  %v15910_v35 = vld [vmem:[%s20388_s4 + $0x18] sm:$0xff]  }
 0x879   :  { %14641 = vmatprep.subr.bf16.mxu1 %v15910_v35 }
 0x87a   :  { %v4460_v1 = vmul.f32 %v4452_v58, %v4368_v0  ;;  %v4468_v33 = vpack.c.bf16 %v4462_v47, %v4461_v57  ;;  %14642 = vmatpush3.bf16.msra.mxu1 %v15910_v35  ;;  %v13483_v58 = vld [vmem:[%s20397_s13] ss:$0 sm:$0xff] }
 0x87b   :  { %14643 = vmatprep.subr.bf16.mxu1 %v15911_v36 }
 0x87c   :  { %v4467_v12 = vpack.c.bf16 %v4460_v1, %v4459_v24 }
 0x87e   :  { %14633 = vmatprep.mubr.msk.bf16.mxu0 %vm4510_vm6, %v4467_v12  ;;  %14644 = vmatpush3.bf16.msra.mxu1 %v15911_v36 }
 0x87f   :  { %14634 = vmatmul.mubr.msk.bf16.vlgmr.msra.gmra.mxu0 %vm4510_vm6, %v4468_v33  ;;  %14659 = vmatprep.subr.bf16.mxu1 %v20456_v46 }
 0x892   :  { %v14623_v52 = vpop.f32.mrf.mxu1 }
 0x893   :  { %v4389_v14 = vadd.f32 %v14623_v52, %v17964_v26 }
 0x894   :  { %v4380_v15 = vpop.f32.mrf.mxu1 }
 0x895   :  { %v4401_v25 = vmul.f32 %v4389_v14, %v4389_v14  ;;  %v4381_v37 = vadd.f32 %v17964_v26, %v4380_v15 }
 0x896   :  { %v14624_v54 = vpop.f32.mrf.mxu1 }
 0x897   :  { %v4409_v27 = vmul.f32 %v4401_v25, %v4389_v14  ;;  %v4399_v62 = vmul.f32 %v4381_v37, %v4381_v37  ;;  %v4392_v55 = vadd.f32 %v14624_v54, %v17964_v26  ;;  %v13492_v25 = vld [vmem:[%s20398_s14] ss:$0 sm:$0xff] }
 0x898   :  { %v4383_v32 = vpop.f32.mrf.mxu1 }
 0x899   :  { %v4417_v11 = vmul.f32 0.044715, %v4409_v27  ;;  %v4407_v28 = vmul.f32 %v4399_v62, %v4381_v37  ;;  %v4402_v41 = vmul.f32 %v4392_v55, %v4392_v55  ;;  %v4384_v44 = vadd.f32 %v17964_v26, %v4383_v32 }
 0x89b   :  { %v4425_v45 = vadd.f32 %v4417_v11, %v4389_v14  ;;  %v4415_v18 = vmul.f32 0.044715, %v4407_v28  ;;  %v4410_v48 = vmul.f32 %v4402_v41, %v4392_v55  ;;  %v4400_v61 = vmul.f32 %v4384_v44, %v4384_v44  ;;  %v13493_v11 = vld [vmem:[#allocation17] ss:$0 sm:$0xff] }
 0x89d   :  { %v4433_v49 = vmul.f32 0.7978846, %v4425_v45  ;;  %v4423_v34 = vadd.f32 %v4415_v18, %v4381_v37  ;;  %v4418_v43 = vmul.f32 0.044715, %v4410_v48  ;;  %v4408_v0 = vmul.f32 %v4400_v61, %v4384_v44 }
 0x89f   :  { %v4431_v42 = vmul.f32 0.7978846, %v4423_v34  ;;  %v4426_v63 = vadd.f32 %v4418_v43, %v4392_v55  ;;  %v4416_v4 = vmul.f32 0.044715, %v4408_v0  ;;  %16066 = vtanh.f32 %v4433_v49 }
 0x8a1   :  { %16068 = vtanh.f32 %v4431_v42  ;;  %v4434_v9 = vmul.f32 0.7978846, %v4426_v63  ;;  %v4424_v3 = vadd.f32 %v4416_v4, %v4384_v44 }
 0x8a3   :  { %16070 = vtanh.f32 %v4434_v9  ;;  %v4432_v13 = vmul.f32 0.7978846, %v4424_v3 }
 0x8a5   :  { %16072 = vtanh.f32 %v4432_v13 }
 0x8ac   :  { %v16067_v21 = vpop.eup %16066 }
 0x8ad   :  { %v4449_v59 = vadd.f32 1.0, %v16067_v21 }
 0x8ae   :  { %v16069_v26 = vpop.eup %16068 }
 0x8af   :  { %v4447_v6 = vadd.f32 1.0, %v16069_v26  ;;  %v4457_v31 = vmul.f32 0.5, %v4449_v59 }
 0x8b0   :  { %v16071_v7 = vpop.eup %16070 }
 0x8b1   :  { %v4450_v60 = vadd.f32 1.0, %v16071_v7  ;;  %v4455_v40 = vmul.f32 0.5, %v4447_v6  ;;  %v4465_v2 = vmul.f32 %v4457_v31, %v4389_v14 }
 0x8b2   :  { %v16073_v39 = vpop.eup %16072 }
 0x8b3   :  { %v4458_v8 = vmul.f32 0.5, %v4450_v60  ;;  %v4448_v19 = vadd.f32 1.0, %v16073_v39  ;;  %v4463_v51 = vmul.f32 %v4455_v40, %v4381_v37  ;;  %v13498_v60 = vld [vmem:[#allocation9 + $0x1] ss:$0 sm:$0xff] }
 0x8b5   :  { %v4456_v20 = vmul.f32 0.5, %v4448_v19  ;;  %v4466_v16 = vmul.f32 %v4458_v8, %v4392_v55 }
 0x8b7   :  { %v4464_v10 = vmul.f32 %v4456_v20, %v4384_v44  ;;  %v4470_v56 = vpack.c.bf16 %v4466_v16, %v4465_v2 }
 0x8b9   :  { %v4469_v29 = vpack.c.bf16 %v4464_v10, %v4463_v51 }
 0x8bb   :  { %14637 = vmatprep.mubr.msk.bf16.mxu0 %vm4510_vm6, %v4469_v29 }
 0x8bc   :  { %14638 = vmatmul.mubr.msk.bf16.gmra.mxu0 %vm4510_vm6, %v4470_v56 }
 0x8bd   :  { %14655 = vmatprep.mubr.msk.bf16.mxu0 %vm16589_vm3, %v20456_v46 }
 0x93f   :  { %v14635_v47 = vpop.f32.mrf.mxu0 }
 0x940   :  { %v4566_v24 = vadd.f32 %v14635_v47, %v13483_v58 }
 0x941   :  { %v4557_v1 = vpop.f32.mrf.mxu0 }
 0x942   :  { %v4558_v57 = vadd.f32 %v13483_v58, %v4557_v1  ;;  %v4590_v14 = vadd.f32 %v4566_v24, %v17922_v5 }
 0x943   :  { %v14636_v12 = vpop.f32.mrf.mxu0 }
 0x944   :  { %v4588_v33 = vadd.f32 %v4558_v57, %v17918_v38  ;;  %v4569_v52 = vadd.f32 %v14636_v12, %v13483_v58  ;;  %v4605_v32 = vmul.f32 %v13492_v25, %v4590_v14 }
 0x945   :  { %v4560_v15 = vpop.f32.mrf.mxu0 }
 0x946   :  { %v4591_v37 = vadd.f32 %v4569_v52, %v17916_v23  ;;  %v4561_v54 = vadd.f32 %v13483_v58, %v4560_v15  ;;  %v4603_v27 = vmul.f32 %v13492_v25, %v4588_v33  ;;  %v18003_v44 = vadd.f32 %v13493_v11, %v4605_v32 }
 0x948   :  { %v4606_v62 = vmul.f32 %v13492_v25, %v4591_v37  ;;  %v4589_v55 = vadd.f32 %v4561_v54, %v17920_v50  ;;  %v17999_v38 = vadd.f32 %v13493_v11, %v4603_v27  ;;  %20480 = vst [vmem:[#allocation36_spill] sm:$0xff] %v18003_v44 }
 0x94a   :  { %v4604_v28 = vmul.f32 %v13492_v25, %v4589_v55  ;;  %v17997_v41 = vadd.f32 %v13493_v11, %v4606_v62  ;;  %20478 = vst [vmem:[#allocation34_spill] sm:$0xff] %v17999_v38 }
 0x94c   :  { %20477 = vst [vmem:[#allocation33_spill] sm:$0xff] %v17997_v41  ;;  %v18001_v5 = vadd.f32 %v13493_v11, %v4604_v28  ;;  %v4627_v23 = vpack.c.bf16 %v17997_v41, %v18003_v44 }
 0x94e   :  { %20479 = vst [vmem:[#allocation35_spill] sm:$0xff] %v18001_v5  ;;  %v4626_v45 = vpack.c.bf16 %v18001_v5, %v17999_v38 }
 0x950   :  { %14645 = vmatprep.mubr.msk.bf16.mxu1 %vm309_vm2, %v4626_v45 }
 0x951   :  { %14646 = vmatmul.mubr.msk.bf16.vlgmr.msra.gmra.mxu1 %vm309_vm2, %v4627_v23 }
 0x97c   :  { %v14639_v50 = vpop.f32.mrf.mxu0 }
 0x97d   :  { %v4582_v18 = vadd.f32 %v14639_v50, %v13483_v58 }
 0x97e   :  { %v4573_v48 = vpop.f32.mrf.mxu0 }
 0x97f   :  { %v4574_v61 = vadd.f32 %v13483_v58, %v4573_v48  ;;  %v4594_v0 = vadd.f32 %v4582_v18, %v17940_v30 }
 0x980   :  { %v14640_v49 = vpop.f32.mrf.mxu0 }
 0x981   :  { %v4592_v34 = vadd.f32 %v4574_v61, %v17936_v53  ;;  %v4585_v43 = vadd.f32 %v14640_v49, %v13483_v58  ;;  %v4609_v21 = vmul.f32 %v13492_v25, %v4594_v0 }
 0x982   :  { %v4576_v42 = vpop.f32.mrf.mxu0 }
 0x983   :  { %v4595_v63 = vadd.f32 %v4585_v43, %v17934_v17  ;;  %v4577_v4 = vadd.f32 %v13483_v58, %v4576_v42  ;;  %v4607_v9 = vmul.f32 %v13492_v25, %v4592_v34  ;;  %v18021_v53 = vadd.f32 %v13493_v11, %v4609_v21 }
 0x985   :  { %v4610_v3 = vmul.f32 %v13492_v25, %v4595_v63  ;;  %v4593_v13 = vadd.f32 %v4577_v4, %v17938_v22  ;;  %v18017_v7 = vadd.f32 %v13493_v11, %v4607_v9  ;;  %20484 = vst [vmem:[#allocation39_spill] sm:$0xff] %v18021_v53 }
 0x987   :  { %v4608_v26 = vmul.f32 %v13492_v25, %v4593_v13  ;;  %v18015_v6 = vadd.f32 %v13493_v11, %v4610_v3  ;;  %20482 = vst [vmem:[#allocation38_spill] sm:$0xff] %v18017_v7 }
 0x989   :  { %20481 = vst [vmem:[#allocation40_spill] sm:$0xff] %v18015_v6  ;;  %v18019_v59 = vadd.f32 %v13493_v11, %v4608_v26  ;;  %v4629_v17 = vpack.c.bf16 %v18015_v6, %v18021_v53 }
 0x98b   :  { %20483 = vst [vmem:[#allocation37_spill] sm:$0xff] %v18019_v59  ;;  %v4628_v30 = vpack.c.bf16 %v18019_v59, %v18017_v7 }
 0x98d   :  { %14649 = vmatprep.mubr.msk.bf16.mxu1 %vm309_vm2, %v4628_v30 }
 0x98e   :  { %14650 = vmatmul.mubr.msk.bf16.gmra.mxu1 %vm309_vm2, %v4629_v17 }
 0x98f   :  { %14661 = vmatprep.mubr.msk.bf16.mxu1 %vm16589_vm3, %v20456_v46 }
 0xa11   :  { %v14647_v22 = vpop.f32.mrf.mxu1 }
 0xa12   :  { %v4710_v8 = vadd.f32 %v14647_v22, %v13498_v60 }
 0xa13   :  { %v4701_v39 = vpop.f32.mrf.mxu1 }
 0xa14   :  { %v4702_v20 = vadd.f32 %v13498_v60, %v4701_v39  ;;  %v18046_v52 = vpack.c.bf16 %v4710_v8, %v4710_v8 }
 0xa15   :  { %v14648_v40 = vpop.f32.mrf.mxu1 }
 0xa16   :  { %v4713_v19 = vadd.f32 %v14648_v40, %v13498_v60  ;;  %v18042_v33 = vpack.c.bf16 %v4702_v20, %v4702_v20 }
 0xa17   :  { %v4704_v31 = vpop.f32.mrf.mxu1 }
 0xa18   :  { %v4705_v16 = vadd.f32 %v13498_v60, %v4704_v31  ;;  %v15665_v51 = vpack.i.bf16 %v4713_v19, %v4710_v8  ;;  %v18052_v14 = vpack.c.bf16 %v4713_v19, %v4713_v19 }
 0xa1a   :  { %15666 = vrot.lane.b32.xlu1 %v15665_v51, %s16588_s9  ;;  %v15660_v10 = vpack.i.bf16 %v4705_v16, %v4702_v20  ;;  %v18038_v12 = vpack.c.bf16 %v4705_v16, %v4705_v16 }
 0xa1c   :  { %15661 = vrot.lane.b32.xlu0 %v15660_v10, %s16588_s9 }
 0xa4e   :  { %v14651_v2 = vpop.f32.mrf.mxu1 }
 0xa4f   :  { %v4726_v35 = vadd.f32 %v14651_v2, %v13498_v60 }
 0xa50   :  { %v4717_v29 = vpop.f32.mrf.mxu1 }
 0xa51   :  { %v4718_v47 = vadd.f32 %v13498_v60, %v4717_v29  ;;  %v18064_v37 = vpack.c.bf16 %v4726_v35, %v4726_v35 }
 0xa52   :  { %v14652_v56 = vpop.f32.mrf.mxu1 }
 0xa53   :  { %v4729_v36 = vadd.f32 %v14652_v56, %v13498_v60  ;;  %v18060_v25 = vpack.c.bf16 %v4718_v47, %v4718_v47 }
 0xa54   :  { %v4720_v58 = vpop.f32.mrf.mxu1 }
 0xa55   :  { %v4721_v24 = vadd.f32 %v13498_v60, %v4720_v58  ;;  %v18033_v1 = vpack.i.bf16 %v4729_v36, %v4726_v35  ;;  %v18071_v54 = vpack.c.bf16 %v4729_v36, %v4729_v36 }
 0xa57   :  { %15676 = vrot.lane.b32.xlu1 %v18033_v1, %s16588_s9  ;;  %v15670_v57 = vpack.i.bf16 %v4721_v24, %v4718_v47  ;;  %v18056_v15 = vpack.c.bf16 %v4721_v24, %v4721_v24 }
 0xa59   :  { %15671 = vrot.lane.b32.xlu0 %v15670_v57, %s16588_s9 }
 0xa5b   :  { %4926 = vrot.lane.b32.xlu1 %v18038_v12, %s16590_s8 }
 0xa5d   :  { %4877 = vrot.lane.b32.xlu0 %v18042_v33, %s16590_s8 }
 0xa5f   :  { %4975 = vrot.lane.b32.xlu1 %v18046_v52, %s16590_s8 }
 0xa61   :  { %15681 = vrot.lane.b32.xlu0 %v15660_v10, %s16591_s22 }
 0xa63   :  { %15686 = vrot.lane.b32.xlu1 %v15665_v51, %s16591_s22 }
 0xa65   :  { %5024 = vrot.lane.b32.xlu0 %v18052_v14, %s16590_s8 }
 0xa67   :  { %5122 = vrot.lane.b32.xlu1 %v18056_v15, %s16590_s8 }
 0xa69   :  { %5073 = vrot.lane.b32.xlu0 %v18060_v25, %s16590_s8 }
 0xa6b   :  { %5171 = vrot.lane.b32.xlu1 %v18064_v37, %s16590_s8 }
 0xa6d   :  { %15691 = vrot.lane.b32.xlu0 %v15670_v57, %s16591_s22 }
 0xa6f   :  { %15696 = vrot.lane.b32.xlu1 %v18033_v1, %s16591_s22 }
 0xa71   :  { %5220 = vrot.lane.b32.xlu0 %v18071_v54, %s16590_s8 }
 0xa8c   :  { %v15667_v27 = vpop.permute.xlu1 %15666 }
 0xa8d   :  { %v15668_v11 = vunpack.i.l.bf16 %v15667_v27  ;;  %v15669_v23 = vunpack.i.h.bf16 %v15667_v27 }
 0xa8e   :  { %v15662_v62 = vpop.permute.xlu0 %15661 }
 0xa8f   :  { %v15664_v55 = vunpack.i.h.bf16 %v15662_v62  ;;  %v15663_v32 = vunpack.i.l.bf16 %v15662_v62  ;;  %v18083_v50 = vpack.c.bf16 %v15668_v11, %v15668_v11  ;;  %v18088_v18 = vpack.c.bf16 %v15669_v23, %v15669_v23 }
 0xa91   :  { %v18075_v28 = vpack.c.bf16 %v15664_v55, %v15664_v55  ;;  %v18077_v45 = vpack.c.bf16 %v15663_v32, %v15663_v32 }
 0xa93   :  { %5318 = vrot.lane.b32.xlu1 %v18075_v28, %s16590_s8  ;;  %5269 = vrot.lane.b32.xlu0 %v18077_v45, %s16590_s8 }
 0xa97   :  { %5367 = vrot.lane.b32.xlu1 %v18083_v50, %s16590_s8  ;;  %15701 = vrot.lane.b32.xlu0 %v15660_v10, %s16592_s25 }
 0xa9b   :  { %15706 = vrot.lane.b32.xlu1 %v15665_v51, %s16592_s25  ;;  %5416 = vrot.lane.b32.xlu0 %v18088_v18, %s16590_s8 }
 0xac9   :  { %v15677_v48 = vpop.permute.xlu1 %15676 }
 0xaca   :  { %v15678_v0 = vunpack.i.l.bf16 %v15677_v48  ;;  %v15679_v26 = vunpack.i.h.bf16 %v15677_v48 }
 0xacb   :  { %v15672_v61 = vpop.permute.xlu0 %15671 }
 0xacc   :  { %v15674_v49 = vunpack.i.h.bf16 %v15672_v61  ;;  %v15673_v34 = vunpack.i.l.bf16 %v15672_v61  ;;  %v18104_v21 = vpack.c.bf16 %v15678_v0, %v15678_v0  ;;  %v18112_v60 = vpack.c.bf16 %v15679_v26, %v15679_v26 }
 0xacd   :  { %v4927_v43 = vpop.permute.xlu1 %4926 }
 0xace   :  { %v18093_v42 = vpack.c.bf16 %v15674_v49, %v15674_v49  ;;  %v18095_v63 = vpack.c.bf16 %v15673_v34, %v15673_v34  ;;  %v4932_v4 = vsel %vm191_vm1, %v4927_v43, 0 }
 0xacf   :  { %14660 = vmatpush3.bf16.xpose.msra.mxu1 %v4932_v4  ;;  %v4878_v9 = vpop.permute.xlu0 %4877 }
 0xad0   :  { %v4883_v3 = vsel %vm191_vm1, %v4878_v9, 0  ;;  %5514 = vrot.lane.b32.xlu1 %v18093_v42, %s16590_s8  ;;  %5465 = vrot.lane.b32.xlu0 %v18095_v63, %s16590_s8 }
 0xad1   :  { %v4976_v13 = vpop.permute.xlu1 %4975  ;;  %14654 = vmatpush3.bf16.xpose.msra.mxu0 %v4883_v3  ;;  %14671 = vmatprep.subr.bf16.mxu1 %v20456_v46 }
 0xad2   :  { %14665 = vmatprep.subr.bf16.mxu0 %v20456_v46  ;;  %v4981_v8 = vsel %vm191_vm1, %v4976_v13, 0 }
 0xad3   :  { %v15682_v30 = vpop.permute.xlu0 %15681 }
 0xad4   :  { %5563 = vrot.lane.b32.xlu1 %v18104_v21, %s16590_s8  ;;  %15711 = vrot.lane.b32.xlu0 %v15670_v57, %s16592_s25  ;;  %v15684_v22 = vunpack.i.h.bf16 %v15682_v30  ;;  %v15683_v39 = vunpack.i.l.bf16 %v15682_v30 }
 0xad5   :  { %v15687_v17 = vpop.permute.xlu1 %15686 }
 0xad6   :  { %14662 = vmatmul.mubr.msk.bf16.vlgmr.msra.gmra.mxu1 %vm191_vm1, %v18038_v12  ;;  %v18124_v20 = vpack.c.bf16 %v15684_v22, %v15684_v22  ;;  %v15689_v16 = vunpack.i.h.bf16 %v15687_v17  ;;  %v18128_v51 = vpack.c.bf16 %v15683_v39, %v15683_v39  ;;  %v15688_v10 = vunpack.i.l.bf16 %v15687_v17 }
 0xad7   :  { %v5025_v40 = vpop.permute.xlu0 %5024  ;;  %14673 = vmatprep.mubr.msk.bf16.mxu1 %vm16589_vm3, %v20456_v46 }
 0xad8   :  { %v5030_v19 = vsel %vm191_vm1, %v5025_v40, 0  ;;  %14656 = vmatmul.mubr.msk.bf16.vlgmr.msra.gmra.mxu0 %vm191_vm1, %v18042_v33  ;;  %15716 = vrot.lane.b32.xlu1 %v18033_v1, %s16592_s25  ;;  %v18136_v56 = vpack.c.bf16 %v15689_v16, %v15689_v16  ;;  %v18138_v35 = vpack.c.bf16 %v15688_v10, %v15688_v10 }
 0xad9   :  { %5612 = vrot.lane.b32.xlu0 %v18112_v60, %s16590_s8  ;;  %v5123_v31 = vpop.permute.xlu1 %5122  ;;  %14666 = vmatpush3.bf16.xpose.msra.mxu0 %v4981_v8 }
 0xada   :  { %14672 = vmatpush3.bf16.xpose.msra.mxu1 %v5030_v19  ;;  %14667 = vmatprep.mubr.msk.bf16.mxu0 %vm16589_vm3, %v20456_v46  ;;  %v5128_v24 = vsel %vm191_vm1, %v5123_v31, 0 }
 0xadb   :  { %v5074_v2 = vpop.permute.xlu0 %5073  ;;  %14677 = vmatprep.subr.bf16.mxu0 %v20456_v46  ;;  %14683 = vmatprep.subr.bf16.mxu1 %v20456_v46 }
 0xadc   :  { %5710 = vrot.lane.b32.xlu1 %v18124_v20, %s16590_s8  ;;  %v5079_v1 = vsel %vm191_vm1, %v5074_v2, 0 }
 0xadd   :  { %5661 = vrot.lane.b32.xlu0 %v18128_v51, %s16590_s8  ;;  %v5172_v29 = vpop.permute.xlu1 %5171 }
 0xade   :  { %v5177_v61 = vsel %vm191_vm1, %v5172_v29, 0 }
 0xadf   :  { %v15692_v36 = vpop.permute.xlu0 %15691 }
 0xae0   :  { %v15694_v58 = vunpack.i.h.bf16 %v15692_v36  ;;  %v15693_v47 = vunpack.i.l.bf16 %v15692_v36  ;;  %14668 = vmatmul.mubr.msk.bf16.vlgmr.msra.gmra.mxu0 %vm191_vm1, %v18046_v52  ;;  %5808 = vrot.lane.b32.xlu1 %v18136_v56, %s16590_s8 }
 0xae1   :  { %14674 = vmatmul.mubr.msk.bf16.vlgmr.msra.gmra.mxu1 %vm191_vm1, %v18052_v14  ;;  %5759 = vrot.lane.b32.xlu0 %v18138_v35, %s16590_s8  ;;  %v15697_v57 = vpop.permute.xlu1 %15696 }
 0xae2   :  { %v18150_v27 = vpack.c.bf16 %v15694_v58, %v15694_v58  ;;  %v18152_v62 = vpack.c.bf16 %v15693_v47, %v15693_v47  ;;  %v15699_v55 = vunpack.i.h.bf16 %v15697_v57  ;;  %14678 = vmatpush3.bf16.xpose.msra.mxu0 %v5079_v1  ;;  %14684 = vmatpush3.bf16.xpose.msra.mxu1 %v5128_v24  ;;  %v15698_v32 = vunpack.i.l.bf16 %v15697_v57 }
 0xae3   :  { %14679 = vmatprep.mubr.msk.bf16.mxu0 %vm16589_vm3, %v20456_v46  ;;  %14685 = vmatprep.mubr.msk.bf16.mxu1 %vm16589_vm3, %v20456_v46  ;;  %v5221_v23 = vpop.permute.xlu0 %5220 }
 0xae4   :  { %5906 = vrot.lane.b32.xlu1 %v18150_v27, %s16590_s8  ;;  %14689 = vmatprep.subr.bf16.mxu0 %v20456_v46  ;;  %v18164_v11 = vpack.c.bf16 %v15699_v55, %v15699_v55  ;;  %v18166_v48 = vpack.c.bf16 %v15698_v32, %v15698_v32  ;;  %v5226_v49 = vsel %vm191_vm1, %v5221_v23, 0 }
 0xae5   :  { %5857 = vrot.lane.b32.xlu0 %v18152_v62, %s16590_s8  ;;  %14695 = vmatprep.subr.bf16.mxu1 %v20456_v46 }
 0xae8   :  { %6004 = vrot.lane.b32.xlu1 %v18164_v11, %s16590_s8 }
 0xae9   :  { %14680 = vmatmul.mubr.msk.bf16.vlgmr.msra.gmra.mxu0 %vm191_vm1, %v18060_v25  ;;  %14686 = vmatmul.mubr.msk.bf16.vlgmr.msra.gmra.mxu1 %vm191_vm1, %v18056_v15 }
 0xaea   :  { %5955 = vrot.lane.b32.xlu0 %v18166_v48, %s16590_s8  ;;  %14690 = vmatpush3.bf16.xpose.msra.mxu0 %v5177_v61 }
 0xaeb   :  { %14696 = vmatpush3.bf16.xpose.msra.mxu1 %v5226_v49  ;;  %14691 = vmatprep.mubr.msk.bf16.mxu0 %vm16589_vm3, %v20456_v46 }
 0xaec   :  { %14697 = vmatprep.mubr.msk.bf16.mxu1 %vm16589_vm3, %v20456_v46  ;;  %14701 = vmatprep.subr.bf16.mxu0 %v20456_v46 }
 0xaed   :  { %14707 = vmatprep.subr.bf16.mxu1 %v20456_v46 }
 0xaf1   :  { %14692 = vmatmul.mubr.msk.bf16.vlgmr.msra.gmra.mxu0 %vm191_vm1, %v18064_v37 }
 0xaf2   :  { %14698 = vmatmul.mubr.msk.bf16.vlgmr.msra.gmra.mxu1 %vm191_vm1, %v18071_v54  ;;  %14703 = vmatprep.mubr.msk.bf16.mxu0 %vm16589_vm3, %v20456_v46 }
 0xaf3   :  { %14709 = vmatprep.mubr.msk.bf16.mxu1 %vm16589_vm3, %v20456_v46 }
 0xb05   :  { %v5319_v34 = vpop.permute.xlu1 %5318  ;;  %v5270_v43 = vpop.permute.xlu0 %5269 }
 0xb06   :  { %v5324_v0 = vsel %vm191_vm1, %v5319_v34, 0  ;;  %v5275_v4 = vsel %vm191_vm1, %v5270_v43, 0 }
 0xb07   :  { %14702 = vmatpush3.bf16.xpose.msra.mxu0 %v5275_v4  ;;  %14708 = vmatpush3.bf16.xpose.msra.mxu1 %v5324_v0 }
 0xb08   :  { %14713 = vmatprep.subr.bf16.mxu0 %v20456_v46  ;;  %14719 = vmatprep.subr.bf16.mxu1 %v20456_v46 }
 0xb09   :  { %v5368_v9 = vpop.permute.xlu1 %5367  ;;  %v15702_v3 = vpop.permute.xlu0 %15701 }
 0xb0a   :  { %v15704_v13 = vunpack.i.h.bf16 %v15702_v3  ;;  %v15703_v26 = vunpack.i.l.bf16 %v15702_v3  ;;  %v5373_v31 = vsel %vm191_vm1, %v5368_v9, 0 }
 0xb0c   :  { %v18196_v30 = vpack.c.bf16 %v15704_v13, %v15704_v13  ;;  %v18198_v17 = vpack.c.bf16 %v15703_v26, %v15703_v26 }
 0xb0d   :  { %v15707_v22 = vpop.permute.xlu1 %15706  ;;  %v5417_v39 = vpop.permute.xlu0 %5416 }
 0xb0e   :  { %v15709_v40 = vunpack.i.h.bf16 %v15707_v22  ;;  %v15708_v8 = vunpack.i.l.bf16 %v15707_v22  ;;  %v5422_v19 = vsel %vm191_vm1, %v5417_v39, 0  ;;  %14704 = vmatmul.mubr.msk.bf16.vlgmr.msra.gmra.mxu0 %vm191_vm1, %v18077_v45  ;;  %14710 = vmatmul.mubr.msk.bf16.vlgmr.msra.gmra.mxu1 %vm191_vm1, %v18075_v28 }
 0xb0f   :  { %6102 = vrot.lane.b32.xlu1 %v18196_v30, %s16590_s8  ;;  %6053 = vrot.lane.b32.xlu0 %v18198_v17, %s16590_s8 }
 0xb10   :  { %v18210_v16 = vpack.c.bf16 %v15709_v40, %v15709_v40  ;;  %v18212_v10 = vpack.c.bf16 %v15708_v8, %v15708_v8  ;;  %14714 = vmatpush3.bf16.xpose.msra.mxu0 %v5373_v31  ;;  %14720 = vmatpush3.bf16.xpose.msra.mxu1 %v5422_v19 }
 0xb11   :  { %14715 = vmatprep.mubr.msk.bf16.mxu0 %vm16589_vm3, %v20456_v46  ;;  %14721 = vmatprep.mubr.msk.bf16.mxu1 %vm16589_vm3, %v20456_v46 }
 0xb12   :  { %14725 = vmatprep.subr.bf16.mxu0 %v20456_v46  ;;  %14731 = vmatprep.subr.bf16.mxu1 %v20456_v46 }
 0xb13   :  { %6200 = vrot.lane.b32.xlu1 %v18210_v16, %s16590_s8  ;;  %6151 = vrot.lane.b32.xlu0 %v18212_v10, %s16590_s8 }
 0xb17   :  { %14716 = vmatmul.mubr.msk.bf16.vlgmr.msra.gmra.mxu0 %vm191_vm1, %v18083_v50  ;;  %14722 = vmatmul.mubr.msk.bf16.vlgmr.msra.gmra.mxu1 %vm191_vm1, %v18088_v18 }
 0xb18   :  { %14727 = vmatprep.mubr.msk.bf16.mxu0 %vm16589_vm3, %v20456_v46  ;;  %14733 = vmatprep.mubr.msk.bf16.mxu1 %vm16589_vm3, %v20456_v46 }
 0xb42   :  { %v5515_v2 = vpop.permute.xlu1 %5514  ;;  %v5466_v29 = vpop.permute.xlu0 %5465 }
 0xb43   :  { %v5520_v36 = vsel %vm191_vm1, %v5515_v2, 0  ;;  %v5471_v58 = vsel %vm191_vm1, %v5466_v29, 0 }
 0xb44   :  { %14726 = vmatpush3.bf16.xpose.msra.mxu0 %v5471_v58  ;;  %14732 = vmatpush3.bf16.xpose.msra.mxu1 %v5520_v36  ;;  %v4846_v36 = vld [vmem:[#allocation2 + $0x10] sm:$0xff] }
 0xb45   :  { %14737 = vmatprep.subr.bf16.mxu0 %v20456_v46  ;;  %14743 = vmatprep.subr.bf16.mxu1 %v20456_v46 }
 0xb46   :  { %v5564_v47 = vpop.permute.xlu1 %5563  ;;  %v15712_v24 = vpop.permute.xlu0 %15711 }
 0xb47   :  { %v15714_v1 = vunpack.i.h.bf16 %v15712_v24  ;;  %v15713_v57 = vunpack.i.l.bf16 %v15712_v24  ;;  %v5569_v43 = vsel %vm191_vm1, %v5564_v47, 0  ;;  %v4847_v24 = vld [vmem:[#allocation2 + $0x18] sm:$0xff] }
 0xb49   :  { %v18236_v55 = vpack.c.bf16 %v15714_v1, %v15714_v1  ;;  %v18238_v32 = vpack.c.bf16 %v15713_v57, %v15713_v57 }
 0xb4a   :  { %v15717_v23 = vpop.permute.xlu1 %15716 }
 0xb4b   :  { %v15719_v61 = vunpack.i.h.bf16 %v15717_v23  ;;  %v15718_v49 = vunpack.i.l.bf16 %v15717_v23  ;;  %v5613_v34 = vpop.permute.xlu0 %5612  ;;  %14728 = vmatmul.mubr.msk.bf16.vlgmr.msra.gmra.mxu0 %vm191_vm1, %v18095_v63  ;;  %14734 = vmatmul.mubr.msk.bf16.vlgmr.msra.gmra.mxu1 %vm191_vm1, %v18093_v42 }
 0xb4c   :  { %v5618_v0 = vsel %vm191_vm1, %v5613_v34, 0  ;;  %6298 = vrot.lane.b32.xlu1 %v18236_v55, %s16590_s8  ;;  %6249 = vrot.lane.b32.xlu0 %v18238_v32, %s16590_s8 }
 0xb4d   :  { %v18250_v4 = vpack.c.bf16 %v15719_v61, %v15719_v61  ;;  %v18252_v9 = vpack.c.bf16 %v15718_v49, %v15718_v49  ;;  %14738 = vmatpush3.bf16.xpose.msra.mxu0 %v5569_v43  ;;  %14744 = vmatpush3.bf16.xpose.msra.mxu1 %v5618_v0 }
 0xb4e   :  { %14739 = vmatprep.mubr.msk.bf16.mxu0 %vm16589_vm3, %v20456_v46  ;;  %14745 = vmatprep.mubr.msk.bf16.mxu1 %vm16589_vm3, %v20456_v46  ;;  %v5711_v3 = vpop.permute.xlu1 %5710 }
 0xb4f   :  { %20485 = vst [vmem:[#allocation43_spill] sm:$0xff] %v18250_v4  ;;  %20486 = vst [vmem:[#allocation41_spill] sm:$0xff] %v18252_v9  ;;  %14749 = vmatprep.subr.bf16.mxu0 %v20456_v46  ;;  %14755 = vmatprep.subr.bf16.mxu1 %v20456_v46  ;;  %v5662_v13 = vpop.permute.xlu0 %5661  ;;  %v5716_v26 = vsel %vm191_vm1, %v5711_v3, 0 }
 0xb50   :  { %6396 = vrot.lane.b32.xlu1 %v18250_v4, %s16590_s8  ;;  %6347 = vrot.lane.b32.xlu0 %v18252_v9, %s16590_s8  ;;  %v5667_v22 = vsel %vm191_vm1, %v5662_v13, 0 }
 0xb54   :  { %14740 = vmatmul.mubr.msk.bf16.vlgmr.msra.gmra.mxu0 %vm191_vm1, %v18104_v21  ;;  %14746 = vmatmul.mubr.msk.bf16.vlgmr.msra.gmra.mxu1 %vm191_vm1, %v18112_v60 }
 0xb55   :  { %6860 = vrot.lane.b32.xlu1 %v18042_v33, %s16583_s1  ;;  %6908 = vrot.lane.b32.xlu0 %v18038_v12, %s16583_s1  ;;  %v5809_v33 = vpop.permute.xlu1 %5808  ;;  %v5760_v12 = vpop.permute.xlu0 %5759 }
 0xb56   :  { %14750 = vmatpush3.bf16.xpose.msra.mxu0 %v5667_v22  ;;  %14756 = vmatpush3.bf16.xpose.msra.mxu1 %v5716_v26  ;;  %v5814_v39 = vsel %vm191_vm1, %v5809_v33, 0  ;;  %v5765_v40 = vsel %vm191_vm1, %v5760_v12, 0  ;;  %v4848_v26 = vld [vmem:[#allocation2 + $0x20] sm:$0xff]  ;;  %v4849_v33 = vld [vmem:[#allocation2 + $0x28] sm:$0xff] }
 0xb57   :  { %14751 = vmatprep.mubr.msk.bf16.mxu0 %vm16589_vm3, %v20456_v46  ;;  %14757 = vmatprep.mubr.msk.bf16.mxu1 %vm16589_vm3, %v20456_v46 }
 0xb58   :  { %14761 = vmatprep.subr.bf16.mxu0 %v20456_v46  ;;  %14767 = vmatprep.subr.bf16.mxu1 %v20456_v46 }
 0xb59   :  { %6956 = vrot.lane.b32.xlu1 %v18046_v52, %s16583_s1  ;;  %7004 = vrot.lane.b32.xlu0 %v18052_v14, %s16583_s1  ;;  %v5907_v52 = vpop.permute.xlu1 %5906  ;;  %v5858_v14 = vpop.permute.xlu0 %5857 }
 0xb5d   :  { %14752 = vmatmul.mubr.msk.bf16.vlgmr.msra.gmra.mxu0 %vm191_vm1, %v18128_v51  ;;  %14758 = vmatmul.mubr.msk.bf16.vlgmr.msra.gmra.mxu1 %vm191_vm1, %v18124_v20 }
 0xb5e   :  { %7052 = vrot.lane.b32.xlu1 %v18060_v25, %s16583_s1  ;;  %7100 = vrot.lane.b32.xlu0 %v18056_v15, %s16583_s1  ;;  %v5912_v15 = vsel %vm191_vm1, %v5907_v52, 0  ;;  %v5863_v25 = vsel %vm191_vm1, %v5858_v14, 0 }
 0xb5f   :  { %14762 = vmatpush3.bf16.xpose.msra.mxu0 %v5765_v40  ;;  %14768 = vmatpush3.bf16.xpose.msra.mxu1 %v5814_v39 }
 0xb60   :  { %14763 = vmatprep.mubr.msk.bf16.mxu0 %vm16589_vm3, %v20456_v46  ;;  %14769 = vmatprep.mubr.msk.bf16.mxu1 %vm16589_vm3, %v20456_v46 }
 0xb61   :  { %14773 = vmatprep.subr.bf16.mxu0 %v20456_v46  ;;  %14779 = vmatprep.subr.bf16.mxu1 %v20456_v46 }
 0xb62   :  { %7148 = vrot.lane.b32.xlu1 %v18064_v37, %s16583_s1  ;;  %7196 = vrot.lane.b32.xlu0 %v18071_v54, %s16583_s1  ;;  %v6005_v37 = vpop.permute.xlu1 %6004  ;;  %v5956_v54 = vpop.permute.xlu0 %5955 }
 0xb66   :  { %14764 = vmatmul.mubr.msk.bf16.vlgmr.msra.gmra.mxu0 %vm191_vm1, %v18138_v35  ;;  %14770 = vmatmul.mubr.msk.bf16.vlgmr.msra.gmra.mxu1 %vm191_vm1, %v18136_v56 }
 0xb67   :  { %7244 = vrot.lane.b32.xlu1 %v18077_v45, %s16583_s1  ;;  %7292 = vrot.lane.b32.xlu0 %v18075_v28, %s16583_s1  ;;  %v6010_v28 = vsel %vm191_vm1, %v6005_v37, 0  ;;  %v5961_v45 = vsel %vm191_vm1, %v5956_v54, 0 }
 0xb68   :  { %14774 = vmatpush3.bf16.xpose.msra.mxu0 %v5863_v25  ;;  %14780 = vmatpush3.bf16.xpose.msra.mxu1 %v5912_v15 }
 0xb69   :  { %14775 = vmatprep.mubr.msk.bf16.mxu0 %vm16589_vm3, %v20456_v46  ;;  %14781 = vmatprep.mubr.msk.bf16.mxu1 %vm16589_vm3, %v20456_v46 }
 0xb6a   :  { %14791 = vmatprep.subr.bf16.mxu1 %v20456_v46  ;;  %14785 = vmatprep.subr.bf16.mxu0 %v20456_v46 }
 0xb6b   :  { %7340 = vrot.lane.b32.xlu1 %v18083_v50, %s16583_s1  ;;  %7388 = vrot.lane.b32.xlu0 %v18088_v18, %s16583_s1 }
 0xb6f   :  { %7436 = vrot.lane.b32.xlu1 %v18095_v63, %s16583_s1  ;;  %14782 = vmatmul.mubr.msk.bf16.vlgmr.msra.gmra.mxu1 %vm191_vm1, %v18150_v27 }
 0xb70   :  { %7580 = vrot.lane.b32.xlu0 %v18112_v60, %s16583_s1  ;;  %14776 = vmatmul.mubr.msk.bf16.vlgmr.msra.gmra.mxu0 %vm191_vm1, %v18152_v62 }
 0xb71   :  { %14786 = vmatpush3.bf16.xpose.msra.mxu0 %v5961_v45  ;;  %14792 = vmatpush3.bf16.xpose.msra.mxu1 %v6010_v28 }
 0xb72   :  { %14787 = vmatprep.mubr.msk.bf16.mxu0 %vm16589_vm3, %v20456_v46  ;;  %14793 = vmatprep.mubr.msk.bf16.mxu1 %vm16589_vm3, %v20456_v46 }
 0xb73   :  { %7532 = vrot.lane.b32.xlu1 %v18104_v21, %s16583_s1  ;;  %14797 = vmatprep.subr.bf16.mxu0 %v20456_v46 }
 0xb74   :  { %7676 = vrot.lane.b32.xlu0 %v18124_v20, %s16583_s1  ;;  %14803 = vmatprep.subr.bf16.mxu1 %v20456_v46 }
 0xb77   :  { %7628 = vrot.lane.b32.xlu1 %v18128_v51, %s16583_s1 }
 0xb78   :  { %14794 = vmatmul.mubr.msk.bf16.vlgmr.msra.gmra.mxu1 %vm191_vm1, %v18164_v11  ;;  %7772 = vrot.lane.b32.xlu0 %v18136_v56, %s16583_s1  ;;  %v4845_v56 = vld [vmem:[#allocation2 + $0x8] sm:$0xff] }
 0xb79   :  { %14788 = vmatmul.mubr.msk.bf16.vlgmr.msra.gmra.mxu0 %vm191_vm1, %v18166_v48  ;;  %14805 = vmatprep.mubr.msk.bf16.mxu1 %vm16589_vm3, %v20456_v46 }
 0xb7a   :  { %14799 = vmatprep.mubr.msk.bf16.mxu0 %vm16589_vm3, %v20456_v46 }
 0xb7b   :  { %7724 = vrot.lane.b32.xlu1 %v18138_v35, %s16583_s1 }
 0xb7c   :  { %7964 = vrot.lane.b32.xlu0 %v18164_v11, %s16583_s1 }
 0xb7f   :  { %7820 = vrot.lane.b32.xlu1 %v18152_v62, %s16583_s1  ;;  %v4844_v62 = vld [vmem:[#allocation2] sm:$0xff] }
 0xb80   :  { %7484 = vrot.lane.b32.xlu0 %v18093_v42, %s16583_s1 }
 0xb81   :  { %v6103_v50 = vpop.permute.xlu1 %6102  ;;  %v6054_v18 = vpop.permute.xlu0 %6053 }
 0xb82   :  { %v6108_v63 = vsel %vm191_vm1, %v6103_v50, 0  ;;  %v6059_v21 = vsel %vm191_vm1, %v6054_v18, 0 }
 0xb83   :  { %7916 = vrot.lane.b32.xlu1 %v18166_v48, %s16583_s1  ;;  %14798 = vmatpush3.bf16.xpose.msra.mxu0 %v6059_v21 }
 0xb84   :  { %7868 = vrot.lane.b32.xlu0 %v18150_v27, %s16583_s1  ;;  %14804 = vmatpush3.bf16.xpose.msra.mxu1 %v6108_v63  ;;  %v4850_v63 = vld [vmem:[#allocation2 + $0x30] sm:$0xff] }
 0xb85   :  { %14809 = vmatprep.subr.bf16.mxu0 %v20456_v46  ;;  %14815 = vmatprep.subr.bf16.mxu1 %v20456_v46  ;;  %v6152_v42 = vpop.permute.xlu0 %6151  ;;  %v6201_v60 = vpop.permute.xlu1 %6200 }
 0xb86   :  { %v6157_v20 = vsel %vm191_vm1, %v6152_v42, 0  ;;  %v6206_v51 = vsel %vm191_vm1, %v6201_v60, 0  ;;  %v4851_v60 = vld [vmem:[#allocation2 + $0x38] sm:$0xff] }
 0xb87   :  { %8012 = vrot.lane.b32.xlu1 %v18198_v17, %s16583_s1 }
 0xb8a   :  { %14800 = vmatmul.mubr.msk.bf16.vlgmr.msra.gmra.mxu0 %vm191_vm1, %v18198_v17 }
 0xb8b   :  { %14806 = vmatmul.mubr.msk.bf16.vlgmr.msra.gmra.mxu1 %vm191_vm1, %v18196_v30  ;;  %14810 = vmatpush3.bf16.xpose.msra.mxu0 %v6157_v20 }
 0xb8c   :  { %14816 = vmatpush3.bf16.xpose.msra.mxu1 %v6206_v51  ;;  %14811 = vmatprep.mubr.msk.bf16.mxu0 %vm16589_vm3, %v20456_v46 }
 0xb8d   :  { %14817 = vmatprep.mubr.msk.bf16.mxu1 %vm16589_vm3, %v20456_v46  ;;  %14821 = vmatprep.subr.bf16.mxu0 %v20456_v46 }
 0xb8e   :  { %14827 = vmatprep.subr.bf16.mxu1 %v20456_v46 }
 0xb92   :  { %14812 = vmatmul.mubr.msk.bf16.vlgmr.msra.gmra.mxu0 %vm191_vm1, %v18212_v10 }
 0xb93   :  { %14818 = vmatmul.mubr.msk.bf16.vlgmr.msra.gmra.mxu1 %vm191_vm1, %v18210_v16  ;;  %14823 = vmatprep.mubr.msk.bf16.mxu0 %vm16589_vm3, %v20456_v46 }
 0xb94   :  { %14829 = vmatprep.mubr.msk.bf16.mxu1 %vm16589_vm3, %v20456_v46 }
 0xb96   :  { %v4968_v35 = vpop.f32.mrf.mxu1 }
 0xb97   :  { %v18394_v27 = vadd.f32 %v4968_v35, %v4845_v56 }
 0xb98   :  { %v4919_v11 = vpop.f32.mrf.mxu0  ;;  %v14663_v48 = vpop.f32.mrf.mxu1 }
 0xb99   :  { %6445 = vst.msk [vmem:[#allocation2 + $0x8] sm:$0xff] %vm191_vm1, %v18394_v27  ;;  %v18398_v17 = vadd.f32 %v4919_v11, %v4844_v62  ;;  %v6479_v39 = vsel %vm191_vm1, %v18394_v27, -inf }
 0xb9a   :  { %v14657_v8 = vpop.f32.mrf.mxu0  ;;  %v4971_v19 = vpop.f32.mrf.mxu1 }
 0xb9b   :  { %6444 = vst.msk [vmem:[#allocation2] sm:$0xff] %vm191_vm1, %v18398_v17  ;;  %v6476_v57 = vsel %vm191_vm1, %v18398_v17, -inf }
 0xb9c   :  { %v4922_v31 = vpop.f32.mrf.mxu0  ;;  %v14664_v2 = vpop.f32.mrf.mxu1 }
 0xb9e   :  { %v14658_v29 = vpop.f32.mrf.mxu0 }
 0xba0   :  { %v5017_v58 = vpop.f32.mrf.mxu0 }
 0xba1   :  { %v18402_v47 = vadd.f32 %v5017_v58, %v4846_v36  ;;  %v5066_v1 = vpop.f32.mrf.mxu1 }
 0xba2   :  { %v18406_v23 = vadd.f32 %v5066_v1, %v4847_v24  ;;  %v14669_v61 = vpop.f32.mrf.mxu0 }
 0xba3   :  { %6477 = vmax.xlane.f32.xlu0 %v6476_v57  ;;  %6446 = vst.msk [vmem:[#allocation2 + $0x10] sm:$0xff] %vm191_vm1, %v18402_v47  ;;  %v14675_v49 = vpop.f32.mrf.mxu1  ;;  %v6482_v43 = vsel %vm191_vm1, %v18402_v47, -inf }
 0xba4   :  { %6447 = vst.msk [vmem:[#allocation2 + $0x18] sm:$0xff] %vm191_vm1, %v18406_v23  ;;  %v5020_v34 = vpop.f32.mrf.mxu0  ;;  %v6485_v14 = vsel %vm191_vm1, %v18406_v23, -inf }
 0xba5   :  { %v5069_v0 = vpop.f32.mrf.mxu1 }
 0xba6   :  { %v14670_v3 = vpop.f32.mrf.mxu0 }
 0xba7   :  { %6483 = vmax.xlane.f32.xlu0 %v6482_v43  ;;  %v14676_v13 = vpop.f32.mrf.mxu1  ;;  %v4852_v43 = vld [vmem:[#allocation2 + $0x40] sm:$0xff]  ;;  %v4853_v3 = vld [vmem:[#allocation2 + $0x48] sm:$0xff] }
 0xba9   :  { %v5115_v22 = vpop.f32.mrf.mxu0  ;;  %v5164_v12 = vpop.f32.mrf.mxu1 }
 0xbaa   :  { %v18416_v40 = vadd.f32 %v5115_v22, %v4848_v26  ;;  %v18418_v52 = vadd.f32 %v5164_v12, %v4849_v33 }
 0xbab   :  { %6480 = vmax.xlane.f32.xlu1 %v6479_v39  ;;  %6486 = vmax.xlane.f32.xlu0 %v6485_v14  ;;  %v14681_v15 = vpop.f32.mrf.mxu0  ;;  %v14687_v25 = vpop.f32.mrf.mxu1 }
 0xbac   :  { %6448 = vst.msk [vmem:[#allocation2 + $0x20] sm:$0xff] %vm191_vm1, %v18416_v40  ;;  %6449 = vst.msk [vmem:[#allocation2 + $0x28] sm:$0xff] %vm191_vm1, %v18418_v52  ;;  %v6488_v37 = vsel %vm191_vm1, %v18416_v40, -inf  ;;  %v6491_v54 = vsel %vm191_vm1, %v18418_v52, -inf }
 0xbad   :  { %v5118_v28 = vpop.f32.mrf.mxu0  ;;  %v5167_v45 = vpop.f32.mrf.mxu1 }
 0xbaf   :  { %6489 = vmax.xlane.f32.xlu1 %v6488_v37  ;;  %6492 = vmax.xlane.f32.xlu0 %v6491_v54  ;;  %v14682_v50 = vpop.f32.mrf.mxu0  ;;  %v14688_v18 = vpop.f32.mrf.mxu1 }
 0xbb0   :  { %v4854_v50 = vld [vmem:[#allocation2 + $0x50] sm:$0xff] }
 0xbb1   :  { %v5213_v21 = vpop.f32.mrf.mxu0 }
 0xbb2   :  { %v18430_v42 = vadd.f32 %v5213_v21, %v4850_v63  ;;  %v5262_v20 = vpop.f32.mrf.mxu1  ;;  %v4855_v63 = vld [vmem:[#allocation2 + $0x58] sm:$0xff] }
 0xbb3   :  { %v18432_v51 = vadd.f32 %v5262_v20, %v4851_v60  ;;  %v14693_v56 = vpop.f32.mrf.mxu0 }
 0xbb4   :  { %6450 = vst.msk [vmem:[#allocation2 + $0x30] sm:$0xff] %vm191_vm1, %v18430_v42  ;;  %v14699_v35 = vpop.f32.mrf.mxu1  ;;  %v6494_v62 = vsel %vm191_vm1, %v18430_v42, -inf }
 0xbb5   :  { %6451 = vst.msk [vmem:[#allocation2 + $0x38] sm:$0xff] %vm191_vm1, %v18432_v51  ;;  %v5216_v11 = vpop.f32.mrf.mxu0  ;;  %6495 = vmax.xlane.f32.xlu1 %v6494_v62  ;;  %v6497_v48 = vsel %vm191_vm1, %v18432_v51, -inf }
 0xbb6   :  { %v5265_v8 = vpop.f32.mrf.mxu1  ;;  %6498 = vmax.xlane.f32.xlu0 %v6497_v48 }
 0xbb7   :  { %v14694_v19 = vpop.f32.mrf.mxu0 }
 0xbb8   :  { %v14700_v31 = vpop.f32.mrf.mxu1 }
 0xbbe   :  { %v6299_v2 = vpop.permute.xlu1 %6298  ;;  %v6250_v29 = vpop.permute.xlu0 %6249 }
 0xbbf   :  { %v6304_v36 = vsel %vm191_vm1, %v6299_v2, 0  ;;  %v6255_v58 = vsel %vm191_vm1, %v6250_v29, 0 }
 0xbc0   :  { %14822 = vmatpush3.bf16.xpose.msra.mxu0 %v6255_v58  ;;  %14828 = vmatpush3.bf16.xpose.msra.mxu1 %v6304_v36 }
 0xbc1   :  { %14833 = vmatprep.subr.bf16.mxu0 %v20456_v46  ;;  %14839 = vmatprep.subr.bf16.mxu1 %v20456_v46 }
 0xbc2   :  { %v6397_v24 = vpop.permute.xlu1 %6396  ;;  %v6348_v1 = vpop.permute.xlu0 %6347 }
 0xbc3   :  { %v6402_v57 = vsel %vm191_vm1, %v6397_v24, 0  ;;  %v6353_v61 = vsel %vm191_vm1, %v6348_v1, 0 }
 0xbc7   :  { %14824 = vmatmul.mubr.msk.bf16.vlgmr.msra.gmra.mxu0 %vm191_vm1, %v18238_v32  ;;  %14830 = vmatmul.mubr.msk.bf16.vlgmr.msra.gmra.mxu1 %vm191_vm1, %v18236_v55  ;;  %v6861_v49 = vpop.permute.xlu1 %6860  ;;  %v6909_v34 = vpop.permute.xlu0 %6908 }
 0xbc8   :  { %14834 = vmatpush3.bf16.xpose.msra.mxu0 %v6353_v61  ;;  %14840 = vmatpush3.bf16.xpose.msra.mxu1 %v6402_v57  ;;  %v6866_v26 = vsel %vm204_vm0, %v6861_v49, 0  ;;  %v6914_v22 = vsel %vm204_vm0, %v6909_v34, 0  ;;  %v4856_v34 = vld [vmem:[#allocation2 + $0x60] sm:$0xff] }
 0xbc9   :  { %14841 = vmatprep.mubr.msk.bf16.mxu1 %vm16589_vm3, %v20456_v46  ;;  %14835 = vmatprep.mubr.msk.bf16.mxu0 %vm16589_vm3, %v20456_v46 }
 0xbca   :  { %14845 = vmatprep.subr.bf16.mxu0 %v20456_v46  ;;  %14851 = vmatprep.subr.bf16.mxu1 %v20456_v46 }
 0xbcb   :  { %v18494_v2 = vpop.permute.xlu1 %6956  ;;  %v18496_v29 = vpop.permute.xlu0 %7004 }
 0xbce   :  { %v5311_v0 = vpop.f32.mrf.mxu0  ;;  %v5360_v13 = vpop.f32.mrf.mxu1 }
 0xbcf   :  { %v18460_v33 = vadd.f32 %v5311_v0, %v4852_v43  ;;  %v18462_v12 = vadd.f32 %v5360_v13, %v4853_v3  ;;  %14836 = vmatmul.mubr.msk.bf16.vlgmr.msra.gmra.mxu0 %vm191_vm1, %v18252_v9  ;;  %14842 = vmatmul.mubr.msk.bf16.vlgmr.msra.gmra.mxu1 %vm191_vm1, %v18250_v4  ;;  %v4857_v0 = vld [vmem:[#allocation2 + $0x68] sm:$0xff] }
 0xbd0   :  { %14846 = vmatpush3.bf16.msra.mxu0 %v6866_v26  ;;  %14852 = vmatpush3.bf16.msra.mxu1 %v6914_v22  ;;  %v14705_v39 = vpop.f32.mrf.mxu0  ;;  %v14711_v14 = vpop.f32.mrf.mxu1 }
 0xbd1   :  { %6452 = vst.msk [vmem:[#allocation2 + $0x40] sm:$0xff] %vm191_vm1, %v18460_v33  ;;  %6453 = vst.msk [vmem:[#allocation2 + $0x48] sm:$0xff] %vm191_vm1, %v18462_v12  ;;  %v6500_v15 = vsel %vm191_vm1, %v18460_v33, -inf  ;;  %v6503_v25 = vsel %vm191_vm1, %v18462_v12, -inf  ;;  %14853 = vmatprep.mubr.msk.bf16.mxu1 %vm16589_vm3, %v20456_v46  ;;  %14863 = vmatprep.subr.bf16.mxu1 %v20456_v46  ;;  %v18498_v36 = vpop.permute.xlu1 %7052  ;;  %v18500_v58 = vpop.permute.xlu0 %7100 }
 0xbd2   :  { %6501 = vmax.xlane.f32.xlu1 %v6500_v15  ;;  %6504 = vmax.xlane.f32.xlu0 %v6503_v25  ;;  %v5314_v37 = vpop.f32.mrf.mxu0  ;;  %v5363_v54 = vpop.f32.mrf.mxu1 }
 0xbd3   :  { %14847 = vmatprep.mubr.msk.bf16.mxu0 %vm16589_vm3, %v20456_v46  ;;  %14857 = vmatprep.subr.bf16.mxu0 %v20456_v46 }
 0xbd4   :  { %v14706_v28 = vpop.f32.mrf.mxu0  ;;  %v14712_v45 = vpop.f32.mrf.mxu1 }
 0xbd5   :  { %v18502_v24 = vpop.permute.xlu1 %7148  ;;  %v18504_v1 = vpop.permute.xlu0 %7196 }
 0xbd7   :  { %v5409_v18 = vpop.f32.mrf.mxu0  ;;  %v5458_v21 = vpop.f32.mrf.mxu1 }
 0xbd8   :  { %v18482_v60 = vadd.f32 %v5409_v18, %v4854_v50  ;;  %v18484_v20 = vadd.f32 %v5458_v21, %v4855_v63  ;;  %v4858_v63 = vld [vmem:[#allocation2 + $0x70] sm:$0xff] }
 0xbd9   :  { %v14717_v56 = vpop.f32.mrf.mxu0  ;;  %v14723_v35 = vpop.f32.mrf.mxu1 }
 0xbda   :  { %6454 = vst.msk [vmem:[#allocation2 + $0x50] sm:$0xff] %vm191_vm1, %v18482_v60  ;;  %6455 = vst.msk [vmem:[#allocation2 + $0x58] sm:$0xff] %vm191_vm1, %v18484_v20  ;;  %v6506_v62 = vsel %vm191_vm1, %v18482_v60, -inf  ;;  %v6509_v11 = vsel %vm191_vm1, %v18484_v20, -inf  ;;  %v18506_v57 = vpop.permute.xlu1 %7244  ;;  %v18508_v61 = vpop.permute.xlu0 %7292  ;;  %v4859_v56 = vld [vmem:[#allocation2 + $0x78] sm:$0xff] }
 0xbdb   :  { %6507 = vmax.xlane.f32.xlu1 %v6506_v62  ;;  %6510 = vmax.xlane.f32.xlu0 %v6509_v11  ;;  %v5412_v48 = vpop.f32.mrf.mxu0  ;;  %v5461_v8 = vpop.f32.mrf.mxu1 }
 0xbdd   :  { %v14718_v19 = vpop.f32.mrf.mxu0  ;;  %v14724_v31 = vpop.f32.mrf.mxu1 }
 0xbde   :  { %v18510_v49 = vpop.permute.xlu1 %7340  ;;  %v18512_v13 = vpop.permute.xlu0 %7388 }
 0xbe2   :  { %v18518_v15 = vpop.permute.xlu1 %7436  ;;  %v18528_v18 = vpop.permute.xlu0 %7580 }
 0xbe6   :  { %v18530_v62 = vpop.permute.xlu1 %7532 }
 0xc0b   :  { %v5507_v43 = vpop.f32.mrf.mxu0  ;;  %v5556_v3 = vpop.f32.mrf.mxu1 }
 0xc0c   :  { %v18514_v26 = vadd.f32 %v5507_v43, %v4856_v34  ;;  %v18516_v22 = vadd.f32 %v5556_v3, %v4857_v0  ;;  %v18544_v3 = vpop.permute.xlu0 %7676 }
 0xc0d   :  { %v14729_v39 = vpop.f32.mrf.mxu0  ;;  %v14735_v14 = vpop.f32.mrf.mxu1  ;;  %20487 = vst [vmem:[#allocation42_spill] sm:$0xff] %v18544_v3 }
 0xc0e   :  { %6456 = vst.msk [vmem:[#allocation2 + $0x60] sm:$0xff] %vm191_vm1, %v18514_v26  ;;  %6457 = vst.msk [vmem:[#allocation2 + $0x68] sm:$0xff] %vm191_vm1, %v18516_v22  ;;  %v6512_v25 = vsel %vm191_vm1, %v18514_v26, -inf  ;;  %v6515_v37 = vsel %vm191_vm1, %v18516_v22, -inf }
 0xc0f   :  { %v5510_v54 = vpop.f32.mrf.mxu0  ;;  %v5559_v28 = vpop.f32.mrf.mxu1  ;;  %6513 = vmax.xlane.f32.xlu1 %v6512_v25  ;;  %6516 = vmax.xlane.f32.xlu0 %v6515_v37  ;;  %v4860_v37 = vld [vmem:[#allocation2 + $0x80] sm:$0xff] }
 0xc10   :  { %v18546_v25 = vpop.permute.xlu1 %7628  ;;  %v4861_v28 = vld [vmem:[#allocation2 + $0x88] sm:$0xff] }
 0xc11   :  { %v14730_v45 = vpop.f32.mrf.mxu0  ;;  %v14736_v50 = vpop.f32.mrf.mxu1 }
 0xc14   :  { %v5605_v21 = vpop.f32.mrf.mxu0  ;;  %v5654_v35 = vpop.f32.mrf.mxu1 }
 0xc15   :  { %v18532_v11 = vadd.f32 %v5605_v21, %v4858_v63  ;;  %v18534_v48 = vadd.f32 %v5654_v35, %v4859_v56  ;;  %v18552_v35 = vpop.permute.xlu0 %7772 }
 0xc16   :  { %v14741_v8 = vpop.f32.mrf.mxu0  ;;  %v14747_v19 = vpop.f32.mrf.mxu1  ;;  %20488 = vst [vmem:[#allocation44_spill] sm:$0xff] %v18552_v35  ;;  %v4873_v35 = vld [vmem:[#allocation2 + $0xe8] sm:$0xff] }
 0xc17   :  { %6458 = vst.msk [vmem:[#allocation2 + $0x70] sm:$0xff] %vm191_vm1, %v18532_v11  ;;  %6459 = vst.msk [vmem:[#allocation2 + $0x78] sm:$0xff] %vm191_vm1, %v18534_v48  ;;  %v6518_v31 = vsel %vm191_vm1, %v18532_v11, -inf  ;;  %v6521_v34 = vsel %vm191_vm1, %v18534_v48, -inf }
 0xc18   :  { %v5608_v43 = vpop.f32.mrf.mxu0  ;;  %v5657_v0 = vpop.f32.mrf.mxu1  ;;  %6519 = vmax.xlane.f32.xlu1 %v6518_v31  ;;  %6522 = vmax.xlane.f32.xlu0 %v6521_v34 }
 0xc19   :  { %v18558_v31 = vpop.permute.xlu1 %7724  ;;  %v4862_v0 = vld [vmem:[#allocation2 + $0x90] sm:$0xff] }
 0xc1a   :  { %v14742_v39 = vpop.f32.mrf.mxu0  ;;  %v14748_v14 = vpop.f32.mrf.mxu1  ;;  %20489 = vst [vmem:[#allocation29_spill] sm:$0xff] %v18558_v31  ;;  %v4872_v31 = vld [vmem:[#allocation2 + $0xe0] sm:$0xff] }
 0xc1b   :  { %v4863_v14 = vld [vmem:[#allocation2 + $0x98] sm:$0xff] }
 0xc1d   :  { %v5703_v54 = vpop.f32.mrf.mxu0  ;;  %v5752_v45 = vpop.f32.mrf.mxu1 }
 0xc1e   :  { %v18548_v50 = vadd.f32 %v5703_v54, %v4860_v37  ;;  %v18550_v63 = vadd.f32 %v5752_v45, %v4861_v28  ;;  %v18560_v54 = vpop.permute.xlu0 %7964  ;;  %v18566_v59 = vpop.permute.xlu1 %7820 }
 0xc1f   :  { %v14753_v21 = vpop.f32.mrf.mxu0  ;;  %v14759_v56 = vpop.f32.mrf.mxu1  ;;  %20490 = vst [vmem:[#allocation27_spill] sm:$0xff] %v18560_v54  ;;  %20491 = vst [vmem:[#allocation25_spill] sm:$0xff] %v18566_v59 }
 0xc20   :  { %6460 = vst.msk [vmem:[#allocation2 + $0x80] sm:$0xff] %vm191_vm1, %v18548_v50  ;;  %6461 = vst.msk [vmem:[#allocation2 + $0x88] sm:$0xff] %vm191_vm1, %v18550_v63 }
 0xc21   :  { %v5706_v8 = vpop.f32.mrf.mxu0  ;;  %v5755_v19 = vpop.f32.mrf.mxu1 }
 0xc23   :  { %v14754_v34 = vpop.f32.mrf.mxu0  ;;  %v14760_v43 = vpop.f32.mrf.mxu1 }
 0xc24   :  { %v18574_v43 = vpop.permute.xlu0 %7484 }
 0xc26   :  { %v5801_v39 = vpop.f32.mrf.mxu0  ;;  %v5850_v37 = vpop.f32.mrf.mxu1 }
 0xc27   :  { %v18562_v28 = vadd.f32 %v5801_v39, %v4862_v0  ;;  %v18564_v45 = vadd.f32 %v5850_v37, %v4863_v14  ;;  %v18580_v39 = vpop.permute.xlu1 %7916  ;;  %v4865_v14 = vld [vmem:[#allocation2 + $0xa8] sm:$0xff] }
 0xc28   :  { %v14765_v21 = vpop.f32.mrf.mxu0  ;;  %v14771_v56 = vpop.f32.mrf.mxu1  ;;  %20492 = vst [vmem:[#allocation28_spill] sm:$0xff] %v18580_v39 }
 0xc29   :  { %6462 = vst.msk [vmem:[#allocation2 + $0x90] sm:$0xff] %vm191_vm1, %v18562_v28  ;;  %6463 = vst.msk [vmem:[#allocation2 + $0x98] sm:$0xff] %vm191_vm1, %v18564_v45  ;;  %8108 = vrot.lane.b32.xlu1 %v18212_v10, %s16583_s1  ;;  %v4864_v21 = vld [vmem:[#allocation2 + $0xa0] sm:$0xff] }
 0xc2a   :  { %v5804_v8 = vpop.f32.mrf.mxu0  ;;  %v5853_v19 = vpop.f32.mrf.mxu1 }
 0xc2c   :  { %v14766_v34 = vpop.f32.mrf.mxu0  ;;  %v14772_v0 = vpop.f32.mrf.mxu1 }
 0xc2d   :  { %8156 = vrot.lane.b32.xlu1 %v18210_v16, %s16583_s1  ;;  %v18588_v34 = vpop.permute.xlu0 %7868  ;;  %v18592_v0 = vpop.permute.xlu1 %8012 }
 0xc2e   :  { %8060 = vrot.lane.b32.xlu0 %v18196_v30, %s16583_s1  ;;  %20493 = vst [vmem:[#allocation31_spill] sm:$0xff] %v18588_v34  ;;  %20494 = vst [vmem:[#allocation26_spill] sm:$0xff] %v18592_v0 }
 0xc2f   :  { %v5948_v37 = vpop.f32.mrf.mxu1 }
 0xc30   :  { %v5899_v56 = vpop.f32.mrf.mxu0  ;;  %v18582_v6 = vadd.f32 %v5948_v37, %v4865_v14  ;;  %v4867_v37 = vld [vmem:[#allocation2 + $0xb8] sm:$0xff] }
 0xc31   :  { %v18584_v10 = vadd.f32 %v5899_v56, %v4864_v21  ;;  %v14783_v8 = vpop.f32.mrf.mxu1  ;;  %v6478_v14 = vpop.xlane.xlu0 %6477 }
 0xc32   :  { %6465 = vst.msk [vmem:[#allocation2 + $0xa8] sm:$0xff] %vm191_vm1, %v18582_v6  ;;  %v14777_v19 = vpop.f32.mrf.mxu0  ;;  %v4866_v8 = vld [vmem:[#allocation2 + $0xb0] sm:$0xff] }
 0xc33   :  { %6464 = vst.msk [vmem:[#allocation2 + $0xa0] sm:$0xff] %vm191_vm1, %v18584_v10  ;;  %v5951_v30 = vpop.f32.mrf.mxu1 }
 0xc34   :  { %v5902_v16 = vpop.f32.mrf.mxu0  ;;  %v6481_v56 = vpop.xlane.xlu1 %6480 }
 0xc35   :  { %v14784_v7 = vpop.f32.mrf.mxu1  ;;  %v6484_v44 = vpop.xlane.xlu0 %6483  ;;  %v6573_v16 = vsub.f32 %v18394_v27, %v6481_v56  ;;  %v4868_v56 = vld [vmem:[#allocation2 + $0xc0] sm:$0xff] }
 0xc36   :  { %v14778_v53 = vpop.f32.mrf.mxu0 }
 0xc38   :  { %v6046_v21 = vpop.f32.mrf.mxu1 }
 0xc39   :  { %v5997_v5 = vpop.f32.mrf.mxu0  ;;  %v18594_v41 = vadd.f32 %v6046_v21, %v4867_v37  ;;  %v6572_v37 = vsub.f32 %v18398_v17, %v6478_v14  ;;  %v6606_v21 = vmul.f32 1.442695, %v6573_v16  ;;  %v6527_v17 = vsel %vm191_vm1, %v18550_v63, -inf  ;;  %v6490_v14 = vpop.xlane.xlu1 %6489 }
 0xc3a   :  { %v18596_v19 = vadd.f32 %v5997_v5, %v4866_v8  ;;  %v14795_v38 = vpop.f32.mrf.mxu1  ;;  %v6487_v5 = vpop.xlane.xlu0 %6486 }
 0xc3b   :  { %6467 = vst.msk [vmem:[#allocation2 + $0xb8] sm:$0xff] %vm191_vm1, %v18594_v41  ;;  %v14789_v30 = vpop.f32.mrf.mxu0  ;;  %v6604_v8 = vmul.f32 1.442695, %v6572_v37  ;;  %16074 = vpow2.f32 %v6606_v21  ;;  %v6575_v38 = vsub.f32 %v18406_v23, %v6487_v5  ;;  %v6533_v5 = vsel %vm191_vm1, %v18564_v45, -inf }
 0xc3c   :  { %6466 = vst.msk [vmem:[#allocation2 + $0xb0] sm:$0xff] %vm191_vm1, %v18596_v19  ;;  %v6049_v7 = vpop.f32.mrf.mxu1  ;;  %v6574_v30 = vsub.f32 %v18402_v47, %v6484_v44  ;;  %v6576_v47 = vsub.f32 %v18416_v40, %v6490_v14 }
 0xc3d   :  { %v6000_v53 = vpop.f32.mrf.mxu0  ;;  %16076 = vpow2.f32 %v6604_v8  ;;  %v6610_v54 = vmul.f32 1.442695, %v6575_v38  ;;  %v4869_v7 = vld [vmem:[#allocation2 + $0xc8] sm:$0xff] }
 0xc3e   :  { %v14796_v0 = vpop.f32.mrf.mxu1  ;;  %v6493_v27 = vpop.xlane.xlu0 %6492 }
 0xc3f   :  { %v14790_v39 = vpop.f32.mrf.mxu0  ;;  %16078 = vpow2.f32 %v6610_v54  ;;  %v6577_v16 = vsub.f32 %v18418_v52, %v6493_v27  ;;  %v6524_v52 = vsel %vm191_vm1, %v18548_v50, -inf  ;;  %v4870_v27 = vld [vmem:[#allocation2 + $0xd0] sm:$0xff] }
 0xc40   :  { %v6608_v39 = vmul.f32 1.442695, %v6574_v30 }
 0xc41   :  { %v6614_v54 = vmul.f32 1.442695, %v6577_v16 }
 0xc42   :  { %16080 = vpow2.f32 %v6608_v39  ;;  %v6499_v38 = vpop.xlane.xlu0 %6498  ;;  %v6530_v39 = vsel %vm191_vm1, %v18562_v28, -inf }
 0xc43   :  { %16082 = vpow2.f32 %v6614_v54  ;;  %v6579_v14 = vsub.f32 %v18432_v51, %v6499_v38 }
 0xc48   :  { %v18622_v8 = vpop.eup %16074 }
 0xc4a   :  { %v6095_v59 = vpop.f32.mrf.mxu0 }
 0xc4b   :  { %v18606_v34 = vadd.f32 %v6095_v59, %v4868_v56  ;;  %v6144_v0 = vpop.f32.mrf.mxu1 }
 0xc4c   :  { %v18611_v23 = vadd.f32 %v6144_v0, %v4869_v7  ;;  %v14801_v53 = vpop.f32.mrf.mxu0  ;;  %v6612_v7 = vmul.f32 1.442695, %v6576_v47  ;;  %v4871_v0 = vld [vmem:[#allocation2 + $0xd8] sm:$0xff] }
 0xc4d   :  { %6468 = vst.msk [vmem:[#allocation2 + $0xc0] sm:$0xff] %vm191_vm1, %v18606_v34  ;;  %v14807_v44 = vpop.f32.mrf.mxu1  ;;  %6528 = vmax.xlane.f32.xlu0 %v6527_v17 }
 0xc4e   :  { %6469 = vst.msk [vmem:[#allocation2 + $0xc8] sm:$0xff] %vm191_vm1, %v18611_v23  ;;  %v6098_v59 = vpop.f32.mrf.mxu0  ;;  %v6671_v44 = vsel %vm191_vm1, %v18622_v8, 0.0  ;;  %16084 = vpow2.f32 %v6612_v7 }
 0xc4f   :  { %v6147_v37 = vpop.f32.mrf.mxu1  ;;  %v18633_v59 = vpop.eup %16076 }
 0xc50   :  { %v14802_v21 = vpop.f32.mrf.mxu0  ;;  %v6496_v37 = vpop.xlane.xlu1 %6495 }
 0xc51   :  { %v14808_v30 = vpop.f32.mrf.mxu1  ;;  %6525 = vmax.xlane.f32.xlu1 %v6524_v52  ;;  %6534 = vmax.xlane.f32.xlu0 %v6533_v5  ;;  %v6539_v21 = vsel %vm191_vm1, %v18582_v6, -inf  ;;  %v6578_v52 = vsub.f32 %v18430_v42, %v6496_v37  ;;  %v6618_v5 = vmul.f32 1.442695, %v6579_v14  ;;  %v6545_v14 = vsel %vm191_vm1, %v18594_v41, -inf }
 0xc52   :  { %v6193_v56 = vpop.f32.mrf.mxu0  ;;  %v6668_v30 = vsel %vm191_vm1, %v18633_v59, 0.0 }
 0xc53   :  { %v18624_v40 = vadd.f32 %v6193_v56, %v4870_v27  ;;  %v6242_v17 = vpop.f32.mrf.mxu1  ;;  %v18644_v27 = vpop.eup %16078  ;;  %16086 = vpow2.f32 %v6618_v5 }
 0xc54   :  { %v18629_v16 = vadd.f32 %v6242_v17, %v4871_v0  ;;  %v14813_v53 = vpop.f32.mrf.mxu0  ;;  %v6616_v0 = vmul.f32 1.442695, %v6578_v52  ;;  %v6536_v17 = vsel %vm191_vm1, %v18584_v10, -inf  ;;  %v6677_v7 = vsel %vm191_vm1, %v18644_v27, 0.0 }
 0xc55   :  { %6470 = vst.msk [vmem:[#allocation2 + $0xd0] sm:$0xff] %vm191_vm1, %v18624_v40  ;;  %v14819_v47 = vpop.f32.mrf.mxu1  ;;  %6531 = vmax.xlane.f32.xlu1 %v6530_v39  ;;  %6672 = vadd.xlane.f32.xlu0 %v6671_v44  ;;  %v18650_v39 = vpop.eup %16080  ;;  %v6542_v44 = vsel %vm191_vm1, %v18596_v19, -inf  ;;  %v6548_v52 = vsel %vm191_vm1, %v18606_v34, -inf }
 0xc56   :  { %6471 = vst.msk [vmem:[#allocation2 + $0xd8] sm:$0xff] %vm191_vm1, %v18629_v16  ;;  %v6196_v54 = vpop.f32.mrf.mxu0  ;;  %16088 = vpow2.f32 %v6616_v0  ;;  %v6674_v42 = vsel %vm191_vm1, %v18650_v39, 0.0  ;;  %v18656_v53 = vpop.eup %16082  ;;  %v6554_v0 = vsel %vm191_vm1, %v18624_v40, -inf }
 0xc57   :  { %v6245_v51 = vpop.f32.mrf.mxu1  ;;  %v6683_v37 = vsel %vm191_vm1, %v18656_v53, 0.0 }
 0xc58   :  { %v14814_v38 = vpop.f32.mrf.mxu0  ;;  %v6551_v51 = vsel %vm191_vm1, %v18611_v23, -inf }
 0xc59   :  { %v14820_v56 = vpop.f32.mrf.mxu1  ;;  %6540 = vmax.xlane.f32.xlu0 %v6539_v21  ;;  %6669 = vadd.xlane.f32.xlu1 %v6668_v30 }
 0xc5a   :  { %v6557_v56 = vsel %vm191_vm1, %v18629_v16, -inf }
 0xc5b   :  { %v18662_v47 = vpop.eup %16084 }
 0xc5c   :  { %v6680_v54 = vsel %vm191_vm1, %v18662_v47, 0.0 }
 0xc5d   :  { %6537 = vmax.xlane.f32.xlu1 %v6536_v17  ;;  %6678 = vadd.xlane.f32.xlu0 %v6677_v7  ;;  %v6502_v17 = vpop.xlane.xlu1 %6501  ;;  %v6505_v7 = vpop.xlane.xlu0 %6504 }
 0xc60   :  { %v18668_v21 = vpop.eup %16086 }
 0xc61   :  { %6675 = vadd.xlane.f32.xlu1 %v6674_v42  ;;  %6546 = vmax.xlane.f32.xlu0 %v6545_v14  ;;  %v6689_v5 = vsel %vm191_vm1, %v18668_v21, 0.0  ;;  %v6580_v42 = vsub.f32 %v18460_v33, %v6502_v17  ;;  %v6581_v14 = vsub.f32 %v18462_v12, %v6505_v7 }
 0xc63   :  { %v18674_v38 = vpop.eup %16088 }
 0xc64   :  { %v6686_v30 = vsel %vm191_vm1, %v18674_v38, 0.0 }
 0xc65   :  { %6543 = vmax.xlane.f32.xlu1 %v6542_v44  ;;  %6684 = vadd.xlane.f32.xlu0 %v6683_v37  ;;  %v6508_v44 = vpop.xlane.xlu1 %6507  ;;  %v6511_v37 = vpop.xlane.xlu0 %6510 }
 0xc69   :  { %6681 = vadd.xlane.f32.xlu1 %v6680_v54  ;;  %6552 = vmax.xlane.f32.xlu0 %v6551_v51  ;;  %v6620_v54 = vmul.f32 1.442695, %v6580_v42  ;;  %v6582_v51 = vsub.f32 %v18482_v60, %v6508_v44  ;;  %v4874_v42 = vld [vmem:[#allocation2 + $0xf0] sm:$0xff]  ;;  %v4875_v44 = vld [vmem:[#allocation2 + $0xf8] sm:$0xff] }
 0xc6b   :  { %16090 = vpow2.f32 %v6620_v54 }
 0xc6d   :  { %6549 = vmax.xlane.f32.xlu1 %v6548_v52  ;;  %6690 = vadd.xlane.f32.xlu0 %v6689_v5  ;;  %v6622_v52 = vmul.f32 1.442695, %v6581_v14  ;;  %v6583_v5 = vsub.f32 %v18484_v20, %v6511_v37 }
 0xc6f   :  { %16092 = vpow2.f32 %v6622_v52 }
 0xc71   :  { %6687 = vadd.xlane.f32.xlu1 %v6686_v30  ;;  %6558 = vmax.xlane.f32.xlu0 %v6557_v56  ;;  %v6624_v30 = vmul.f32 1.442695, %v6582_v51  ;;  %v6626_v56 = vmul.f32 1.442695, %v6583_v5 }
 0xc73   :  { %16094 = vpow2.f32 %v6624_v30 }
 0xc74   :  { %16096 = vpow2.f32 %v6626_v56 }
 0xc75   :  { %6555 = vmax.xlane.f32.xlu1 %v6554_v0 }
 0xc78   :  { %v18702_v30 = vpop.eup %16090 }
 0xc87   :  { %v6291_v0 = vpop.f32.mrf.mxu0  ;;  %v6340_v9 = vpop.f32.mrf.mxu1 }
 0xc88   :  { %v18686_v4 = vadd.f32 %v6291_v0, %v4872_v31  ;;  %v18688_v33 = vadd.f32 %v6340_v9, %v4873_v35 }
 0xc89   :  { %v14825_v12 = vpop.f32.mrf.mxu0  ;;  %v14831_v17 = vpop.f32.mrf.mxu1 }
 0xc8a   :  { %6472 = vst.msk [vmem:[#allocation2 + $0xe0] sm:$0xff] %vm191_vm1, %v18686_v4  ;;  %6473 = vst.msk [vmem:[#allocation2 + $0xe8] sm:$0xff] %vm191_vm1, %v18688_v33  ;;  %v6560_v60 = vsel %vm191_vm1, %v18686_v4, -inf  ;;  %v6563_v20 = vsel %vm191_vm1, %v18688_v33, -inf  ;;  %v18712_v12 = vpop.eup %16092 }
 0xc8b   :  { %v6294_v31 = vpop.f32.mrf.mxu0  ;;  %v6343_v7 = vpop.f32.mrf.mxu1  ;;  %6561 = vmax.xlane.f32.xlu1 %v6560_v60  ;;  %6564 = vmax.xlane.f32.xlu0 %v6563_v20 }
 0xc8c   :  { %v18714_v7 = vpop.eup %16094 }
 0xc8d   :  { %v14826_v9 = vpop.f32.mrf.mxu0  ;;  %v14832_v35 = vpop.f32.mrf.mxu1 }
 0xc8e   :  { %v6692_v9 = vsel %vm191_vm1, %v18702_v30, 0.0  ;;  %v6695_v35 = vsel %vm191_vm1, %v18712_v12, 0.0 }
 0xc8f   :  { %v6389_v14 = vpop.f32.mrf.mxu0  ;;  %v6438_v37 = vpop.f32.mrf.mxu1 }
 0xc90   :  { %v18698_v54 = vadd.f32 %v6389_v14, %v4874_v42  ;;  %v18700_v51 = vadd.f32 %v6438_v37, %v4875_v44  ;;  %v18720_v42 = vpop.eup %16096 }
 0xc91   :  { %v14837_v52 = vpop.f32.mrf.mxu0  ;;  %v14843_v5 = vpop.f32.mrf.mxu1 }
 0xc92   :  { %6474 = vst.msk [vmem:[#allocation2 + $0xf0] sm:$0xff] %vm191_vm1, %v18698_v54  ;;  %6475 = vst.msk [vmem:[#allocation2 + $0xf8] sm:$0xff] %vm191_vm1, %v18700_v51  ;;  %v6566_v56 = vsel %vm191_vm1, %v18698_v54, -inf  ;;  %v6569_v0 = vsel %vm191_vm1, %v18700_v51, -inf  ;;  %v6698_v5 = vsel %vm191_vm1, %v18714_v7, 0.0 }
 0xc93   :  { %v6392_v17 = vpop.f32.mrf.mxu0  ;;  %v6441_v60 = vpop.f32.mrf.mxu1  ;;  %6567 = vmax.xlane.f32.xlu1 %v6566_v56  ;;  %6570 = vmax.xlane.f32.xlu0 %v6569_v0  ;;  %v6701_v56 = vsel %vm191_vm1, %v18720_v42, 0.0 }
 0xc95   :  { %v14838_v20 = vpop.f32.mrf.mxu0  ;;  %v14844_v31 = vpop.f32.mrf.mxu1 }
 0xc97   :  { %6693 = vadd.xlane.f32.xlu1 %v6692_v9  ;;  %6696 = vadd.xlane.f32.xlu0 %v6695_v35 }
 0xc98   :  { %v6514_v14 = vpop.xlane.xlu1 %6513  ;;  %v6517_v44 = vpop.xlane.xlu0 %6516 }
 0xc99   :  { %v6584_v37 = vsub.f32 %v18514_v26, %v6514_v14  ;;  %v6585_v52 = vsub.f32 %v18516_v22, %v6517_v44 }
 0xc9b   :  { %v6628_v0 = vmul.f32 1.442695, %v6584_v37  ;;  %v6630_v17 = vmul.f32 1.442695, %v6585_v52  ;;  %6699 = vadd.xlane.f32.xlu1 %v6698_v5  ;;  %6702 = vadd.xlane.f32.xlu0 %v6701_v56 }
 0xc9d   :  { %16098 = vpow2.f32 %v6628_v0 }
 0xc9e   :  { %16100 = vpow2.f32 %v6630_v17 }
 0xca1   :  { %v6520_v60 = vpop.xlane.xlu1 %6519  ;;  %v6523_v20 = vpop.xlane.xlu0 %6522 }
 0xca2   :  { %v6586_v31 = vsub.f32 %v18532_v11, %v6520_v60  ;;  %v6587_v26 = vsub.f32 %v18534_v48, %v6523_v20 }
 0xca4   :  { %v6632_v9 = vmul.f32 1.442695, %v6586_v31  ;;  %v6634_v22 = vmul.f32 1.442695, %v6587_v26 }
 0xca5   :  { %v18746_v56 = vpop.permute.xlu1 %8108  ;;  %v18748_v0 = vpop.permute.xlu0 %8060 }
 0xca6   :  { %16102 = vpow2.f32 %v6632_v9  ;;  %20495 = vst [vmem:[#allocation32_spill] sm:$0xff] %v18746_v56  ;;  %20496 = vst [vmem:[#allocation30_spill] sm:$0xff] %v18748_v0 }
 0xca7   :  { %16104 = vpow2.f32 %v6634_v22 }
 0xca9   :  { %v18750_v17 = vpop.permute.xlu1 %8156 }
 0xcaa   :  { %v18730_v35 = vpop.eup %16098  ;;  %20497 = vst [vmem:[#allocation45_spill] sm:$0xff] %v18750_v17 }
 0xcab   :  { %v18732_v14 = vpop.eup %16100  ;;  %v6704_v44 = vsel %vm191_vm1, %v18730_v35, 0.0 }
 0xcac   :  { %6705 = vadd.xlane.f32.xlu1 %v6704_v44  ;;  %v6707_v37 = vsel %vm191_vm1, %v18732_v14, 0.0 }
 0xcad   :  { %6708 = vadd.xlane.f32.xlu0 %v6707_v37 }
 0xcb3   :  { %v18738_v52 = vpop.eup %16102 }
 0xcb4   :  { %v18740_v11 = vpop.eup %16104  ;;  %v6710_v48 = vsel %vm191_vm1, %v18738_v52, 0.0 }
 0xcb5   :  { %6711 = vadd.xlane.f32.xlu1 %v6710_v48  ;;  %v6713_v5 = vsel %vm191_vm1, %v18740_v11, 0.0 }
 0xcb6   :  { %6714 = vadd.xlane.f32.xlu0 %v6713_v5 }
 0xcd6   :  { %v6529_v60 = vpop.xlane.xlu0 %6528 }
 0xcd7   :  { %v6589_v20 = vsub.f32 %v18550_v63, %v6529_v60 }
 0xcd9   :  { %v6638_v31 = vmul.f32 1.442695, %v6589_v20 }
 0xcda   :  { %v6526_v26 = vpop.xlane.xlu1 %6525  ;;  %v6535_v9 = vpop.xlane.xlu0 %6534 }
 0xcdb   :  { %16106 = vpow2.f32 %v6638_v31  ;;  %v6588_v22 = vsub.f32 %v18548_v50, %v6526_v26  ;;  %v6591_v44 = vsub.f32 %v18564_v45, %v6535_v9 }
 0xcdd   :  { %v6636_v37 = vmul.f32 1.442695, %v6588_v22  ;;  %v6642_v48 = vmul.f32 1.442695, %v6591_v44 }
 0xcde   :  { %v6532_v5 = vpop.xlane.xlu1 %6531  ;;  %v6673_v3 = vpop.xlane.xlu0 %6672 }
 0xcdf   :  { %16108 = vpow2.f32 %v6636_v37  ;;  %v6590_v56 = vsub.f32 %v18562_v28, %v6532_v5 }
 0xce0   :  { %16110 = vpow2.f32 %v6642_v48 }
 0xce1   :  { %v6640_v17 = vmul.f32 1.442695, %v6590_v56  ;;  %16112 = vrcp.f32 %v6673_v3 }
 0xce2   :  { %v6670_v0 = vpop.xlane.xlu1 %6669  ;;  %v6541_v63 = vpop.xlane.xlu0 %6540 }
 0xce3   :  { %16114 = vpow2.f32 %v6640_v17  ;;  %v6593_v60 = vsub.f32 %v18582_v6, %v6541_v63 }
 0xce4   :  { %16116 = vrcp.f32 %v6670_v0 }
 0xce5   :  { %v6646_v20 = vmul.f32 1.442695, %v6593_v60 }
 0xce6   :  { %v6538_v50 = vpop.xlane.xlu1 %6537  ;;  %v6679_v31 = vpop.xlane.xlu0 %6678 }
 0xce7   :  { %16118 = vpow2.f32 %v6646_v20  ;;  %v6592_v45 = vsub.f32 %v18584_v10, %v6538_v50 }
 0xce8   :  { %v18758_v26 = vpop.eup %16106  ;;  %16120 = vrcp.f32 %v6679_v31 }
 0xce9   :  { %v6644_v9 = vmul.f32 1.442695, %v6592_v45  ;;  %v6719_v28 = vsel %vm191_vm1, %v18758_v26, 0.0 }
 0xcea   :  { %v6676_v3 = vpop.xlane.xlu1 %6675  ;;  %6720 = vadd.xlane.f32.xlu0 %v6719_v28  ;;  %v6547_v56 = vpop.xlane.xlu0 %6546 }
 0xceb   :  { %16122 = vpow2.f32 %v6644_v9  ;;  %v6595_v6 = vsub.f32 %v18594_v41, %v6547_v56 }
 0xcec   :  { %v18763_v0 = vpop.eup %16108  ;;  %16124 = vrcp.f32 %v6676_v3 }
 0xced   :  { %v18765_v17 = vpop.eup %16110  ;;  %v6650_v22 = vmul.f32 1.442695, %v6595_v6  ;;  %v6716_v10 = vsel %vm191_vm1, %v18763_v0, 0.0 }
 0xcee   :  { %v16113_v44 = vpop.eup %16112  ;;  %6717 = vadd.xlane.f32.xlu1 %v6716_v10  ;;  %v6544_v37 = vpop.xlane.xlu1 %6543  ;;  %v6725_v48 = vsel %vm191_vm1, %v18765_v17, 0.0 }
 0xcef   :  { %v6685_v5 = vpop.xlane.xlu0 %6684  ;;  %v6797_v63 = vmul.f32 %v16113_v44, %v18622_v8  ;;  %16126 = vpow2.f32 %v6650_v22  ;;  %v6594_v41 = vsub.f32 %v18596_v19, %v6544_v37  ;;  %6726 = vadd.xlane.f32.xlu0 %v6725_v48  ;;  %v7010_v8 = vsel %vm204_vm0, %v18496_v29, 0 }
 0xcf0   :  { %v18773_v60 = vpop.eup %16114  ;;  %16128 = vrcp.f32 %v6685_v5  ;;  %v6962_v29 = vsel %vm204_vm0, %v18494_v2, 0 }
 0xcf1   :  { %v16117_v20 = vpop.eup %16116  ;;  %v6829_v50 = vpack.c.bf16 %v6797_v63, %v6797_v63  ;;  %v6648_v31 = vmul.f32 1.442695, %v6594_v41  ;;  %v6722_v45 = vsel %vm191_vm1, %v18773_v60, 0.0 }
 0xcf2   :  { %v6796_v9 = vmul.f32 %v16117_v20, %v18633_v59  ;;  %6723 = vadd.xlane.f32.xlu1 %v6722_v45  ;;  %v6682_v28 = vpop.xlane.xlu1 %6681 }
 0xcf3   :  { %v6553_v3 = vpop.xlane.xlu0 %6552  ;;  %16130 = vpow2.f32 %v6648_v31  ;;  %14854 = vmatmul.mubr.msk.bf16.vlgmr.msra.gmra.mxu1 %vm191_vm1, %v6829_v50 }
 0xcf4   :  { %v6597_v19 = vsub.f32 %v18611_v23, %v6553_v3  ;;  %v18782_v56 = vpop.eup %16118  ;;  %v6828_v6 = vpack.c.bf16 %v6796_v9, %v6796_v9  ;;  %14864 = vmatpush3.bf16.msra.mxu1 %v7010_v8  ;;  %16132 = vrcp.f32 %v6682_v28  ;;  %14865 = vmatprep.mubr.msk.bf16.mxu1 %vm16589_vm3, %v20456_v46 }
 0xcf5   :  { %v16121_v59 = vpop.eup %16120  ;;  %v6731_v10 = vsel %vm191_vm1, %v18782_v56, 0.0  ;;  %14875 = vmatprep.subr.bf16.mxu1 %v20456_v46 }
 0xcf6   :  { %v6654_v22 = vmul.f32 1.442695, %v6597_v19  ;;  %v6799_v23 = vmul.f32 %v16121_v59, %v18644_v27  ;;  %14848 = vmatmul.mubr.msk.bf16.vlgmr.msra.gmra.mxu0 %vm191_vm1, %v6828_v6  ;;  %v6550_v44 = vpop.xlane.xlu1 %6549  ;;  %6732 = vadd.xlane.f32.xlu0 %v6731_v10 }
 0xcf7   :  { %v6691_v37 = vpop.xlane.xlu0 %6690  ;;  %14858 = vmatpush3.bf16.msra.mxu0 %v6962_v29  ;;  %v6596_v48 = vsub.f32 %v18606_v34, %v6550_v44  ;;  %14859 = vmatprep.mubr.msk.bf16.mxu0 %vm16589_vm3, %v20456_v46  ;;  %v7106_v34 = vsel %vm204_vm0, %v18500_v58, 0  ;;  %v7058_v58 = vsel %vm204_vm0, %v18498_v36, 0 }
 0xcf8   :  { %16134 = vpow2.f32 %v6654_v22  ;;  %v18796_v5 = vpop.eup %16122  ;;  %v6831_v63 = vpack.c.bf16 %v6799_v23, %v6799_v23  ;;  %14869 = vmatprep.subr.bf16.mxu0 %v20456_v46  ;;  %v7202_v23 = vsel %vm204_vm0, %v18504_v1, 0 }
 0xcf9   :  { %16136 = vrcp.f32 %v6691_v37  ;;  %v16125_v2 = vpop.eup %16124  ;;  %v6652_v27 = vmul.f32 1.442695, %v6596_v48  ;;  %v6728_v41 = vsel %vm191_vm1, %v18796_v5, 0.0 }
 0xcfa   :  { %v6798_v20 = vmul.f32 %v16125_v2, %v18650_v39  ;;  %6729 = vadd.xlane.f32.xlu1 %v6728_v41  ;;  %v6688_v50 = vpop.xlane.xlu1 %6687 }
 0xcfb   :  { %v6559_v31 = vpop.xlane.xlu0 %6558  ;;  %16138 = vpow2.f32 %v6652_v27  ;;  %14866 = vmatmul.mubr.msk.bf16.vlgmr.msra.gmra.mxu1 %vm191_vm1, %v6831_v63 }
 0xcfc   :  { %v6599_v45 = vsub.f32 %v18629_v16, %v6559_v31  ;;  %v18806_v9 = vpop.eup %16126  ;;  %v6830_v28 = vpack.c.bf16 %v6798_v20, %v6798_v20  ;;  %14876 = vmatpush3.bf16.msra.mxu1 %v7106_v34  ;;  %16140 = vrcp.f32 %v6688_v50  ;;  %14877 = vmatprep.mubr.msk.bf16.mxu1 %vm16589_vm3, %v20456_v46 }
 0xcfd   :  { %v16129_v39 = vpop.eup %16128  ;;  %v6737_v8 = vsel %vm191_vm1, %v18806_v9, 0.0  ;;  %14887 = vmatprep.subr.bf16.mxu1 %v20456_v46 }
 0xcfe   :  { %v6658_v3 = vmul.f32 1.442695, %v6599_v45  ;;  %v6801_v16 = vmul.f32 %v16129_v39, %v18656_v53  ;;  %14860 = vmatmul.mubr.msk.bf16.vlgmr.msra.gmra.mxu0 %vm191_vm1, %v6830_v28  ;;  %v6556_v19 = vpop.xlane.xlu1 %6555  ;;  %6738 = vadd.xlane.f32.xlu0 %v6737_v8 }
 0xcff   :  { %14870 = vmatpush3.bf16.msra.mxu0 %v7058_v58  ;;  %v6598_v6 = vsub.f32 %v18624_v40, %v6556_v19  ;;  %14871 = vmatprep.mubr.msk.bf16.mxu0 %vm16589_vm3, %v20456_v46 }
 0xd00   :  { %16142 = vpow2.f32 %v6658_v3  ;;  %v18820_v59 = vpop.eup %16130  ;;  %v6833_v22 = vpack.c.bf16 %v6801_v16, %v6801_v16  ;;  %14881 = vmatprep.subr.bf16.mxu0 %v20456_v46 }
 0xd01   :  { %v16133_v10 = vpop.eup %16132  ;;  %v6656_v36 = vmul.f32 1.442695, %v6598_v6  ;;  %v6734_v53 = vsel %vm191_vm1, %v18820_v59, 0.0 }
 0xd02   :  { %v6800_v29 = vmul.f32 %v16133_v10, %v18662_v47  ;;  %6735 = vadd.xlane.f32.xlu1 %v6734_v53  ;;  %v7154_v47 = vsel %vm204_vm0, %v18502_v24, 0 }
 0xd03   :  { %16144 = vpow2.f32 %v6656_v36  ;;  %14878 = vmatmul.mubr.msk.bf16.vlgmr.msra.gmra.mxu1 %vm191_vm1, %v6833_v22 }
 0xd04   :  { %v6832_v44 = vpack.c.bf16 %v6800_v29, %v6800_v29  ;;  %14888 = vmatpush3.bf16.msra.mxu1 %v7202_v23  ;;  %14889 = vmatprep.mubr.msk.bf16.mxu1 %vm16589_vm3, %v20456_v46 }
 0xd05   :  { %v18829_v40 = vpop.eup %16134  ;;  %14899 = vmatprep.subr.bf16.mxu1 %v20456_v46 }
 0xd06   :  { %v16137_v37 = vpop.eup %16136  ;;  %v6743_v48 = vsel %vm191_vm1, %v18829_v40, 0.0  ;;  %14872 = vmatmul.mubr.msk.bf16.vlgmr.msra.gmra.mxu0 %vm191_vm1, %v6832_v44 }
 0xd07   :  { %v6803_v1 = vmul.f32 %v16137_v37, %v18668_v21  ;;  %6744 = vadd.xlane.f32.xlu0 %v6743_v48  ;;  %14882 = vmatpush3.bf16.msra.mxu0 %v7154_v47  ;;  %v7298_v21 = vsel %vm204_vm0, %v18508_v61, 0 }
 0xd08   :  { %14883 = vmatprep.mubr.msk.bf16.mxu0 %vm16589_vm3, %v20456_v46  ;;  %v18842_v63 = vpop.eup %16138  ;;  %14893 = vmatprep.subr.bf16.mxu0 %v20456_v46 }
 0xd09   :  { %v6835_v2 = vpack.c.bf16 %v6803_v1, %v6803_v1  ;;  %v16141_v27 = vpop.eup %16140  ;;  %v6740_v41 = vsel %vm191_vm1, %v18842_v63, 0.0 }
 0xd0a   :  { %v6802_v24 = vmul.f32 %v16141_v27, %v18674_v38  ;;  %6741 = vadd.xlane.f32.xlu1 %v6740_v41  ;;  %v7250_v38 = vsel %vm204_vm0, %v18506_v57, 0  ;;  %v7490_v27 = vsel %vm204_vm0, %v18574_v43, 0 }
 0xd0b   :  { %14890 = vmatmul.mubr.msk.bf16.vlgmr.msra.gmra.mxu1 %vm191_vm1, %v6835_v2 }
 0xd0c   :  { %v6834_v50 = vpack.c.bf16 %v6802_v24, %v6802_v24  ;;  %14900 = vmatpush3.bf16.msra.mxu1 %v7298_v21  ;;  %14901 = vmatprep.mubr.msk.bf16.mxu1 %vm16589_vm3, %v20456_v46 }
 0xd0d   :  { %v18851_v20 = vpop.eup %16142  ;;  %14911 = vmatprep.subr.bf16.mxu1 %v20456_v46 }
 0xd0e   :  { %v6749_v31 = vsel %vm191_vm1, %v18851_v20, 0.0  ;;  %14884 = vmatmul.mubr.msk.bf16.vlgmr.msra.gmra.mxu0 %vm191_vm1, %v6834_v50 }
 0xd0f   :  { %6750 = vadd.xlane.f32.xlu0 %v6749_v31  ;;  %14894 = vmatpush3.bf16.msra.mxu0 %v7250_v38 }
 0xd10   :  { %14895 = vmatprep.mubr.msk.bf16.mxu0 %vm16589_vm3, %v20456_v46  ;;  %v18863_v61 = vpop.eup %16144  ;;  %14905 = vmatprep.subr.bf16.mxu0 %v20456_v46 }
 0xd11   :  { %v6746_v34 = vsel %vm191_vm1, %v18863_v61, 0.0 }
 0xd12   :  { %6747 = vadd.xlane.f32.xlu1 %v6746_v34 }
 0xd14   :  { %v6562_v45 = vpop.xlane.xlu1 %6561  ;;  %v6565_v28 = vpop.xlane.xlu0 %6564 }
 0xd15   :  { %v6601_v19 = vsub.f32 %v18688_v33, %v6565_v28  ;;  %v6600_v6 = vsub.f32 %v18686_v4, %v6562_v45  ;;  %v7346_v4 = vsel %vm204_vm0, %v18510_v49, 0 }
 0xd17   :  { %v6662_v10 = vmul.f32 1.442695, %v6601_v19  ;;  %v6660_v53 = vmul.f32 1.442695, %v6600_v6 }
 0xd1c   :  { %v6568_v39 = vpop.xlane.xlu1 %6567  ;;  %v6571_v3 = vpop.xlane.xlu0 %6570 }
 0xd1d   :  { %v6603_v22 = vsub.f32 %v18700_v51, %v6571_v3  ;;  %v6602_v44 = vsub.f32 %v18698_v54, %v6568_v39 }
 0xd1f   :  { %v6666_v23 = vmul.f32 1.442695, %v6603_v22  ;;  %v6664_v1 = vmul.f32 1.442695, %v6602_v44  ;;  %v7634_v22 = vsel %vm204_vm0, %v18546_v25, 0  ;;  %v20499_v25 = vld [vmem:[#allocation43_spill] sm:$0xff] }
 0xd20   :  { %v6694_v57 = vpop.xlane.xlu1 %6693  ;;  %v6697_v8 = vpop.xlane.xlu0 %6696 }
 0xd21   :  { %16146 = vrcp.f32 %v6694_v57 }
 0xd22   :  { %16148 = vrcp.f32 %v6697_v8  ;;  %v7538_v8 = vsel %vm204_vm0, %v18530_v62, 0 }
 0xd23   :  { %8252 = vrot.lane.b32.xlu1 %v18236_v55, %s16583_s1 }
 0xd24   :  { %v6700_v58 = vpop.xlane.xlu1 %6699  ;;  %v6703_v16 = vpop.xlane.xlu0 %6702 }
 0xd25   :  { %8204 = vrot.lane.b32.xlu0 %v18238_v32, %s16583_s1  ;;  %16150 = vrcp.f32 %v6700_v58 }
 0xd26   :  { %16152 = vrcp.f32 %v6703_v16 }
 0xd27   :  { %16154 = vpow2.f32 %v6662_v10  ;;  %v20498_v10 = vld [vmem:[#allocation42_spill] sm:$0xff] }
 0xd28   :  { %16156 = vpow2.f32 %v6660_v53 }
 0xd29   :  { %16158 = vpow2.f32 %v6666_v23 }
 0xd2e   :  { %v16147_v36 = vpop.eup %16146 }
 0xd2f   :  { %v16149_v29 = vpop.eup %16148  ;;  %v6804_v55 = vmul.f32 %v16147_v36, %v18702_v30  ;;  %v7394_v30 = vsel %vm204_vm0, %v18512_v13, 0  ;;  %v7682_v36 = vsel %vm204_vm0, %v20498_v10, 0 }
 0xd30   :  { %v6805_v32 = vmul.f32 %v16149_v29, %v18712_v12 }
 0xd31   :  { %v6836_v37 = vpack.c.bf16 %v6804_v55, %v6804_v55 }
 0xd32   :  { %v16151_v48 = vpop.eup %16150  ;;  %v6837_v33 = vpack.c.bf16 %v6805_v32, %v6805_v32 }
 0xd33   :  { %v16153_v47 = vpop.eup %16152  ;;  %14896 = vmatmul.mubr.msk.bf16.vlgmr.msra.gmra.mxu0 %vm191_vm1, %v6836_v37  ;;  %v6806_v12 = vmul.f32 %v16151_v48, %v18714_v7  ;;  %v7442_v7 = vsel %vm204_vm0, %v18518_v15, 0 }
 0xd34   :  { %14902 = vmatmul.mubr.msk.bf16.vlgmr.msra.gmra.mxu1 %vm191_vm1, %v6837_v33  ;;  %14906 = vmatpush3.bf16.msra.mxu0 %v7346_v4  ;;  %v6807_v49 = vmul.f32 %v16153_v47, %v18720_v42  ;;  %v18898_v41 = vpop.eup %16154  ;;  %v20501_v4 = vld [vmem:[#allocation44_spill] sm:$0xff] }
 0xd35   :  { %v6706_v51 = vpop.xlane.xlu1 %6705  ;;  %14912 = vmatpush3.bf16.msra.mxu1 %v7394_v30  ;;  %14907 = vmatprep.mubr.msk.bf16.mxu0 %vm16589_vm3, %v20456_v46  ;;  %v6838_v13 = vpack.c.bf16 %v6806_v12, %v6806_v12  ;;  %v18905_v15 = vpop.eup %16156  ;;  %v6755_v21 = vsel %vm191_vm1, %v18898_v41, 0.0 }
 0xd36   :  { %16160 = vrcp.f32 %v6706_v51  ;;  %v6709_v54 = vpop.xlane.xlu0 %6708  ;;  %14913 = vmatprep.mubr.msk.bf16.mxu1 %vm16589_vm3, %v20456_v46  ;;  %14917 = vmatprep.subr.bf16.mxu0 %v20456_v46  ;;  %v6839_v2 = vpack.c.bf16 %v6807_v49, %v6807_v49  ;;  %v18908_v43 = vpop.eup %16158  ;;  %v6752_v28 = vsel %vm191_vm1, %v18905_v15, 0.0  ;;  %v7778_v51 = vsel %vm204_vm0, %v20501_v4, 0  ;;  %v20502_v49 = vld [vmem:[#allocation29_spill] sm:$0xff] }
 0xd37   :  { %16162 = vrcp.f32 %v6709_v54  ;;  %14923 = vmatprep.subr.bf16.mxu1 %v20456_v46  ;;  %v6761_v39 = vsel %vm191_vm1, %v18908_v43, 0.0 }
 0xd38   :  { %16164 = vpow2.f32 %v6664_v1 }
 0xd3b   :  { %14908 = vmatmul.mubr.msk.bf16.vlgmr.msra.gmra.mxu0 %vm191_vm1, %v6838_v13  ;;  %v7730_v13 = vsel %vm204_vm0, %v20502_v49, 0 }
 0xd3c   :  { %14914 = vmatmul.mubr.msk.bf16.vlgmr.msra.gmra.mxu1 %vm191_vm1, %v6839_v2  ;;  %14918 = vmatpush3.bf16.msra.mxu0 %v7442_v7 }
 0xd3d   :  { %14924 = vmatpush3.bf16.msra.mxu1 %v7490_v27  ;;  %14919 = vmatprep.mubr.msk.bf16.mxu0 %vm16589_vm3, %v20456_v46  ;;  %v20503_v27 = vld [vmem:[#allocation31_spill] sm:$0xff] }
 0xd3e   :  { %v6712_v42 = vpop.xlane.xlu1 %6711  ;;  %14925 = vmatprep.mubr.msk.bf16.mxu1 %vm16589_vm3, %v20456_v46  ;;  %14929 = vmatprep.subr.bf16.mxu0 %v20456_v46 }
 0xd3f   :  { %16166 = vrcp.f32 %v6712_v42  ;;  %v6715_v24 = vpop.xlane.xlu0 %6714  ;;  %14935 = vmatprep.subr.bf16.mxu1 %v20456_v46  ;;  %v7874_v42 = vsel %vm204_vm0, %v20503_v27, 0 }
 0xd40   :  { %16168 = vrcp.f32 %v6715_v24 }
 0xd43   :  { %v16161_v50 = vpop.eup %16160 }
 0xd44   :  { %6756 = vadd.xlane.f32.xlu0 %v6755_v21  ;;  %v16163_v31 = vpop.eup %16162  ;;  %v6808_v38 = vmul.f32 %v16161_v50, %v18730_v35  ;;  %v7586_v35 = vsel %vm204_vm0, %v18528_v18, 0 }
 0xd45   :  { %v6809_v34 = vmul.f32 %v16163_v31, %v18732_v14  ;;  %v18918_v3 = vpop.eup %16164  ;;  %v20504_v31 = vld [vmem:[#allocation25_spill] sm:$0xff] }
 0xd46   :  { %v6840_v45 = vpack.c.bf16 %v6808_v38, %v6808_v38  ;;  %v6758_v14 = vsel %vm191_vm1, %v18918_v3, 0.0  ;;  %v7826_v38 = vsel %vm204_vm0, %v20504_v31, 0 }
 0xd47   :  { %v6841_v57 = vpack.c.bf16 %v6809_v34, %v6809_v34  ;;  %6753 = vadd.xlane.f32.xlu1 %v6752_v28 }
 0xd48   :  { %6762 = vadd.xlane.f32.xlu0 %v6761_v39  ;;  %14920 = vmatmul.mubr.msk.bf16.vlgmr.msra.gmra.mxu0 %vm191_vm1, %v6840_v45  ;;  %v20505_v39 = vld [vmem:[#allocation27_spill] sm:$0xff] }
 0xd49   :  { %14926 = vmatmul.mubr.msk.bf16.vlgmr.msra.gmra.mxu1 %vm191_vm1, %v6841_v57  ;;  %14930 = vmatpush3.bf16.msra.mxu0 %v7538_v8  ;;  %v7970_v57 = vsel %vm204_vm0, %v20505_v39, 0 }
 0xd4a   :  { %14936 = vmatpush3.bf16.msra.mxu1 %v7586_v35  ;;  %14931 = vmatprep.mubr.msk.bf16.mxu0 %vm16589_vm3, %v20456_v46 }
 0xd4b   :  { %6759 = vadd.xlane.f32.xlu1 %v6758_v14  ;;  %14937 = vmatprep.mubr.msk.bf16.mxu1 %vm16589_vm3, %v20456_v46 }
 0xd4c   :  { %v16167_v62 = vpop.eup %16166  ;;  %14941 = vmatprep.subr.bf16.mxu0 %v20456_v46  ;;  %14947 = vmatprep.subr.bf16.mxu1 %v20456_v46 }
 0xd4d   :  { %v16169_v18 = vpop.eup %16168  ;;  %v6810_v58 = vmul.f32 %v16167_v62, %v18738_v52  ;;  %v20500_v52 = vld [vmem:[#allocation41_spill] sm:$0xff]  ;;  %v20506_v62 = vld [vmem:[#allocation28_spill] sm:$0xff] }
 0xd4e   :  { %v6811_v16 = vmul.f32 %v16169_v18, %v18740_v11  ;;  %v7922_v18 = vsel %vm204_vm0, %v20506_v62, 0 }
 0xd4f   :  { %v6842_v19 = vpack.c.bf16 %v6810_v58, %v6810_v58 }
 0xd50   :  { %v6843_v6 = vpack.c.bf16 %v6811_v16, %v6811_v16 }
 0xd51   :  { %14932 = vmatmul.mubr.msk.bf16.vlgmr.msra.gmra.mxu0 %vm191_vm1, %v6842_v19 }
 0xd52   :  { %14938 = vmatmul.mubr.msk.bf16.vlgmr.msra.gmra.mxu1 %vm191_vm1, %v6843_v6  ;;  %14942 = vmatpush3.bf16.msra.mxu0 %v7634_v22  ;;  %v20507_v6 = vld [vmem:[#allocation30_spill] sm:$0xff] }
 0xd53   :  { %14948 = vmatpush3.bf16.msra.mxu1 %v7682_v36  ;;  %14949 = vmatprep.mubr.msk.bf16.mxu1 %vm16589_vm3, %v20456_v46  ;;  %v8066_v22 = vsel %vm204_vm0, %v20507_v6, 0 }
 0xd54   :  { %14959 = vmatprep.subr.bf16.mxu1 %v20456_v46  ;;  %14943 = vmatprep.mubr.msk.bf16.mxu0 %vm16589_vm3, %v20456_v46 }
 0xd55   :  { %14953 = vmatprep.subr.bf16.mxu0 %v20456_v46 }
 0xd5c   :  { %8348 = vrot.lane.b32.xlu1 %v20499_v25, %s16583_s1 }
 0xd5e   :  { %8300 = vrot.lane.b32.xlu0 %v20500_v52, %s16583_s1 }
 0xd73   :  { %v6721_v11 = vpop.xlane.xlu0 %6720 }
 0xd74   :  { %16170 = vrcp.f32 %v6721_v11 }
 0xd77   :  { %v6718_v53 = vpop.xlane.xlu1 %6717 }
 0xd78   :  { %16172 = vrcp.f32 %v6718_v53  ;;  %v6727_v29 = vpop.xlane.xlu0 %6726 }
 0xd79   :  { %16174 = vrcp.f32 %v6727_v29 }
 0xd7b   :  { %v6724_v23 = vpop.xlane.xlu1 %6723 }
 0xd7c   :  { %16176 = vrcp.f32 %v6724_v23  ;;  %v20509_v23 = vld [vmem:[#allocation45_spill] sm:$0xff] }
 0xd7f   :  { %v6733_v55 = vpop.xlane.xlu0 %6732 }
 0xd80   :  { %16178 = vrcp.f32 %v6733_v55 }
 0xd81   :  { %v16171_v44 = vpop.eup %16170 }
 0xd82   :  { %v6813_v32 = vmul.f32 %v16171_v44, %v18758_v26 }
 0xd83   :  { %v6730_v37 = vpop.xlane.xlu1 %6729 }
 0xd84   :  { %v6845_v48 = vpack.c.bf16 %v6813_v32, %v6813_v32  ;;  %16180 = vrcp.f32 %v6730_v37  ;;  %v20510_v37 = vld [vmem:[#allocation32_spill] sm:$0xff] }
 0xd85   :  { %v16173_v33 = vpop.eup %16172 }
 0xd86   :  { %v16175_v47 = vpop.eup %16174  ;;  %v6812_v30 = vmul.f32 %v16173_v33, %v18763_v0  ;;  %14950 = vmatmul.mubr.msk.bf16.vlgmr.msra.gmra.mxu1 %vm191_vm1, %v6845_v48 }
 0xd87   :  { %14960 = vmatpush3.bf16.msra.mxu1 %v7778_v51  ;;  %v6739_v1 = vpop.xlane.xlu0 %6738  ;;  %14961 = vmatprep.mubr.msk.bf16.mxu1 %vm16589_vm3, %v20456_v46  ;;  %v6815_v26 = vmul.f32 %v16175_v47, %v18765_v17 }
 0xd88   :  { %v6844_v54 = vpack.c.bf16 %v6812_v30, %v6812_v30  ;;  %16182 = vrcp.f32 %v6739_v1  ;;  %14971 = vmatprep.subr.bf16.mxu1 %v20456_v46 }
 0xd89   :  { %v16177_v12 = vpop.eup %16176  ;;  %v6847_v2 = vpack.c.bf16 %v6815_v26, %v6815_v26 }
 0xd8a   :  { %14944 = vmatmul.mubr.msk.bf16.vlgmr.msra.gmra.mxu0 %vm191_vm1, %v6844_v54  ;;  %v6814_v7 = vmul.f32 %v16177_v12, %v18773_v60 }
 0xd8b   :  { %14954 = vmatpush3.bf16.msra.mxu0 %v7730_v13  ;;  %v6736_v0 = vpop.xlane.xlu1 %6735  ;;  %14955 = vmatprep.mubr.msk.bf16.mxu0 %vm16589_vm3, %v20456_v46 }
 0xd8c   :  { %16184 = vrcp.f32 %v6736_v0  ;;  %14965 = vmatprep.subr.bf16.mxu0 %v20456_v46  ;;  %v6846_v21 = vpack.c.bf16 %v6814_v7, %v6814_v7 }
 0xd8d   :  { %v16179_v17 = vpop.eup %16178 }
 0xd8e   :  { %14962 = vmatmul.mubr.msk.bf16.vlgmr.msra.gmra.mxu1 %vm191_vm1, %v6847_v2  ;;  %v6817_v50 = vmul.f32 %v16179_v17, %v18782_v56 }
 0xd8f   :  { %14972 = vmatpush3.bf16.msra.mxu1 %v7874_v42  ;;  %14973 = vmatprep.mubr.msk.bf16.mxu1 %vm16589_vm3, %v20456_v46 }
 0xd90   :  { %v6745_v24 = vpop.xlane.xlu0 %6744  ;;  %14983 = vmatprep.subr.bf16.mxu1 %v20456_v46  ;;  %v6849_v45 = vpack.c.bf16 %v6817_v50, %v6817_v50 }
 0xd91   :  { %16186 = vrcp.f32 %v6745_v24  ;;  %v16181_v60 = vpop.eup %16180 }
 0xd92   :  { %14956 = vmatmul.mubr.msk.bf16.vlgmr.msra.gmra.mxu0 %vm191_vm1, %v6846_v21  ;;  %v6816_v28 = vmul.f32 %v16181_v60, %v18796_v5 }
 0xd93   :  { %14966 = vmatpush3.bf16.msra.mxu0 %v7826_v38  ;;  %v6742_v34 = vpop.xlane.xlu1 %6741  ;;  %14967 = vmatprep.mubr.msk.bf16.mxu0 %vm16589_vm3, %v20456_v46 }
 0xd94   :  { %16188 = vrcp.f32 %v6742_v34  ;;  %14977 = vmatprep.subr.bf16.mxu0 %v20456_v46  ;;  %v6848_v35 = vpack.c.bf16 %v6816_v28, %v6816_v28 }
 0xd95   :  { %v16183_v56 = vpop.eup %16182 }
 0xd96   :  { %14974 = vmatmul.mubr.msk.bf16.vlgmr.msra.gmra.mxu1 %vm191_vm1, %v6849_v45  ;;  %v6819_v14 = vmul.f32 %v16183_v56, %v18806_v9 }
 0xd97   :  { %14984 = vmatpush3.bf16.msra.mxu1 %v7970_v57  ;;  %14985 = vmatprep.mubr.msk.bf16.mxu1 %vm16589_vm3, %v20456_v46 }
 0xd98   :  { %v6751_v8 = vpop.xlane.xlu0 %6750  ;;  %14995 = vmatprep.subr.bf16.mxu1 %v20456_v46  ;;  %v6851_v16 = vpack.c.bf16 %v6819_v14, %v6819_v14 }
 0xd99   :  { %16190 = vrcp.f32 %v6751_v8  ;;  %v16185_v5 = vpop.eup %16184 }
 0xd9a   :  { %14968 = vmatmul.mubr.msk.bf16.vlgmr.msra.gmra.mxu0 %vm191_vm1, %v6848_v35  ;;  %v6818_v19 = vmul.f32 %v16185_v5, %v18820_v59  ;;  %v20508_v59 = vld [vmem:[#allocation26_spill] sm:$0xff] }
 0xd9b   :  { %14978 = vmatpush3.bf16.msra.mxu0 %v7922_v18  ;;  %v6748_v58 = vpop.xlane.xlu1 %6747  ;;  %14979 = vmatprep.mubr.msk.bf16.mxu0 %vm16589_vm3, %v20456_v46  ;;  %v8018_v52 = vsel %vm204_vm0, %v20508_v59, 0 }
 0xd9c   :  { %16192 = vrcp.f32 %v6748_v58  ;;  %14989 = vmatprep.subr.bf16.mxu0 %v20456_v46  ;;  %v6850_v10 = vpack.c.bf16 %v6818_v19, %v6818_v19  ;;  %v8205_v4 = vpop.permute.xlu0 %8204 }
 0xd9d   :  { %v8210_v30 = vsel %vm204_vm0, %v8205_v4, 0 }
 0xd9e   :  { %v16187_v9 = vpop.eup %16186  ;;  %14986 = vmatmul.mubr.msk.bf16.vlgmr.msra.gmra.mxu1 %vm191_vm1, %v6851_v16 }
 0xd9f   :  { %14996 = vmatpush3.bf16.msra.mxu1 %v8066_v22  ;;  %14997 = vmatprep.mubr.msk.bf16.mxu1 %vm16589_vm3, %v20456_v46  ;;  %v6821_v36 = vmul.f32 %v16187_v9, %v18829_v40  ;;  %v8162_v40 = vsel %vm204_vm0, %v20509_v23, 0  ;;  %v8253_v48 = vpop.permute.xlu1 %8252 }
 0xda0   :  { %15007 = vmatprep.subr.bf16.mxu1 %v20456_v46 }
 0xda1   :  { %v16189_v25 = vpop.eup %16188  ;;  %v6853_v11 = vpack.c.bf16 %v6821_v36, %v6821_v36 }
 0xda2   :  { %14980 = vmatmul.mubr.msk.bf16.vlgmr.msra.gmra.mxu0 %vm191_vm1, %v6850_v10  ;;  %v6820_v53 = vmul.f32 %v16189_v25, %v18842_v63  ;;  %v8114_v63 = vsel %vm204_vm0, %v20510_v37, 0 }
 0xda3   :  { %14990 = vmatpush3.bf16.msra.mxu0 %v8018_v52  ;;  %14991 = vmatprep.mubr.msk.bf16.mxu0 %vm16589_vm3, %v20456_v46 }
 0xda4   :  { %15001 = vmatprep.subr.bf16.mxu0 %v20456_v46  ;;  %v6852_v55 = vpack.c.bf16 %v6820_v53, %v6820_v53 }
 0xda6   :  { %v16191_v29 = vpop.eup %16190  ;;  %14998 = vmatmul.mubr.msk.bf16.vlgmr.msra.gmra.mxu1 %vm191_vm1, %v6853_v11 }
 0xda7   :  { %15008 = vmatpush3.bf16.msra.mxu1 %v8162_v40  ;;  %15009 = vmatprep.mubr.msk.bf16.mxu1 %vm16589_vm3, %v20456_v46  ;;  %v6823_v44 = vmul.f32 %v16191_v29, %v18851_v20  ;;  %v8258_v20 = vsel %vm204_vm0, %v8253_v48, 0 }
 0xda8   :  { %15019 = vmatprep.subr.bf16.mxu1 %v20456_v46 }
 0xda9   :  { %v16193_v32 = vpop.eup %16192  ;;  %v6855_v33 = vpack.c.bf16 %v6823_v44, %v6823_v44 }
 0xdaa   :  { %14992 = vmatmul.mubr.msk.bf16.vlgmr.msra.gmra.mxu0 %vm191_vm1, %v6852_v55  ;;  %v6822_v47 = vmul.f32 %v16193_v32, %v18863_v61 }
 0xdab   :  { %15002 = vmatpush3.bf16.msra.mxu0 %v8114_v63  ;;  %15003 = vmatprep.mubr.msk.bf16.mxu0 %vm16589_vm3, %v20456_v46 }
 0xdac   :  { %15013 = vmatprep.subr.bf16.mxu0 %v20456_v46  ;;  %v6854_v51 = vpack.c.bf16 %v6822_v47, %v6822_v47 }
 0xdae   :  { %15010 = vmatmul.mubr.msk.bf16.vlgmr.msra.gmra.mxu1 %vm191_vm1, %v6855_v33 }
 0xdaf   :  { %15020 = vmatpush3.bf16.msra.mxu1 %v8258_v20  ;;  %15021 = vmatprep.mubr.msk.bf16.mxu1 %vm16589_vm3, %v20456_v46 }
 0xdb0   :  { %15031 = vmatprep.subr.bf16.mxu1 %v20456_v46 }
 0xdb2   :  { %15004 = vmatmul.mubr.msk.bf16.vlgmr.msra.gmra.mxu0 %vm191_vm1, %v6854_v51 }
 0xdb3   :  { %v19031_v1 = vpop.f32.mrf.mxu1  ;;  %15014 = vmatpush3.bf16.msra.mxu0 %v8210_v30  ;;  %15015 = vmatprep.mubr.msk.bf16.mxu0 %vm16589_vm3, %v20456_v46 }
 0xdb4   :  { %15025 = vmatprep.subr.bf16.mxu0 %v20456_v46 }
 0xdb5   :  { %v14855_v61 = vpop.f32.mrf.mxu1 }
 0xdb6   :  { %v19036_v54 = vpop.f32.mrf.mxu0 }
 0xdb7   :  { %v6953_v26 = vpop.f32.mrf.mxu1 }
 0xdb8   :  { %v14849_v12 = vpop.f32.mrf.mxu0 }
 0xdb9   :  { %v14856_v49 = vpop.f32.mrf.mxu1 }
 0xdba   :  { %v6905_v13 = vpop.f32.mrf.mxu0 }
 0xdbb   :  { %v19038_v0 = vpop.f32.mrf.mxu1 }
 0xdbc   :  { %v14850_v2 = vpop.f32.mrf.mxu0 }
 0xdbd   :  { %v14867_v7 = vpop.f32.mrf.mxu1 }
 0xdbe   :  { %v19040_v17 = vpop.f32.mrf.mxu0 }
 0xdbf   :  { %v7049_v27 = vpop.f32.mrf.mxu1 }
 0xdc0   :  { %v14861_v42 = vpop.f32.mrf.mxu0 }
 0xdc1   :  { %v14868_v24 = vpop.f32.mrf.mxu1 }
 0xdc2   :  { %v7001_v21 = vpop.f32.mrf.mxu0 }
 0xdc3   :  { %v19042_v50 = vpop.f32.mrf.mxu1 }
 0xdc4   :  { %v14862_v60 = vpop.f32.mrf.mxu0 }
 0xdc5   :  { %v14879_v31 = vpop.f32.mrf.mxu1 }
 0xdc6   :  { %v19044_v38 = vpop.f32.mrf.mxu0 }
 0xdc7   :  { %v7145_v34 = vpop.f32.mrf.mxu1 }
 0xdc8   :  { %v14873_v45 = vpop.f32.mrf.mxu0 }
 0xdc9   :  { %v14880_v28 = vpop.f32.mrf.mxu1 }
 0xdca   :  { %v7097_v56 = vpop.f32.mrf.mxu0 }
 0xdcb   :  { %v19046_v39 = vpop.f32.mrf.mxu1 }
 0xdcc   :  { %v14874_v57 = vpop.f32.mrf.mxu0 }
 0xdcd   :  { %v6757_v8 = vpop.xlane.xlu0 %6756  ;;  %v14891_v35 = vpop.f32.mrf.mxu1 }
 0xdce   :  { %16194 = vrcp.f32 %v6757_v8  ;;  %v19048_v14 = vpop.f32.mrf.mxu0 }
 0xdcf   :  { %v7241_v5 = vpop.f32.mrf.mxu1 }
 0xdd0   :  { %v14885_v62 = vpop.f32.mrf.mxu0  ;;  %v6754_v18 = vpop.xlane.xlu1 %6753 }
 0xdd1   :  { %v14892_v58 = vpop.f32.mrf.mxu1  ;;  %16196 = vrcp.f32 %v6754_v18  ;;  %v6763_v16 = vpop.xlane.xlu0 %6762 }
 0xdd2   :  { %16198 = vrcp.f32 %v6763_v16  ;;  %v7193_v19 = vpop.f32.mrf.mxu0 }
 0xdd4   :  { %v14886_v9 = vpop.f32.mrf.mxu0  ;;  %v6760_v6 = vpop.xlane.xlu1 %6759 }
 0xdd5   :  { %16200 = vrcp.f32 %v6760_v6  ;;  %v8301_v29 = vpop.permute.xlu0 %8300 }
 0xdd8   :  { %v8349_v36 = vpop.permute.xlu1 %8348 }
 0xdd9   :  { %v8354_v53 = vsel %vm204_vm0, %v8349_v36, 0 }
 0xddb   :  { %v16195_v22 = vpop.eup %16194 }
 0xddc   :  { %v6825_v10 = vmul.f32 %v16195_v22, %v18898_v41  ;;  %v8306_v41 = vsel %vm204_vm0, %v8301_v29, 0 }
 0xdde   :  { %v6857_v25 = vpack.c.bf16 %v6825_v10, %v6825_v10  ;;  %v16197_v59 = vpop.eup %16196 }
 0xddf   :  { %v16199_v52 = vpop.eup %16198  ;;  %v6824_v11 = vmul.f32 %v16197_v59, %v18905_v15 }
 0xde0   :  { %15022 = vmatmul.mubr.msk.bf16.vlgmr.msra.gmra.mxu1 %vm191_vm1, %v6857_v25  ;;  %v6827_v40 = vmul.f32 %v16199_v52, %v18908_v43 }
 0xde1   :  { %15032 = vmatpush3.bf16.msra.mxu1 %v8354_v53  ;;  %15033 = vmatprep.mubr.msk.bf16.mxu1 %vm16589_vm3, %v20456_v46  ;;  %v6856_v23 = vpack.c.bf16 %v6824_v11, %v6824_v11 }
 0xde2   :  { %v16201_v55 = vpop.eup %16200  ;;  %v6859_v15 = vpack.c.bf16 %v6827_v40, %v6827_v40 }
 0xde3   :  { %15016 = vmatmul.mubr.msk.bf16.vlgmr.msra.gmra.mxu0 %vm191_vm1, %v6856_v23  ;;  %v6826_v44 = vmul.f32 %v16201_v55, %v18918_v3 }
 0xde4   :  { %15026 = vmatpush3.bf16.msra.mxu0 %v8306_v41  ;;  %15027 = vmatprep.mubr.msk.bf16.mxu0 %vm16589_vm3, %v20456_v46 }
 0xde5   :  { %v6858_v32 = vpack.c.bf16 %v6826_v44, %v6826_v44 }
 0xde8   :  { %15034 = vmatmul.mubr.msk.bf16.vlgmr.msra.gmra.mxu1 %vm191_vm1, %v6859_v15 }
 0xdeb   :  { %15028 = vmatmul.mubr.msk.bf16.vlgmr.msra.gmra.mxu0 %vm191_vm1, %v6858_v32 }
 0xdf3   :  { %v7286_v37 = vpop.f32.mrf.mxu0 }
 0xdf4   :  { %v7334_v63 = vpop.f32.mrf.mxu1 }
 0xdf5   :  { %v15720_v43 = vpack.i.bf16 %v7334_v63, %v7286_v37  ;;  %v14897_v48 = vpop.f32.mrf.mxu0 }
 0xdf6   :  { %v14903_v33 = vpop.f32.mrf.mxu1 }
 0xdf7   :  { %15721 = vrot.lane.b32.xlu0 %v15720_v43, %s16593_s26  ;;  %v7289_v47 = vpop.f32.mrf.mxu0 }
 0xdf8   :  { %v7337_v20 = vpop.f32.mrf.mxu1 }
 0xdf9   :  { %v14898_v4 = vpop.f32.mrf.mxu0 }
 0xdfa   :  { %v14904_v51 = vpop.f32.mrf.mxu1 }
 0xdfb   :  { %v7382_v30 = vpop.f32.mrf.mxu0 }
 0xdfc   :  { %v7430_v61 = vpop.f32.mrf.mxu1 }
 0xdfd   :  { %v15725_v26 = vpack.i.bf16 %v7430_v61, %v7382_v30  ;;  %v14909_v3 = vpop.f32.mrf.mxu0 }
 0xdfe   :  { %v14915_v12 = vpop.f32.mrf.mxu1 }
 0xdff   :  { %15726 = vrot.lane.b32.xlu1 %v15725_v26, %s16593_s26  ;;  %v7385_v49 = vpop.f32.mrf.mxu0 }
 0xe00   :  { %v7433_v13 = vpop.f32.mrf.mxu1 }
 0xe01   :  { %v14910_v2 = vpop.f32.mrf.mxu0  ;;  %v15912_v13 = vld [vmem:[#allocation11 + $0x18] sm:$0xff]  }
 0xe02   :  { %v14916_v7 = vpop.f32.mrf.mxu1  ;;  %15037 = vmatprep.subr.bf16.mxu0 %v15912_v13 }
 0xe03   :  { %15038 = vmatpush3.bf16.msra.mxu0 %v15912_v13 }
 0xe08   :  { %v19066_v27 = vpop.f32.mrf.mxu0 }
 0xe09   :  { %v19068_v42 = vpop.f32.mrf.mxu1 }
 0xe0a   :  { %v15750_v24 = vpack.i.bf16 %v19068_v42, %v19066_v27  ;;  %v14921_v21 = vpop.f32.mrf.mxu0 }
 0xe0b   :  { %v14927_v60 = vpop.f32.mrf.mxu1 }
 0xe0c   :  { %v7481_v31 = vpop.f32.mrf.mxu0 }
 0xe0d   :  { %v7529_v34 = vpop.f32.mrf.mxu1 }
 0xe0e   :  { %v14922_v45 = vpop.f32.mrf.mxu0  ;;  %v15913_v34 = vld [vmem:[#allocation11 + $0x10] sm:$0xff]  }
 0xe0f   :  { %v14928_v28 = vpop.f32.mrf.mxu1  ;;  %15039 = vmatprep.subr.bf16.mxu0 %v15913_v34 }
 0xe10   :  { %15040 = vmatpush3.bf16.msra.mxu0 %v15913_v34 }
 0xe11   :  { %v19072_v56 = vpop.f32.mrf.mxu0 }
 0xe12   :  { %v19074_v57 = vpop.f32.mrf.mxu1 }
 0xe13   :  { %v15755_v8 = vpack.i.bf16 %v19074_v57, %v19072_v56  ;;  %v14933_v35 = vpop.f32.mrf.mxu0 }
 0xe14   :  { %v14939_v5 = vpop.f32.mrf.mxu1 }
 0xe15   :  { %v7577_v62 = vpop.f32.mrf.mxu0 }
 0xe16   :  { %v7625_v18 = vpop.f32.mrf.mxu1 }
 0xe17   :  { %v14934_v58 = vpop.f32.mrf.mxu0 }
 0xe18   :  { %v14940_v16 = vpop.f32.mrf.mxu1 }
 0xe46   :  { %v7718_v19 = vpop.f32.mrf.mxu1 }
 0xe48   :  { %v14951_v9 = vpop.f32.mrf.mxu1 }
 0xe4a   :  { %v7670_v6 = vpop.f32.mrf.mxu0  ;;  %v7721_v22 = vpop.f32.mrf.mxu1 }
 0xe4b   :  { %v15730_v10 = vpack.i.bf16 %v7718_v19, %v7670_v6 }
 0xe4c   :  { %v14945_v36 = vpop.f32.mrf.mxu0  ;;  %v14952_v25 = vpop.f32.mrf.mxu1 }
 0xe4d   :  { %15731 = vrot.lane.b32.xlu0 %v15730_v10, %s16576_s0 }
 0xe4e   :  { %v7673_v59 = vpop.f32.mrf.mxu0  ;;  %v7814_v52 = vpop.f32.mrf.mxu1 }
 0xe50   :  { %v14946_v11 = vpop.f32.mrf.mxu0  ;;  %v14963_v53 = vpop.f32.mrf.mxu1 }
 0xe52   :  { %v7766_v29 = vpop.f32.mrf.mxu0  ;;  %v7817_v23 = vpop.f32.mrf.mxu1 }
 0xe53   :  { %v15735_v40 = vpack.i.bf16 %v7814_v52, %v7766_v29 }
 0xe54   :  { %v14957_v55 = vpop.f32.mrf.mxu0  ;;  %v14964_v41 = vpop.f32.mrf.mxu1 }
 0xe55   :  { %15736 = vrot.lane.b32.xlu1 %v15735_v40, %s16576_s0 }
 0xe56   :  { %v7769_v15 = vpop.f32.mrf.mxu0  ;;  %v7910_v44 = vpop.f32.mrf.mxu1 }
 0xe58   :  { %v14958_v32 = vpop.f32.mrf.mxu0  ;;  %v14975_v37 = vpop.f32.mrf.mxu1 }
 0xe5a   :  { %v7862_v63 = vpop.f32.mrf.mxu0  ;;  %v7913_v43 = vpop.f32.mrf.mxu1 }
 0xe5b   :  { %v15760_v19 = vpack.i.bf16 %v7910_v44, %v7862_v63 }
 0xe5c   :  { %v14969_v48 = vpop.f32.mrf.mxu0  ;;  %v14976_v33 = vpop.f32.mrf.mxu1 }
 0xe5e   :  { %v7865_v47 = vpop.f32.mrf.mxu0  ;;  %v8006_v20 = vpop.f32.mrf.mxu1 }
 0xe60   :  { %v14970_v4 = vpop.f32.mrf.mxu0  ;;  %v14987_v51 = vpop.f32.mrf.mxu1 }
 0xe62   :  { %v7958_v30 = vpop.f32.mrf.mxu0  ;;  %v8009_v61 = vpop.f32.mrf.mxu1 }
 0xe63   :  { %v15765_v25 = vpack.i.bf16 %v8006_v20, %v7958_v30 }
 0xe64   :  { %v14981_v26 = vpop.f32.mrf.mxu0  ;;  %v14988_v3 = vpop.f32.mrf.mxu1 }
 0xe66   :  { %v7961_v12 = vpop.f32.mrf.mxu0  ;;  %v8102_v49 = vpop.f32.mrf.mxu1 }
 0xe68   :  { %v14982_v2 = vpop.f32.mrf.mxu0  ;;  %v14999_v7 = vpop.f32.mrf.mxu1 }
 0xe69   :  { %v15722_v37 = vpop.permute.xlu0 %15721 }
 0xe6a   :  { %v8054_v21 = vpop.f32.mrf.mxu0  ;;  %v8105_v60 = vpop.f32.mrf.mxu1  ;;  %v15724_v43 = vunpack.i.h.bf16 %v15722_v37  ;;  %v15723_v48 = vunpack.i.l.bf16 %v15722_v37 }
 0xe6b   :  { %v15740_v31 = vpack.i.bf16 %v8102_v49, %v8054_v21 }
 0xe6c   :  { %v14993_v45 = vpop.f32.mrf.mxu0  ;;  %v15000_v28 = vpop.f32.mrf.mxu1  ;;  %v8493_v51 = vsel %vm191_vm1, %v19031_v1, %v15724_v43  ;;  %v8492_v30 = vsel %vm191_vm1, %v19036_v54, %v15723_v48 }
 0xe6d   :  { %15741 = vrot.lane.b32.xlu0 %v15740_v31, %s16594_s27 }
 0xe6e   :  { %v8057_v35 = vpop.f32.mrf.mxu0  ;;  %v8198_v5 = vpop.f32.mrf.mxu1 }
 0xe70   :  { %v14994_v62 = vpop.f32.mrf.mxu0  ;;  %v15011_v18 = vpop.f32.mrf.mxu1 }
 0xe71   :  { %15751 = vrot.lane.b32.xlu0 %v15750_v24, %s16593_s26  ;;  %v15727_v20 = vpop.permute.xlu1 %15726 }
 0xe72   :  { %v8150_v58 = vpop.f32.mrf.mxu0  ;;  %v8201_v16 = vpop.f32.mrf.mxu1  ;;  %v15729_v21 = vunpack.i.h.bf16 %v15727_v20  ;;  %v15728_v60 = vunpack.i.l.bf16 %v15727_v20 }
 0xe73   :  { %v15745_v9 = vpack.i.bf16 %v8198_v5, %v8150_v58 }
 0xe74   :  { %v15005_v6 = vpop.f32.mrf.mxu0  ;;  %v15012_v22 = vpop.f32.mrf.mxu1  ;;  %v8495_v54 = vsel %vm191_vm1, %v19038_v0, %v15729_v21  ;;  %v8494_v45 = vsel %vm191_vm1, %v19040_v17, %v15728_v60  ;;  %v20514_v21 = vld [vmem:[#allocation35_spill] sm:$0xff] }
 0xe75   :  { %15761 = vrot.lane.b32.xlu0 %v15760_v19, %s16576_s0  ;;  %15746 = vrot.lane.b32.xlu1 %v15745_v9, %s16594_s27 }
 0xe76   :  { %v8153_v10 = vpop.f32.mrf.mxu0 }
 0xe78   :  { %v15006_v36 = vpop.f32.mrf.mxu0 }
 0xe79   :  { %15756 = vrot.lane.b32.xlu1 %v15755_v8, %s16593_s26 }
 0xe7d   :  { %15766 = vrot.lane.b32.xlu1 %v15765_v25, %s16576_s0 }
 0xea0   :  { %v8294_v27 = vpop.f32.mrf.mxu1 }
 0xea2   :  { %v15023_v42 = vpop.f32.mrf.mxu1 }
 0xea3   :  { %v8246_v24 = vpop.f32.mrf.mxu0 }
 0xea4   :  { %v8297_v59 = vpop.f32.mrf.mxu1  ;;  %v15770_v52 = vpack.i.bf16 %v8294_v27, %v8246_v24 }
 0xea5   :  { %v15017_v11 = vpop.f32.mrf.mxu0 }
 0xea6   :  { %v15024_v53 = vpop.f32.mrf.mxu1  ;;  %15771 = vrot.lane.b32.xlu0 %v15770_v52, %s16594_s27 }
 0xea7   :  { %v8249_v29 = vpop.f32.mrf.mxu0 }
 0xea8   :  { %v8390_v23 = vpop.f32.mrf.mxu1 }
 0xea9   :  { %v15018_v40 = vpop.f32.mrf.mxu0 }
 0xeaa   :  { %v15035_v55 = vpop.f32.mrf.mxu1 }
 0xeab   :  { %v8342_v41 = vpop.f32.mrf.mxu0 }
 0xeac   :  { %v8393_v15 = vpop.f32.mrf.mxu1  ;;  %v15775_v56 = vpack.i.bf16 %v8390_v23, %v8342_v41 }
 0xead   :  { %v15029_v57 = vpop.f32.mrf.mxu0 }
 0xeae   :  { %v15036_v8 = vpop.f32.mrf.mxu1  ;;  %15776 = vrot.lane.b32.xlu1 %v15775_v56, %s16594_s27 }
 0xeaf   :  { %v8345_v44 = vpop.f32.mrf.mxu0 }
 0xeb1   :  { %v15030_v32 = vpop.f32.mrf.mxu0 }
 0xebf   :  { %v15732_v63 = vpop.permute.xlu0 %15731 }
 0xec0   :  { %v15734_v33 = vunpack.i.h.bf16 %v15732_v63  ;;  %v15733_v47 = vunpack.i.l.bf16 %v15732_v63 }
 0xec2   :  { %v8500_v3 = vsel %vm4123_vm4, %v8492_v30, %v15733_v47  ;;  %v8501_v12 = vsel %vm4123_vm4, %v8493_v51, %v15734_v33  ;;  %v20511_v33 = vld [vmem:[#allocation36_spill] sm:$0xff]  ;;  %v20512_v51 = vld [vmem:[#allocation34_spill] sm:$0xff] }
 0xec7   :  { %v15737_v49 = vpop.permute.xlu1 %15736 }
 0xec8   :  { %v15739_v31 = vunpack.i.h.bf16 %v15737_v49  ;;  %v15738_v34 = vunpack.i.l.bf16 %v15737_v49 }
 0xeca   :  { %v8503_v5 = vsel %vm4123_vm4, %v8495_v54, %v15739_v31  ;;  %v8502_v62 = vsel %vm4123_vm4, %v8494_v45, %v15738_v34  ;;  %v13577_v45 = vld [vmem:[#allocation15 + $0x1] ss:$0 sm:$0xff] }
 0xedf   :  { %v15742_v4 = vpop.permute.xlu0 %15741 }
 0xee0   :  { %v15744_v61 = vunpack.i.h.bf16 %v15742_v4  ;;  %v15743_v26 = vunpack.i.l.bf16 %v15742_v4  ;;  %v13575_v4 = vld [vmem:[#allocation12 + $0x1] ss:$0 sm:$0xff] }
 0xee2   :  { %v8508_v13 = vsel %vm4132_vm5, %v8500_v3, %v15743_v26  ;;  %v8509_v2 = vsel %vm4132_vm5, %v8501_v12, %v15744_v61  ;;  %v20513_v3 = vld [vmem:[#allocation33_spill] sm:$0xff] }
 0xee3   :  { %v8516_v7 = vpack.c.bf16 %v8509_v2, %v8508_v13  ;;  %v15752_v19 = vpop.permute.xlu0 %15751  ;;  %v13576_v2 = vld [vmem:[#allocation14 + $0x1] ss:$0 sm:$0xff] }
 0xee4   :  { %v15754_v6 = vunpack.i.h.bf16 %v15752_v19  ;;  %v15753_v0 = vunpack.i.l.bf16 %v15752_v19 }
 0xee5   :  { %15041 = vmatprep.mubr.msk.bf16.mxu0 %vm309_vm2, %v8516_v7 }
 0xee6   :  { %v8497_v25 = vsel %vm191_vm1, %v19042_v50, %v15754_v6  ;;  %v8496_v27 = vsel %vm191_vm1, %v19044_v38, %v15753_v0 }
 0xee7   :  { %v15747_v1 = vpop.permute.xlu1 %15746  ;;  %v15762_v9 = vpop.permute.xlu0 %15761 }
 0xee8   :  { %v15749_v28 = vunpack.i.h.bf16 %v15747_v1  ;;  %v15748_v35 = vunpack.i.l.bf16 %v15747_v1  ;;  %v15764_v10 = vunpack.i.h.bf16 %v15762_v9  ;;  %v15763_v17 = vunpack.i.l.bf16 %v15762_v9  ;;  %v20515_v9 = vld [vmem:[#allocation39_spill] sm:$0xff] }
 0xeea   :  { %v8511_v18 = vsel %vm4132_vm5, %v8503_v5, %v15749_v28  ;;  %v8510_v58 = vsel %vm4132_vm5, %v8502_v62, %v15748_v35  ;;  %v8504_v59 = vsel %vm4123_vm4, %v8496_v27, %v15763_v17  ;;  %v8505_v52 = vsel %vm4123_vm4, %v8497_v25, %v15764_v10  ;;  %v20517_v25 = vld [vmem:[#allocation40_spill] sm:$0xff] }
 0xeeb   :  { %v8517_v16 = vpack.c.bf16 %v8511_v18, %v8510_v58  ;;  %v15757_v22 = vpop.permute.xlu1 %15756 }
 0xeec   :  { %v15759_v40 = vunpack.i.h.bf16 %v15757_v22  ;;  %v15758_v55 = vunpack.i.l.bf16 %v15757_v22  ;;  %v20516_v22 = vld [vmem:[#allocation38_spill] sm:$0xff] }
 0xeed   :  { %15042 = vmatmul.mubr.msk.bf16.vlgmr.msra.gmra.mxu0 %vm309_vm2, %v8517_v16 }
 0xeee   :  { %v8499_v38 = vsel %vm191_vm1, %v19046_v39, %v15759_v40  ;;  %v8498_v56 = vsel %vm191_vm1, %v19048_v14, %v15758_v55  ;;  %v15914_v39 = vld [vmem:[%s20394_s10 + $0x18] sm:$0xff]   ;;  %v15915_v14 = vld [vmem:[%s20394_s10 + $0x10] sm:$0xff]  }
 0xeef   :  { %v15767_v11 = vpop.permute.xlu1 %15766  ;;  %15049 = vmatprep.subr.bf16.mxu1 %v15914_v39 }
 0xef0   :  { %v15769_v41 = vunpack.i.h.bf16 %v15767_v11  ;;  %v15768_v15 = vunpack.i.l.bf16 %v15767_v11  ;;  %15050 = vmatpush3.bf16.msra.mxu1 %v15914_v39 }
 0xef1   :  { %15051 = vmatprep.subr.bf16.mxu1 %v15915_v14 }
 0xef2   :  { %v8506_v44 = vsel %vm4123_vm4, %v8498_v56, %v15768_v15  ;;  %v8507_v32 = vsel %vm4123_vm4, %v8499_v38, %v15769_v41 }
 0xef4   :  { %15052 = vmatpush3.bf16.msra.mxu1 %v15915_v14 }
 0xf18   :  { %v15772_v36 = vpop.permute.xlu0 %15771 }
 0xf19   :  { %v15774_v42 = vunpack.i.h.bf16 %v15772_v36  ;;  %v15773_v24 = vunpack.i.l.bf16 %v15772_v36 }
 0xf1b   :  { %v8512_v53 = vsel %vm4132_vm5, %v8504_v59, %v15773_v24  ;;  %v8513_v29 = vsel %vm4132_vm5, %v8505_v52, %v15774_v42  ;;  %v20518_v52 = vld [vmem:[#allocation37_spill] sm:$0xff] }
 0xf1c   :  { %v8518_v23 = vpack.c.bf16 %v8513_v29, %v8512_v53 }
 0xf1e   :  { %15045 = vmatprep.mubr.msk.bf16.mxu0 %vm309_vm2, %v8518_v23 }
 0xf20   :  { %v15777_v50 = vpop.permute.xlu1 %15776 }
 0xf21   :  { %v15779_v57 = vunpack.i.h.bf16 %v15777_v50  ;;  %v15778_v8 = vunpack.i.l.bf16 %v15777_v50 }
 0xf23   :  { %v8515_v37 = vsel %vm4132_vm5, %v8507_v32, %v15779_v57  ;;  %v8514_v63 = vsel %vm4132_vm5, %v8506_v44, %v15778_v8  ;;  %v15916_v8 = vld [vmem:[%s20396_s12 + $0x38] sm:$0xff]   ;;  %v15917_v44 = vld [vmem:[%s20396_s12 + $0x30] sm:$0xff]   ;;  %v15918_v32 = vld [vmem:[%s20396_s12 + $0x28] sm:$0xff]  }
 0xf24   :  { %v8519_v43 = vpack.c.bf16 %v8515_v37, %v8514_v63  ;;  %15061 = vmatprep.subr.bf16.mxu0 %v15916_v8  ;;  %v15919_v37 = vld [vmem:[%s20396_s12 + $0x20] sm:$0xff]  }
 0xf25   :  { %15062 = vmatpush3.bf16.msra.mxu0 %v15916_v8  ;;  %v19188_v63 = vld [vmem:[%s20395_s11 + $0x1] ss:$0 sm:$0xff] }
 0xf26   :  { %15046 = vmatmul.mubr.msk.bf16.gmra.mxu0 %vm309_vm2, %v8519_v43  ;;  %15063 = vmatprep.subr.bf16.mxu0 %v15917_v44 }
 0xf29   :  { %15064 = vmatpush3.bf16.msra.mxu0 %v15917_v44 }
 0xf2a   :  { %15065 = vmatprep.subr.bf16.mxu0 %v15918_v32 }
 0xf2d   :  { %15066 = vmatpush3.bf16.msra.mxu0 %v15918_v32 }
 0xf2e   :  { %15067 = vmatprep.subr.bf16.mxu0 %v15919_v37 }
 0xf31   :  { %15068 = vmatpush3.bf16.msra.mxu0 %v15919_v37 }
 0xf32   :  { %15089 = vmatprep.subr.bf16.mxu0 %v20456_v46 }
 0xfad   :  { %v15043_v48 = vpop.f32.mrf.mxu0 }
 0xfae   :  { %v8616_v47 = vadd.f32 %v15043_v48, %v20511_v33 }
 0xfaf   :  { %v8583_v20 = vpop.f32.mrf.mxu0 }
 0xfb0   :  { %v8614_v30 = vadd.f32 %v8583_v20, %v20512_v51  ;;  %v8632_v49 = vadd.f32 %v13575_v4, %v8616_v47 }
 0xfb1   :  { %v15044_v61 = vpop.f32.mrf.mxu0 }
 0xfb2   :  { %v8630_v26 = vadd.f32 %v13575_v4, %v8614_v30  ;;  %v8617_v12 = vadd.f32 %v15044_v61, %v20513_v3  ;;  %v8648_v54 = vmul.f32 %v13576_v2, %v8632_v49 }
 0xfb3   :  { %v8586_v13 = vpop.f32.mrf.mxu0 }
 0xfb4   :  { %v8633_v7 = vadd.f32 %v13575_v4, %v8617_v12  ;;  %v8615_v60 = vadd.f32 %v8586_v13, %v20514_v21  ;;  %v8646_v31 = vmul.f32 %v13576_v2, %v8630_v26  ;;  %v19146_v18 = vadd.f32 %v13577_v45, %v8648_v54 }
 0xfb6   :  { %v8649_v34 = vmul.f32 %v13576_v2, %v8633_v7  ;;  %v8631_v1 = vadd.f32 %v13575_v4, %v8615_v60  ;;  %v19142_v5 = vadd.f32 %v13577_v45, %v8646_v31 }
 0xfb8   :  { %v8647_v28 = vmul.f32 %v13576_v2, %v8631_v1  ;;  %v19140_v35 = vadd.f32 %v13577_v45, %v8649_v34 }
 0xfba   :  { %v19144_v62 = vadd.f32 %v13577_v45, %v8647_v28  ;;  %v8671_v16 = vpack.c.bf16 %v19140_v35, %v19146_v18 }
 0xfbc   :  { %v8670_v58 = vpack.c.bf16 %v19144_v62, %v19142_v5 }
 0xfbe   :  { %15053 = vmatprep.mubr.msk.bf16.mxu1 %vm309_vm2, %v8670_v58 }
 0xfbf   :  { %15054 = vmatmul.mubr.msk.bf16.vlgmr.msra.gmra.mxu1 %vm309_vm2, %v8671_v16 }
 0xfe6   :  { %v15047_v19 = vpop.f32.mrf.mxu0 }
 0xfe7   :  { %v8620_v6 = vadd.f32 %v15047_v19, %v20515_v9 }
 0xfe8   :  { %v8599_v0 = vpop.f32.mrf.mxu0 }
 0xfe9   :  { %v8618_v10 = vadd.f32 %v8599_v0, %v20516_v22  ;;  %v8636_v42 = vadd.f32 %v13575_v4, %v8620_v6 }
 0xfea   :  { %v15048_v17 = vpop.f32.mrf.mxu0 }
 0xfeb   :  { %v8634_v36 = vadd.f32 %v13575_v4, %v8618_v10  ;;  %v8621_v27 = vadd.f32 %v15048_v17, %v20517_v25  ;;  %v8652_v40 = vmul.f32 %v13576_v2, %v8636_v42 }
 0xfec   :  { %v8602_v24 = vpop.f32.mrf.mxu0 }
 0xfed   :  { %v8637_v59 = vadd.f32 %v13575_v4, %v8621_v27  ;;  %v8619_v11 = vadd.f32 %v8602_v24, %v20518_v52  ;;  %v8650_v53 = vmul.f32 %v13576_v2, %v8634_v36  ;;  %v19164_v38 = vadd.f32 %v13577_v45, %v8652_v40 }
 0xfef   :  { %v8653_v29 = vmul.f32 %v13576_v2, %v8637_v59  ;;  %v8635_v23 = vadd.f32 %v13575_v4, %v8619_v11  ;;  %v19160_v15 = vadd.f32 %v13577_v45, %v8650_v53 }
 0xff1   :  { %v8651_v55 = vmul.f32 %v13576_v2, %v8635_v23  ;;  %v19158_v41 = vadd.f32 %v13577_v45, %v8653_v29 }
 0xff3   :  { %v19162_v50 = vadd.f32 %v13577_v45, %v8651_v55  ;;  %v8673_v57 = vpack.c.bf16 %v19158_v41, %v19164_v38 }
 0xff5   :  { %v8672_v56 = vpack.c.bf16 %v19162_v50, %v19160_v15 }
 0xff7   :  { %15057 = vmatprep.mubr.msk.bf16.mxu1 %vm309_vm2, %v8672_v56 }
 0xff8   :  { %15058 = vmatmul.mubr.msk.bf16.gmra.mxu1 %vm309_vm2, %v8673_v57 }
0x107f   :  { %v15055_v43 = vpop.f32.mrf.mxu1 }
0x1080   :  { %v8754_v39 = vadd.f32 %v15055_v43, %v19188_v63 }
0x1081   :  { %v8745_v14 = vpop.f32.mrf.mxu1 }
0x1082   :  { %v8778_v48 = vmul.f32 %v8754_v39, %v8754_v39  ;;  %v8746_v33 = vadd.f32 %v19188_v63, %v8745_v14 }
0x1083   :  { %v15056_v47 = vpop.f32.mrf.mxu1 }
0x1084   :  { %v8786_v20 = vmul.f32 %v8778_v48, %v8754_v39  ;;  %v8776_v4 = vmul.f32 %v8746_v33, %v8746_v33  ;;  %v8757_v51 = vadd.f32 %v15056_v47, %v19188_v63 }
0x1085   :  { %v8748_v30 = vpop.f32.mrf.mxu1 }
0x1086   :  { %v8794_v61 = vmul.f32 0.044715, %v8786_v20  ;;  %v8784_v26 = vmul.f32 %v8776_v4, %v8746_v33  ;;  %v8779_v3 = vmul.f32 %v8757_v51, %v8757_v51  ;;  %v8749_v12 = vadd.f32 %v19188_v63, %v8748_v30 }
0x1088   :  { %v8802_v49 = vadd.f32 %v8794_v61, %v8754_v39  ;;  %v8792_v13 = vmul.f32 0.044715, %v8784_v26  ;;  %v8787_v2 = vmul.f32 %v8779_v3, %v8757_v51  ;;  %v8777_v7 = vmul.f32 %v8749_v12, %v8749_v12 }
0x108a   :  { %v8810_v21 = vmul.f32 0.7978846, %v8802_v49  ;;  %v8800_v60 = vadd.f32 %v8792_v13, %v8746_v33  ;;  %v8795_v31 = vmul.f32 0.044715, %v8787_v2  ;;  %v8785_v34 = vmul.f32 %v8777_v7, %v8749_v12 }
0x108c   :  { %v8808_v1 = vmul.f32 0.7978846, %v8800_v60  ;;  %v8803_v54 = vadd.f32 %v8795_v31, %v8757_v51  ;;  %v8793_v45 = vmul.f32 0.044715, %v8785_v34  ;;  %16202 = vtanh.f32 %v8810_v21 }
0x108e   :  { %16204 = vtanh.f32 %v8808_v1  ;;  %v8811_v28 = vmul.f32 0.7978846, %v8803_v54  ;;  %v8801_v58 = vadd.f32 %v8793_v45, %v8749_v12 }
0x1090   :  { %16206 = vtanh.f32 %v8811_v28  ;;  %v8809_v16 = vmul.f32 0.7978846, %v8801_v58 }
0x1092   :  { %16208 = vtanh.f32 %v8809_v16 }
0x1099   :  { %v16203_v19 = vpop.eup %16202 }
0x109a   :  { %v8826_v22 = vadd.f32 1.0, %v16203_v19 }
0x109b   :  { %v16205_v9 = vpop.eup %16204 }
0x109c   :  { %v8824_v6 = vadd.f32 1.0, %v16205_v9  ;;  %v8834_v42 = vmul.f32 0.5, %v8826_v22 }
0x109d   :  { %v16207_v0 = vpop.eup %16206 }
0x109e   :  { %v8827_v10 = vadd.f32 1.0, %v16207_v0  ;;  %v8832_v36 = vmul.f32 0.5, %v8824_v6  ;;  %v8842_v53 = vmul.f32 %v8834_v42, %v8754_v39  ;;  %v15921_v42 = vld [vmem:[%s20388_s4 + $0x20] sm:$0xff]  }
0x109f   :  { %v16209_v17 = vpop.eup %16208 }
0x10a0   :  { %v8835_v25 = vmul.f32 0.5, %v8827_v10  ;;  %v8825_v27 = vadd.f32 1.0, %v16209_v17  ;;  %v8840_v52 = vmul.f32 %v8832_v36, %v8746_v33 }
0x10a2   :  { %v8833_v24 = vmul.f32 0.5, %v8825_v27  ;;  %v8843_v59 = vmul.f32 %v8835_v25, %v8757_v51  ;;  %v15920_v27 = vld [vmem:[%s20388_s4 + $0x28] sm:$0xff]  }
0x10a3   :  { %15077 = vmatprep.subr.bf16.mxu1 %v15920_v27 }
0x10a4   :  { %v8841_v11 = vmul.f32 %v8833_v24, %v8749_v12  ;;  %v8849_v23 = vpack.c.bf16 %v8843_v59, %v8842_v53  ;;  %15078 = vmatpush3.bf16.msra.mxu1 %v15920_v27  ;;  %v13599_v24 = vld [vmem:[%s20397_s13 + $0x1] ss:$0 sm:$0xff] }
0x10a5   :  { %15079 = vmatprep.subr.bf16.mxu1 %v15921_v42 }
0x10a6   :  { %v8848_v29 = vpack.c.bf16 %v8841_v11, %v8840_v52 }
0x10a8   :  { %15069 = vmatprep.mubr.msk.bf16.mxu0 %vm4510_vm6, %v8848_v29  ;;  %15080 = vmatpush3.bf16.msra.mxu1 %v15921_v42 }
0x10a9   :  { %15070 = vmatmul.mubr.msk.bf16.vlgmr.msra.gmra.mxu0 %vm4510_vm6, %v8849_v23  ;;  %15095 = vmatprep.subr.bf16.mxu1 %v20456_v46 }
0x10b8   :  { %v15059_v40 = vpop.f32.mrf.mxu1 }
0x10b9   :  { %v8770_v55 = vadd.f32 %v15059_v40, %v19188_v63 }
0x10ba   :  { %v8761_v56 = vpop.f32.mrf.mxu1 }
0x10bb   :  { %v8782_v57 = vmul.f32 %v8770_v55, %v8770_v55  ;;  %v8762_v8 = vadd.f32 %v19188_v63, %v8761_v56 }
0x10bc   :  { %v15060_v44 = vpop.f32.mrf.mxu1 }
0x10bd   :  { %v8790_v32 = vmul.f32 %v8782_v57, %v8770_v55  ;;  %v8780_v37 = vmul.f32 %v8762_v8, %v8762_v8  ;;  %v8773_v43 = vadd.f32 %v15060_v44, %v19188_v63  ;;  %v13609_v57 = vld [vmem:[%s20398_s14 + $0x1] ss:$0 sm:$0xff] }
0x10be   :  { %v8764_v14 = vpop.f32.mrf.mxu1 }
0x10bf   :  { %v8798_v39 = vmul.f32 0.044715, %v8790_v32  ;;  %v8788_v48 = vmul.f32 %v8780_v37, %v8762_v8  ;;  %v8783_v33 = vmul.f32 %v8773_v43, %v8773_v43  ;;  %v8765_v47 = vadd.f32 %v19188_v63, %v8764_v14 }
0x10c1   :  { %v8806_v20 = vadd.f32 %v8798_v39, %v8770_v55  ;;  %v8796_v4 = vmul.f32 0.044715, %v8788_v48  ;;  %v8791_v51 = vmul.f32 %v8783_v33, %v8773_v43  ;;  %v8781_v30 = vmul.f32 %v8765_v47, %v8765_v47  ;;  %v13610_v39 = vld [vmem:[#allocation17 + $0x1] ss:$0 sm:$0xff] }
0x10c3   :  { %v8814_v61 = vmul.f32 0.7978846, %v8806_v20  ;;  %v8804_v26 = vadd.f32 %v8796_v4, %v8762_v8  ;;  %v8799_v3 = vmul.f32 0.044715, %v8791_v51  ;;  %v8789_v12 = vmul.f32 %v8781_v30, %v8765_v47 }
0x10c5   :  { %v8812_v49 = vmul.f32 0.7978846, %v8804_v26  ;;  %v8807_v13 = vadd.f32 %v8799_v3, %v8773_v43  ;;  %v8797_v2 = vmul.f32 0.044715, %v8789_v12  ;;  %16210 = vtanh.f32 %v8814_v61 }
0x10c7   :  { %16212 = vtanh.f32 %v8812_v49  ;;  %v8815_v7 = vmul.f32 0.7978846, %v8807_v13  ;;  %v8805_v21 = vadd.f32 %v8797_v2, %v8765_v47 }
0x10c9   :  { %16214 = vtanh.f32 %v8815_v7  ;;  %v8813_v60 = vmul.f32 0.7978846, %v8805_v21 }
0x10cb   :  { %16216 = vtanh.f32 %v8813_v60 }
0x10d2   :  { %v16211_v31 = vpop.eup %16210 }
0x10d3   :  { %v8830_v54 = vadd.f32 1.0, %v16211_v31 }
0x10d4   :  { %v16213_v63 = vpop.eup %16212 }
0x10d5   :  { %v8828_v34 = vadd.f32 1.0, %v16213_v63  ;;  %v8838_v9 = vmul.f32 0.5, %v8830_v54 }
0x10d6   :  { %v16215_v1 = vpop.eup %16214 }
0x10d7   :  { %v8831_v45 = vadd.f32 1.0, %v16215_v1  ;;  %v8836_v58 = vmul.f32 0.5, %v8828_v34  ;;  %v8846_v17 = vmul.f32 %v8838_v9, %v8770_v55 }
0x10d8   :  { %v16217_v28 = vpop.eup %16216 }
0x10d9   :  { %v8839_v16 = vmul.f32 0.5, %v8831_v45  ;;  %v8829_v19 = vadd.f32 1.0, %v16217_v28  ;;  %v8844_v22 = vmul.f32 %v8836_v58, %v8762_v8  ;;  %v13615_v45 = vld [vmem:[#allocation9 + $0x2] ss:$0 sm:$0xff] }
0x10db   :  { %v8837_v6 = vmul.f32 0.5, %v8829_v19  ;;  %v8847_v0 = vmul.f32 %v8839_v16, %v8773_v43 }
0x10dd   :  { %v8845_v10 = vmul.f32 %v8837_v6, %v8765_v47  ;;  %v8851_v25 = vpack.c.bf16 %v8847_v0, %v8846_v17 }
0x10df   :  { %v8850_v36 = vpack.c.bf16 %v8845_v10, %v8844_v22 }
0x10e1   :  { %15073 = vmatprep.mubr.msk.bf16.mxu0 %vm4510_vm6, %v8850_v36 }
0x10e2   :  { %15074 = vmatmul.mubr.msk.bf16.gmra.mxu0 %vm4510_vm6, %v8851_v25 }
0x10e3   :  { %15091 = vmatprep.mubr.msk.bf16.mxu0 %vm16589_vm3, %v20456_v46 }
0x1169   :  { %v15071_v59 = vpop.f32.mrf.mxu0 }
0x116a   :  { %v8948_v52 = vadd.f32 %v15071_v59, %v13599_v24 }
0x116b   :  { %v8939_v11 = vpop.f32.mrf.mxu0 }
0x116c   :  { %v8940_v53 = vadd.f32 %v13599_v24, %v8939_v11  ;;  %v8972_v55 = vadd.f32 %v8948_v52, %v19146_v18 }
0x116d   :  { %v15072_v29 = vpop.f32.mrf.mxu0 }
0x116e   :  { %v8970_v23 = vadd.f32 %v8940_v53, %v19142_v5  ;;  %v8951_v40 = vadd.f32 %v15072_v29, %v13599_v24  ;;  %v8988_v14 = vmul.f32 %v13609_v57, %v8972_v55 }
0x116f   :  { %v8942_v56 = vpop.f32.mrf.mxu0 }
0x1170   :  { %v8973_v8 = vadd.f32 %v8951_v40, %v19140_v35  ;;  %v8943_v44 = vadd.f32 %v13599_v24, %v8942_v56  ;;  %v8986_v32 = vmul.f32 %v13609_v57, %v8970_v23  ;;  %v19227_v47 = vadd.f32 %v13610_v39, %v8988_v14 }
0x1172   :  { %v8989_v37 = vmul.f32 %v13609_v57, %v8973_v8  ;;  %v8971_v43 = vadd.f32 %v8943_v44, %v19144_v62  ;;  %v19223_v5 = vadd.f32 %v13610_v39, %v8986_v32  ;;  %20522 = vst [vmem:[#allocation44_spill] sm:$0xff] %v19227_v47 }
0x1174   :  { %v8987_v48 = vmul.f32 %v13609_v57, %v8971_v43  ;;  %v19221_v33 = vadd.f32 %v13610_v39, %v8989_v37  ;;  %20520 = vst [vmem:[#allocation43_spill] sm:$0xff] %v19223_v5 }
0x1176   :  { %20519 = vst [vmem:[#allocation42_spill] sm:$0xff] %v19221_v33  ;;  %v19225_v18 = vadd.f32 %v13610_v39, %v8987_v48  ;;  %v9011_v35 = vpack.c.bf16 %v19221_v33, %v19227_v47 }
0x1178   :  { %20521 = vst [vmem:[#allocation41_spill] sm:$0xff] %v19225_v18  ;;  %v9010_v20 = vpack.c.bf16 %v19225_v18, %v19223_v5 }
0x117a   :  { %15081 = vmatprep.mubr.msk.bf16.mxu1 %vm309_vm2, %v9010_v20 }
0x117b   :  { %15082 = vmatmul.mubr.msk.bf16.vlgmr.msra.gmra.mxu1 %vm309_vm2, %v9011_v35 }
0x11a2   :  { %v15075_v62 = vpop.f32.mrf.mxu0 }
0x11a3   :  { %v8964_v4 = vadd.f32 %v15075_v62, %v13599_v24 }
0x11a4   :  { %v8955_v51 = vpop.f32.mrf.mxu0 }
0x11a5   :  { %v8956_v30 = vadd.f32 %v13599_v24, %v8955_v51  ;;  %v8976_v12 = vadd.f32 %v8964_v4, %v19164_v38 }
0x11a6   :  { %v15076_v61 = vpop.f32.mrf.mxu0 }
0x11a7   :  { %v8974_v26 = vadd.f32 %v8956_v30, %v19160_v15  ;;  %v8967_v3 = vadd.f32 %v15076_v61, %v13599_v24  ;;  %v8992_v31 = vmul.f32 %v13609_v57, %v8976_v12 }
0x11a8   :  { %v8958_v49 = vpop.f32.mrf.mxu0 }
0x11a9   :  { %v8977_v13 = vadd.f32 %v8967_v3, %v19158_v41  ;;  %v8959_v2 = vadd.f32 %v13599_v24, %v8958_v49  ;;  %v8990_v7 = vmul.f32 %v13609_v57, %v8974_v26  ;;  %v19245_v15 = vadd.f32 %v13610_v39, %v8992_v31 }
0x11ab   :  { %v8993_v21 = vmul.f32 %v13609_v57, %v8977_v13  ;;  %v8975_v60 = vadd.f32 %v8959_v2, %v19162_v50  ;;  %v19241_v1 = vadd.f32 %v13610_v39, %v8990_v7  ;;  %20526 = vst [vmem:[#allocation27_spill] sm:$0xff] %v19245_v15 }
0x11ad   :  { %v8991_v63 = vmul.f32 %v13609_v57, %v8975_v60  ;;  %v19239_v34 = vadd.f32 %v13610_v39, %v8993_v21  ;;  %20524 = vst [vmem:[#allocation31_spill] sm:$0xff] %v19241_v1 }
0x11af   :  { %20523 = vst [vmem:[#allocation29_spill] sm:$0xff] %v19239_v34  ;;  %v19243_v54 = vadd.f32 %v13610_v39, %v8991_v63  ;;  %v9013_v41 = vpack.c.bf16 %v19239_v34, %v19245_v15 }
0x11b1   :  { %20525 = vst [vmem:[#allocation25_spill] sm:$0xff] %v19243_v54  ;;  %v9012_v38 = vpack.c.bf16 %v19243_v54, %v19241_v1 }
0x11b3   :  { %15085 = vmatprep.mubr.msk.bf16.mxu1 %vm309_vm2, %v9012_v38 }
0x11b4   :  { %15086 = vmatmul.mubr.msk.bf16.gmra.mxu1 %vm309_vm2, %v9013_v41 }
0x11b5   :  { %15097 = vmatprep.mubr.msk.bf16.mxu1 %vm16589_vm3, %v20456_v46 }
0x123b   :  { %v15083_v50 = vpop.f32.mrf.mxu1 }
0x123c   :  { %v9094_v16 = vadd.f32 %v15083_v50, %v13615_v45 }
0x123d   :  { %v9085_v28 = vpop.f32.mrf.mxu1 }
0x123e   :  { %v9086_v6 = vadd.f32 %v13615_v45, %v9085_v28  ;;  %v19270_v40 = vpack.c.bf16 %v9094_v16, %v9094_v16 }
0x123f   :  { %v15084_v58 = vpop.f32.mrf.mxu1 }
0x1240   :  { %v9097_v19 = vadd.f32 %v15084_v58, %v13615_v45  ;;  %v19266_v23 = vpack.c.bf16 %v9086_v6, %v9086_v6 }
0x1241   :  { %v9088_v9 = vpop.f32.mrf.mxu1 }
0x1242   :  { %v9089_v0 = vadd.f32 %v13615_v45, %v9088_v9  ;;  %v15785_v22 = vpack.i.bf16 %v9097_v19, %v9094_v16  ;;  %v19276_v55 = vpack.c.bf16 %v9097_v19, %v9097_v19 }
0x1244   :  { %15786 = vrot.lane.b32.xlu1 %v15785_v22, %s16588_s9  ;;  %v15780_v10 = vpack.i.bf16 %v9089_v0, %v9086_v6  ;;  %v19262_v29 = vpack.c.bf16 %v9089_v0, %v9089_v0 }
0x1246   :  { %15781 = vrot.lane.b32.xlu0 %v15780_v10, %s16588_s9 }
0x1274   :  { %v15087_v17 = vpop.f32.mrf.mxu1 }
0x1275   :  { %v9110_v27 = vadd.f32 %v15087_v17, %v13615_v45 }
0x1276   :  { %v9101_v36 = vpop.f32.mrf.mxu1 }
0x1277   :  { %v9102_v59 = vadd.f32 %v13615_v45, %v9101_v36  ;;  %v19288_v8 = vpack.c.bf16 %v9110_v27, %v9110_v27 }
0x1278   :  { %v15088_v25 = vpop.f32.mrf.mxu1 }
0x1279   :  { %v9113_v42 = vadd.f32 %v15088_v25, %v13615_v45  ;;  %v19284_v57 = vpack.c.bf16 %v9102_v59, %v9102_v59 }
0x127a   :  { %v9104_v24 = vpop.f32.mrf.mxu1 }
0x127b   :  { %v9105_v52 = vadd.f32 %v13615_v45, %v9104_v24  ;;  %v19257_v11 = vpack.i.bf16 %v9113_v42, %v9110_v27  ;;  %v19295_v44 = vpack.c.bf16 %v9113_v42, %v9113_v42 }
0x127d   :  { %15796 = vrot.lane.b32.xlu1 %v19257_v11, %s16588_s9  ;;  %v15790_v53 = vpack.i.bf16 %v9105_v52, %v9102_v59  ;;  %v19280_v56 = vpack.c.bf16 %v9105_v52, %v9105_v52 }
0x127f   :  { %15791 = vrot.lane.b32.xlu0 %v15790_v53, %s16588_s9 }
0x1281   :  { %9310 = vrot.lane.b32.xlu1 %v19262_v29, %s16590_s8 }
0x1283   :  { %9261 = vrot.lane.b32.xlu0 %v19266_v23, %s16590_s8 }
0x1285   :  { %9359 = vrot.lane.b32.xlu1 %v19270_v40, %s16590_s8 }
0x1287   :  { %15801 = vrot.lane.b32.xlu0 %v15780_v10, %s16591_s22 }
0x1289   :  { %15806 = vrot.lane.b32.xlu1 %v15785_v22, %s16591_s22 }
0x128b   :  { %9408 = vrot.lane.b32.xlu0 %v19276_v55, %s16590_s8 }
0x128d   :  { %9506 = vrot.lane.b32.xlu1 %v19280_v56, %s16590_s8 }
0x128f   :  { %9457 = vrot.lane.b32.xlu0 %v19284_v57, %s16590_s8 }
0x1291   :  { %9555 = vrot.lane.b32.xlu1 %v19288_v8, %s16590_s8 }
0x1293   :  { %15811 = vrot.lane.b32.xlu0 %v15790_v53, %s16591_s22 }
0x1295   :  { %15816 = vrot.lane.b32.xlu1 %v19257_v11, %s16591_s22 }
0x1297   :  { %9604 = vrot.lane.b32.xlu0 %v19295_v44, %s16590_s8 }
0x12b6   :  { %v15787_v32 = vpop.permute.xlu1 %15786 }
0x12b7   :  { %v15788_v39 = vunpack.i.l.bf16 %v15787_v32  ;;  %v15789_v35 = vunpack.i.h.bf16 %v15787_v32 }
0x12b8   :  { %v15782_v37 = vpop.permute.xlu0 %15781 }
0x12b9   :  { %v15784_v43 = vunpack.i.h.bf16 %v15782_v37  ;;  %v15783_v14 = vunpack.i.l.bf16 %v15782_v37  ;;  %v19307_v62 = vpack.c.bf16 %v15788_v39, %v15788_v39  ;;  %v19312_v4 = vpack.c.bf16 %v15789_v35, %v15789_v35 }
0x12bb   :  { %v19299_v48 = vpack.c.bf16 %v15784_v43, %v15784_v43  ;;  %v19301_v20 = vpack.c.bf16 %v15783_v14, %v15783_v14 }
0x12bd   :  { %9702 = vrot.lane.b32.xlu1 %v19299_v48, %s16590_s8  ;;  %9653 = vrot.lane.b32.xlu0 %v19301_v20, %s16590_s8 }
0x12c1   :  { %9751 = vrot.lane.b32.xlu1 %v19307_v62, %s16590_s8  ;;  %15821 = vrot.lane.b32.xlu0 %v15780_v10, %s16592_s25 }
0x12c5   :  { %15826 = vrot.lane.b32.xlu1 %v15785_v22, %s16592_s25  ;;  %9800 = vrot.lane.b32.xlu0 %v19312_v4, %s16590_s8 }
0x12ef   :  { %v15797_v51 = vpop.permute.xlu1 %15796 }
0x12f0   :  { %v15798_v12 = vunpack.i.l.bf16 %v15797_v51  ;;  %v15799_v63 = vunpack.i.h.bf16 %v15797_v51 }
0x12f1   :  { %v15792_v30 = vpop.permute.xlu0 %15791 }
0x12f2   :  { %v15794_v61 = vunpack.i.h.bf16 %v15792_v30  ;;  %v15793_v26 = vunpack.i.l.bf16 %v15792_v30  ;;  %v19328_v31 = vpack.c.bf16 %v15798_v12, %v15798_v12  ;;  %v19336_v45 = vpack.c.bf16 %v15799_v63, %v15799_v63 }
0x12f3   :  { %v9311_v3 = vpop.permute.xlu1 %9310 }
0x12f4   :  { %v19317_v49 = vpack.c.bf16 %v15794_v61, %v15794_v61  ;;  %v19319_v13 = vpack.c.bf16 %v15793_v26, %v15793_v26  ;;  %v9316_v2 = vsel %vm191_vm1, %v9311_v3, 0 }
0x12f5   :  { %15096 = vmatpush3.bf16.xpose.msra.mxu1 %v9316_v2  ;;  %v9262_v7 = vpop.permute.xlu0 %9261 }
0x12f6   :  { %v9267_v21 = vsel %vm191_vm1, %v9262_v7, 0  ;;  %9898 = vrot.lane.b32.xlu1 %v19317_v49, %s16590_s8  ;;  %9849 = vrot.lane.b32.xlu0 %v19319_v13, %s16590_s8 }
0x12f7   :  { %v9360_v60 = vpop.permute.xlu1 %9359  ;;  %15090 = vmatpush3.bf16.xpose.msra.mxu0 %v9267_v21  ;;  %15107 = vmatprep.subr.bf16.mxu1 %v20456_v46 }
0x12f8   :  { %15101 = vmatprep.subr.bf16.mxu0 %v20456_v46  ;;  %v9365_v16 = vsel %vm191_vm1, %v9360_v60, 0 }
0x12f9   :  { %v15802_v38 = vpop.permute.xlu0 %15801 }
0x12fa   :  { %9947 = vrot.lane.b32.xlu1 %v19328_v31, %s16590_s8  ;;  %15831 = vrot.lane.b32.xlu0 %v15790_v53, %s16592_s25  ;;  %v15804_v50 = vunpack.i.h.bf16 %v15802_v38  ;;  %v15803_v28 = vunpack.i.l.bf16 %v15802_v38 }
0x12fb   :  { %v15807_v41 = vpop.permute.xlu1 %15806 }
0x12fc   :  { %15098 = vmatmul.mubr.msk.bf16.vlgmr.msra.gmra.mxu1 %vm191_vm1, %v19262_v29  ;;  %v19348_v6 = vpack.c.bf16 %v15804_v50, %v15804_v50  ;;  %v15809_v0 = vunpack.i.h.bf16 %v15807_v41  ;;  %v19352_v22 = vpack.c.bf16 %v15803_v28, %v15803_v28  ;;  %v15808_v10 = vunpack.i.l.bf16 %v15807_v41 }
0x12fd   :  { %v9409_v58 = vpop.permute.xlu0 %9408  ;;  %15109 = vmatprep.mubr.msk.bf16.mxu1 %vm16589_vm3, %v20456_v46 }
0x12fe   :  { %v9414_v19 = vsel %vm191_vm1, %v9409_v58, 0  ;;  %15092 = vmatmul.mubr.msk.bf16.vlgmr.msra.gmra.mxu0 %vm191_vm1, %v19266_v23  ;;  %15836 = vrot.lane.b32.xlu1 %v19257_v11, %s16592_s25  ;;  %v19360_v25 = vpack.c.bf16 %v15809_v0, %v15809_v0  ;;  %v19362_v27 = vpack.c.bf16 %v15808_v10, %v15808_v10 }
0x12ff   :  { %9996 = vrot.lane.b32.xlu0 %v19336_v45, %s16590_s8  ;;  %v9507_v9 = vpop.permute.xlu1 %9506  ;;  %15102 = vmatpush3.bf16.xpose.msra.mxu0 %v9365_v16 }
0x1300   :  { %15108 = vmatpush3.bf16.xpose.msra.mxu1 %v9414_v19  ;;  %15103 = vmatprep.mubr.msk.bf16.mxu0 %vm16589_vm3, %v20456_v46  ;;  %v9512_v52 = vsel %vm191_vm1, %v9507_v9, 0 }
0x1301   :  { %v9458_v17 = vpop.permute.xlu0 %9457  ;;  %15113 = vmatprep.subr.bf16.mxu0 %v20456_v46  ;;  %15119 = vmatprep.subr.bf16.mxu1 %v20456_v46 }
0x1302   :  { %10094 = vrot.lane.b32.xlu1 %v19348_v6, %s16590_s8  ;;  %v9463_v11 = vsel %vm191_vm1, %v9458_v17, 0 }
0x1303   :  { %10045 = vrot.lane.b32.xlu0 %v19352_v22, %s16590_s8  ;;  %v9556_v36 = vpop.permute.xlu1 %9555 }
0x1304   :  { %v9561_v30 = vsel %vm191_vm1, %v9556_v36, 0 }
0x1305   :  { %v15812_v42 = vpop.permute.xlu0 %15811 }
0x1306   :  { %v15814_v24 = vunpack.i.h.bf16 %v15812_v42  ;;  %v15813_v59 = vunpack.i.l.bf16 %v15812_v42  ;;  %15104 = vmatmul.mubr.msk.bf16.vlgmr.msra.gmra.mxu0 %vm191_vm1, %v19270_v40  ;;  %10192 = vrot.lane.b32.xlu1 %v19360_v25, %s16590_s8 }
0x1307   :  { %15110 = vmatmul.mubr.msk.bf16.vlgmr.msra.gmra.mxu1 %vm191_vm1, %v19276_v55  ;;  %10143 = vrot.lane.b32.xlu0 %v19362_v27, %s16590_s8  ;;  %v15817_v53 = vpop.permute.xlu1 %15816 }
0x1308   :  { %v19374_v32 = vpack.c.bf16 %v15814_v24, %v15814_v24  ;;  %v19376_v37 = vpack.c.bf16 %v15813_v59, %v15813_v59  ;;  %v15819_v43 = vunpack.i.h.bf16 %v15817_v53  ;;  %15114 = vmatpush3.bf16.xpose.msra.mxu0 %v9463_v11  ;;  %15120 = vmatpush3.bf16.xpose.msra.mxu1 %v9512_v52  ;;  %v15818_v14 = vunpack.i.l.bf16 %v15817_v53 }
0x1309   :  { %15115 = vmatprep.mubr.msk.bf16.mxu0 %vm16589_vm3, %v20456_v46  ;;  %15121 = vmatprep.mubr.msk.bf16.mxu1 %vm16589_vm3, %v20456_v46  ;;  %v9605_v35 = vpop.permute.xlu0 %9604 }
0x130a   :  { %10290 = vrot.lane.b32.xlu1 %v19374_v32, %s16590_s8  ;;  %15125 = vmatprep.subr.bf16.mxu0 %v20456_v46  ;;  %v19388_v39 = vpack.c.bf16 %v15819_v43, %v15819_v43  ;;  %v19390_v51 = vpack.c.bf16 %v15818_v14, %v15818_v14  ;;  %v9610_v61 = vsel %vm191_vm1, %v9605_v35, 0 }
0x130b   :  { %10241 = vrot.lane.b32.xlu0 %v19376_v37, %s16590_s8  ;;  %15131 = vmatprep.subr.bf16.mxu1 %v20456_v46 }
0x130e   :  { %10388 = vrot.lane.b32.xlu1 %v19388_v39, %s16590_s8 }
0x130f   :  { %15116 = vmatmul.mubr.msk.bf16.vlgmr.msra.gmra.mxu0 %vm191_vm1, %v19284_v57  ;;  %15122 = vmatmul.mubr.msk.bf16.vlgmr.msra.gmra.mxu1 %vm191_vm1, %v19280_v56 }
0x1310   :  { %10339 = vrot.lane.b32.xlu0 %v19390_v51, %s16590_s8  ;;  %15126 = vmatpush3.bf16.xpose.msra.mxu0 %v9561_v30 }
0x1311   :  { %15132 = vmatpush3.bf16.xpose.msra.mxu1 %v9610_v61  ;;  %15127 = vmatprep.mubr.msk.bf16.mxu0 %vm16589_vm3, %v20456_v46 }
0x1312   :  { %15133 = vmatprep.mubr.msk.bf16.mxu1 %vm16589_vm3, %v20456_v46  ;;  %15137 = vmatprep.subr.bf16.mxu0 %v20456_v46 }
0x1313   :  { %15143 = vmatprep.subr.bf16.mxu1 %v20456_v46 }
0x1317   :  { %15128 = vmatmul.mubr.msk.bf16.vlgmr.msra.gmra.mxu0 %vm191_vm1, %v19288_v8 }
0x1318   :  { %15134 = vmatmul.mubr.msk.bf16.vlgmr.msra.gmra.mxu1 %vm191_vm1, %v19295_v44  ;;  %15139 = vmatprep.mubr.msk.bf16.mxu0 %vm16589_vm3, %v20456_v46 }
0x1319   :  { %15145 = vmatprep.mubr.msk.bf16.mxu1 %vm16589_vm3, %v20456_v46 }
0x132f   :  { %v9703_v26 = vpop.permute.xlu1 %9702  ;;  %v9654_v3 = vpop.permute.xlu0 %9653 }
0x1330   :  { %v9708_v12 = vsel %vm191_vm1, %v9703_v26, 0  ;;  %v9659_v2 = vsel %vm191_vm1, %v9654_v3, 0 }
0x1331   :  { %15138 = vmatpush3.bf16.xpose.msra.mxu0 %v9659_v2  ;;  %15144 = vmatpush3.bf16.xpose.msra.mxu1 %v9708_v12 }
0x1332   :  { %15149 = vmatprep.subr.bf16.mxu0 %v20456_v46  ;;  %15155 = vmatprep.subr.bf16.mxu1 %v20456_v46 }
0x1333   :  { %v9752_v7 = vpop.permute.xlu1 %9751  ;;  %v15822_v21 = vpop.permute.xlu0 %15821 }
0x1334   :  { %v15824_v60 = vunpack.i.h.bf16 %v15822_v21  ;;  %v15823_v63 = vunpack.i.l.bf16 %v15822_v21  ;;  %v9757_v9 = vsel %vm191_vm1, %v9752_v7, 0 }
0x1336   :  { %v19420_v38 = vpack.c.bf16 %v15824_v60, %v15824_v60  ;;  %v19422_v41 = vpack.c.bf16 %v15823_v63, %v15823_v63 }
0x1337   :  { %v15827_v50 = vpop.permute.xlu1 %15826  ;;  %v9801_v28 = vpop.permute.xlu0 %9800 }
0x1338   :  { %v15829_v58 = vunpack.i.h.bf16 %v15827_v50  ;;  %v15828_v16 = vunpack.i.l.bf16 %v15827_v50  ;;  %v9806_v19 = vsel %vm191_vm1, %v9801_v28, 0  ;;  %15140 = vmatmul.mubr.msk.bf16.vlgmr.msra.gmra.mxu0 %vm191_vm1, %v19301_v20  ;;  %15146 = vmatmul.mubr.msk.bf16.vlgmr.msra.gmra.mxu1 %vm191_vm1, %v19299_v48 }
0x1339   :  { %10486 = vrot.lane.b32.xlu1 %v19420_v38, %s16590_s8  ;;  %10437 = vrot.lane.b32.xlu0 %v19422_v41, %s16590_s8 }
0x133a   :  { %v19434_v0 = vpack.c.bf16 %v15829_v58, %v15829_v58  ;;  %v19436_v10 = vpack.c.bf16 %v15828_v16, %v15828_v16  ;;  %15150 = vmatpush3.bf16.xpose.msra.mxu0 %v9757_v9  ;;  %15156 = vmatpush3.bf16.xpose.msra.mxu1 %v9806_v19  ;;  %v9228_v16 = vld [vmem:[#allocation2] sm:$0xff] }
0x133b   :  { %15151 = vmatprep.mubr.msk.bf16.mxu0 %vm16589_vm3, %v20456_v46  ;;  %15157 = vmatprep.mubr.msk.bf16.mxu1 %vm16589_vm3, %v20456_v46 }
0x133c   :  { %15161 = vmatprep.subr.bf16.mxu0 %v20456_v46  ;;  %15167 = vmatprep.subr.bf16.mxu1 %v20456_v46 }
0x133d   :  { %10584 = vrot.lane.b32.xlu1 %v19434_v0, %s16590_s8  ;;  %10535 = vrot.lane.b32.xlu0 %v19436_v10, %s16590_s8 }
0x1341   :  { %15152 = vmatmul.mubr.msk.bf16.vlgmr.msra.gmra.mxu0 %vm191_vm1, %v19307_v62  ;;  %15158 = vmatmul.mubr.msk.bf16.vlgmr.msra.gmra.mxu1 %vm191_vm1, %v19312_v4 }
0x1342   :  { %15163 = vmatprep.mubr.msk.bf16.mxu0 %vm16589_vm3, %v20456_v46  ;;  %15169 = vmatprep.mubr.msk.bf16.mxu1 %vm16589_vm3, %v20456_v46 }
0x1368   :  { %v9899_v17 = vpop.permute.xlu1 %9898  ;;  %v9850_v36 = vpop.permute.xlu0 %9849 }
0x1369   :  { %v9904_v42 = vsel %vm191_vm1, %v9899_v17, 0  ;;  %v9855_v24 = vsel %vm191_vm1, %v9850_v36, 0  ;;  %v9230_v17 = vld [vmem:[#allocation2 + $0x10] sm:$0xff] }
0x136a   :  { %15162 = vmatpush3.bf16.xpose.msra.mxu0 %v9855_v24  ;;  %15168 = vmatpush3.bf16.xpose.msra.mxu1 %v9904_v42 }
0x136b   :  { %15173 = vmatprep.subr.bf16.mxu0 %v20456_v46  ;;  %15179 = vmatprep.subr.bf16.mxu1 %v20456_v46 }
0x136c   :  { %v9948_v59 = vpop.permute.xlu1 %9947  ;;  %v15832_v52 = vpop.permute.xlu0 %15831 }
0x136d   :  { %v15834_v11 = vunpack.i.h.bf16 %v15832_v52  ;;  %v15833_v53 = vunpack.i.l.bf16 %v15832_v52  ;;  %v9953_v3 = vsel %vm191_vm1, %v9948_v59, 0 }
0x136f   :  { %v19460_v43 = vpack.c.bf16 %v15834_v11, %v15834_v11  ;;  %v19462_v14 = vpack.c.bf16 %v15833_v53, %v15833_v53 }
0x1370   :  { %v15837_v35 = vpop.permute.xlu1 %15836 }
0x1371   :  { %v15839_v30 = vunpack.i.h.bf16 %v15837_v35  ;;  %v15838_v61 = vunpack.i.l.bf16 %v15837_v35  ;;  %v9997_v26 = vpop.permute.xlu0 %9996  ;;  %15164 = vmatmul.mubr.msk.bf16.vlgmr.msra.gmra.mxu0 %vm191_vm1, %v19319_v13  ;;  %15170 = vmatmul.mubr.msk.bf16.vlgmr.msra.gmra.mxu1 %vm191_vm1, %v19317_v49 }
0x1372   :  { %v10002_v12 = vsel %vm191_vm1, %v9997_v26, 0  ;;  %10682 = vrot.lane.b32.xlu1 %v19460_v43, %s16590_s8  ;;  %10633 = vrot.lane.b32.xlu0 %v19462_v14, %s16590_s8 }
0x1373   :  { %v19474_v2 = vpack.c.bf16 %v15839_v30, %v15839_v30  ;;  %v19476_v7 = vpack.c.bf16 %v15838_v61, %v15838_v61  ;;  %15174 = vmatpush3.bf16.xpose.msra.mxu0 %v9953_v3  ;;  %15180 = vmatpush3.bf16.xpose.msra.mxu1 %v10002_v12  ;;  %v9229_v30 = vld [vmem:[#allocation2 + $0x8] sm:$0xff]  ;;  %v9231_v61 = vld [vmem:[#allocation2 + $0x18] sm:$0xff] }
0x1374   :  { %15175 = vmatprep.mubr.msk.bf16.mxu0 %vm16589_vm3, %v20456_v46  ;;  %15181 = vmatprep.mubr.msk.bf16.mxu1 %vm16589_vm3, %v20456_v46  ;;  %v10095_v21 = vpop.permute.xlu1 %10094 }
0x1375   :  { %20527 = vst [vmem:[#allocation28_spill] sm:$0xff] %v19474_v2  ;;  %20528 = vst [vmem:[#allocation30_spill] sm:$0xff] %v19476_v7  ;;  %15185 = vmatprep.subr.bf16.mxu0 %v20456_v46  ;;  %15191 = vmatprep.subr.bf16.mxu1 %v20456_v46  ;;  %v10046_v60 = vpop.permute.xlu0 %10045  ;;  %v10100_v63 = vsel %vm191_vm1, %v10095_v21, 0 }
0x1376   :  { %10780 = vrot.lane.b32.xlu1 %v19474_v2, %s16590_s8  ;;  %10731 = vrot.lane.b32.xlu0 %v19476_v7, %s16590_s8  ;;  %v10051_v50 = vsel %vm191_vm1, %v10046_v60, 0 }
0x137a   :  { %15176 = vmatmul.mubr.msk.bf16.vlgmr.msra.gmra.mxu0 %vm191_vm1, %v19328_v31  ;;  %15182 = vmatmul.mubr.msk.bf16.vlgmr.msra.gmra.mxu1 %vm191_vm1, %v19336_v45 }
0x137b   :  { %11212 = vrot.lane.b32.xlu1 %v19266_v23, %s16583_s1  ;;  %11260 = vrot.lane.b32.xlu0 %v19262_v29, %s16583_s1  ;;  %v10193_v23 = vpop.permute.xlu1 %10192  ;;  %v10144_v29 = vpop.permute.xlu0 %10143 }
0x137c   :  { %15186 = vmatpush3.bf16.xpose.msra.mxu0 %v10051_v50  ;;  %15192 = vmatpush3.bf16.xpose.msra.mxu1 %v10100_v63  ;;  %v10198_v28 = vsel %vm191_vm1, %v10193_v23, 0  ;;  %v10149_v58 = vsel %vm191_vm1, %v10144_v29, 0  ;;  %v9232_v63 = vld [vmem:[#allocation2 + $0x20] sm:$0xff]  ;;  %v9233_v23 = vld [vmem:[#allocation2 + $0x28] sm:$0xff] }
0x137d   :  { %15187 = vmatprep.mubr.msk.bf16.mxu0 %vm16589_vm3, %v20456_v46  ;;  %15193 = vmatprep.mubr.msk.bf16.mxu1 %vm16589_vm3, %v20456_v46 }
0x137e   :  { %15197 = vmatprep.subr.bf16.mxu0 %v20456_v46  ;;  %15203 = vmatprep.subr.bf16.mxu1 %v20456_v46 }
0x137f   :  { %11308 = vrot.lane.b32.xlu1 %v19270_v40, %s16583_s1  ;;  %11356 = vrot.lane.b32.xlu0 %v19276_v55, %s16583_s1  ;;  %v10291_v40 = vpop.permute.xlu1 %10290  ;;  %v10242_v55 = vpop.permute.xlu0 %10241 }
0x1383   :  { %15188 = vmatmul.mubr.msk.bf16.vlgmr.msra.gmra.mxu0 %vm191_vm1, %v19352_v22  ;;  %15194 = vmatmul.mubr.msk.bf16.vlgmr.msra.gmra.mxu1 %vm191_vm1, %v19348_v6 }
0x1384   :  { %11404 = vrot.lane.b32.xlu1 %v19284_v57, %s16583_s1  ;;  %11452 = vrot.lane.b32.xlu0 %v19280_v56, %s16583_s1  ;;  %v10296_v56 = vsel %vm191_vm1, %v10291_v40, 0  ;;  %v10247_v57 = vsel %vm191_vm1, %v10242_v55, 0 }
0x1385   :  { %15198 = vmatpush3.bf16.xpose.msra.mxu0 %v10149_v58  ;;  %15204 = vmatpush3.bf16.xpose.msra.mxu1 %v10198_v28 }
0x1386   :  { %15199 = vmatprep.mubr.msk.bf16.mxu0 %vm16589_vm3, %v20456_v46  ;;  %15205 = vmatprep.mubr.msk.bf16.mxu1 %vm16589_vm3, %v20456_v46 }
0x1387   :  { %15209 = vmatprep.subr.bf16.mxu0 %v20456_v46  ;;  %15215 = vmatprep.subr.bf16.mxu1 %v20456_v46 }
0x1388   :  { %11500 = vrot.lane.b32.xlu1 %v19288_v8, %s16583_s1  ;;  %11548 = vrot.lane.b32.xlu0 %v19295_v44, %s16583_s1  ;;  %v10389_v8 = vpop.permute.xlu1 %10388  ;;  %v10340_v44 = vpop.permute.xlu0 %10339 }
0x138c   :  { %15200 = vmatmul.mubr.msk.bf16.vlgmr.msra.gmra.mxu0 %vm191_vm1, %v19362_v27  ;;  %15206 = vmatmul.mubr.msk.bf16.vlgmr.msra.gmra.mxu1 %vm191_vm1, %v19360_v25 }
0x138d   :  { %11596 = vrot.lane.b32.xlu1 %v19301_v20, %s16583_s1  ;;  %11644 = vrot.lane.b32.xlu0 %v19299_v48, %s16583_s1  ;;  %v10394_v48 = vsel %vm191_vm1, %v10389_v8, 0  ;;  %v10345_v20 = vsel %vm191_vm1, %v10340_v44, 0 }
0x138e   :  { %15210 = vmatpush3.bf16.xpose.msra.mxu0 %v10247_v57  ;;  %15216 = vmatpush3.bf16.xpose.msra.mxu1 %v10296_v56 }
0x138f   :  { %15211 = vmatprep.mubr.msk.bf16.mxu0 %vm16589_vm3, %v20456_v46  ;;  %15217 = vmatprep.mubr.msk.bf16.mxu1 %vm16589_vm3, %v20456_v46 }
0x1390   :  { %15227 = vmatprep.subr.bf16.mxu1 %v20456_v46  ;;  %15221 = vmatprep.subr.bf16.mxu0 %v20456_v46 }
0x1391   :  { %11692 = vrot.lane.b32.xlu1 %v19307_v62, %s16583_s1  ;;  %11740 = vrot.lane.b32.xlu0 %v19312_v4, %s16583_s1 }
0x1395   :  { %11788 = vrot.lane.b32.xlu1 %v19319_v13, %s16583_s1  ;;  %15218 = vmatmul.mubr.msk.bf16.vlgmr.msra.gmra.mxu1 %vm191_vm1, %v19374_v32 }
0x1396   :  { %11932 = vrot.lane.b32.xlu0 %v19336_v45, %s16583_s1  ;;  %15212 = vmatmul.mubr.msk.bf16.vlgmr.msra.gmra.mxu0 %vm191_vm1, %v19376_v37 }
0x1397   :  { %15222 = vmatpush3.bf16.xpose.msra.mxu0 %v10345_v20  ;;  %15228 = vmatpush3.bf16.xpose.msra.mxu1 %v10394_v48 }
0x1398   :  { %15223 = vmatprep.mubr.msk.bf16.mxu0 %vm16589_vm3, %v20456_v46  ;;  %15229 = vmatprep.mubr.msk.bf16.mxu1 %vm16589_vm3, %v20456_v46 }
0x1399   :  { %11884 = vrot.lane.b32.xlu1 %v19328_v31, %s16583_s1  ;;  %15233 = vmatprep.subr.bf16.mxu0 %v20456_v46 }
0x139a   :  { %12028 = vrot.lane.b32.xlu0 %v19348_v6, %s16583_s1  ;;  %15239 = vmatprep.subr.bf16.mxu1 %v20456_v46 }
0x139d   :  { %11980 = vrot.lane.b32.xlu1 %v19352_v22, %s16583_s1 }
0x139e   :  { %15230 = vmatmul.mubr.msk.bf16.vlgmr.msra.gmra.mxu1 %vm191_vm1, %v19388_v39  ;;  %12124 = vrot.lane.b32.xlu0 %v19360_v25, %s16583_s1 }
0x139f   :  { %15224 = vmatmul.mubr.msk.bf16.vlgmr.msra.gmra.mxu0 %vm191_vm1, %v19390_v51  ;;  %15241 = vmatprep.mubr.msk.bf16.mxu1 %vm16589_vm3, %v20456_v46 }
0x13a0   :  { %15235 = vmatprep.mubr.msk.bf16.mxu0 %vm16589_vm3, %v20456_v46 }
0x13a1   :  { %12076 = vrot.lane.b32.xlu1 %v19362_v27, %s16583_s1 }
0x13a2   :  { %12316 = vrot.lane.b32.xlu0 %v19388_v39, %s16583_s1 }
0x13a5   :  { %12172 = vrot.lane.b32.xlu1 %v19376_v37, %s16583_s1 }
0x13a6   :  { %11836 = vrot.lane.b32.xlu0 %v19317_v49, %s16583_s1 }
0x13a9   :  { %12268 = vrot.lane.b32.xlu1 %v19390_v51, %s16583_s1 }
0x13aa   :  { %12220 = vrot.lane.b32.xlu0 %v19374_v32, %s16583_s1 }
0x13ab   :  { %v10487_v62 = vpop.permute.xlu1 %10486  ;;  %v10438_v4 = vpop.permute.xlu0 %10437 }
0x13ac   :  { %v10492_v13 = vsel %vm191_vm1, %v10487_v62, 0  ;;  %v10443_v31 = vsel %vm191_vm1, %v10438_v4, 0 }
0x13ad   :  { %12364 = vrot.lane.b32.xlu1 %v19422_v41, %s16583_s1  ;;  %15234 = vmatpush3.bf16.xpose.msra.mxu0 %v10443_v31 }
0x13ae   :  { %15240 = vmatpush3.bf16.xpose.msra.mxu1 %v10492_v13  ;;  %15245 = vmatprep.subr.bf16.mxu0 %v20456_v46  ;;  %v9234_v13 = vld [vmem:[#allocation2 + $0x30] sm:$0xff] }
0x13af   :  { %15251 = vmatprep.subr.bf16.mxu1 %v20456_v46  ;;  %v10536_v49 = vpop.permute.xlu0 %10535  ;;  %v10585_v45 = vpop.permute.xlu1 %10584 }
0x13b0   :  { %v10541_v6 = vsel %vm191_vm1, %v10536_v49, 0  ;;  %v10590_v22 = vsel %vm191_vm1, %v10585_v45, 0  ;;  %v9235_v45 = vld [vmem:[#allocation2 + $0x38] sm:$0xff] }
0x13b4   :  { %15236 = vmatmul.mubr.msk.bf16.vlgmr.msra.gmra.mxu0 %vm191_vm1, %v19422_v41 }
0x13b5   :  { %15242 = vmatmul.mubr.msk.bf16.vlgmr.msra.gmra.mxu1 %vm191_vm1, %v19420_v38  ;;  %15246 = vmatpush3.bf16.xpose.msra.mxu0 %v10541_v6 }
0x13b6   :  { %15252 = vmatpush3.bf16.xpose.msra.mxu1 %v10590_v22  ;;  %15247 = vmatprep.mubr.msk.bf16.mxu0 %vm16589_vm3, %v20456_v46 }
0x13b7   :  { %15253 = vmatprep.mubr.msk.bf16.mxu1 %vm16589_vm3, %v20456_v46  ;;  %15257 = vmatprep.subr.bf16.mxu0 %v20456_v46 }
0x13b8   :  { %15263 = vmatprep.subr.bf16.mxu1 %v20456_v46 }
0x13bc   :  { %15248 = vmatmul.mubr.msk.bf16.vlgmr.msra.gmra.mxu0 %vm191_vm1, %v19436_v10  ;;  %v9352_v25 = vpop.f32.mrf.mxu1 }
0x13bd   :  { %15254 = vmatmul.mubr.msk.bf16.vlgmr.msra.gmra.mxu1 %vm191_vm1, %v19434_v0  ;;  %15259 = vmatprep.mubr.msk.bf16.mxu0 %vm16589_vm3, %v20456_v46  ;;  %v19626_v3 = vadd.f32 %v9352_v25, %v9229_v30 }
0x13be   :  { %v9303_v27 = vpop.f32.mrf.mxu0  ;;  %v15099_v32 = vpop.f32.mrf.mxu1  ;;  %15265 = vmatprep.mubr.msk.bf16.mxu1 %vm16589_vm3, %v20456_v46 }
0x13bf   :  { %v19618_v19 = vadd.f32 %v9303_v27, %v9228_v16  ;;  %v10831_v28 = vsel %vm191_vm1, %v19626_v3, -inf }
0x13c0   :  { %v15093_v37 = vpop.f32.mrf.mxu0  ;;  %v9355_v39 = vpop.f32.mrf.mxu1 }
0x13c1   :  { %v10828_v59 = vsel %vm191_vm1, %v19618_v19, -inf }
0x13c2   :  { %v9306_v51 = vpop.f32.mrf.mxu0  ;;  %v15100_v41 = vpop.f32.mrf.mxu1 }
0x13c4   :  { %v15094_v9 = vpop.f32.mrf.mxu0 }
0x13c6   :  { %v9401_v36 = vpop.f32.mrf.mxu0 }
0x13c7   :  { %v19620_v42 = vadd.f32 %v9401_v36, %v9230_v17  ;;  %v9450_v24 = vpop.f32.mrf.mxu1 }
0x13c8   :  { %v15105_v52 = vpop.f32.mrf.mxu0  ;;  %v19628_v12 = vadd.f32 %v9450_v24, %v9231_v61 }
0x13c9   :  { %10829 = vmax.xlane.f32.xlu0 %v10828_v59  ;;  %v15111_v11 = vpop.f32.mrf.mxu1  ;;  %v10834_v35 = vsel %vm191_vm1, %v19620_v42, -inf }
0x13ca   :  { %v9404_v53 = vpop.f32.mrf.mxu0  ;;  %v10837_v55 = vsel %vm191_vm1, %v19628_v12, -inf }
0x13cb   :  { %v9453_v26 = vpop.f32.mrf.mxu1 }
0x13cc   :  { %v15106_v21 = vpop.f32.mrf.mxu0 }
0x13cd   :  { %10835 = vmax.xlane.f32.xlu0 %v10834_v35  ;;  %v15112_v60 = vpop.f32.mrf.mxu1  ;;  %v9236_v21 = vld [vmem:[#allocation2 + $0x40] sm:$0xff] }
0x13cf   :  { %v9499_v50 = vpop.f32.mrf.mxu0  ;;  %v9548_v29 = vpop.f32.mrf.mxu1 }
0x13d0   :  { %v19632_v58 = vadd.f32 %v9499_v50, %v9232_v63  ;;  %v19634_v40 = vadd.f32 %v9548_v29, %v9233_v23  ;;  %v9237_v63 = vld [vmem:[#allocation2 + $0x48] sm:$0xff] }
0x13d1   :  { %10832 = vmax.xlane.f32.xlu1 %v10831_v28  ;;  %10838 = vmax.xlane.f32.xlu0 %v10837_v55  ;;  %v15117_v56 = vpop.f32.mrf.mxu0  ;;  %v15123_v57 = vpop.f32.mrf.mxu1 }
0x13d2   :  { %v10840_v8 = vsel %vm191_vm1, %v19632_v58, -inf  ;;  %v10843_v44 = vsel %vm191_vm1, %v19634_v40, -inf }
0x13d3   :  { %v9502_v48 = vpop.f32.mrf.mxu0  ;;  %v9551_v20 = vpop.f32.mrf.mxu1 }
0x13d5   :  { %10841 = vmax.xlane.f32.xlu1 %v10840_v8  ;;  %10844 = vmax.xlane.f32.xlu0 %v10843_v44  ;;  %v15118_v62 = vpop.f32.mrf.mxu0  ;;  %v15124_v4 = vpop.f32.mrf.mxu1 }
0x13d6   :  { %v9238_v62 = vld [vmem:[#allocation2 + $0x50] sm:$0xff] }
0x13d7   :  { %v9597_v31 = vpop.f32.mrf.mxu0 }
0x13d8   :  { %v19642_v49 = vadd.f32 %v9597_v31, %v9234_v13  ;;  %v9646_v6 = vpop.f32.mrf.mxu1  ;;  %v9239_v13 = vld [vmem:[#allocation2 + $0x58] sm:$0xff] }
0x13d9   :  { %v19644_v22 = vadd.f32 %v9646_v6, %v9235_v45  ;;  %v15129_v25 = vpop.f32.mrf.mxu0 }
0x13da   :  { %v15135_v27 = vpop.f32.mrf.mxu1  ;;  %v10846_v32 = vsel %vm191_vm1, %v19642_v49, -inf }
0x13db   :  { %v9600_v37 = vpop.f32.mrf.mxu0  ;;  %10847 = vmax.xlane.f32.xlu1 %v10846_v32  ;;  %v10849_v39 = vsel %vm191_vm1, %v19644_v22, -inf }
0x13dc   :  { %v9649_v51 = vpop.f32.mrf.mxu1  ;;  %10850 = vmax.xlane.f32.xlu0 %v10849_v39 }
0x13dd   :  { %v15130_v41 = vpop.f32.mrf.mxu0 }
0x13de   :  { %v15136_v16 = vpop.f32.mrf.mxu1 }
0x13e4   :  { %v10683_v9 = vpop.permute.xlu1 %10682  ;;  %v10634_v17 = vpop.permute.xlu0 %10633 }
0x13e5   :  { %v10688_v36 = vsel %vm191_vm1, %v10683_v9, 0  ;;  %v10639_v24 = vsel %vm191_vm1, %v10634_v17, 0 }
0x13e6   :  { %15258 = vmatpush3.bf16.xpose.msra.mxu0 %v10639_v24  ;;  %15264 = vmatpush3.bf16.xpose.msra.mxu1 %v10688_v36 }
0x13e7   :  { %15269 = vmatprep.subr.bf16.mxu0 %v20456_v46  ;;  %15275 = vmatprep.subr.bf16.mxu1 %v20456_v46 }
0x13e8   :  { %v10781_v59 = vpop.permute.xlu1 %10780  ;;  %v10732_v52 = vpop.permute.xlu0 %10731 }
0x13e9   :  { %v10786_v11 = vsel %vm191_vm1, %v10781_v59, 0  ;;  %v10737_v53 = vsel %vm191_vm1, %v10732_v52, 0 }
0x13ed   :  { %15260 = vmatmul.mubr.msk.bf16.vlgmr.msra.gmra.mxu0 %vm191_vm1, %v19462_v14  ;;  %15266 = vmatmul.mubr.msk.bf16.vlgmr.msra.gmra.mxu1 %vm191_vm1, %v19460_v43  ;;  %v11213_v35 = vpop.permute.xlu1 %11212  ;;  %v11261_v30 = vpop.permute.xlu0 %11260 }
0x13ee   :  { %15270 = vmatpush3.bf16.xpose.msra.mxu0 %v10737_v53  ;;  %15276 = vmatpush3.bf16.xpose.msra.mxu1 %v10786_v11  ;;  %v11218_v61 = vsel %vm204_vm0, %v11213_v35, 0  ;;  %v11266_v26 = vsel %vm204_vm0, %v11261_v30, 0  ;;  %v9240_v30 = vld [vmem:[#allocation2 + $0x60] sm:$0xff] }
0x13ef   :  { %15277 = vmatprep.mubr.msk.bf16.mxu1 %vm16589_vm3, %v20456_v46  ;;  %15271 = vmatprep.mubr.msk.bf16.mxu0 %vm16589_vm3, %v20456_v46 }
0x13f0   :  { %15281 = vmatprep.subr.bf16.mxu0 %v20456_v46  ;;  %15287 = vmatprep.subr.bf16.mxu1 %v20456_v46 }
0x13f1   :  { %v19694_v9 = vpop.permute.xlu1 %11308  ;;  %v19696_v17 = vpop.permute.xlu0 %11356 }
0x13f5   :  { %15272 = vmatmul.mubr.msk.bf16.vlgmr.msra.gmra.mxu0 %vm191_vm1, %v19476_v7  ;;  %15278 = vmatmul.mubr.msk.bf16.vlgmr.msra.gmra.mxu1 %vm191_vm1, %v19474_v2 }
0x13f6   :  { %15282 = vmatpush3.bf16.msra.mxu0 %v11218_v61  ;;  %15288 = vmatpush3.bf16.msra.mxu1 %v11266_v26  ;;  %v19698_v36 = vpop.permute.xlu1 %11404  ;;  %v19700_v24 = vpop.permute.xlu0 %11452  ;;  %v9241_v26 = vld [vmem:[#allocation2 + $0x68] sm:$0xff] }
0x13f7   :  { %15289 = vmatprep.mubr.msk.bf16.mxu1 %vm16589_vm3, %v20456_v46  ;;  %15299 = vmatprep.subr.bf16.mxu1 %v20456_v46 }
0x13f8   :  { %v9695_v60 = vpop.f32.mrf.mxu0  ;;  %v9744_v50 = vpop.f32.mrf.mxu1  ;;  %15283 = vmatprep.mubr.msk.bf16.mxu0 %vm16589_vm3, %v20456_v46  ;;  %15293 = vmatprep.subr.bf16.mxu0 %v20456_v46 }
0x13f9   :  { %v19678_v23 = vadd.f32 %v9695_v60, %v9236_v21  ;;  %v19680_v29 = vadd.f32 %v9744_v50, %v9237_v63 }
0x13fa   :  { %v15141_v28 = vpop.f32.mrf.mxu0  ;;  %v15147_v55 = vpop.f32.mrf.mxu1 }
0x13fb   :  { %v10852_v56 = vsel %vm191_vm1, %v19678_v23, -inf  ;;  %v10855_v57 = vsel %vm191_vm1, %v19680_v29, -inf  ;;  %v19702_v59 = vpop.permute.xlu1 %11500  ;;  %v19704_v52 = vpop.permute.xlu0 %11548 }
0x13fc   :  { %10853 = vmax.xlane.f32.xlu1 %v10852_v56  ;;  %10856 = vmax.xlane.f32.xlu0 %v10855_v57  ;;  %v9698_v8 = vpop.f32.mrf.mxu0  ;;  %v9747_v44 = vpop.f32.mrf.mxu1 }
0x13fe   :  { %v15142_v48 = vpop.f32.mrf.mxu0  ;;  %v15148_v20 = vpop.f32.mrf.mxu1 }
0x13ff   :  { %v19706_v11 = vpop.permute.xlu1 %11596  ;;  %v19708_v53 = vpop.permute.xlu0 %11644 }
0x1401   :  { %v9793_v4 = vpop.f32.mrf.mxu0  ;;  %v9842_v31 = vpop.f32.mrf.mxu1 }
0x1402   :  { %v19686_v45 = vadd.f32 %v9793_v4, %v9238_v62  ;;  %v19688_v6 = vadd.f32 %v9842_v31, %v9239_v13  ;;  %v9242_v13 = vld [vmem:[#allocation2 + $0x70] sm:$0xff] }
0x1403   :  { %v15153_v25 = vpop.f32.mrf.mxu0  ;;  %v15159_v27 = vpop.f32.mrf.mxu1 }
0x1404   :  { %v10858_v32 = vsel %vm191_vm1, %v19686_v45, -inf  ;;  %v10861_v37 = vsel %vm191_vm1, %v19688_v6, -inf  ;;  %v19710_v35 = vpop.permute.xlu1 %11692  ;;  %v19712_v60 = vpop.permute.xlu0 %11740  ;;  %v9243_v25 = vld [vmem:[#allocation2 + $0x78] sm:$0xff] }
0x1405   :  { %v9796_v39 = vpop.f32.mrf.mxu0  ;;  %v9845_v51 = vpop.f32.mrf.mxu1  ;;  %10859 = vmax.xlane.f32.xlu1 %v10858_v32  ;;  %10862 = vmax.xlane.f32.xlu0 %v10861_v37 }
0x1407   :  { %v15154_v41 = vpop.f32.mrf.mxu0  ;;  %v15160_v16 = vpop.f32.mrf.mxu1 }
0x1408   :  { %v19718_v56 = vpop.permute.xlu1 %11788  ;;  %v19724_v4 = vpop.permute.xlu0 %11932 }
0x140c   :  { %v19726_v32 = vpop.permute.xlu1 %11884 }
0x1431   :  { %v9891_v61 = vpop.f32.mrf.mxu0  ;;  %v9940_v21 = vpop.f32.mrf.mxu1 }
0x1432   :  { %v19714_v63 = vadd.f32 %v9891_v61, %v9240_v30  ;;  %v19716_v50 = vadd.f32 %v9940_v21, %v9241_v26  ;;  %v19736_v21 = vpop.permute.xlu0 %12028 }
0x1433   :  { %v15165_v28 = vpop.f32.mrf.mxu0  ;;  %v15171_v55 = vpop.f32.mrf.mxu1  ;;  %20529 = vst [vmem:[#allocation26_spill] sm:$0xff] %v19736_v21 }
0x1434   :  { %v10864_v57 = vsel %vm191_vm1, %v19714_v63, -inf  ;;  %v10867_v8 = vsel %vm191_vm1, %v19716_v50, -inf }
0x1435   :  { %v9894_v44 = vpop.f32.mrf.mxu0  ;;  %v9943_v48 = vpop.f32.mrf.mxu1  ;;  %10865 = vmax.xlane.f32.xlu1 %v10864_v57  ;;  %10868 = vmax.xlane.f32.xlu0 %v10867_v8 }
0x1436   :  { %v19738_v57 = vpop.permute.xlu1 %11980 }
0x1437   :  { %v15166_v20 = vpop.f32.mrf.mxu0  ;;  %v15172_v62 = vpop.f32.mrf.mxu1 }
0x1438   :  { %v19740_v62 = vpop.permute.xlu0 %12124 }
0x1439   :  { %20530 = vst [vmem:[#allocation45_spill] sm:$0xff] %v19740_v62  ;;  %v9257_v62 = vld [vmem:[#allocation2 + $0xe8] sm:$0xff] }
0x143a   :  { %v9989_v31 = vpop.f32.mrf.mxu0  ;;  %v10038_v27 = vpop.f32.mrf.mxu1 }
0x143b   :  { %v19728_v37 = vadd.f32 %v9989_v31, %v9242_v13  ;;  %v19730_v39 = vadd.f32 %v10038_v27, %v9243_v25  ;;  %v19742_v25 = vpop.permute.xlu1 %12076 }
0x143c   :  { %v15177_v51 = vpop.f32.mrf.mxu0  ;;  %v15183_v41 = vpop.f32.mrf.mxu1  ;;  %20531 = vst [vmem:[#allocation32_spill] sm:$0xff] %v19742_v25  ;;  %v9256_v25 = vld [vmem:[#allocation2 + $0xe0] sm:$0xff] }
0x143d   :  { %v10870_v16 = vsel %vm191_vm1, %v19728_v37, -inf  ;;  %v10873_v30 = vsel %vm191_vm1, %v19730_v39, -inf }
0x143e   :  { %v9992_v61 = vpop.f32.mrf.mxu0  ;;  %v10041_v26 = vpop.f32.mrf.mxu1  ;;  %10871 = vmax.xlane.f32.xlu1 %v10870_v16  ;;  %10874 = vmax.xlane.f32.xlu0 %v10873_v30 }
0x143f   :  { %v19744_v30 = vpop.permute.xlu0 %12316 }
0x1440   :  { %v15178_v28 = vpop.f32.mrf.mxu0  ;;  %v15184_v55 = vpop.f32.mrf.mxu1  ;;  %20532 = vst [vmem:[#allocation36_spill] sm:$0xff] %v19744_v30 }
0x1441   :  { %v19746_v28 = vpop.permute.xlu1 %12172 }
0x1442   :  { %20533 = vst [vmem:[#allocation34_spill] sm:$0xff] %v19746_v28  ;;  %v9245_v28 = vld [vmem:[#allocation2 + $0x88] sm:$0xff] }
0x1443   :  { %v10087_v8 = vpop.f32.mrf.mxu0  ;;  %v10136_v44 = vpop.f32.mrf.mxu1 }
0x1445   :  { %v15189_v48 = vpop.f32.mrf.mxu0  ;;  %v15195_v20 = vpop.f32.mrf.mxu1 }
0x1447   :  { %v10090_v13 = vpop.f32.mrf.mxu0  ;;  %v10139_v31 = vpop.f32.mrf.mxu1 }
0x1448   :  { %v19750_v13 = vpop.permute.xlu0 %11836 }
0x1449   :  { %v15190_v27 = vpop.f32.mrf.mxu0  ;;  %v15196_v51 = vpop.f32.mrf.mxu1 }
0x144a   :  { %v19756_v27 = vpop.permute.xlu1 %12268 }
0x144b   :  { %20534 = vst [vmem:[#allocation33_spill] sm:$0xff] %v19756_v27 }
0x144c   :  { %v10185_v41 = vpop.f32.mrf.mxu0  ;;  %v10234_v16 = vpop.f32.mrf.mxu1 }
0x144e   :  { %v15201_v61 = vpop.f32.mrf.mxu0  ;;  %v15207_v26 = vpop.f32.mrf.mxu1 }
0x144f   :  { %12460 = vrot.lane.b32.xlu1 %v19436_v10, %s16583_s1  ;;  %v19760_v10 = vpop.permute.xlu0 %12220 }
0x1450   :  { %v10188_v55 = vpop.f32.mrf.mxu0  ;;  %v10237_v48 = vpop.f32.mrf.mxu1  ;;  %20535 = vst [vmem:[#allocation35_spill] sm:$0xff] %v19760_v10  ;;  %v19771_v10 = vadd.f32 %v10136_v44, %v9245_v28  ;;  %v9246_v28 = vld [vmem:[#allocation2 + $0x90] sm:$0xff] }
0x1452   :  { %v15202_v20 = vpop.f32.mrf.mxu0  ;;  %v15208_v31 = vpop.f32.mrf.mxu1 }
0x1453   :  { %12508 = vrot.lane.b32.xlu1 %v19434_v0, %s16583_s1  ;;  %v19762_v20 = vpop.permute.xlu1 %12364  ;;  %v10830_v1 = vpop.xlane.xlu0 %10829 }
0x1454   :  { %12412 = vrot.lane.b32.xlu0 %v19420_v38, %s16583_s1  ;;  %20536 = vst [vmem:[#allocation39_spill] sm:$0xff] %v19762_v20 }
0x1455   :  { %v10332_v51 = vpop.f32.mrf.mxu1 }
0x1456   :  { %v19758_v61 = vpop.f32.mrf.mxu0 }
0x1457   :  { %v15219_v26 = vpop.f32.mrf.mxu1  ;;  %v10836_v33 = vpop.xlane.xlu0 %10835 }
0x1458   :  { %v15213_v54 = vpop.f32.mrf.mxu0 }
0x1459   :  { %v10335_v55 = vpop.f32.mrf.mxu1 }
0x145a   :  { %v10286_v48 = vpop.f32.mrf.mxu0  ;;  %v10833_v15 = vpop.xlane.xlu1 %10832 }
0x145b   :  { %v15220_v31 = vpop.f32.mrf.mxu1  ;;  %v10925_v26 = vsub.f32 %v19626_v3, %v10833_v15  ;;  %v10924_v48 = vsub.f32 %v19618_v19, %v10830_v1  ;;  %v9244_v3 = vld [vmem:[#allocation2 + $0x80] sm:$0xff]  ;;  %v10879_v1 = vsel %vm191_vm1, %v19771_v10, -inf }
0x145c   :  { %v15214_v34 = vpop.f32.mrf.mxu0  ;;  %v10839_v31 = vpop.xlane.xlu0 %10838 }
0x145d   :  { %v10958_v20 = vmul.f32 1.442695, %v10925_v26  ;;  %v10956_v34 = vmul.f32 1.442695, %v10924_v48  ;;  %v10927_v30 = vsub.f32 %v19628_v12, %v10839_v31 }
0x145e   :  { %v19764_v0 = vpop.f32.mrf.mxu1  ;;  %v10842_v44 = vpop.xlane.xlu1 %10841 }
0x145f   :  { %v19766_v38 = vpop.f32.mrf.mxu0  ;;  %16218 = vpow2.f32 %v10958_v20 }
0x1460   :  { %v15231_v18 = vpop.f32.mrf.mxu1  ;;  %16220 = vpow2.f32 %v10956_v34  ;;  %v10845_v15 = vpop.xlane.xlu0 %10844 }
0x1461   :  { %v15225_v5 = vpop.f32.mrf.mxu0  ;;  %v10962_v18 = vmul.f32 1.442695, %v10927_v30  ;;  %v10929_v12 = vsub.f32 %v19634_v40, %v10845_v15 }
0x1462   :  { %v10433_v54 = vpop.f32.mrf.mxu1  ;;  %v10926_v5 = vsub.f32 %v19620_v42, %v10836_v33  ;;  %v19783_v33 = vadd.f32 %v10185_v41, %v9246_v28  ;;  %v9249_v41 = vld [vmem:[#allocation2 + $0xa8] sm:$0xff] }
0x1463   :  { %v10384_v47 = vpop.f32.mrf.mxu0  ;;  %16222 = vpow2.f32 %v10962_v18  ;;  %v10966_v30 = vmul.f32 1.442695, %v10929_v12 }
0x1464   :  { %v15232_v27 = vpop.f32.mrf.mxu1  ;;  %v19774_v47 = vadd.f32 %v10087_v8, %v9244_v3  ;;  %v10960_v20 = vmul.f32 1.442695, %v10926_v5  ;;  %v19794_v5 = vadd.f32 %v10332_v51, %v9249_v41  ;;  %v10882_v15 = vsel %vm191_vm1, %v19783_v33, -inf  ;;  %v10848_v12 = vpop.xlane.xlu1 %10847  ;;  %v9248_v51 = vld [vmem:[#allocation2 + $0xa0] sm:$0xff] }
0x1465   :  { %v15226_v55 = vpop.f32.mrf.mxu0  ;;  %v9247_v27 = vld [vmem:[#allocation2 + $0x98] sm:$0xff]  ;;  %v10851_v48 = vpop.xlane.xlu0 %10850 }
0x1466   :  { %v19778_v19 = vadd.f32 %v10234_v16, %v9247_v27  ;;  %v10876_v8 = vsel %vm191_vm1, %v19774_v47, -inf  ;;  %16224 = vpow2.f32 %v10960_v20  ;;  %v10928_v16 = vsub.f32 %v19632_v58, %v10842_v44 }
0x1467   :  { %16226 = vpow2.f32 %v10966_v30  ;;  %v10931_v3 = vsub.f32 %v19644_v22, %v10851_v48  ;;  %v10930_v22 = vsub.f32 %v19642_v49, %v10848_v12 }
0x1468   :  { %v10885_v40 = vsel %vm191_vm1, %v19778_v19, -inf  ;;  %v10964_v58 = vmul.f32 1.442695, %v10928_v16  ;;  %v10891_v16 = vsel %vm191_vm1, %v19794_v5, -inf }
0x1469   :  { %v10970_v30 = vmul.f32 1.442695, %v10931_v3  ;;  %v10968_v49 = vmul.f32 1.442695, %v10930_v22 }
0x146a   :  { %16228 = vpow2.f32 %v10964_v58 }
0x146b   :  { %16230 = vpow2.f32 %v10970_v30  ;;  %v9253_v30 = vld [vmem:[#allocation2 + $0xc8] sm:$0xff] }
0x146c   :  { %v19792_v55 = vpop.eup %16218  ;;  %16232 = vpow2.f32 %v10968_v49  ;;  %v9255_v49 = vld [vmem:[#allocation2 + $0xd8] sm:$0xff] }
0x146d   :  { %v19801_v20 = vpop.eup %16220 }
0x146e   :  { %v11020_v48 = vsel %vm191_vm1, %v19801_v20, 0.0 }
0x1473   :  { %10880 = vmax.xlane.f32.xlu0 %v10879_v1  ;;  %v11023_v1 = vsel %vm191_vm1, %v19792_v55, 0.0 }
0x1474   :  { %v19781_v26 = vpop.f32.mrf.mxu0 }
0x1475   :  { %v19785_v42 = vpop.f32.mrf.mxu1 }
0x1476   :  { %v15237_v54 = vpop.f32.mrf.mxu0 }
0x1477   :  { %v15243_v31 = vpop.f32.mrf.mxu1  ;;  %10877 = vmax.xlane.f32.xlu1 %v10876_v8  ;;  %10886 = vmax.xlane.f32.xlu0 %v10885_v40  ;;  %v19804_v8 = vadd.f32 %v19758_v61, %v9248_v51  ;;  %v9251_v61 = vld [vmem:[#allocation2 + $0xb8] sm:$0xff] }
0x1478   :  { %v10482_v34 = vpop.f32.mrf.mxu0  ;;  %v19811_v31 = vpop.eup %16222  ;;  %v19816_v58 = vadd.f32 %v19764_v0, %v9251_v61 }
0x1479   :  { %v10531_v18 = vpop.f32.mrf.mxu1 }
0x147a   :  { %v15238_v27 = vpop.f32.mrf.mxu0 }
0x147b   :  { %v15244_v44 = vpop.f32.mrf.mxu1  ;;  %10883 = vmax.xlane.f32.xlu1 %v10882_v15  ;;  %11024 = vadd.xlane.f32.xlu0 %v11023_v1  ;;  %v10888_v15 = vsel %vm191_vm1, %v19804_v8, -inf  ;;  %v11029_v27 = vsel %vm191_vm1, %v19811_v31, 0.0  ;;  %v19820_v1 = vpop.eup %16224 }
0x147c   :  { %v10577_v28 = vpop.f32.mrf.mxu0  ;;  %v9250_v44 = vld [vmem:[#allocation2 + $0xb0] sm:$0xff]  ;;  %v11026_v0 = vsel %vm191_vm1, %v19820_v1, 0.0  ;;  %v19829_v22 = vpop.eup %16226 }
0x147d   :  { %v10626_v54 = vpop.f32.mrf.mxu1  ;;  %v19823_v51 = vadd.f32 %v19766_v38, %v9250_v44  ;;  %v11035_v38 = vsel %vm191_vm1, %v19829_v22, 0.0  ;;  %v9254_v44 = vld [vmem:[#allocation2 + $0xd0] sm:$0xff] }
0x147e   :  { %v15249_v40 = vpop.f32.mrf.mxu0 }
0x147f   :  { %v15255_v41 = vpop.f32.mrf.mxu1  ;;  %10892 = vmax.xlane.f32.xlu0 %v10891_v16  ;;  %11021 = vadd.xlane.f32.xlu1 %v11020_v48  ;;  %v10897_v16 = vsel %vm191_vm1, %v19816_v58, -inf  ;;  %v19832_v40 = vadd.f32 %v19785_v42, %v9253_v30  ;;  %v10894_v48 = vsel %vm191_vm1, %v19823_v51, -inf }
0x1480   :  { %v10580_v34 = vpop.f32.mrf.mxu0  ;;  %v19838_v41 = vpop.eup %16228 }
0x1481   :  { %v10629_v18 = vpop.f32.mrf.mxu1  ;;  %v9252_v34 = vld [vmem:[#allocation2 + $0xc0] sm:$0xff]  ;;  %v10903_v42 = vsel %vm191_vm1, %v19832_v40, -inf }
0x1482   :  { %v15250_v3 = vpop.f32.mrf.mxu0  ;;  %v19841_v61 = vadd.f32 %v19781_v26, %v9252_v34  ;;  %v11032_v18 = vsel %vm191_vm1, %v19838_v41, 0.0 }
0x1483   :  { %v15256_v12 = vpop.f32.mrf.mxu1  ;;  %10889 = vmax.xlane.f32.xlu1 %v10888_v15  ;;  %11030 = vadd.xlane.f32.xlu0 %v11029_v27  ;;  %v19847_v15 = vpop.eup %16230  ;;  %v19849_v3 = vadd.f32 %v10626_v54, %v9255_v49 }
0x1484   :  { %v10900_v27 = vsel %vm191_vm1, %v19841_v61, -inf  ;;  %v11041_v26 = vsel %vm191_vm1, %v19847_v15, 0.0  ;;  %v19855_v12 = vpop.eup %16232 }
0x1485   :  { %v10909_v54 = vsel %vm191_vm1, %v19849_v3, -inf }
0x1487   :  { %11027 = vadd.xlane.f32.xlu1 %v11026_v0  ;;  %10898 = vmax.xlane.f32.xlu0 %v10897_v16  ;;  %v19857_v0 = vadd.f32 %v10577_v28, %v9254_v44  ;;  %v11038_v16 = vsel %vm191_vm1, %v19855_v12, 0.0 }
0x1489   :  { %v10906_v30 = vsel %vm191_vm1, %v19857_v0, -inf }
0x148b   :  { %10895 = vmax.xlane.f32.xlu1 %v10894_v48  ;;  %11036 = vadd.xlane.f32.xlu0 %v11035_v38  ;;  %v10854_v48 = vpop.xlane.xlu1 %10853  ;;  %v10857_v38 = vpop.xlane.xlu0 %10856 }
0x148c   :  { %v10932_v34 = vsub.f32 %v19678_v23, %v10854_v48 }
0x148e   :  { %v10972_v49 = vmul.f32 1.442695, %v10932_v34 }
0x148f   :  { %11033 = vadd.xlane.f32.xlu1 %v11032_v18  ;;  %10904 = vmax.xlane.f32.xlu0 %v10903_v42  ;;  %v10933_v18 = vsub.f32 %v19680_v29, %v10857_v38  ;;  %v10860_v28 = vpop.xlane.xlu1 %10859  ;;  %v10863_v42 = vpop.xlane.xlu0 %10862 }
0x1490   :  { %v10935_v44 = vsub.f32 %v19688_v6, %v10863_v42  ;;  %16234 = vpow2.f32 %v10972_v49 }
0x1493   :  { %10901 = vmax.xlane.f32.xlu1 %v10900_v27  ;;  %11042 = vadd.xlane.f32.xlu0 %v11041_v26  ;;  %v10934_v27 = vsub.f32 %v19686_v45, %v10860_v28  ;;  %v10974_v26 = vmul.f32 1.442695, %v10933_v18 }
0x1495   :  { %16236 = vpow2.f32 %v10974_v26 }
0x1497   :  { %11039 = vadd.xlane.f32.xlu1 %v11038_v16  ;;  %10910 = vmax.xlane.f32.xlu0 %v10909_v54  ;;  %v10976_v16 = vmul.f32 1.442695, %v10934_v27  ;;  %v10978_v54 = vmul.f32 1.442695, %v10935_v44 }
0x1499   :  { %16238 = vpow2.f32 %v10976_v16 }
0x149a   :  { %16240 = vpow2.f32 %v10978_v54 }
0x149b   :  { %10907 = vmax.xlane.f32.xlu1 %v10906_v30 }
0x149d   :  { %v19881_v16 = vpop.eup %16234 }
0x14ad   :  { %v10675_v30 = vpop.f32.mrf.mxu0  ;;  %v10724_v7 = vpop.f32.mrf.mxu1 }
0x14ae   :  { %v19869_v2 = vadd.f32 %v10675_v30, %v9256_v25  ;;  %v19871_v23 = vadd.f32 %v10724_v7, %v9257_v62  ;;  %v9258_v25 = vld [vmem:[#allocation2 + $0xf0] sm:$0xff]  ;;  %v9259_v7 = vld [vmem:[#allocation2 + $0xf8] sm:$0xff] }
0x14af   :  { %v15261_v29 = vpop.f32.mrf.mxu0  ;;  %v15267_v48 = vpop.f32.mrf.mxu1 }
0x14b0   :  { %v10912_v45 = vsel %vm191_vm1, %v19869_v2, -inf  ;;  %v10915_v6 = vsel %vm191_vm1, %v19871_v23, -inf  ;;  %v19887_v29 = vpop.eup %16236 }
0x14b1   :  { %v10678_v38 = vpop.f32.mrf.mxu0  ;;  %v10727_v34 = vpop.f32.mrf.mxu1  ;;  %10913 = vmax.xlane.f32.xlu1 %v10912_v45  ;;  %10916 = vmax.xlane.f32.xlu0 %v10915_v6 }
0x14b2   :  { %v19889_v34 = vpop.eup %16238 }
0x14b3   :  { %v15262_v18 = vpop.f32.mrf.mxu0  ;;  %v15268_v28 = vpop.f32.mrf.mxu1 }
0x14b4   :  { %v11044_v18 = vsel %vm191_vm1, %v19881_v16, 0.0  ;;  %v11047_v28 = vsel %vm191_vm1, %v19887_v29, 0.0 }
0x14b5   :  { %v10773_v42 = vpop.f32.mrf.mxu0  ;;  %v10822_v62 = vpop.f32.mrf.mxu1 }
0x14b6   :  { %v19877_v49 = vadd.f32 %v10773_v42, %v9258_v25  ;;  %v19879_v27 = vadd.f32 %v10822_v62, %v9259_v7  ;;  %v19895_v25 = vpop.eup %16240 }
0x14b7   :  { %v15273_v26 = vpop.f32.mrf.mxu0  ;;  %v15279_v44 = vpop.f32.mrf.mxu1 }
0x14b8   :  { %v10918_v54 = vsel %vm191_vm1, %v19877_v49, -inf  ;;  %v10921_v30 = vsel %vm191_vm1, %v19879_v27, -inf  ;;  %v11050_v44 = vsel %vm191_vm1, %v19889_v34, 0.0 }
0x14b9   :  { %v10776_v48 = vpop.f32.mrf.mxu0  ;;  %v10825_v45 = vpop.f32.mrf.mxu1  ;;  %10919 = vmax.xlane.f32.xlu1 %v10918_v54  ;;  %10922 = vmax.xlane.f32.xlu0 %v10921_v30  ;;  %v11053_v54 = vsel %vm191_vm1, %v19895_v25, 0.0 }
0x14bb   :  { %v15274_v6 = vpop.f32.mrf.mxu0  ;;  %v15280_v38 = vpop.f32.mrf.mxu1 }
0x14bd   :  { %11045 = vadd.xlane.f32.xlu1 %v11044_v18  ;;  %11048 = vadd.xlane.f32.xlu0 %v11047_v28 }
0x14be   :  { %v10866_v42 = vpop.xlane.xlu1 %10865  ;;  %v10869_v7 = vpop.xlane.xlu0 %10868 }
0x14bf   :  { %v10936_v62 = vsub.f32 %v19714_v63, %v10866_v42  ;;  %v10937_v26 = vsub.f32 %v19716_v50, %v10869_v7 }
0x14c1   :  { %v10980_v30 = vmul.f32 1.442695, %v10936_v62  ;;  %v10982_v48 = vmul.f32 1.442695, %v10937_v26  ;;  %11051 = vadd.xlane.f32.xlu1 %v11050_v44  ;;  %11054 = vadd.xlane.f32.xlu0 %v11053_v54 }
0x14c3   :  { %16242 = vpow2.f32 %v10980_v30 }
0x14c4   :  { %16244 = vpow2.f32 %v10982_v48 }
0x14c7   :  { %v10872_v45 = vpop.xlane.xlu1 %10871  ;;  %v10875_v6 = vpop.xlane.xlu0 %10874 }
0x14c8   :  { %v10938_v38 = vsub.f32 %v19728_v37, %v10872_v45  ;;  %v10939_v63 = vsub.f32 %v19730_v39, %v10875_v6 }
0x14ca   :  { %v10984_v18 = vmul.f32 1.442695, %v10938_v38  ;;  %v10986_v50 = vmul.f32 1.442695, %v10939_v63 }
0x14cb   :  { %v19921_v54 = vpop.permute.xlu1 %12460  ;;  %v19923_v30 = vpop.permute.xlu0 %12412 }
0x14cc   :  { %16246 = vpow2.f32 %v10984_v18  ;;  %20537 = vst [vmem:[#allocation38_spill] sm:$0xff] %v19921_v54  ;;  %20538 = vst [vmem:[#allocation40_spill] sm:$0xff] %v19923_v30 }
0x14cd   :  { %16248 = vpow2.f32 %v10986_v50 }
0x14cf   :  { %v19925_v48 = vpop.permute.xlu1 %12508 }
0x14d0   :  { %v19905_v28 = vpop.eup %16242  ;;  %20539 = vst [vmem:[#allocation37_spill] sm:$0xff] %v19925_v48 }
0x14d1   :  { %v19907_v42 = vpop.eup %16244  ;;  %v11056_v7 = vsel %vm191_vm1, %v19905_v28, 0.0 }
0x14d2   :  { %11057 = vadd.xlane.f32.xlu1 %v11056_v7  ;;  %v11059_v62 = vsel %vm191_vm1, %v19907_v42, 0.0 }
0x14d3   :  { %11060 = vadd.xlane.f32.xlu0 %v11059_v62 }
0x14d9   :  { %v19913_v26 = vpop.eup %16246 }
0x14da   :  { %v19915_v37 = vpop.eup %16248  ;;  %v11062_v39 = vsel %vm191_vm1, %v19913_v26, 0.0 }
0x14db   :  { %11063 = vadd.xlane.f32.xlu1 %v11062_v39  ;;  %v11065_v44 = vsel %vm191_vm1, %v19915_v37, 0.0 }
0x14dc   :  { %11066 = vadd.xlane.f32.xlu0 %v11065_v44 }
0x14fc   :  { %v10881_v45 = vpop.xlane.xlu0 %10880 }
0x14fd   :  { %v10941_v6 = vsub.f32 %v19771_v10, %v10881_v45 }
0x14ff   :  { %v10990_v38 = vmul.f32 1.442695, %v10941_v6 }
0x1500   :  { %v10878_v63 = vpop.xlane.xlu1 %10877  ;;  %v10887_v18 = vpop.xlane.xlu0 %10886 }
0x1501   :  { %16250 = vpow2.f32 %v10990_v38  ;;  %v10940_v50 = vsub.f32 %v19774_v47, %v10878_v63  ;;  %v10943_v7 = vsub.f32 %v19778_v19, %v10887_v18 }
0x1503   :  { %v10988_v62 = vmul.f32 1.442695, %v10940_v50  ;;  %v10994_v39 = vmul.f32 1.442695, %v10943_v7 }
0x1504   :  { %v10884_v44 = vpop.xlane.xlu1 %10883  ;;  %v11025_v21 = vpop.xlane.xlu0 %11024 }
0x1505   :  { %16252 = vpow2.f32 %v10988_v62  ;;  %v10942_v54 = vsub.f32 %v19783_v33, %v10884_v44 }
0x1506   :  { %16254 = vpow2.f32 %v10994_v39 }
0x1507   :  { %v10992_v48 = vmul.f32 1.442695, %v10942_v54  ;;  %16256 = vrcp.f32 %v11025_v21 }
0x1508   :  { %v11022_v30 = vpop.xlane.xlu1 %11021  ;;  %v10893_v10 = vpop.xlane.xlu0 %10892 }
0x1509   :  { %16258 = vpow2.f32 %v10992_v48  ;;  %v10945_v45 = vsub.f32 %v19794_v5, %v10893_v10 }
0x150a   :  { %16260 = vrcp.f32 %v11022_v30 }
0x150b   :  { %v10998_v6 = vmul.f32 1.442695, %v10945_v45 }
0x150c   :  { %v10890_v47 = vpop.xlane.xlu1 %10889  ;;  %v11031_v38 = vpop.xlane.xlu0 %11030 }
0x150d   :  { %16262 = vpow2.f32 %v10998_v6  ;;  %v10944_v19 = vsub.f32 %v19804_v8, %v10890_v47 }
0x150e   :  { %v19933_v63 = vpop.eup %16250  ;;  %16264 = vrcp.f32 %v11031_v38 }
0x150f   :  { %v10996_v18 = vmul.f32 1.442695, %v10944_v19  ;;  %v11071_v33 = vsel %vm191_vm1, %v19933_v63, 0.0 }
0x1510   :  { %v11028_v21 = vpop.xlane.xlu1 %11027  ;;  %11072 = vadd.xlane.f32.xlu0 %v11071_v33  ;;  %v10899_v54 = vpop.xlane.xlu0 %10898 }
0x1511   :  { %16266 = vpow2.f32 %v10996_v18  ;;  %v10947_v5 = vsub.f32 %v19816_v58, %v10899_v54 }
0x1512   :  { %v19938_v30 = vpop.eup %16252  ;;  %16268 = vrcp.f32 %v11028_v21 }
0x1513   :  { %v19940_v48 = vpop.eup %16254  ;;  %v11002_v50 = vmul.f32 1.442695, %v10947_v5  ;;  %v11068_v8 = vsel %vm191_vm1, %v19938_v30, 0.0 }
0x1514   :  { %v16257_v7 = vpop.eup %16256  ;;  %11069 = vadd.xlane.f32.xlu1 %v11068_v8  ;;  %v10896_v62 = vpop.xlane.xlu1 %10895  ;;  %v11077_v39 = vsel %vm191_vm1, %v19940_v48, 0.0 }
0x1515   :  { %v11037_v44 = vpop.xlane.xlu0 %11036  ;;  %v11149_v10 = vmul.f32 %v16257_v7, %v19792_v55  ;;  %16270 = vpow2.f32 %v11002_v50  ;;  %v10946_v58 = vsub.f32 %v19823_v51, %v10896_v62  ;;  %11078 = vadd.xlane.f32.xlu0 %v11077_v39  ;;  %v11362_v55 = vsel %vm204_vm0, %v19696_v17, 0 }
0x1516   :  { %v19948_v45 = vpop.eup %16258  ;;  %16272 = vrcp.f32 %v11037_v44  ;;  %v11314_v17 = vsel %vm204_vm0, %v19694_v9, 0 }
0x1517   :  { %v16261_v6 = vpop.eup %16260  ;;  %v11181_v47 = vpack.c.bf16 %v11149_v10, %v11149_v10  ;;  %v11000_v38 = vmul.f32 1.442695, %v10946_v58  ;;  %v11074_v19 = vsel %vm191_vm1, %v19948_v45, 0.0 }
0x1518   :  { %v11148_v18 = vmul.f32 %v16261_v6, %v19801_v20  ;;  %11075 = vadd.xlane.f32.xlu1 %v11074_v19  ;;  %v11034_v33 = vpop.xlane.xlu1 %11033 }
0x1519   :  { %v10905_v21 = vpop.xlane.xlu0 %10904  ;;  %16274 = vpow2.f32 %v11000_v38  ;;  %15290 = vmatmul.mubr.msk.bf16.vlgmr.msra.gmra.mxu1 %vm191_vm1, %v11181_v47 }
0x151a   :  { %v10949_v51 = vsub.f32 %v19832_v40, %v10905_v21  ;;  %v19957_v54 = vpop.eup %16262  ;;  %v11180_v5 = vpack.c.bf16 %v11148_v18, %v11148_v18  ;;  %15300 = vmatpush3.bf16.msra.mxu1 %v11362_v55  ;;  %16276 = vrcp.f32 %v11034_v33  ;;  %15301 = vmatprep.mubr.msk.bf16.mxu1 %vm16589_vm3, %v20456_v46 }
0x151b   :  { %v16265_v20 = vpop.eup %16264  ;;  %v11083_v8 = vsel %vm191_vm1, %v19957_v54, 0.0  ;;  %15311 = vmatprep.subr.bf16.mxu1 %v20456_v46 }
0x151c   :  { %v11006_v50 = vmul.f32 1.442695, %v10949_v51  ;;  %v11151_v40 = vmul.f32 %v16265_v20, %v19811_v31  ;;  %15284 = vmatmul.mubr.msk.bf16.vlgmr.msra.gmra.mxu0 %vm191_vm1, %v11180_v5  ;;  %v10902_v7 = vpop.xlane.xlu1 %10901  ;;  %11084 = vadd.xlane.f32.xlu0 %v11083_v8 }
0x151d   :  { %v11043_v62 = vpop.xlane.xlu0 %11042  ;;  %15294 = vmatpush3.bf16.msra.mxu0 %v11314_v17  ;;  %v10948_v39 = vsub.f32 %v19841_v61, %v10902_v7  ;;  %15295 = vmatprep.mubr.msk.bf16.mxu0 %vm16589_vm3, %v20456_v46  ;;  %v11458_v61 = vsel %vm204_vm0, %v19700_v24, 0  ;;  %v11410_v24 = vsel %vm204_vm0, %v19698_v36, 0 }
0x151e   :  { %16278 = vpow2.f32 %v11006_v50  ;;  %v19971_v44 = vpop.eup %16266  ;;  %v11183_v10 = vpack.c.bf16 %v11151_v40, %v11151_v40  ;;  %15305 = vmatprep.subr.bf16.mxu0 %v20456_v46  ;;  %v11554_v40 = vsel %vm204_vm0, %v19704_v52, 0 }
0x151f   :  { %16280 = vrcp.f32 %v11043_v62  ;;  %v16269_v9 = vpop.eup %16268  ;;  %v11004_v31 = vmul.f32 1.442695, %v10948_v39  ;;  %v11080_v58 = vsel %vm191_vm1, %v19971_v44, 0.0 }
0x1520   :  { %v11150_v6 = vmul.f32 %v16269_v9, %v19820_v1  ;;  %11081 = vadd.xlane.f32.xlu1 %v11080_v58  ;;  %v11040_v47 = vpop.xlane.xlu1 %11039 }
0x1521   :  { %v10911_v38 = vpop.xlane.xlu0 %10910  ;;  %16282 = vpow2.f32 %v11004_v31  ;;  %15302 = vmatmul.mubr.msk.bf16.vlgmr.msra.gmra.mxu1 %vm191_vm1, %v11183_v10 }
0x1522   :  { %v10951_v19 = vsub.f32 %v19849_v3, %v10911_v38  ;;  %v19981_v18 = vpop.eup %16270  ;;  %v11182_v33 = vpack.c.bf16 %v11150_v6, %v11150_v6  ;;  %15312 = vmatpush3.bf16.msra.mxu1 %v11458_v61  ;;  %16284 = vrcp.f32 %v11040_v47  ;;  %15313 = vmatprep.mubr.msk.bf16.mxu1 %vm16589_vm3, %v20456_v46 }
0x1523   :  { %v16273_v1 = vpop.eup %16272  ;;  %v11089_v55 = vsel %vm191_vm1, %v19981_v18, 0.0  ;;  %15323 = vmatprep.subr.bf16.mxu1 %v20456_v46 }
0x1524   :  { %v11010_v21 = vmul.f32 1.442695, %v10951_v19  ;;  %v11153_v3 = vmul.f32 %v16273_v1, %v19829_v22  ;;  %15296 = vmatmul.mubr.msk.bf16.vlgmr.msra.gmra.mxu0 %vm191_vm1, %v11182_v33  ;;  %v10908_v51 = vpop.xlane.xlu1 %10907  ;;  %11090 = vadd.xlane.f32.xlu0 %v11089_v55 }
0x1525   :  { %15306 = vmatpush3.bf16.msra.mxu0 %v11410_v24  ;;  %v10950_v5 = vsub.f32 %v19857_v0, %v10908_v51  ;;  %15307 = vmatprep.mubr.msk.bf16.mxu0 %vm16589_vm3, %v20456_v46 }
0x1526   :  { %16286 = vpow2.f32 %v11010_v21  ;;  %v19995_v20 = vpop.eup %16274  ;;  %v11185_v50 = vpack.c.bf16 %v11153_v3, %v11153_v3  ;;  %15317 = vmatprep.subr.bf16.mxu0 %v20456_v46 }
0x1527   :  { %v16277_v8 = vpop.eup %16276  ;;  %v11008_v36 = vmul.f32 1.442695, %v10950_v5  ;;  %v11086_v22 = vsel %vm191_vm1, %v19995_v20, 0.0 }
0x1528   :  { %v11152_v17 = vmul.f32 %v16277_v8, %v19838_v41  ;;  %11087 = vadd.xlane.f32.xlu1 %v11086_v22  ;;  %v11506_v41 = vsel %vm204_vm0, %v19702_v59, 0 }
0x1529   :  { %16288 = vpow2.f32 %v11008_v36  ;;  %15314 = vmatmul.mubr.msk.bf16.vlgmr.msra.gmra.mxu1 %vm191_vm1, %v11185_v50 }
0x152a   :  { %v11184_v7 = vpack.c.bf16 %v11152_v17, %v11152_v17  ;;  %15324 = vmatpush3.bf16.msra.mxu1 %v11554_v40  ;;  %15325 = vmatprep.mubr.msk.bf16.mxu1 %vm16589_vm3, %v20456_v46 }
0x152b   :  { %v20004_v0 = vpop.eup %16278  ;;  %15335 = vmatprep.subr.bf16.mxu1 %v20456_v46 }
0x152c   :  { %v16281_v62 = vpop.eup %16280  ;;  %v11095_v39 = vsel %vm191_vm1, %v20004_v0, 0.0  ;;  %15308 = vmatmul.mubr.msk.bf16.vlgmr.msra.gmra.mxu0 %vm191_vm1, %v11184_v7 }
0x152d   :  { %v11155_v52 = vmul.f32 %v16281_v62, %v19847_v15  ;;  %11096 = vadd.xlane.f32.xlu0 %v11095_v39  ;;  %15318 = vmatpush3.bf16.msra.mxu0 %v11506_v41  ;;  %v11650_v15 = vsel %vm204_vm0, %v19708_v53, 0 }
0x152e   :  { %15319 = vmatprep.mubr.msk.bf16.mxu0 %vm16589_vm3, %v20456_v46  ;;  %v20017_v10 = vpop.eup %16282  ;;  %15329 = vmatprep.subr.bf16.mxu0 %v20456_v46 }
0x152f   :  { %v11187_v9 = vpack.c.bf16 %v11155_v52, %v11155_v52  ;;  %v16285_v31 = vpop.eup %16284  ;;  %v11092_v58 = vsel %vm191_vm1, %v20017_v10, 0.0 }
0x1530   :  { %v11154_v59 = vmul.f32 %v16285_v31, %v19855_v12  ;;  %11093 = vadd.xlane.f32.xlu1 %v11092_v58  ;;  %v11602_v12 = vsel %vm204_vm0, %v19706_v11, 0  ;;  %v11842_v31 = vsel %vm204_vm0, %v19750_v13, 0 }
0x1531   :  { %15326 = vmatmul.mubr.msk.bf16.vlgmr.msra.gmra.mxu1 %vm191_vm1, %v11187_v9 }
0x1532   :  { %v11186_v47 = vpack.c.bf16 %v11154_v59, %v11154_v59  ;;  %15336 = vmatpush3.bf16.msra.mxu1 %v11650_v15  ;;  %15337 = vmatprep.mubr.msk.bf16.mxu1 %vm16589_vm3, %v20456_v46 }
0x1533   :  { %v20026_v6 = vpop.eup %16286  ;;  %15347 = vmatprep.subr.bf16.mxu1 %v20456_v46 }
0x1534   :  { %v11101_v38 = vsel %vm191_vm1, %v20026_v6, 0.0  ;;  %15320 = vmatmul.mubr.msk.bf16.vlgmr.msra.gmra.mxu0 %vm191_vm1, %v11186_v47 }
0x1535   :  { %11102 = vadd.xlane.f32.xlu0 %v11101_v38  ;;  %15330 = vmatpush3.bf16.msra.mxu0 %v11602_v12 }
0x1536   :  { %15331 = vmatprep.mubr.msk.bf16.mxu0 %vm16589_vm3, %v20456_v46  ;;  %v20038_v53 = vpop.eup %16288  ;;  %15341 = vmatprep.subr.bf16.mxu0 %v20456_v46 }
0x1537   :  { %v11098_v61 = vsel %vm191_vm1, %v20038_v53, 0.0 }
0x1538   :  { %11099 = vadd.xlane.f32.xlu1 %v11098_v61 }
0x153a   :  { %v10914_v19 = vpop.xlane.xlu1 %10913  ;;  %v10917_v33 = vpop.xlane.xlu0 %10916 }
0x153b   :  { %v10953_v51 = vsub.f32 %v19871_v23, %v10917_v33  ;;  %v10952_v5 = vsub.f32 %v19869_v2, %v10914_v19  ;;  %v11698_v2 = vsel %vm204_vm0, %v19710_v35, 0 }
0x153d   :  { %v11014_v8 = vmul.f32 1.442695, %v10953_v51  ;;  %v11012_v22 = vmul.f32 1.442695, %v10952_v5 }
0x1542   :  { %v10920_v1 = vpop.xlane.xlu1 %10919  ;;  %v10923_v21 = vpop.xlane.xlu0 %10922 }
0x1543   :  { %v10955_v50 = vsub.f32 %v19879_v27, %v10923_v21  ;;  %v10954_v7 = vsub.f32 %v19877_v49, %v10920_v1 }
0x1545   :  { %v11018_v40 = vmul.f32 1.442695, %v10955_v50  ;;  %v11016_v52 = vmul.f32 1.442695, %v10954_v7  ;;  %v11986_v50 = vsel %vm204_vm0, %v19738_v57, 0  ;;  %v20541_v57 = vld [vmem:[#allocation28_spill] sm:$0xff] }
0x1546   :  { %v11046_v11 = vpop.xlane.xlu1 %11045  ;;  %v11049_v55 = vpop.xlane.xlu0 %11048 }
0x1547   :  { %16290 = vrcp.f32 %v11046_v11 }
0x1548   :  { %16292 = vrcp.f32 %v11049_v55  ;;  %v11890_v55 = vsel %vm204_vm0, %v19726_v32, 0 }
0x1549   :  { %12604 = vrot.lane.b32.xlu1 %v19460_v43, %s16583_s1 }
0x154a   :  { %v11052_v24 = vpop.xlane.xlu1 %11051  ;;  %v11055_v3 = vpop.xlane.xlu0 %11054 }
0x154b   :  { %12556 = vrot.lane.b32.xlu0 %v19462_v14, %s16583_s1  ;;  %16294 = vrcp.f32 %v11052_v24 }
0x154c   :  { %16296 = vrcp.f32 %v11055_v3 }
0x154d   :  { %16298 = vpow2.f32 %v11014_v8  ;;  %v20540_v8 = vld [vmem:[#allocation26_spill] sm:$0xff] }
0x154e   :  { %16300 = vpow2.f32 %v11012_v22 }
0x154f   :  { %16302 = vpow2.f32 %v11018_v40 }
0x1554   :  { %v16291_v36 = vpop.eup %16290 }
0x1555   :  { %v16293_v17 = vpop.eup %16292  ;;  %v11156_v43 = vmul.f32 %v16291_v36, %v19881_v16  ;;  %v11746_v16 = vsel %vm204_vm0, %v19712_v60, 0  ;;  %v12034_v36 = vsel %vm204_vm0, %v20540_v8, 0 }
0x1556   :  { %v11157_v14 = vmul.f32 %v16293_v17, %v19887_v29 }
0x1557   :  { %v11188_v62 = vpack.c.bf16 %v11156_v43, %v11156_v43 }
0x1558   :  { %v16295_v39 = vpop.eup %16294  ;;  %v11189_v23 = vpack.c.bf16 %v11157_v14, %v11157_v14 }
0x1559   :  { %v16297_v41 = vpop.eup %16296  ;;  %15332 = vmatmul.mubr.msk.bf16.vlgmr.msra.gmra.mxu0 %vm191_vm1, %v11188_v62  ;;  %v11158_v29 = vmul.f32 %v16295_v39, %v19889_v34  ;;  %v11794_v34 = vsel %vm204_vm0, %v19718_v56, 0 }
0x155a   :  { %15338 = vmatmul.mubr.msk.bf16.vlgmr.msra.gmra.mxu1 %vm191_vm1, %v11189_v23  ;;  %15342 = vmatpush3.bf16.msra.mxu0 %v11698_v2  ;;  %v11159_v35 = vmul.f32 %v16297_v41, %v19895_v25  ;;  %v20073_v58 = vpop.eup %16298  ;;  %v20543_v2 = vld [vmem:[#allocation45_spill] sm:$0xff] }
0x155b   :  { %v11058_v27 = vpop.xlane.xlu1 %11057  ;;  %15348 = vmatpush3.bf16.msra.mxu1 %v11746_v16  ;;  %15343 = vmatprep.mubr.msk.bf16.mxu0 %vm16589_vm3, %v20456_v46  ;;  %v11190_v60 = vpack.c.bf16 %v11158_v29, %v11158_v29  ;;  %v20080_v56 = vpop.eup %16300  ;;  %v11107_v15 = vsel %vm191_vm1, %v20073_v58, 0.0 }
0x155c   :  { %16304 = vrcp.f32 %v11058_v27  ;;  %v11061_v49 = vpop.xlane.xlu0 %11060  ;;  %15349 = vmatprep.mubr.msk.bf16.mxu1 %vm16589_vm3, %v20456_v46  ;;  %15353 = vmatprep.subr.bf16.mxu0 %v20456_v46  ;;  %v11191_v9 = vpack.c.bf16 %v11159_v35, %v11159_v35  ;;  %v20083_v13 = vpop.eup %16302  ;;  %v11104_v33 = vsel %vm191_vm1, %v20080_v56, 0.0  ;;  %v12130_v27 = vsel %vm204_vm0, %v20543_v2, 0  ;;  %v20544_v35 = vld [vmem:[#allocation32_spill] sm:$0xff] }
0x155d   :  { %16306 = vrcp.f32 %v11061_v49  ;;  %15359 = vmatprep.subr.bf16.mxu1 %v20456_v46  ;;  %v11113_v1 = vsel %vm191_vm1, %v20083_v13, 0.0 }
0x155e   :  { %16308 = vpow2.f32 %v11016_v52 }
0x1561   :  { %15344 = vmatmul.mubr.msk.bf16.vlgmr.msra.gmra.mxu0 %vm191_vm1, %v11190_v60  ;;  %v12082_v60 = vsel %vm204_vm0, %v20544_v35, 0 }
0x1562   :  { %15350 = vmatmul.mubr.msk.bf16.vlgmr.msra.gmra.mxu1 %vm191_vm1, %v11191_v9  ;;  %15354 = vmatpush3.bf16.msra.mxu0 %v11794_v34 }
0x1563   :  { %15360 = vmatpush3.bf16.msra.mxu1 %v11842_v31  ;;  %15355 = vmatprep.mubr.msk.bf16.mxu0 %vm16589_vm3, %v20456_v46  ;;  %v20545_v31 = vld [vmem:[#allocation35_spill] sm:$0xff] }
0x1564   :  { %v11064_v25 = vpop.xlane.xlu1 %11063  ;;  %15361 = vmatprep.mubr.msk.bf16.mxu1 %vm16589_vm3, %v20456_v46  ;;  %15365 = vmatprep.subr.bf16.mxu0 %v20456_v46 }
0x1565   :  { %16310 = vrcp.f32 %v11064_v25  ;;  %v11067_v59 = vpop.xlane.xlu0 %11066  ;;  %15371 = vmatprep.subr.bf16.mxu1 %v20456_v46  ;;  %v12226_v25 = vsel %vm204_vm0, %v20545_v31, 0 }
0x1566   :  { %16312 = vrcp.f32 %v11067_v59 }
0x1569   :  { %v16305_v47 = vpop.eup %16304 }
0x156a   :  { %11108 = vadd.xlane.f32.xlu0 %v11107_v15  ;;  %v16307_v38 = vpop.eup %16306  ;;  %v11160_v12 = vmul.f32 %v16305_v47, %v19905_v28  ;;  %v11938_v28 = vsel %vm204_vm0, %v19724_v4, 0 }
0x156b   :  { %v11161_v61 = vmul.f32 %v16307_v38, %v19907_v42  ;;  %v20093_v21 = vpop.eup %16308  ;;  %v20546_v38 = vld [vmem:[#allocation34_spill] sm:$0xff] }
0x156c   :  { %v11192_v19 = vpack.c.bf16 %v11160_v12, %v11160_v12  ;;  %v11110_v42 = vsel %vm191_vm1, %v20093_v21, 0.0  ;;  %v12178_v12 = vsel %vm204_vm0, %v20546_v38, 0 }
0x156d   :  { %v11193_v11 = vpack.c.bf16 %v11161_v61, %v11161_v61  ;;  %11105 = vadd.xlane.f32.xlu1 %v11104_v33 }
0x156e   :  { %11114 = vadd.xlane.f32.xlu0 %v11113_v1  ;;  %15356 = vmatmul.mubr.msk.bf16.vlgmr.msra.gmra.mxu0 %vm191_vm1, %v11192_v19  ;;  %v20547_v1 = vld [vmem:[#allocation36_spill] sm:$0xff] }
0x156f   :  { %15362 = vmatmul.mubr.msk.bf16.vlgmr.msra.gmra.mxu1 %vm191_vm1, %v11193_v11  ;;  %15366 = vmatpush3.bf16.msra.mxu0 %v11890_v55  ;;  %v12322_v11 = vsel %vm204_vm0, %v20547_v1, 0 }
0x1570   :  { %15372 = vmatpush3.bf16.msra.mxu1 %v11938_v28  ;;  %15367 = vmatprep.mubr.msk.bf16.mxu0 %vm16589_vm3, %v20456_v46 }
0x1571   :  { %11111 = vadd.xlane.f32.xlu1 %v11110_v42  ;;  %15373 = vmatprep.mubr.msk.bf16.mxu1 %vm16589_vm3, %v20456_v46 }
0x1572   :  { %v16311_v32 = vpop.eup %16310  ;;  %15377 = vmatprep.subr.bf16.mxu0 %v20456_v46  ;;  %15383 = vmatprep.subr.bf16.mxu1 %v20456_v46 }
0x1573   :  { %v16313_v4 = vpop.eup %16312  ;;  %v11162_v24 = vmul.f32 %v16311_v32, %v19913_v26  ;;  %v20542_v26 = vld [vmem:[#allocation30_spill] sm:$0xff]  ;;  %v20548_v32 = vld [vmem:[#allocation33_spill] sm:$0xff] }
0x1574   :  { %v11163_v3 = vmul.f32 %v16313_v4, %v19915_v37  ;;  %v12274_v4 = vsel %vm204_vm0, %v20548_v32, 0 }
0x1575   :  { %v11194_v51 = vpack.c.bf16 %v11162_v24, %v11162_v24 }
0x1576   :  { %v11195_v5 = vpack.c.bf16 %v11163_v3, %v11163_v3 }
0x1577   :  { %15368 = vmatmul.mubr.msk.bf16.vlgmr.msra.gmra.mxu0 %vm191_vm1, %v11194_v51 }
0x1578   :  { %15374 = vmatmul.mubr.msk.bf16.vlgmr.msra.gmra.mxu1 %vm191_vm1, %v11195_v5  ;;  %15378 = vmatpush3.bf16.msra.mxu0 %v11986_v50  ;;  %v20549_v5 = vld [vmem:[#allocation40_spill] sm:$0xff] }
0x1579   :  { %15384 = vmatpush3.bf16.msra.mxu1 %v12034_v36  ;;  %15385 = vmatprep.mubr.msk.bf16.mxu1 %vm16589_vm3, %v20456_v46  ;;  %v12418_v50 = vsel %vm204_vm0, %v20549_v5, 0 }
0x157a   :  { %15395 = vmatprep.subr.bf16.mxu1 %v20456_v46  ;;  %15379 = vmatprep.mubr.msk.bf16.mxu0 %vm16589_vm3, %v20456_v46 }
0x157b   :  { %15389 = vmatprep.subr.bf16.mxu0 %v20456_v46 }
0x1582   :  { %12700 = vrot.lane.b32.xlu1 %v20541_v57, %s16583_s1 }
0x1584   :  { %12652 = vrot.lane.b32.xlu0 %v20542_v26, %s16583_s1 }
0x1599   :  { %v11073_v37 = vpop.xlane.xlu0 %11072 }
0x159a   :  { %16314 = vrcp.f32 %v11073_v37 }
0x159d   :  { %v11070_v22 = vpop.xlane.xlu1 %11069 }
0x159e   :  { %16316 = vrcp.f32 %v11070_v22  ;;  %v11079_v17 = vpop.xlane.xlu0 %11078 }
0x159f   :  { %16318 = vrcp.f32 %v11079_v17 }
0x15a1   :  { %v11076_v40 = vpop.xlane.xlu1 %11075 }
0x15a2   :  { %16320 = vrcp.f32 %v11076_v40  ;;  %v20551_v40 = vld [vmem:[#allocation37_spill] sm:$0xff] }
0x15a5   :  { %v11085_v43 = vpop.xlane.xlu0 %11084 }
0x15a6   :  { %16322 = vrcp.f32 %v11085_v43 }
0x15a7   :  { %v16315_v7 = vpop.eup %16314 }
0x15a8   :  { %v11165_v14 = vmul.f32 %v16315_v7, %v19933_v63 }
0x15a9   :  { %v11082_v62 = vpop.xlane.xlu1 %11081 }
0x15aa   :  { %v11197_v39 = vpack.c.bf16 %v11165_v14, %v11165_v14  ;;  %16324 = vrcp.f32 %v11082_v62  ;;  %v20552_v62 = vld [vmem:[#allocation38_spill] sm:$0xff] }
0x15ab   :  { %v16317_v23 = vpop.eup %16316 }
0x15ac   :  { %v16319_v41 = vpop.eup %16318  ;;  %v11164_v16 = vmul.f32 %v16317_v23, %v19938_v30  ;;  %15386 = vmatmul.mubr.msk.bf16.vlgmr.msra.gmra.mxu1 %vm191_vm1, %v11197_v39 }
0x15ad   :  { %15396 = vmatpush3.bf16.msra.mxu1 %v12130_v27  ;;  %v11091_v52 = vpop.xlane.xlu0 %11090  ;;  %15397 = vmatprep.mubr.msk.bf16.mxu1 %vm16589_vm3, %v20456_v46  ;;  %v11167_v63 = vmul.f32 %v16319_v41, %v19940_v48 }
0x15ae   :  { %v11196_v49 = vpack.c.bf16 %v11164_v16, %v11164_v16  ;;  %16326 = vrcp.f32 %v11091_v52  ;;  %15407 = vmatprep.subr.bf16.mxu1 %v20456_v46 }
0x15af   :  { %v16321_v29 = vpop.eup %16320  ;;  %v11199_v9 = vpack.c.bf16 %v11167_v63, %v11167_v63 }
0x15b0   :  { %15380 = vmatmul.mubr.msk.bf16.vlgmr.msra.gmra.mxu0 %vm191_vm1, %v11196_v49  ;;  %v11166_v34 = vmul.f32 %v16321_v29, %v19948_v45 }
0x15b1   :  { %15390 = vmatpush3.bf16.msra.mxu0 %v12082_v60  ;;  %v11088_v30 = vpop.xlane.xlu1 %11087  ;;  %15391 = vmatprep.mubr.msk.bf16.mxu0 %vm16589_vm3, %v20456_v46 }
0x15b2   :  { %16328 = vrcp.f32 %v11088_v30  ;;  %15401 = vmatprep.subr.bf16.mxu0 %v20456_v46  ;;  %v11198_v15 = vpack.c.bf16 %v11166_v34, %v11166_v34 }
0x15b3   :  { %v16323_v48 = vpop.eup %16322 }
0x15b4   :  { %15398 = vmatmul.mubr.msk.bf16.vlgmr.msra.gmra.mxu1 %vm191_vm1, %v11199_v9  ;;  %v11169_v47 = vmul.f32 %v16323_v48, %v19957_v54 }
0x15b5   :  { %15408 = vmatpush3.bf16.msra.mxu1 %v12226_v25  ;;  %15409 = vmatprep.mubr.msk.bf16.mxu1 %vm16589_vm3, %v20456_v46 }
0x15b6   :  { %v11097_v59 = vpop.xlane.xlu0 %11096  ;;  %15419 = vmatprep.subr.bf16.mxu1 %v20456_v46  ;;  %v11201_v19 = vpack.c.bf16 %v11169_v47, %v11169_v47 }
0x15b7   :  { %16330 = vrcp.f32 %v11097_v59  ;;  %v16325_v45 = vpop.eup %16324 }
0x15b8   :  { %15392 = vmatmul.mubr.msk.bf16.vlgmr.msra.gmra.mxu0 %vm191_vm1, %v11198_v15  ;;  %v11168_v33 = vmul.f32 %v16325_v45, %v19971_v44 }
0x15b9   :  { %15402 = vmatpush3.bf16.msra.mxu0 %v12178_v12  ;;  %v11094_v61 = vpop.xlane.xlu1 %11093  ;;  %15403 = vmatprep.mubr.msk.bf16.mxu0 %vm16589_vm3, %v20456_v46 }
0x15ba   :  { %16332 = vrcp.f32 %v11094_v61  ;;  %15413 = vmatprep.subr.bf16.mxu0 %v20456_v46  ;;  %v11200_v28 = vpack.c.bf16 %v11168_v33, %v11168_v33 }
0x15bb   :  { %v16327_v54 = vpop.eup %16326 }
0x15bc   :  { %15410 = vmatmul.mubr.msk.bf16.vlgmr.msra.gmra.mxu1 %vm191_vm1, %v11201_v19  ;;  %v11171_v42 = vmul.f32 %v16327_v54, %v19981_v18 }
0x15bd   :  { %15420 = vmatpush3.bf16.msra.mxu1 %v12322_v11  ;;  %15421 = vmatprep.mubr.msk.bf16.mxu1 %vm16589_vm3, %v20456_v46 }
0x15be   :  { %v11103_v55 = vpop.xlane.xlu0 %11102  ;;  %15431 = vmatprep.subr.bf16.mxu1 %v20456_v46  ;;  %v11203_v3 = vpack.c.bf16 %v11171_v42, %v11171_v42 }
0x15bf   :  { %16334 = vrcp.f32 %v11103_v55  ;;  %v16329_v44 = vpop.eup %16328 }
0x15c0   :  { %15404 = vmatmul.mubr.msk.bf16.vlgmr.msra.gmra.mxu0 %vm191_vm1, %v11200_v28  ;;  %v11170_v51 = vmul.f32 %v16329_v44, %v19995_v20  ;;  %v20550_v20 = vld [vmem:[#allocation39_spill] sm:$0xff] }
0x15c1   :  { %15414 = vmatpush3.bf16.msra.mxu0 %v12274_v4  ;;  %v11100_v24 = vpop.xlane.xlu1 %11099  ;;  %15415 = vmatprep.mubr.msk.bf16.mxu0 %vm16589_vm3, %v20456_v46  ;;  %v12370_v26 = vsel %vm204_vm0, %v20550_v20, 0 }
0x15c2   :  { %16336 = vrcp.f32 %v11100_v24  ;;  %15425 = vmatprep.subr.bf16.mxu0 %v20456_v46  ;;  %v11202_v8 = vpack.c.bf16 %v11170_v51, %v11170_v51  ;;  %v12557_v2 = vpop.permute.xlu0 %12556 }
0x15c3   :  { %v12562_v16 = vsel %vm204_vm0, %v12557_v2, 0 }
0x15c4   :  { %v16331_v18 = vpop.eup %16330  ;;  %15422 = vmatmul.mubr.msk.bf16.vlgmr.msra.gmra.mxu1 %vm191_vm1, %v11203_v3 }
0x15c5   :  { %15432 = vmatpush3.bf16.msra.mxu1 %v12418_v50  ;;  %15433 = vmatprep.mubr.msk.bf16.mxu1 %vm16589_vm3, %v20456_v46  ;;  %v11173_v36 = vmul.f32 %v16331_v18, %v20004_v0  ;;  %v12514_v0 = vsel %vm204_vm0, %v20551_v40, 0  ;;  %v12605_v39 = vpop.permute.xlu1 %12604 }
0x15c6   :  { %15443 = vmatprep.subr.bf16.mxu1 %v20456_v46 }
0x15c7   :  { %v16333_v57 = vpop.eup %16332  ;;  %v11205_v37 = vpack.c.bf16 %v11173_v36, %v11173_v36 }
0x15c8   :  { %15416 = vmatmul.mubr.msk.bf16.vlgmr.msra.gmra.mxu0 %vm191_vm1, %v11202_v8  ;;  %v11172_v22 = vmul.f32 %v16333_v57, %v20017_v10  ;;  %v12466_v10 = vsel %vm204_vm0, %v20552_v62, 0 }
0x15c9   :  { %15426 = vmatpush3.bf16.msra.mxu0 %v12370_v26  ;;  %15427 = vmatprep.mubr.msk.bf16.mxu0 %vm16589_vm3, %v20456_v46 }
0x15ca   :  { %15437 = vmatprep.subr.bf16.mxu0 %v20456_v46  ;;  %v11204_v43 = vpack.c.bf16 %v11172_v22, %v11172_v22 }
0x15cc   :  { %v16335_v17 = vpop.eup %16334  ;;  %15434 = vmatmul.mubr.msk.bf16.vlgmr.msra.gmra.mxu1 %vm191_vm1, %v11205_v37 }
0x15cd   :  { %15444 = vmatpush3.bf16.msra.mxu1 %v12514_v0  ;;  %15445 = vmatprep.mubr.msk.bf16.mxu1 %vm16589_vm3, %v20456_v46  ;;  %v11175_v7 = vmul.f32 %v16335_v17, %v20026_v6  ;;  %v12610_v6 = vsel %vm204_vm0, %v12605_v39, 0 }
0x15ce   :  { %15455 = vmatprep.subr.bf16.mxu1 %v20456_v46 }
0x15cf   :  { %v16337_v14 = vpop.eup %16336  ;;  %v11207_v23 = vpack.c.bf16 %v11175_v7, %v11175_v7 }
0x15d0   :  { %15428 = vmatmul.mubr.msk.bf16.vlgmr.msra.gmra.mxu0 %vm191_vm1, %v11204_v43  ;;  %v11174_v41 = vmul.f32 %v16337_v14, %v20038_v53 }
0x15d1   :  { %15438 = vmatpush3.bf16.msra.mxu0 %v12466_v10  ;;  %15439 = vmatprep.mubr.msk.bf16.mxu0 %vm16589_vm3, %v20456_v46 }
0x15d2   :  { %15449 = vmatprep.subr.bf16.mxu0 %v20456_v46  ;;  %v11206_v27 = vpack.c.bf16 %v11174_v41, %v11174_v41 }
0x15d4   :  { %15446 = vmatmul.mubr.msk.bf16.vlgmr.msra.gmra.mxu1 %vm191_vm1, %v11207_v23 }
0x15d5   :  { %15456 = vmatpush3.bf16.msra.mxu1 %v12610_v6  ;;  %15457 = vmatprep.mubr.msk.bf16.mxu1 %vm16589_vm3, %v20456_v46 }
0x15d6   :  { %15467 = vmatprep.subr.bf16.mxu1 %v20456_v46 }
0x15d8   :  { %15440 = vmatmul.mubr.msk.bf16.vlgmr.msra.gmra.mxu0 %vm191_vm1, %v11206_v27 }
0x15d9   :  { %v20206_v52 = vpop.f32.mrf.mxu1  ;;  %15450 = vmatpush3.bf16.msra.mxu0 %v12562_v16  ;;  %15451 = vmatprep.mubr.msk.bf16.mxu0 %vm16589_vm3, %v20456_v46 }
0x15da   :  { %15461 = vmatprep.subr.bf16.mxu0 %v20456_v46 }
0x15db   :  { %v15291_v53 = vpop.f32.mrf.mxu1 }
0x15dc   :  { %v20211_v49 = vpop.f32.mrf.mxu0 }
0x15dd   :  { %v11305_v63 = vpop.f32.mrf.mxu1 }
0x15de   :  { %v15285_v29 = vpop.f32.mrf.mxu0 }
0x15df   :  { %v15292_v35 = vpop.f32.mrf.mxu1 }
0x15e0   :  { %v11257_v60 = vpop.f32.mrf.mxu0 }
0x15e1   :  { %v20213_v30 = vpop.f32.mrf.mxu1 }
0x15e2   :  { %v15286_v9 = vpop.f32.mrf.mxu0 }
0x15e3   :  { %v15303_v34 = vpop.f32.mrf.mxu1 }
0x15e4   :  { %v20215_v48 = vpop.f32.mrf.mxu0 }
0x15e5   :  { %v11401_v31 = vpop.f32.mrf.mxu1 }
0x15e6   :  { %v15297_v25 = vpop.f32.mrf.mxu0 }
0x15e7   :  { %v15304_v59 = vpop.f32.mrf.mxu1 }
0x15e8   :  { %v11353_v15 = vpop.f32.mrf.mxu0 }
0x15e9   :  { %v20217_v47 = vpop.f32.mrf.mxu1 }
0x15ea   :  { %v15298_v45 = vpop.f32.mrf.mxu0 }
0x15eb   :  { %v15315_v38 = vpop.f32.mrf.mxu1 }
0x15ec   :  { %v20219_v12 = vpop.f32.mrf.mxu0 }
0x15ed   :  { %v11497_v61 = vpop.f32.mrf.mxu1 }
0x15ee   :  { %v15309_v19 = vpop.f32.mrf.mxu0 }
0x15ef   :  { %v15316_v33 = vpop.f32.mrf.mxu1 }
0x15f0   :  { %v11449_v54 = vpop.f32.mrf.mxu0 }
0x15f1   :  { %v20221_v1 = vpop.f32.mrf.mxu1 }
0x15f2   :  { %v15310_v11 = vpop.f32.mrf.mxu0 }
0x15f3   :  { %v11109_v55 = vpop.xlane.xlu0 %11108  ;;  %v15327_v28 = vpop.f32.mrf.mxu1 }
0x15f4   :  { %16338 = vrcp.f32 %v11109_v55  ;;  %v20223_v42 = vpop.f32.mrf.mxu0 }
0x15f5   :  { %v11593_v44 = vpop.f32.mrf.mxu1 }
0x15f6   :  { %v15321_v32 = vpop.f32.mrf.mxu0  ;;  %v11106_v4 = vpop.xlane.xlu1 %11105 }
0x15f7   :  { %v15328_v24 = vpop.f32.mrf.mxu1  ;;  %16340 = vrcp.f32 %v11106_v4  ;;  %v11115_v3 = vpop.xlane.xlu0 %11114 }
0x15f8   :  { %16342 = vrcp.f32 %v11115_v3  ;;  %v11545_v51 = vpop.f32.mrf.mxu0 }
0x15fa   :  { %v15322_v18 = vpop.f32.mrf.mxu0  ;;  %v11112_v5 = vpop.xlane.xlu1 %11111 }
0x15fb   :  { %16344 = vrcp.f32 %v11112_v5  ;;  %v12653_v17 = vpop.permute.xlu0 %12652 }
0x15fe   :  { %v12701_v36 = vpop.permute.xlu1 %12700 }
0x15ff   :  { %v12706_v22 = vsel %vm204_vm0, %v12701_v36, 0 }
0x1601   :  { %v16339_v50 = vpop.eup %16338 }
0x1602   :  { %v11177_v8 = vmul.f32 %v16339_v50, %v20073_v58  ;;  %v12658_v58 = vsel %vm204_vm0, %v12653_v17, 0 }
0x1604   :  { %v11209_v57 = vpack.c.bf16 %v11177_v8, %v11177_v8  ;;  %v16341_v20 = vpop.eup %16340 }
0x1605   :  { %v16343_v26 = vpop.eup %16342  ;;  %v11176_v37 = vmul.f32 %v16341_v20, %v20080_v56 }
0x1606   :  { %15458 = vmatmul.mubr.msk.bf16.vlgmr.msra.gmra.mxu1 %vm191_vm1, %v11209_v57  ;;  %v11179_v0 = vmul.f32 %v16343_v26, %v20083_v13 }
0x1607   :  { %15468 = vmatpush3.bf16.msra.mxu1 %v12706_v22  ;;  %15469 = vmatprep.mubr.msk.bf16.mxu1 %vm16589_vm3, %v20456_v46  ;;  %v11208_v40 = vpack.c.bf16 %v11176_v37, %v11176_v37 }
0x1608   :  { %v16345_v43 = vpop.eup %16344  ;;  %v11211_v56 = vpack.c.bf16 %v11179_v0, %v11179_v0 }
0x1609   :  { %15452 = vmatmul.mubr.msk.bf16.vlgmr.msra.gmra.mxu0 %vm191_vm1, %v11208_v40  ;;  %v11178_v7 = vmul.f32 %v16345_v43, %v20093_v21 }
0x160a   :  { %15462 = vmatpush3.bf16.msra.mxu0 %v12658_v58  ;;  %15463 = vmatprep.mubr.msk.bf16.mxu0 %vm16589_vm3, %v20456_v46 }
0x160b   :  { %v11210_v14 = vpack.c.bf16 %v11178_v7, %v11178_v7 }
0x160e   :  { %15470 = vmatmul.mubr.msk.bf16.vlgmr.msra.gmra.mxu1 %vm191_vm1, %v11211_v56 }
0x1611   :  { %15464 = vmatmul.mubr.msk.bf16.vlgmr.msra.gmra.mxu0 %vm191_vm1, %v11210_v14 }
0x1619   :  { %v11638_v62 = vpop.f32.mrf.mxu0 }
0x161a   :  { %v11686_v10 = vpop.f32.mrf.mxu1 }
0x161b   :  { %v15840_v13 = vpack.i.bf16 %v11686_v10, %v11638_v62  ;;  %v15333_v39 = vpop.f32.mrf.mxu0 }
0x161c   :  { %v15339_v23 = vpop.f32.mrf.mxu1 }
0x161d   :  { %15841 = vrot.lane.b32.xlu0 %v15840_v13, %s16593_s26  ;;  %v11641_v41 = vpop.f32.mrf.mxu0 }
0x161e   :  { %v11689_v6 = vpop.f32.mrf.mxu1 }
0x161f   :  { %v15334_v2 = vpop.f32.mrf.mxu0 }
0x1620   :  { %v15340_v27 = vpop.f32.mrf.mxu1 }
0x1621   :  { %v11734_v46 = vpop.f32.mrf.mxu0 }
0x1622   :  { %v11782_v16 = vpop.f32.mrf.mxu1 }
0x1623   :  { %v15845_v53 = vpack.i.bf16 %v11782_v16, %v11734_v46  ;;  %v15345_v21 = vpop.f32.mrf.mxu0 }
0x1624   :  { %v15351_v63 = vpop.f32.mrf.mxu1 }
0x1625   :  { %15846 = vrot.lane.b32.xlu1 %v15845_v53, %s16593_s26  ;;  %v11737_v29 = vpop.f32.mrf.mxu0 }
0x1626   :  { %v11785_v35 = vpop.f32.mrf.mxu1  ;;  %v15922_v29 = vld [vmem:[#allocation11 + $0x28] sm:$0xff]  }
0x1627   :  { %v15346_v60 = vpop.f32.mrf.mxu0  ;;  %15473 = vmatprep.subr.bf16.mxu0 %v15922_v29 }
0x1628   :  { %v15352_v9 = vpop.f32.mrf.mxu1  ;;  %15474 = vmatpush3.bf16.msra.mxu0 %v15922_v29 }
0x162e   :  { %v11830_v34 = vpop.f32.mrf.mxu0 }
0x162f   :  { %v11878_v31 = vpop.f32.mrf.mxu1 }
0x1630   :  { %v15850_v25 = vpack.i.bf16 %v11878_v31, %v11830_v34  ;;  %v15357_v59 = vpop.f32.mrf.mxu0 }
0x1631   :  { %v15363_v15 = vpop.f32.mrf.mxu1 }
0x1632   :  { %15851 = vrot.lane.b32.xlu0 %v15850_v25, %s16593_s26  ;;  %v11833_v45 = vpop.f32.mrf.mxu0  ;;  %v15923_v25 = vld [vmem:[#allocation11 + $0x20] sm:$0xff]  }
0x1633   :  { %v11881_v38 = vpop.f32.mrf.mxu1  ;;  %15475 = vmatprep.subr.bf16.mxu0 %v15923_v25 }
0x1634   :  { %v15358_v61 = vpop.f32.mrf.mxu0  ;;  %15476 = vmatpush3.bf16.msra.mxu0 %v15923_v25 }
0x1635   :  { %v15364_v19 = vpop.f32.mrf.mxu1 }
0x1637   :  { %v11926_v33 = vpop.f32.mrf.mxu0 }
0x1638   :  { %v11974_v54 = vpop.f32.mrf.mxu1 }
0x1639   :  { %v15855_v11 = vpack.i.bf16 %v11974_v54, %v11926_v33  ;;  %v15369_v55 = vpop.f32.mrf.mxu0 }
0x163a   :  { %v15375_v28 = vpop.f32.mrf.mxu1 }
0x163b   :  { %15856 = vrot.lane.b32.xlu1 %v15855_v11, %s16593_s26  ;;  %v11929_v44 = vpop.f32.mrf.mxu0 }
0x163c   :  { %v11977_v32 = vpop.f32.mrf.mxu1 }
0x163d   :  { %v15370_v4 = vpop.f32.mrf.mxu0 }
0x163e   :  { %v15376_v24 = vpop.f32.mrf.mxu1 }
0x166c   :  { %v12070_v3 = vpop.f32.mrf.mxu1 }
0x166e   :  { %v15387_v51 = vpop.f32.mrf.mxu1 }
0x1670   :  { %v12022_v18 = vpop.f32.mrf.mxu0  ;;  %v12073_v5 = vpop.f32.mrf.mxu1 }
0x1671   :  { %v15860_v50 = vpack.i.bf16 %v12070_v3, %v12022_v18 }
0x1672   :  { %v15381_v8 = vpop.f32.mrf.mxu0  ;;  %v15388_v36 = vpop.f32.mrf.mxu1 }
0x1673   :  { %15861 = vrot.lane.b32.xlu0 %v15860_v50, %s16576_s0 }
0x1674   :  { %v12025_v57 = vpop.f32.mrf.mxu0  ;;  %v12166_v20 = vpop.f32.mrf.mxu1 }
0x1676   :  { %v15382_v26 = vpop.f32.mrf.mxu0  ;;  %v15399_v37 = vpop.f32.mrf.mxu1 }
0x1678   :  { %v12118_v22 = vpop.f32.mrf.mxu0  ;;  %v12169_v17 = vpop.f32.mrf.mxu1 }
0x1679   :  { %v15865_v40 = vpack.i.bf16 %v12166_v20, %v12118_v22 }
0x167a   :  { %v15393_v0 = vpop.f32.mrf.mxu0  ;;  %v15400_v43 = vpop.f32.mrf.mxu1 }
0x167b   :  { %15866 = vrot.lane.b32.xlu1 %v15865_v40, %s16576_s0 }
0x167c   :  { %v12121_v58 = vpop.f32.mrf.mxu0  ;;  %v12262_v56 = vpop.f32.mrf.mxu1 }
0x167e   :  { %v15394_v7 = vpop.f32.mrf.mxu0  ;;  %v15411_v14 = vpop.f32.mrf.mxu1 }
0x1680   :  { %v12214_v62 = vpop.f32.mrf.mxu0  ;;  %v12265_v10 = vpop.f32.mrf.mxu1 }
0x1681   :  { %v15875_v61 = vpack.i.bf16 %v12262_v56, %v12214_v62 }
0x1682   :  { %v15405_v13 = vpop.f32.mrf.mxu0  ;;  %v15412_v39 = vpop.f32.mrf.mxu1 }
0x1684   :  { %v12217_v23 = vpop.f32.mrf.mxu0  ;;  %v12358_v41 = vpop.f32.mrf.mxu1 }
0x1686   :  { %v15406_v6 = vpop.f32.mrf.mxu0  ;;  %v15423_v2 = vpop.f32.mrf.mxu1 }
0x1688   :  { %v12310_v27 = vpop.f32.mrf.mxu0  ;;  %v12361_v46 = vpop.f32.mrf.mxu1 }
0x1689   :  { %v15885_v4 = vpack.i.bf16 %v12358_v41, %v12310_v27 }
0x168a   :  { %v15417_v16 = vpop.f32.mrf.mxu0  ;;  %v15424_v53 = vpop.f32.mrf.mxu1 }
0x168c   :  { %v12313_v21 = vpop.f32.mrf.mxu0  ;;  %v12454_v63 = vpop.f32.mrf.mxu1 }
0x168e   :  { %v15418_v35 = vpop.f32.mrf.mxu0  ;;  %v15435_v60 = vpop.f32.mrf.mxu1 }
0x168f   :  { %v15842_v7 = vpop.permute.xlu0 %15841 }
0x1690   :  { %v12406_v9 = vpop.f32.mrf.mxu0  ;;  %v12457_v34 = vpop.f32.mrf.mxu1  ;;  %v15844_v13 = vunpack.i.h.bf16 %v15842_v7  ;;  %v15843_v39 = vunpack.i.l.bf16 %v15842_v7 }
0x1691   :  { %v15870_v31 = vpack.i.bf16 %v12454_v63, %v12406_v9 }
0x1692   :  { %v15429_v59 = vpop.f32.mrf.mxu0  ;;  %v15436_v15 = vpop.f32.mrf.mxu1  ;;  %v12845_v27 = vsel %vm191_vm1, %v20206_v52, %v15844_v13  ;;  %v12844_v46 = vsel %vm191_vm1, %v20211_v49, %v15843_v39 }
0x1693   :  { %15871 = vrot.lane.b32.xlu0 %v15870_v31, %s16594_s27 }
0x1694   :  { %v12409_v45 = vpop.f32.mrf.mxu0  ;;  %v12550_v38 = vpop.f32.mrf.mxu1 }
0x1696   :  { %v15430_v19 = vpop.f32.mrf.mxu0  ;;  %v15447_v33 = vpop.f32.mrf.mxu1 }
0x1697   :  { %15876 = vrot.lane.b32.xlu0 %v15875_v61, %s16576_s0  ;;  %v15847_v62 = vpop.permute.xlu1 %15846 }
0x1698   :  { %v12502_v54 = vpop.f32.mrf.mxu0  ;;  %v12553_v11 = vpop.f32.mrf.mxu1  ;;  %v15849_v34 = vunpack.i.h.bf16 %v15847_v62  ;;  %v15848_v31 = vunpack.i.l.bf16 %v15847_v62 }
0x1699   :  { %v15880_v55 = vpack.i.bf16 %v12550_v38, %v12502_v54 }
0x169a   :  { %v15441_v28 = vpop.f32.mrf.mxu0  ;;  %v15448_v44 = vpop.f32.mrf.mxu1  ;;  %v12847_v49 = vsel %vm191_vm1, %v20213_v30, %v15849_v34  ;;  %v12846_v15 = vsel %vm191_vm1, %v20215_v48, %v15848_v31 }
0x169b   :  { %15881 = vrot.lane.b32.xlu1 %v15880_v55, %s16594_s27 }
0x169c   :  { %v12505_v32 = vpop.f32.mrf.mxu0 }
0x169e   :  { %v15442_v24 = vpop.f32.mrf.mxu0 }
0x169f   :  { %15886 = vrot.lane.b32.xlu1 %v15885_v4, %s16576_s0 }
0x16a4   :  { %v15852_v14 = vpop.permute.xlu0 %15851 }
0x16a5   :  { %v15854_v28 = vunpack.i.h.bf16 %v15852_v14  ;;  %v15853_v44 = vunpack.i.l.bf16 %v15852_v14 }
0x16a7   :  { %v12849_v48 = vsel %vm191_vm1, %v20217_v47, %v15854_v28  ;;  %v12848_v24 = vsel %vm191_vm1, %v20219_v12, %v15853_v44  ;;  %v20558_v28 = vld [vmem:[#allocation31_spill] sm:$0xff] }
0x16ad   :  { %v15857_v6 = vpop.permute.xlu1 %15856 }
0x16c6   :  { %v12646_v3 = vpop.f32.mrf.mxu1 }
0x16c8   :  { %v15459_v51 = vpop.f32.mrf.mxu1 }
0x16c9   :  { %v12598_v18 = vpop.f32.mrf.mxu0 }
0x16ca   :  { %v12649_v5 = vpop.f32.mrf.mxu1  ;;  %v15890_v50 = vpack.i.bf16 %v12646_v3, %v12598_v18 }
0x16cb   :  { %v15453_v8 = vpop.f32.mrf.mxu0 }
0x16cc   :  { %v15460_v36 = vpop.f32.mrf.mxu1  ;;  %15891 = vrot.lane.b32.xlu0 %v15890_v50, %s16594_s27 }
0x16cd   :  { %v12601_v57 = vpop.f32.mrf.mxu0 }
0x16ce   :  { %v12742_v20 = vpop.f32.mrf.mxu1 }
0x16cf   :  { %v15454_v26 = vpop.f32.mrf.mxu0 }
0x16d0   :  { %v15471_v37 = vpop.f32.mrf.mxu1  ;;  %v15858_v26 = vunpack.i.l.bf16 %v15857_v6 }
0x16d1   :  { %v12694_v22 = vpop.f32.mrf.mxu0 }
0x16d2   :  { %v12745_v17 = vpop.f32.mrf.mxu1  ;;  %v15895_v40 = vpack.i.bf16 %v12742_v20, %v12694_v22  ;;  %v15859_v20 = vunpack.i.h.bf16 %v15857_v6 }
0x16d3   :  { %v15465_v0 = vpop.f32.mrf.mxu0  ;;  %v12850_v17 = vsel %vm191_vm1, %v20223_v42, %v15858_v26  ;;  %v15925_v42 = vld [vmem:[%s20394_s10 + $0x20] sm:$0xff]  }
0x16d4   :  { %v15472_v43 = vpop.f32.mrf.mxu1  ;;  %15896 = vrot.lane.b32.xlu1 %v15895_v40, %s16594_s27  ;;  %v12851_v12 = vsel %vm191_vm1, %v20221_v1, %v15859_v20  ;;  %v15924_v1 = vld [vmem:[%s20394_s10 + $0x28] sm:$0xff]  }
0x16d5   :  { %v12697_v58 = vpop.f32.mrf.mxu0  ;;  %15485 = vmatprep.subr.bf16.mxu1 %v15924_v1 }
0x16d6   :  { %15486 = vmatpush3.bf16.msra.mxu1 %v15924_v1 }
0x16d7   :  { %v15466_v56 = vpop.f32.mrf.mxu0  ;;  %15487 = vmatprep.subr.bf16.mxu1 %v15925_v42 }
0x16da   :  { %15488 = vmatpush3.bf16.msra.mxu1 %v15925_v42 }
0x16e5   :  { %v15862_v10 = vpop.permute.xlu0 %15861 }
0x16e6   :  { %v15864_v23 = vunpack.i.h.bf16 %v15862_v10  ;;  %v15863_v41 = vunpack.i.l.bf16 %v15862_v10  ;;  %v20553_v10 = vld [vmem:[#allocation44_spill] sm:$0xff] }
0x16e8   :  { %v12852_v21 = vsel %vm4123_vm4, %v12844_v46, %v15863_v41  ;;  %v12853_v63 = vsel %vm4123_vm4, %v12845_v27, %v15864_v23  ;;  %v13692_v23 = vld [vmem:[#allocation12 + $0x2] ss:$0 sm:$0xff]  ;;  %v20555_v46 = vld [vmem:[#allocation42_spill] sm:$0xff] }
0x16e9   :  { %v20554_v41 = vld [vmem:[#allocation43_spill] sm:$0xff] }
0x16ed   :  { %v15867_v29 = vpop.permute.xlu1 %15866 }
0x16ee   :  { %v15869_v25 = vunpack.i.h.bf16 %v15867_v29  ;;  %v15868_v59 = vunpack.i.l.bf16 %v15867_v29 }
0x16f0   :  { %v12855_v61 = vsel %vm4123_vm4, %v12847_v49, %v15869_v25  ;;  %v12854_v19 = vsel %vm4123_vm4, %v12846_v15, %v15868_v59  ;;  %v13694_v59 = vld [vmem:[#allocation15 + $0x2] ss:$0 sm:$0xff] }
0x1705   :  { %v15872_v2 = vpop.permute.xlu0 %15871 }
0x1706   :  { %v15874_v16 = vunpack.i.h.bf16 %v15872_v2  ;;  %v15873_v53 = vunpack.i.l.bf16 %v15872_v2 }
0x1708   :  { %v12860_v35 = vsel %vm4132_vm5, %v12852_v21, %v15873_v53  ;;  %v12861_v60 = vsel %vm4132_vm5, %v12853_v63, %v15874_v16  ;;  %v13693_v63 = vld [vmem:[#allocation14 + $0x2] ss:$0 sm:$0xff] }
0x1709   :  { %v12868_v9 = vpack.c.bf16 %v12861_v60, %v12860_v35  ;;  %v15877_v55 = vpop.permute.xlu0 %15876  ;;  %v20556_v35 = vld [vmem:[#allocation41_spill] sm:$0xff] }
0x170a   :  { %v15879_v30 = vunpack.i.h.bf16 %v15877_v55  ;;  %v15878_v32 = vunpack.i.l.bf16 %v15877_v55 }
0x170b   :  { %15477 = vmatprep.mubr.msk.bf16.mxu0 %vm309_vm2, %v12868_v9 }
0x170c   :  { %v12856_v18 = vsel %vm4123_vm4, %v12848_v24, %v15878_v32  ;;  %v12857_v5 = vsel %vm4123_vm4, %v12849_v48, %v15879_v30 }
0x170d   :  { %v15882_v52 = vpop.permute.xlu1 %15881 }
0x170e   :  { %v15884_v45 = vunpack.i.h.bf16 %v15882_v52  ;;  %v15883_v38 = vunpack.i.l.bf16 %v15882_v52 }
0x1710   :  { %v12863_v33 = vsel %vm4132_vm5, %v12855_v61, %v15884_v45  ;;  %v12862_v54 = vsel %vm4132_vm5, %v12854_v19, %v15883_v38 }
0x1711   :  { %v12869_v11 = vpack.c.bf16 %v12863_v33, %v12862_v54  ;;  %v15887_v50 = vpop.permute.xlu1 %15886  ;;  %v20557_v54 = vld [vmem:[#allocation27_spill] sm:$0xff] }
0x1712   :  { %v15889_v37 = vunpack.i.h.bf16 %v15887_v50  ;;  %v15888_v22 = vunpack.i.l.bf16 %v15887_v50 }
0x1713   :  { %15478 = vmatmul.mubr.msk.bf16.vlgmr.msra.gmra.mxu0 %vm309_vm2, %v12869_v11 }
0x1714   :  { %v12859_v43 = vsel %vm4123_vm4, %v12851_v12, %v15889_v37  ;;  %v12858_v58 = vsel %vm4123_vm4, %v12850_v17, %v15888_v22 }
0x173e   :  { %v15892_v4 = vpop.permute.xlu0 %15891 }
0x173f   :  { %v15894_v3 = vunpack.i.h.bf16 %v15892_v4  ;;  %v15893_v51 = vunpack.i.l.bf16 %v15892_v4  ;;  %v20559_v4 = vld [vmem:[#allocation29_spill] sm:$0xff] }
0x1741   :  { %v12864_v8 = vsel %vm4132_vm5, %v12856_v18, %v15893_v51  ;;  %v12865_v36 = vsel %vm4132_vm5, %v12857_v5, %v15894_v3  ;;  %v20560_v18 = vld [vmem:[#allocation25_spill] sm:$0xff] }
0x1742   :  { %v12870_v57 = vpack.c.bf16 %v12865_v36, %v12864_v8 }
0x1744   :  { %15481 = vmatprep.mubr.msk.bf16.mxu0 %vm309_vm2, %v12870_v57 }
0x1746   :  { %v15897_v47 = vpop.permute.xlu1 %15896 }
0x1747   :  { %v15899_v40 = vunpack.i.h.bf16 %v15897_v47  ;;  %v15898_v0 = vunpack.i.l.bf16 %v15897_v47 }
0x1749   :  { %v12867_v56 = vsel %vm4132_vm5, %v12859_v43, %v15899_v40  ;;  %v12866_v7 = vsel %vm4132_vm5, %v12858_v58, %v15898_v0  ;;  %v15926_v40 = vld [vmem:[%s20396_s12 + $0x58] sm:$0xff]   ;;  %v15927_v0 = vld [vmem:[%s20396_s12 + $0x50] sm:$0xff]   ;;  %v15928_v43 = vld [vmem:[%s20396_s12 + $0x48] sm:$0xff]  }
0x174a   :  { %v12871_v14 = vpack.c.bf16 %v12867_v56, %v12866_v7  ;;  %15497 = vmatprep.subr.bf16.mxu0 %v15926_v40  ;;  %v15929_v58 = vld [vmem:[%s20396_s12 + $0x40] sm:$0xff]  }
0x174b   :  { %15498 = vmatpush3.bf16.msra.mxu0 %v15926_v40  ;;  %v20344_v56 = vld [vmem:[%s20395_s11 + $0x2] ss:$0 sm:$0xff] }
0x174c   :  { %15482 = vmatmul.mubr.msk.bf16.gmra.mxu0 %vm309_vm2, %v12871_v14  ;;  %15499 = vmatprep.subr.bf16.mxu0 %v15927_v0 }
0x174f   :  { %15500 = vmatpush3.bf16.msra.mxu0 %v15927_v0 }
0x1750   :  { %15501 = vmatprep.subr.bf16.mxu0 %v15928_v43 }
0x1753   :  { %15502 = vmatpush3.bf16.msra.mxu0 %v15928_v43 }
0x1754   :  { %15503 = vmatprep.subr.bf16.mxu0 %v15929_v58 }
0x1757   :  { %15504 = vmatpush3.bf16.msra.mxu0 %v15929_v58 }
0x17d3   :  { %v15479_v62 = vpop.f32.mrf.mxu0 }
0x17d4   :  { %v12968_v13 = vadd.f32 %v15479_v62, %v20553_v10 }
0x17d5   :  { %v12935_v39 = vpop.f32.mrf.mxu0 }
0x17d6   :  { %v12966_v6 = vadd.f32 %v12935_v39, %v20554_v41  ;;  %v12984_v53 = vadd.f32 %v13692_v23, %v12968_v13 }
0x17d7   :  { %v15480_v2 = vpop.f32.mrf.mxu0 }
0x17d8   :  { %v12982_v27 = vadd.f32 %v13692_v23, %v12966_v6  ;;  %v12969_v16 = vadd.f32 %v15480_v2, %v20555_v46  ;;  %v13000_v25 = vmul.f32 %v13693_v63, %v12984_v53 }
0x17d9   :  { %v12938_v21 = vpop.f32.mrf.mxu0 }
0x17da   :  { %v12985_v29 = vadd.f32 %v13692_v23, %v12969_v16  ;;  %v12967_v60 = vadd.f32 %v12938_v21, %v20556_v35  ;;  %v12998_v9 = vmul.f32 %v13693_v63, %v12982_v27  ;;  %v20303_v38 = vadd.f32 %v13694_v59, %v13000_v25 }
0x17dc   :  { %v13001_v34 = vmul.f32 %v13693_v63, %v12985_v29  ;;  %v12983_v31 = vadd.f32 %v13692_v23, %v12967_v60  ;;  %v20299_v15 = vadd.f32 %v13694_v59, %v12998_v9 }
0x17de   :  { %v12999_v52 = vmul.f32 %v13693_v63, %v12983_v31  ;;  %v20297_v49 = vadd.f32 %v13694_v59, %v13001_v34 }
0x17e0   :  { %v20301_v45 = vadd.f32 %v13694_v59, %v12999_v52  ;;  %v13023_v19 = vpack.c.bf16 %v20297_v49, %v20303_v38 }
0x17e2   :  { %v13022_v61 = vpack.c.bf16 %v20301_v45, %v20299_v15 }
0x17e4   :  { %15489 = vmatprep.mubr.msk.bf16.mxu1 %vm309_vm2, %v13022_v61 }
0x17e5   :  { %15490 = vmatmul.mubr.msk.bf16.vlgmr.msra.gmra.mxu1 %vm309_vm2, %v13023_v19 }
0x180c   :  { %v15483_v33 = vpop.f32.mrf.mxu0 }
0x180d   :  { %v12972_v11 = vadd.f32 %v15483_v33, %v20557_v54 }
0x180e   :  { %v12951_v55 = vpop.f32.mrf.mxu0 }
0x180f   :  { %v12970_v44 = vadd.f32 %v12951_v55, %v20558_v28  ;;  %v12988_v24 = vadd.f32 %v13692_v23, %v12972_v11 }
0x1810   :  { %v15484_v30 = vpop.f32.mrf.mxu0 }
0x1811   :  { %v12986_v32 = vadd.f32 %v13692_v23, %v12970_v44  ;;  %v12973_v48 = vadd.f32 %v15484_v30, %v20559_v4  ;;  %v13004_v57 = vmul.f32 %v13693_v63, %v12988_v24 }
0x1812   :  { %v12954_v3 = vpop.f32.mrf.mxu0 }
0x1813   :  { %v12989_v51 = vadd.f32 %v13692_v23, %v12973_v48  ;;  %v12971_v5 = vadd.f32 %v12954_v3, %v20560_v18  ;;  %v13002_v50 = vmul.f32 %v13693_v63, %v12986_v32  ;;  %v20321_v47 = vadd.f32 %v13694_v59, %v13004_v57 }
0x1815   :  { %v13005_v8 = vmul.f32 %v13693_v63, %v12989_v51  ;;  %v12987_v36 = vadd.f32 %v13692_v23, %v12971_v5  ;;  %v20317_v37 = vadd.f32 %v13694_v59, %v13002_v50 }
0x1817   :  { %v13003_v20 = vmul.f32 %v13693_v63, %v12987_v36  ;;  %v20315_v26 = vadd.f32 %v13694_v59, %v13005_v8 }
0x1819   :  { %v20319_v22 = vadd.f32 %v13694_v59, %v13003_v20  ;;  %v13025_v17 = vpack.c.bf16 %v20315_v26, %v20321_v47 }
0x181b   :  { %v13024_v12 = vpack.c.bf16 %v20319_v22, %v20317_v37 }
0x181d   :  { %15493 = vmatprep.mubr.msk.bf16.mxu1 %vm309_vm2, %v13024_v12 }
0x181e   :  { %15494 = vmatmul.mubr.msk.bf16.gmra.mxu1 %vm309_vm2, %v13025_v17 }
0x18a5   :  { %v15491_v7 = vpop.f32.mrf.mxu1 }
0x18a6   :  { %v13106_v14 = vadd.f32 %v15491_v7, %v20344_v56 }
0x18a7   :  { %v13097_v1 = vpop.f32.mrf.mxu1 }
0x18a8   :  { %v13130_v42 = vmul.f32 %v13106_v14, %v13106_v14  ;;  %v13098_v62 = vadd.f32 %v20344_v56, %v13097_v1 }
0x18a9   :  { %v15492_v10 = vpop.f32.mrf.mxu1 }
0x18aa   :  { %v13138_v13 = vmul.f32 %v13130_v42, %v13106_v14  ;;  %v13128_v39 = vmul.f32 %v13098_v62, %v13098_v62  ;;  %v13109_v23 = vadd.f32 %v15492_v10, %v20344_v56 }
0x18ab   :  { %v13100_v41 = vpop.f32.mrf.mxu1 }
0x18ac   :  { %v13146_v6 = vmul.f32 0.044715, %v13138_v13  ;;  %v13136_v2 = vmul.f32 %v13128_v39, %v13098_v62  ;;  %v13131_v27 = vmul.f32 %v13109_v23, %v13109_v23  ;;  %v13101_v46 = vadd.f32 %v20344_v56, %v13100_v41 }
0x18ae   :  { %v13154_v16 = vadd.f32 %v13146_v6, %v13106_v14  ;;  %v13144_v53 = vmul.f32 0.044715, %v13136_v2  ;;  %v13139_v21 = vmul.f32 %v13131_v27, %v13109_v23  ;;  %v13129_v63 = vmul.f32 %v13101_v46, %v13101_v46 }
0x18b0   :  { %v13162_v29 = vmul.f32 0.7978846, %v13154_v16  ;;  %v13152_v35 = vadd.f32 %v13144_v53, %v13098_v62  ;;  %v13147_v60 = vmul.f32 0.044715, %v13139_v21  ;;  %v13137_v9 = vmul.f32 %v13129_v63, %v13101_v46 }
0x18b2   :  { %v13160_v34 = vmul.f32 0.7978846, %v13152_v35  ;;  %v13155_v31 = vadd.f32 %v13147_v60, %v13109_v23  ;;  %v13145_v25 = vmul.f32 0.044715, %v13137_v9  ;;  %16346 = vtanh.f32 %v13162_v29 }
0x18b4   :  { %16348 = vtanh.f32 %v13160_v34  ;;  %v13163_v59 = vmul.f32 0.7978846, %v13155_v31  ;;  %v13153_v52 = vadd.f32 %v13145_v25, %v13101_v46 }
0x18b6   :  { %16350 = vtanh.f32 %v13163_v59  ;;  %v13161_v61 = vmul.f32 0.7978846, %v13153_v52 }
0x18b8   :  { %16352 = vtanh.f32 %v13161_v61 }
0x18bf   :  { %v16347_v19 = vpop.eup %16346 }
0x18c0   :  { %v13178_v55 = vadd.f32 1.0, %v16347_v19 }
0x18c1   :  { %v16349_v33 = vpop.eup %16348 }
0x18c2   :  { %v13176_v54 = vadd.f32 1.0, %v16349_v33  ;;  %v13186_v48 = vmul.f32 0.5, %v13178_v55 }
0x18c3   :  { %v16351_v11 = vpop.eup %16350 }
0x18c4   :  { %v13179_v28 = vadd.f32 1.0, %v16351_v11  ;;  %v13184_v30 = vmul.f32 0.5, %v13176_v54  ;;  %v13194_v5 = vmul.f32 %v13186_v48, %v13106_v14 }
0x18c5   :  { %v16353_v44 = vpop.eup %16352 }
0x18c6   :  { %v13187_v32 = vmul.f32 0.5, %v13179_v28  ;;  %v13177_v4 = vadd.f32 1.0, %v16353_v44  ;;  %v13192_v51 = vmul.f32 %v13184_v30, %v13098_v62 }
0x18c8   :  { %v13185_v24 = vmul.f32 0.5, %v13177_v4  ;;  %v13195_v3 = vmul.f32 %v13187_v32, %v13109_v23  ;;  %v13716_v32 = vld [vmem:[%s20397_s13 + $0x2] ss:$0 sm:$0xff]  ;;  %s16595_s13 = smov [#allocation18]  }
0x18ca   :  { %v13193_v18 = vmul.f32 %v13185_v24, %v13101_v46  ;;  %v13201_v8 = vpack.c.bf16 %v13195_v3, %v13194_v5  ;;  %v13726_v24 = vld [vmem:[%s20398_s14 + $0x2] ss:$0 sm:$0xff]  ;;  %v13727_v5 = vld [vmem:[#allocation17 + $0x2] ss:$0 sm:$0xff]  ;;  %s13375_s14 = sshll.u32 %s16595_s13, 4  ;;  %s13376_s14 = int_to_ptr.vmem [resolvable:$true] %s13375_s14 }
0x18cb   :  { %s16542_s24 = scalar_lea.vmem %s13376_s14, 1024  ;;  %p16547_p4 = scmp.lt.s32.totalorder %s13376_s14, %s13376_s14 }
0x18cc   :  { %v13200_v50 = vpack.c.bf16 %v13193_v18, %v13192_v51  ;;  %p16543_p3 = scmp.ne.s32.totalorder %s13376_s14, %s16542_s24  ;;  %p16548_p5 = scmp.lt.s32.totalorder %s16542_s24, %s16542_s24 }
0x18ce   :  { %15505 = vmatprep.mubr.msk.bf16.mxu0 %vm4510_vm6, %v13200_v50  ;;  %p16549_p6 = por %p16548_p5, %p16547_p4 }
0x18cf   :  { %15506 = vmatmul.mubr.msk.bf16.vlgmr.msra.gmra.mxu0 %vm4510_vm6, %v13201_v8 }
0x18d0   :  { %p16550_p7 = pnand %p16549_p6, %p16543_p3 }
0x18de   :  { %v15495_v36 = vpop.f32.mrf.mxu1 }
0x18df   :  { %v13122_v57 = vadd.f32 %v15495_v36, %v20344_v56 }
0x18e0   :  { %v13113_v20 = vpop.f32.mrf.mxu1 }
0x18e1   :  { %v13134_v12 = vmul.f32 %v13122_v57, %v13122_v57  ;;  %v13114_v17 = vadd.f32 %v20344_v56, %v13113_v20 }
0x18e2   :  { %v15496_v40 = vpop.f32.mrf.mxu1 }
0x18e3   :  { %v13142_v0 = vmul.f32 %v13134_v12, %v13122_v57  ;;  %v13132_v43 = vmul.f32 %v13114_v17, %v13114_v17  ;;  %v13125_v58 = vadd.f32 %v15496_v40, %v20344_v56 }
0x18e4   :  { %v13116_v7 = vpop.f32.mrf.mxu1 }
0x18e5   :  { %v13150_v14 = vmul.f32 0.044715, %v13142_v0  ;;  %v13140_v1 = vmul.f32 %v13132_v43, %v13114_v17  ;;  %v13135_v42 = vmul.f32 %v13125_v58, %v13125_v58  ;;  %v13117_v62 = vadd.f32 %v20344_v56, %v13116_v7 }
0x18e7   :  { %v13158_v10 = vadd.f32 %v13150_v14, %v13122_v57  ;;  %v13148_v13 = vmul.f32 0.044715, %v13140_v1  ;;  %v13143_v39 = vmul.f32 %v13135_v42, %v13125_v58  ;;  %v13133_v23 = vmul.f32 %v13117_v62, %v13117_v62 }
0x18e9   :  { %v13166_v41 = vmul.f32 0.7978846, %v13158_v10  ;;  %v13156_v6 = vadd.f32 %v13148_v13, %v13114_v17  ;;  %v13151_v2 = vmul.f32 0.044715, %v13143_v39  ;;  %v13141_v27 = vmul.f32 %v13133_v23, %v13117_v62 }
0x18eb   :  { %v13164_v46 = vmul.f32 0.7978846, %v13156_v6  ;;  %v13159_v16 = vadd.f32 %v13151_v2, %v13125_v58  ;;  %v13149_v53 = vmul.f32 0.044715, %v13141_v27  ;;  %16354 = vtanh.f32 %v13166_v41 }
0x18ed   :  { %16356 = vtanh.f32 %v13164_v46  ;;  %v13167_v21 = vmul.f32 0.7978846, %v13159_v16  ;;  %v13157_v63 = vadd.f32 %v13149_v53, %v13117_v62 }
0x18ef   :  { %16358 = vtanh.f32 %v13167_v21  ;;  %v13165_v29 = vmul.f32 0.7978846, %v13157_v63 }
0x18f1   :  { %16360 = vtanh.f32 %v13165_v29 }
0x18f8   :  { %v16355_v35 = vpop.eup %16354 }
0x18f9   :  { %v13182_v34 = vadd.f32 1.0, %v16355_v35 }
0x18fa   :  { %v16357_v56 = vpop.eup %16356 }
0x18fb   :  { %v13180_v60 = vadd.f32 1.0, %v16357_v56  ;;  %v13190_v19 = vmul.f32 0.5, %v13182_v34 }
0x18fc   :  { %v16359_v9 = vpop.eup %16358 }
0x18fd   :  { %v13183_v31 = vadd.f32 1.0, %v16359_v9  ;;  %v13188_v59 = vmul.f32 0.5, %v13180_v60  ;;  %v13198_v28 = vmul.f32 %v13190_v19, %v13122_v57 }
0x18fe   :  { %v16361_v25 = vpop.eup %16360 }
0x18ff   :  { %v13191_v52 = vmul.f32 0.5, %v13183_v31  ;;  %v13181_v61 = vadd.f32 1.0, %v16361_v25  ;;  %v13196_v11 = vmul.f32 %v13188_v59, %v13114_v17 }
0x1901   :  { %v13189_v33 = vmul.f32 0.5, %v13181_v61  ;;  %v13199_v54 = vmul.f32 %v13191_v52, %v13125_v58 }
0x1903   :  { %v13197_v55 = vmul.f32 %v13189_v33, %v13117_v62  ;;  %v13203_v30 = vpack.c.bf16 %v13199_v54, %v13198_v28 }
0x1905   :  { %v13202_v44 = vpack.c.bf16 %v13197_v55, %v13196_v11 }
0x1907   :  { %15509 = vmatprep.mubr.msk.bf16.mxu0 %vm4510_vm6, %v13202_v44 }
0x1908   :  { %15510 = vmatmul.mubr.msk.bf16.gmra.mxu0 %vm4510_vm6, %v13203_v30 }
0x198f   :  { %v15507_v4 = vpop.f32.mrf.mxu0 }
0x1990   :  { %v13300_v48 = vadd.f32 %v15507_v4, %v13716_v32 }
0x1991   :  { %v13291_v3 = vpop.f32.mrf.mxu0 }
0x1992   :  { %v13324_v51 = vadd.f32 %v13300_v48, %v20303_v38  ;;  %v13292_v18 = vadd.f32 %v13716_v32, %v13291_v3 }
0x1993   :  { %v15508_v50 = vpop.f32.mrf.mxu0 }
0x1994   :  { %v13340_v8 = vmul.f32 %v13726_v24, %v13324_v51  ;;  %v13322_v36 = vadd.f32 %v13292_v18, %v20299_v15  ;;  %v13303_v57 = vadd.f32 %v15508_v50, %v13716_v32 }
0x1995   :  { %v13294_v20 = vpop.f32.mrf.mxu0 }
0x1996   :  { %v13356_v12 = vadd.f32 %v13727_v5, %v13340_v8  ;;  %v13338_v17 = vmul.f32 %v13726_v24, %v13322_v36  ;;  %v13325_v40 = vadd.f32 %v13303_v57, %v20297_v49  ;;  %v13295_v0 = vadd.f32 %v13716_v32, %v13294_v20 }
0x1998   :  { %13364 = vst.msk [vmem:[#allocation18 + $0x10] sm:$0xff] %vm309_vm2, %v13356_v12  ;;  %v13354_v43 = vadd.f32 %v13727_v5, %v13338_v17  ;;  %v13341_v58 = vmul.f32 %v13726_v24, %v13325_v40  ;;  %v13323_v7 = vadd.f32 %v13295_v0, %v20301_v45 }
0x199a   :  { %13362 = vst.msk [vmem:[#allocation18] sm:$0xff] %vm309_vm2, %v13354_v43  ;;  %v13357_v38 = vadd.f32 %v13727_v5, %v13341_v58  ;;  %v13339_v14 = vmul.f32 %v13726_v24, %v13323_v7 }
0x199c   :  { %13365 = vst.msk [vmem:[#allocation18 + $0x18] sm:$0xff] %vm309_vm2, %v13357_v38  ;;  %v13355_v15 = vadd.f32 %v13727_v5, %v13339_v14 }
0x199e   :  { %13363 = vst.msk [vmem:[#allocation18 + $0x8] sm:$0xff] %vm309_vm2, %v13355_v15 }
0x19c8   :  { %v15511_v1 = vpop.f32.mrf.mxu0 }
0x19c9   :  { %v13316_v42 = vadd.f32 %v15511_v1, %v13716_v32 }
0x19ca   :  { %v13307_v62 = vpop.f32.mrf.mxu0 }
0x19cb   :  { %v13328_v49 = vadd.f32 %v13316_v42, %v20321_v47  ;;  %v13308_v10 = vadd.f32 %v13716_v32, %v13307_v62 }
0x19cc   :  { %v15512_v13 = vpop.f32.mrf.mxu0 }
0x19cd   :  { %v13344_v39 = vmul.f32 %v13726_v24, %v13328_v49  ;;  %v13326_v23 = vadd.f32 %v13308_v10, %v20317_v37  ;;  %v13319_v45 = vadd.f32 %v15512_v13, %v13716_v32 }
0x19ce   :  { %v13310_v41 = vpop.f32.mrf.mxu0 }
0x19cf   :  { %v13360_v6 = vadd.f32 %v13727_v5, %v13344_v39  ;;  %v13342_v2 = vmul.f32 %v13726_v24, %v13326_v23  ;;  %v13329_v27 = vadd.f32 %v13319_v45, %v20315_v26  ;;  %v13311_v46 = vadd.f32 %v13716_v32, %v13310_v41 }
0x19d1   :  { %13368 = vst.msk [vmem:[#allocation18 + $0x30] sm:$0xff] %vm309_vm2, %v13360_v6  ;;  %v13358_v16 = vadd.f32 %v13727_v5, %v13342_v2  ;;  %v13345_v53 = vmul.f32 %v13726_v24, %v13329_v27  ;;  %v13327_v21 = vadd.f32 %v13311_v46, %v20319_v22 }
0x19d3   :  { %13366 = vst.msk [vmem:[#allocation18 + $0x20] sm:$0xff] %vm309_vm2, %v13358_v16  ;;  %v13361_v47 = vadd.f32 %v13727_v5, %v13345_v53  ;;  %v13343_v63 = vmul.f32 %v13726_v24, %v13327_v21 }
0x19d5   :  { %13369 = vst.msk [vmem:[#allocation18 + $0x38] sm:$0xff] %vm309_vm2, %v13361_v47  ;;  %v13359_v37 = vadd.f32 %v13727_v5, %v13343_v63 }
0x19d7   :  { %13367 = vst.msk [vmem:[#allocation18 + $0x28] sm:$0xff] %vm309_vm2, %v13359_v37 }
0x19d8   :  { %16553 = shalt.err (!%p16550_p7)
}
0x19d9   :  { %s16596_s28 = smov 128  }
0x19da   :  { %13381 = dma.vmem_to_hbm [thread:$0]  %s13376_s14, 1024, %s20400_s16, [#allocation5], %s16596_s28, %s16596_s28, %s16593_s26  }
0x19db   :  { %16572 = dma.done.wait [#allocation5], 1024  }
0x19dc   :  { %16573 = vsyncadd [#allocation5], 4294966272 }
0x19dd   :  { %13385 = vsyncpa [#allocation4], 1 }
0x19de   :  { %13386 = vsyncpa [#allocation7], 1 }
0x19df   :  { %13387 = vsyncpa [#allocation10], 1 }
0x19e0   :  { %13388 = vsyncpa [#allocation13], 1 }
0x19e1   :  { %13389 = vsyncpa [#allocation16], 1 }
0x19e2   :  { %13390 = vsyncpa [#allocation5], 1 }

</bundles_post_ra>
